<compile_context>
chip_gen: v5e
topology: v5e:2x2
jax: 0.10.0
libtpu: 0.0.40
codegen_flags: <defaults>
</compile_context>

<pallas_src>
import math
import functools

import numpy as np
import jax
import jax.numpy as jnp
from jax import lax
from jax.experimental import pallas as pl
from jax.experimental.pallas import tpu as pltpu


# Parameter order as passed to the kernel (QKV weights pre-fused in the wrapper).
KERNEL_PARAM_NAMES = (
    "Wg", "bg",
    "W_in", "b_in",
    "pe",
    "t_n1w", "t_n1b", "tWqkv",
    "t_n2w", "t_n2b", "tWf1", "tbf1", "tWf2", "tbf2",
    "s_n1w", "s_n1b", "sWqkv",
    "s_n2w", "s_n2b", "sWf1", "sbf1", "sWf2", "sbf2",
    "Wft",
    "Wd", "bd",
)

# Names as produced by make_params (QKV separate, like the PyTorch module).
RAW_PARAM_NAMES = (
    "Wg", "bg", "W_in", "b_in", "pe",
    "t_n1w", "t_n1b", "tWq", "tWk", "tWv",
    "t_n2w", "t_n2b", "tWf1", "tbf1", "tWf2", "tbf2",
    "s_n1w", "s_n1b", "sWq", "sWk", "sWv",
    "s_n2w", "s_n2b", "sWf1", "sbf1", "sWf2", "sbf2",
    "Wft", "Wd", "bd",
)


# ----------------------------- in-kernel math helpers -----------------------------

def _softmax_lastdim(x):
    m = jnp.max(x, axis=-1, keepdims=True)
    e = jnp.exp(x - m)
    return e / jnp.sum(e, axis=-1, keepdims=True)


def _layernorm(x, w, b, eps=1e-5):
    mu = jnp.mean(x, axis=-1, keepdims=True)
    var = jnp.mean(jnp.square(x - mu), axis=-1, keepdims=True)
    return (x - mu) * lax.rsqrt(var + eps) * w + b


def _mha_heads(q, k, v, nhead, temp, mask=None):
    """Multi-head attention with a leading batch dim.  q/k/v: (B, L, D) -> (B, L, D)."""
    D = q.shape[-1]
    hd = D // nhead
    outs = []
    off = 0
    for i in range(nhead):
        d_i = hd if i < nhead - 1 else D - off
        qh = q[:, :, off:off + d_i]
        kh = k[:, :, off:off + d_i]
        vh = v[:, :, off:off + d_i]
        off += d_i
        s = lax.dot_general(qh, kh, (((2,), (2,)), ((0,), (0,))),
                            preferred_element_type=jnp.float32) / temp
        if mask is not None:
            s = s + mask
        att = _softmax_lastdim(s)
        outs.append(lax.dot_general(att, vh, (((2,), (1,)), ((0,), (0,))),
                                    preferred_element_type=jnp.float32))
    return jnp.concatenate(outs, axis=-1)


# ----------------------------------- the kernel -----------------------------------

def _master_kernel(cfg, *refs):
    n_in = 2 + len(KERNEL_PARAM_NAMES)
    x_ss_ref, x_mkt_ref = refs[0], refs[1]
    p = {name: refs[2 + i][...] for i, name in enumerate(KERNEL_PARAM_NAMES)}
    out_ref = refs[n_in]

    N, T, Fm = x_mkt_ref.shape
    Fss = x_ss_ref.shape[2]
    D = cfg["d_model"]
    t_nhead = cfg["t_nhead"]
    s_nhead = cfg["s_nhead"]
    t_temp = math.sqrt(D / t_nhead)
    s_temp = math.sqrt(D / s_nhead)
    f32 = jnp.float32

    x_ss2 = x_ss_ref[...].reshape(N * T, Fss)
    x_mkt2 = x_mkt_ref[...].reshape(N * T, Fm)

    # ---- feature-selection Gate (market features -> gate over stock features) ----
    gate = float(Fm) * _softmax_lastdim(
        jnp.dot(x_mkt2, p["Wg"], preferred_element_type=f32) + p["bg"])
    gated2 = x_ss2 * gate

    # ---- input Linear + PositionalEncoding ----
    z = (jnp.dot(gated2, p["W_in"], preferred_element_type=f32)
         + p["b_in"]).reshape(N, T, D) + p["pe"]

    # ---- TAttention: causal multi-head attention over time, per stock ----
    xn = _layernorm(z, p["t_n1w"], p["t_n1b"])
    qkv = jnp.dot(xn.reshape(N * T, D), p["tWqkv"],
                  preferred_element_type=f32).reshape(N, T, 3 * D)
    q, k, v = qkv[:, :, :D], qkv[:, :, D:2 * D], qkv[:, :, 2 * D:]

    row = lax.broadcasted_iota(jnp.int32, (T, T), 0)
    col = lax.broadcasted_iota(jnp.int32, (T, T), 1)
    causal = jnp.where(col > row, jnp.float32(-1e30), jnp.float32(0.0))[None, :, :]

    att_t = _mha_heads(q, k, v, t_nhead, t_temp, mask=causal)          # (N, T, D)
    xt = z + att_t
    xt_n2 = _layernorm(xt, p["t_n2w"], p["t_n2b"]).reshape(N * T, D)
    h1 = jnp.maximum(
        jnp.dot(xt_n2, p["tWf1"], preferred_element_type=f32) + p["tbf1"], 0.0)
    ffn = jnp.dot(h1, p["tWf2"], preferred_element_type=f32) + p["tbf2"]
    y = xt + ffn.reshape(N, T, D)                                      # TAttention out

    # ---- SAttention: multi-head attention across stocks, batched over time ----
    yn = _layernorm(y, p["s_n1w"], p["s_n1b"])
    qkv_s = jnp.dot(yn.reshape(N * T, D), p["sWqkv"],
                    preferred_element_type=f32).reshape(N, T, 3 * D)
    qkv_s = pltpu.einshape("ntd->tnd", qkv_s)                          # (T, N, 3D)
    qs, ks, vs = qkv_s[:, :, :D], qkv_s[:, :, D:2 * D], qkv_s[:, :, 2 * D:]
    att_s = _mha_heads(qs, ks, vs, s_nhead, s_temp)                    # (T, N, D)
    att_s = pltpu.einshape("tnd->ntd", att_s)                          # (N, T, D)

    yt = y + att_s
    yt_n2 = _layernorm(yt, p["s_n2w"], p["s_n2b"]).reshape(N * T, D)
    h2 = jnp.maximum(
        jnp.dot(yt_n2, p["sWf1"], preferred_element_type=f32) + p["sbf1"], 0.0)
    ffn2 = jnp.dot(h2, p["sWf2"], preferred_element_type=f32) + p["sbf2"]
    u = yt + ffn2.reshape(N, T, D)                                     # SAttention out

    # ---- FinalTemporalAttention ----
    h = jnp.dot(u.reshape(N * T, D), p["Wft"],
                preferred_element_type=f32).reshape(N, T, D)
    h_last = h[:, T - 1:T, :]                                          # (N, 1, D)
    lam = lax.dot_general(h_last, h, (((2,), (2,)), ((0,), (0,))),
                          preferred_element_type=f32)                  # (N, 1, T)
    lam = _softmax_lastdim(lam)                                        # softmax over time
    pooled = lax.dot_general(lam, u, (((2,), (1,)), ((0,), (0,))),
                             preferred_element_type=f32)               # (N, 1, D)

    # ---- decoder Linear(d_model, 1) ----
    pred = jnp.dot(pooled.reshape(N, D), p["Wd"],
                   preferred_element_type=f32) + p["bd"]               # (N, 1)
    out_ref[...] = pred


# --------------------------------- wrapper (glue) ---------------------------------

def paper_master_forward(x, params, cfg):
    gs, ge = cfg["gate_start"], cfg["gate_end"]
    if gs == 0:
        x_ss = x[:, :, ge:]
    elif ge == x.shape[2]:
        x_ss = x[:, :, :gs]
    else:
        x_ss = jnp.concatenate([x[:, :, :gs], x[:, :, ge:]], axis=2)
    x_mkt = x[:, :, gs:ge]

    N, T, _ = x.shape
    D = cfg["d_model"]
    Fm = ge - gs
    Fss = x_ss.shape[2]

    # Fuse Q/K/V weights: one (D, 3D) matmul per attention block.
    kp = dict(params)
    kp["tWqkv"] = jnp.concatenate([params["tWq"], params["tWk"], params["tWv"]], axis=1)
    kp["sWqkv"] = jnp.concatenate([params["sWq"], params["sWk"], params["sWv"]], axis=1)

    inputs = [x_ss, x_mkt] + [kp[name] for name in KERNEL_PARAM_NAMES]

    # rough advisory cost numbers for XLA scheduling
    flops = (2 * N * T * (Fm * Fm + Fss * D + 2 * 3 * D * D + 4 * D * D + 2 * D * D + D)
             + 8 * N * T * T * D)
    transcendentals = N * T * (Fm + 2 * T) + N * T
    bytes_accessed = sum(int(np.prod(a.shape)) * 4 for a in inputs) + N * 4

    kernel = functools.partial(_master_kernel, cfg)
    out = pl.pallas_call(
        kernel,
        out_shape=jax.ShapeDtypeStruct((N, 1), jnp.float32),
        in_specs=[pl.BlockSpec(memory_space=pltpu.MemorySpace.VMEM)] * len(inputs),
        out_specs=pl.BlockSpec(memory_space=pltpu.MemorySpace.VMEM),
        cost_estimate=pl.CostEstimate(flops=int(flops),
                                      transcendentals=int(transcendentals),
                                      bytes_accessed=int(bytes_accessed)),
    )(*inputs)
    return out.reshape(N)


# ------------------------- deterministic parameter creation -------------------------

def make_params(key, cfg, f_total, T):
    D = cfg["d_model"]
    Fm = cfg["gate_end"] - cfg["gate_start"]
    Fss = f_total - Fm
    keys = iter(jax.random.split(key, 24))

    def w(shape, scale=0.1):
        return (scale * jax.random.normal(next(keys), shape)).astype(jnp.float32)

    p = {}
    p["Wg"], p["bg"] = w((Fm, Fm)), w((1, Fm))
    p["W_in"], p["b_in"] = w((Fss, D)), w((1, D))

    # deterministic sinusoidal positional encoding (same formula as the module)
    max_len = cfg["max_len"]
    pe = np.zeros((max_len, D), dtype=np.float32)
    position = np.arange(max_len, dtype=np.float32)[:, None]
    div_term = np.exp(np.arange(0, D, 2, dtype=np.float32) * (-math.log(10000.0) / D))
    pe[:, 0::2] = np.sin(position * div_term)
    pe[:, 1::2] = np.cos(position * div_term)
    p["pe"] = jnp.asarray(pe[None, :T, :])

    for pre in ("t", "s"):
        p[f"{pre}_n1w"] = jnp.ones((1, D), jnp.float32)
        p[f"{pre}_n1b"] = jnp.zeros((1, D), jnp.float32)
        p[f"{pre}Wq"], p[f"{pre}Wk"], p[f"{pre}Wv"] = w((D, D)), w((D, D)), w((D, D))
        p[f"{pre}_n2w"] = jnp.ones((1, D), jnp.float32)
        p[f"{pre}_n2b"] = jnp.zeros((1, D), jnp.float32)
        p[f"{pre}Wf1"], p[f"{pre}bf1"] = w((D, D)), w((1, D))
        p[f"{pre}Wf2"], p[f"{pre}bf2"] = w((D, D)), w((1, D))

    p["Wft"] = w((D, D))
    p["Wd"], p["bd"] = w((D, 1)), w((1, 1))
    return p


# ------------------------------ plain-JAX reference ------------------------------

def reference_forward(x, p, cfg):
    gs, ge = cfg["gate_start"], cfg["gate_end"]
    if gs == 0:
        x_ss = x[:, :, ge:]
    elif ge == x.shape[2]:
        x_ss = x[:, :, :gs]
    else:
        x_ss = jnp.concatenate([x[:, :, :gs], x[:, :, ge:]], axis=2)
    x_mkt = x[:, :, gs:ge]
    Fm = ge - gs
    N, T, _ = x.shape
    D = cfg["d_model"]

    def ln(a, w, b, eps=1e-5):
        mu = a.mean(-1, keepdims=True)
        var = ((a - mu) ** 2).mean(-1, keepdims=True)
        return (a - mu) / jnp.sqrt(var + eps) * w + b

    gate = Fm * jax.nn.softmax(x_mkt @ p["Wg"] + p["bg"], axis=-1)
    z = (x_ss * gate) @ p["W_in"] + p["b_in"] + p["pe"]

    # TAttention (causal, over time)
    t_temp = math.sqrt(D / cfg["t_nhead"])
    xn = ln(z, p["t_n1w"], p["t_n1b"])
    q, k, v = xn @ p["tWq"], xn @ p["tWk"], xn @ p["tWv"]
    mask = jnp.where(jnp.triu(jnp.ones((T, T)), k=1) == 1, -jnp.inf, 0.0)
    outs, off, hd = [], 0, D // cfg["t_nhead"]
    for i in range(cfg["t_nhead"]):
        d_i = hd if i < cfg["t_nhead"] - 1 else D - off
        qh, kh, vh = q[..., off:off + d_i], k[..., off:off + d_i], v[..., off:off + d_i]
        off += d_i
        s = jnp.einsum("ntd,nsd->nts", qh, kh) / t_temp + mask
        outs.append(jnp.einsum("nts,nsd->ntd", jax.nn.softmax(s, -1), vh))
    xt = z + jnp.concatenate(outs, -1)
    ffn = jnp.maximum(ln(xt, p["t_n2w"], p["t_n2b"]) @ p["tWf1"] + p["tbf1"], 0.0) @ p["tWf2"] + p["tbf2"]
    y = xt + ffn

    # SAttention (over stocks)
    s_temp = math.sqrt(D / cfg["s_nhead"])
    yn = ln(y, p["s_n1w"], p["s_n1b"])
    q = jnp.transpose(yn @ p["sWq"], (1, 0, 2))
    k = jnp.transpose(yn @ p["sWk"], (1, 0, 2))
    v = jnp.transpose(yn @ p["sWv"], (1, 0, 2))
    outs, off, hd = [], 0, D // cfg["s_nhead"]
    for i in range(cfg["s_nhead"]):
        d_i = hd if i < cfg["s_nhead"] - 1 else D - off
        qh, kh, vh = q[..., off:off + d_i], k[..., off:off + d_i], v[..., off:off + d_i]
        off += d_i
        s = jnp.einsum("tad,tbd->tab", qh, kh) / s_temp
        outs.append(jnp.transpose(jnp.einsum("tab,tbd->tad", jax.nn.softmax(s, -1), vh), (1, 0, 2)))
    yt = y + jnp.concatenate(outs, -1)
    ffn2 = jnp.maximum(ln(yt, p["s_n2w"], p["s_n2b"]) @ p["sWf1"] + p["sbf1"], 0.0) @ p["sWf2"] + p["sbf2"]
    u = yt + ffn2

    # FinalTemporalAttention + decoder
    h = u @ p["Wft"]
    lam = jax.nn.softmax(jnp.einsum("ntd,nd->nt", h, h[:, -1, :]), axis=1)
    pooled = jnp.einsum("nt,ntd->nd", lam, u)
    return (pooled @ p["Wd"] + p["bd"]).reshape(-1)


# --------------------------------------- main ---------------------------------------

if __name__ == "__main__":
    cfg = dict(d_model=32, t_nhead=4, s_nhead=2,
               gate_start=8, gate_end=16, max_len=100)
    N, T, F_total = 8, 8, 16     # stocks, lookback, total features (8 stock + 8 market)

    key = jax.random.PRNGKey(0)
    kx, kp = jax.random.split(key)
    x = jax.random.normal(kx, (N, T, F_total), dtype=jnp.float32)
    params = make_params(kp, cfg, F_total, T)

    out = paper_master_forward(x, params, cfg)
    out = jax.block_until_ready(out)

    ref = reference_forward(x, params, cfg)
    np.testing.assert_allclose(np.asarray(out), np.asarray(ref), rtol=2e-2, atol=2e-2)

    print("KERNEL_OK")
</pallas_src>

<mosaic_0001>
module attributes {stable_mosaic.version = 11 : i64} {
  func.func @_master_kernel(%arg0: memref<8x8x8xf32, #tpu.memory_space<vmem>>, %arg1: memref<8x8x8xf32, #tpu.memory_space<vmem>>, %arg2: memref<8x8xf32, #tpu.memory_space<vmem>>, %arg3: memref<1x8xf32, #tpu.memory_space<vmem>>, %arg4: memref<8x32xf32, #tpu.memory_space<vmem>>, %arg5: memref<1x32xf32, #tpu.memory_space<vmem>>, %arg6: memref<1x8x32xf32, #tpu.memory_space<vmem>>, %arg7: memref<1x32xf32, #tpu.memory_space<vmem>>, %arg8: memref<1x32xf32, #tpu.memory_space<vmem>>, %arg9: memref<32x96xf32, #tpu.memory_space<vmem>>, %arg10: memref<1x32xf32, #tpu.memory_space<vmem>>, %arg11: memref<1x32xf32, #tpu.memory_space<vmem>>, %arg12: memref<32x32xf32, #tpu.memory_space<vmem>>, %arg13: memref<1x32xf32, #tpu.memory_space<vmem>>, %arg14: memref<32x32xf32, #tpu.memory_space<vmem>>, %arg15: memref<1x32xf32, #tpu.memory_space<vmem>>, %arg16: memref<1x32xf32, #tpu.memory_space<vmem>>, %arg17: memref<1x32xf32, #tpu.memory_space<vmem>>, %arg18: memref<32x96xf32, #tpu.memory_space<vmem>>, %arg19: memref<1x32xf32, #tpu.memory_space<vmem>>, %arg20: memref<1x32xf32, #tpu.memory_space<vmem>>, %arg21: memref<32x32xf32, #tpu.memory_space<vmem>>, %arg22: memref<1x32xf32, #tpu.memory_space<vmem>>, %arg23: memref<32x32xf32, #tpu.memory_space<vmem>>, %arg24: memref<1x32xf32, #tpu.memory_space<vmem>>, %arg25: memref<32x32xf32, #tpu.memory_space<vmem>>, %arg26: memref<32x1xf32, #tpu.memory_space<vmem>>, %arg27: memref<1x1xf32, #tpu.memory_space<vmem>>, %arg28: memref<8x1xf32, #tpu.memory_space<vmem>>) attributes {dimension_semantics = [], scalar_prefetch = 0 : i64, scratch_operands = 0 : i64, tpu.core_type = #tpu.core_type<tc>} {
    %c0 = arith.constant 0 : index
    %c0_0 = arith.constant 0 : index
    %0 = vector.load %arg2[%c0, %c0_0] : memref<8x8xf32, #tpu.memory_space<vmem>>, vector<8x8xf32>
    %c0_1 = arith.constant 0 : index
    %c0_2 = arith.constant 0 : index
    %1 = vector.load %arg3[%c0_1, %c0_2] : memref<1x8xf32, #tpu.memory_space<vmem>>, vector<1x8xf32>
    %c0_3 = arith.constant 0 : index
    %c0_4 = arith.constant 0 : index
    %2 = vector.load %arg4[%c0_3, %c0_4] : memref<8x32xf32, #tpu.memory_space<vmem>>, vector<8x32xf32>
    %c0_5 = arith.constant 0 : index
    %c0_6 = arith.constant 0 : index
    %3 = vector.load %arg5[%c0_5, %c0_6] : memref<1x32xf32, #tpu.memory_space<vmem>>, vector<1x32xf32>
    %c0_7 = arith.constant 0 : index
    %c0_8 = arith.constant 0 : index
    %c0_9 = arith.constant 0 : index
    %4 = vector.load %arg6[%c0_7, %c0_8, %c0_9] : memref<1x8x32xf32, #tpu.memory_space<vmem>>, vector<1x8x32xf32>
    %c0_10 = arith.constant 0 : index
    %c0_11 = arith.constant 0 : index
    %5 = vector.load %arg7[%c0_10, %c0_11] : memref<1x32xf32, #tpu.memory_space<vmem>>, vector<1x32xf32>
    %c0_12 = arith.constant 0 : index
    %c0_13 = arith.constant 0 : index
    %6 = vector.load %arg8[%c0_12, %c0_13] : memref<1x32xf32, #tpu.memory_space<vmem>>, vector<1x32xf32>
    %c0_14 = arith.constant 0 : index
    %c0_15 = arith.constant 0 : index
    %7 = vector.load %arg9[%c0_14, %c0_15] : memref<32x96xf32, #tpu.memory_space<vmem>>, vector<32x96xf32>
    %c0_16 = arith.constant 0 : index
    %c0_17 = arith.constant 0 : index
    %8 = vector.load %arg10[%c0_16, %c0_17] : memref<1x32xf32, #tpu.memory_space<vmem>>, vector<1x32xf32>
    %c0_18 = arith.constant 0 : index
    %c0_19 = arith.constant 0 : index
    %9 = vector.load %arg11[%c0_18, %c0_19] : memref<1x32xf32, #tpu.memory_space<vmem>>, vector<1x32xf32>
    %c0_20 = arith.constant 0 : index
    %c0_21 = arith.constant 0 : index
    %10 = vector.load %arg12[%c0_20, %c0_21] : memref<32x32xf32, #tpu.memory_space<vmem>>, vector<32x32xf32>
    %c0_22 = arith.constant 0 : index
    %c0_23 = arith.constant 0 : index
    %11 = vector.load %arg13[%c0_22, %c0_23] : memref<1x32xf32, #tpu.memory_space<vmem>>, vector<1x32xf32>
    %c0_24 = arith.constant 0 : index
    %c0_25 = arith.constant 0 : index
    %12 = vector.load %arg14[%c0_24, %c0_25] : memref<32x32xf32, #tpu.memory_space<vmem>>, vector<32x32xf32>
    %c0_26 = arith.constant 0 : index
    %c0_27 = arith.constant 0 : index
    %13 = vector.load %arg15[%c0_26, %c0_27] : memref<1x32xf32, #tpu.memory_space<vmem>>, vector<1x32xf32>
    %c0_28 = arith.constant 0 : index
    %c0_29 = arith.constant 0 : index
    %14 = vector.load %arg16[%c0_28, %c0_29] : memref<1x32xf32, #tpu.memory_space<vmem>>, vector<1x32xf32>
    %c0_30 = arith.constant 0 : index
    %c0_31 = arith.constant 0 : index
    %15 = vector.load %arg17[%c0_30, %c0_31] : memref<1x32xf32, #tpu.memory_space<vmem>>, vector<1x32xf32>
    %c0_32 = arith.constant 0 : index
    %c0_33 = arith.constant 0 : index
    %16 = vector.load %arg18[%c0_32, %c0_33] : memref<32x96xf32, #tpu.memory_space<vmem>>, vector<32x96xf32>
    %c0_34 = arith.constant 0 : index
    %c0_35 = arith.constant 0 : index
    %17 = vector.load %arg19[%c0_34, %c0_35] : memref<1x32xf32, #tpu.memory_space<vmem>>, vector<1x32xf32>
    %c0_36 = arith.constant 0 : index
    %c0_37 = arith.constant 0 : index
    %18 = vector.load %arg20[%c0_36, %c0_37] : memref<1x32xf32, #tpu.memory_space<vmem>>, vector<1x32xf32>
    %c0_38 = arith.constant 0 : index
    %c0_39 = arith.constant 0 : index
    %19 = vector.load %arg21[%c0_38, %c0_39] : memref<32x32xf32, #tpu.memory_space<vmem>>, vector<32x32xf32>
    %c0_40 = arith.constant 0 : index
    %c0_41 = arith.constant 0 : index
    %20 = vector.load %arg22[%c0_40, %c0_41] : memref<1x32xf32, #tpu.memory_space<vmem>>, vector<1x32xf32>
    %c0_42 = arith.constant 0 : index
    %c0_43 = arith.constant 0 : index
    %21 = vector.load %arg23[%c0_42, %c0_43] : memref<32x32xf32, #tpu.memory_space<vmem>>, vector<32x32xf32>
    %c0_44 = arith.constant 0 : index
    %c0_45 = arith.constant 0 : index
    %22 = vector.load %arg24[%c0_44, %c0_45] : memref<1x32xf32, #tpu.memory_space<vmem>>, vector<1x32xf32>
    %c0_46 = arith.constant 0 : index
    %c0_47 = arith.constant 0 : index
    %23 = vector.load %arg25[%c0_46, %c0_47] : memref<32x32xf32, #tpu.memory_space<vmem>>, vector<32x32xf32>
    %c0_48 = arith.constant 0 : index
    %c0_49 = arith.constant 0 : index
    %24 = vector.load %arg26[%c0_48, %c0_49] : memref<32x1xf32, #tpu.memory_space<vmem>>, vector<32x1xf32>
    %c0_50 = arith.constant 0 : index
    %c0_51 = arith.constant 0 : index
    %25 = vector.load %arg27[%c0_50, %c0_51] : memref<1x1xf32, #tpu.memory_space<vmem>>, vector<1x1xf32>
    %c0_52 = arith.constant 0 : index
    %c0_53 = arith.constant 0 : index
    %c0_54 = arith.constant 0 : index
    %26 = vector.load %arg0[%c0_52, %c0_53, %c0_54] : memref<8x8x8xf32, #tpu.memory_space<vmem>>, vector<8x8x8xf32>
    %27 = vector.shape_cast %26 : vector<8x8x8xf32> to vector<64x8xf32>
    %c0_55 = arith.constant 0 : index
    %c0_56 = arith.constant 0 : index
    %c0_57 = arith.constant 0 : index
    %28 = vector.load %arg1[%c0_55, %c0_56, %c0_57] : memref<8x8x8xf32, #tpu.memory_space<vmem>>, vector<8x8x8xf32>
    %29 = vector.shape_cast %28 : vector<8x8x8xf32> to vector<64x8xf32>
    %cst = arith.constant dense<0.000000e+00> : vector<64x8xf32>
    %30 = tpu.matmul %29, %0, %cst {dimension_numbers = #tpu.dot_dimension_numbers<[1], [0], [0], [1], [0, 0, 1, 1], [], []>} : vector<64x8xf32>, vector<8x8xf32>, vector<64x8xf32> -> vector<64x8xf32>
    %31 = vector.broadcast %1 : vector<1x8xf32> to vector<64x8xf32>
    %32 = arith.addf %30, %31 : vector<64x8xf32>
    %cst_58 = arith.constant dense<0xFF800000> : vector<64xf32>
    %33 = vector.multi_reduction <maximumf>, %32, %cst_58 [1] : vector<64x8xf32> to vector<64xf32>
    %34 = vector.shape_cast %33 : vector<64xf32> to vector<64x1xf32>
    %35 = vector.broadcast %34 : vector<64x1xf32> to vector<64x8xf32>
    %36 = arith.subf %32, %35 : vector<64x8xf32>
    %37 = math.exp %36 : vector<64x8xf32>
    %cst_59 = arith.constant dense<0.000000e+00> : vector<64xf32>
    %38 = vector.multi_reduction <add>, %37, %cst_59 [1] : vector<64x8xf32> to vector<64xf32>
    %39 = vector.shape_cast %38 : vector<64xf32> to vector<64x1xf32>
    %40 = vector.broadcast %39 : vector<64x1xf32> to vector<64x8xf32>
    %41 = arith.divf %37, %40 : vector<64x8xf32>
    %cst_60 = arith.constant 8.000000e+00 : f32
    %42 = vector.broadcast %cst_60 : f32 to vector<64x8xf32>
    %43 = arith.mulf %42, %41 : vector<64x8xf32>
    %44 = arith.mulf %27, %43 : vector<64x8xf32>
    %cst_61 = arith.constant dense<0.000000e+00> : vector<64x32xf32>
    %45 = tpu.matmul %44, %2, %cst_61 {dimension_numbers = #tpu.dot_dimension_numbers<[1], [0], [0], [1], [0, 0, 1, 1], [], []>} : vector<64x8xf32>, vector<8x32xf32>, vector<64x32xf32> -> vector<64x32xf32>
    %46 = vector.broadcast %3 : vector<1x32xf32> to vector<64x32xf32>
    %47 = arith.addf %45, %46 : vector<64x32xf32>
    %48 = vector.shape_cast %47 : vector<64x32xf32> to vector<8x8x32xf32>
    %49 = vector.broadcast %4 : vector<1x8x32xf32> to vector<8x8x32xf32>
    %50 = arith.addf %48, %49 : vector<8x8x32xf32>
    %cst_62 = arith.constant dense<0.000000e+00> : vector<8x8xf32>
    %51 = vector.multi_reduction <add>, %50, %cst_62 [2] : vector<8x8x32xf32> to vector<8x8xf32>
    %52 = vector.shape_cast %51 : vector<8x8xf32> to vector<8x8x1xf32>
    %cst_63 = arith.constant 3.200000e+01 : f32
    %53 = vector.broadcast %cst_63 : f32 to vector<8x8x1xf32>
    %54 = arith.divf %52, %53 : vector<8x8x1xf32>
    %55 = vector.broadcast %54 : vector<8x8x1xf32> to vector<8x8x32xf32>
    %56 = arith.subf %50, %55 : vector<8x8x32xf32>
    %57 = arith.mulf %56, %56 : vector<8x8x32xf32>
    %cst_64 = arith.constant dense<0.000000e+00> : vector<8x8xf32>
    %58 = vector.multi_reduction <add>, %57, %cst_64 [2] : vector<8x8x32xf32> to vector<8x8xf32>
    %59 = vector.shape_cast %58 : vector<8x8xf32> to vector<8x8x1xf32>
    %cst_65 = arith.constant 3.200000e+01 : f32
    %60 = vector.broadcast %cst_65 : f32 to vector<8x8x1xf32>
    %61 = arith.divf %59, %60 : vector<8x8x1xf32>
    %62 = vector.broadcast %54 : vector<8x8x1xf32> to vector<8x8x32xf32>
    %63 = arith.subf %50, %62 : vector<8x8x32xf32>
    %cst_66 = arith.constant 9.99999974E-6 : f32
    %64 = vector.broadcast %cst_66 : f32 to vector<8x8x1xf32>
    %65 = arith.addf %61, %64 : vector<8x8x1xf32>
    %66 = math.rsqrt %65 : vector<8x8x1xf32>
    %67 = vector.broadcast %66 : vector<8x8x1xf32> to vector<8x8x32xf32>
    %68 = arith.mulf %63, %67 : vector<8x8x32xf32>
    %69 = vector.shape_cast %5 : vector<1x32xf32> to vector<1x1x32xf32>
    %70 = vector.broadcast %69 : vector<1x1x32xf32> to vector<8x8x32xf32>
    %71 = arith.mulf %68, %70 : vector<8x8x32xf32>
    %72 = vector.shape_cast %6 : vector<1x32xf32> to vector<1x1x32xf32>
    %73 = vector.broadcast %72 : vector<1x1x32xf32> to vector<8x8x32xf32>
    %74 = arith.addf %71, %73 : vector<8x8x32xf32>
    %75 = vector.shape_cast %74 : vector<8x8x32xf32> to vector<64x32xf32>
    %cst_67 = arith.constant dense<0.000000e+00> : vector<64x96xf32>
    %76 = tpu.matmul %75, %7, %cst_67 {dimension_numbers = #tpu.dot_dimension_numbers<[1], [0], [0], [1], [0, 0, 1, 1], [], []>} : vector<64x32xf32>, vector<32x96xf32>, vector<64x96xf32> -> vector<64x96xf32>
    %77 = vector.shape_cast %76 : vector<64x96xf32> to vector<8x8x96xf32>
    %78 = vector.extract_strided_slice %77 {offsets = [0, 0, 0], sizes = [8, 8, 32], strides = [1, 1, 1]} : vector<8x8x96xf32> to vector<8x8x32xf32>
    %79 = vector.extract_strided_slice %77 {offsets = [0, 0, 32], sizes = [8, 8, 32], strides = [1, 1, 1]} : vector<8x8x96xf32> to vector<8x8x32xf32>
    %80 = vector.extract_strided_slice %77 {offsets = [0, 0, 64], sizes = [8, 8, 32], strides = [1, 1, 1]} : vector<8x8x96xf32> to vector<8x8x32xf32>
    %81 = tpu.iota {dimensions = array<i32: 0>} : vector<8x8xi32>
    %82 = tpu.iota {dimensions = array<i32: 1>} : vector<8x8xi32>
    %83 = arith.cmpi sgt, %82, %81 : vector<8x8xi32>
    %cst_68 = arith.constant -1.000000e+30 : f32
    %cst_69 = arith.constant 0.000000e+00 : f32
    %84 = vector.broadcast %cst_68 : f32 to vector<8x8xf32>
    %85 = vector.broadcast %cst_69 : f32 to vector<8x8xf32>
    %86 = arith.select %83, %84, %85 : vector<8x8xi1>, vector<8x8xf32>
    %87 = vector.shape_cast %86 : vector<8x8xf32> to vector<1x8x8xf32>
    %88 = vector.extract_strided_slice %78 {offsets = [0, 0, 0], sizes = [8, 8, 8], strides = [1, 1, 1]} : vector<8x8x32xf32> to vector<8x8x8xf32>
    %89 = vector.extract_strided_slice %79 {offsets = [0, 0, 0], sizes = [8, 8, 8], strides = [1, 1, 1]} : vector<8x8x32xf32> to vector<8x8x8xf32>
    %90 = vector.extract_strided_slice %80 {offsets = [0, 0, 0], sizes = [8, 8, 8], strides = [1, 1, 1]} : vector<8x8x32xf32> to vector<8x8x8xf32>
    %cst_70 = arith.constant dense<0.000000e+00> : vector<8x8x8xf32>
    %91 = tpu.matmul %88, %89, %cst_70 {dimension_numbers = #tpu.dot_dimension_numbers<[2], [2], [1], [1], [0, 0, 0, 1, 1, 1], [0], [0]>} : vector<8x8x8xf32>, vector<8x8x8xf32>, vector<8x8x8xf32> -> vector<8x8x8xf32>
    %cst_71 = arith.constant 2.82842708 : f32
    %92 = vector.broadcast %cst_71 : f32 to vector<8x8x8xf32>
    %93 = arith.divf %91, %92 : vector<8x8x8xf32>
    %94 = vector.broadcast %87 : vector<1x8x8xf32> to vector<8x8x8xf32>
    %95 = arith.addf %93, %94 : vector<8x8x8xf32>
    %cst_72 = arith.constant dense<0xFF800000> : vector<8x8xf32>
    %96 = vector.multi_reduction <maximumf>, %95, %cst_72 [2] : vector<8x8x8xf32> to vector<8x8xf32>
    %97 = vector.shape_cast %96 : vector<8x8xf32> to vector<8x8x1xf32>
    %98 = vector.broadcast %97 : vector<8x8x1xf32> to vector<8x8x8xf32>
    %99 = arith.subf %95, %98 : vector<8x8x8xf32>
    %100 = math.exp %99 : vector<8x8x8xf32>
    %cst_73 = arith.constant dense<0.000000e+00> : vector<8x8xf32>
    %101 = vector.multi_reduction <add>, %100, %cst_73 [2] : vector<8x8x8xf32> to vector<8x8xf32>
    %102 = vector.shape_cast %101 : vector<8x8xf32> to vector<8x8x1xf32>
    %103 = vector.broadcast %102 : vector<8x8x1xf32> to vector<8x8x8xf32>
    %104 = arith.divf %100, %103 : vector<8x8x8xf32>
    %cst_74 = arith.constant dense<0.000000e+00> : vector<8x8x8xf32>
    %105 = tpu.matmul %104, %90, %cst_74 {dimension_numbers = #tpu.dot_dimension_numbers<[2], [1], [1], [2], [0, 0, 0, 1, 1, 2], [0], [0]>} : vector<8x8x8xf32>, vector<8x8x8xf32>, vector<8x8x8xf32> -> vector<8x8x8xf32>
    %106 = vector.extract_strided_slice %78 {offsets = [0, 0, 8], sizes = [8, 8, 8], strides = [1, 1, 1]} : vector<8x8x32xf32> to vector<8x8x8xf32>
    %107 = vector.extract_strided_slice %79 {offsets = [0, 0, 8], sizes = [8, 8, 8], strides = [1, 1, 1]} : vector<8x8x32xf32> to vector<8x8x8xf32>
    %108 = vector.extract_strided_slice %80 {offsets = [0, 0, 8], sizes = [8, 8, 8], strides = [1, 1, 1]} : vector<8x8x32xf32> to vector<8x8x8xf32>
    %cst_75 = arith.constant dense<0.000000e+00> : vector<8x8x8xf32>
    %109 = tpu.matmul %106, %107, %cst_75 {dimension_numbers = #tpu.dot_dimension_numbers<[2], [2], [1], [1], [0, 0, 0, 1, 1, 1], [0], [0]>} : vector<8x8x8xf32>, vector<8x8x8xf32>, vector<8x8x8xf32> -> vector<8x8x8xf32>
    %cst_76 = arith.constant 2.82842708 : f32
    %110 = vector.broadcast %cst_76 : f32 to vector<8x8x8xf32>
    %111 = arith.divf %109, %110 : vector<8x8x8xf32>
    %112 = vector.broadcast %87 : vector<1x8x8xf32> to vector<8x8x8xf32>
    %113 = arith.addf %111, %112 : vector<8x8x8xf32>
    %cst_77 = arith.constant dense<0xFF800000> : vector<8x8xf32>
    %114 = vector.multi_reduction <maximumf>, %113, %cst_77 [2] : vector<8x8x8xf32> to vector<8x8xf32>
    %115 = vector.shape_cast %114 : vector<8x8xf32> to vector<8x8x1xf32>
    %116 = vector.broadcast %115 : vector<8x8x1xf32> to vector<8x8x8xf32>
    %117 = arith.subf %113, %116 : vector<8x8x8xf32>
    %118 = math.exp %117 : vector<8x8x8xf32>
    %cst_78 = arith.constant dense<0.000000e+00> : vector<8x8xf32>
    %119 = vector.multi_reduction <add>, %118, %cst_78 [2] : vector<8x8x8xf32> to vector<8x8xf32>
    %120 = vector.shape_cast %119 : vector<8x8xf32> to vector<8x8x1xf32>
    %121 = vector.broadcast %120 : vector<8x8x1xf32> to vector<8x8x8xf32>
    %122 = arith.divf %118, %121 : vector<8x8x8xf32>
    %cst_79 = arith.constant dense<0.000000e+00> : vector<8x8x8xf32>
    %123 = tpu.matmul %122, %108, %cst_79 {dimension_numbers = #tpu.dot_dimension_numbers<[2], [1], [1], [2], [0, 0, 0, 1, 1, 2], [0], [0]>} : vector<8x8x8xf32>, vector<8x8x8xf32>, vector<8x8x8xf32> -> vector<8x8x8xf32>
    %124 = vector.extract_strided_slice %78 {offsets = [0, 0, 16], sizes = [8, 8, 8], strides = [1, 1, 1]} : vector<8x8x32xf32> to vector<8x8x8xf32>
    %125 = vector.extract_strided_slice %79 {offsets = [0, 0, 16], sizes = [8, 8, 8], strides = [1, 1, 1]} : vector<8x8x32xf32> to vector<8x8x8xf32>
    %126 = vector.extract_strided_slice %80 {offsets = [0, 0, 16], sizes = [8, 8, 8], strides = [1, 1, 1]} : vector<8x8x32xf32> to vector<8x8x8xf32>
    %cst_80 = arith.constant dense<0.000000e+00> : vector<8x8x8xf32>
    %127 = tpu.matmul %124, %125, %cst_80 {dimension_numbers = #tpu.dot_dimension_numbers<[2], [2], [1], [1], [0, 0, 0, 1, 1, 1], [0], [0]>} : vector<8x8x8xf32>, vector<8x8x8xf32>, vector<8x8x8xf32> -> vector<8x8x8xf32>
    %cst_81 = arith.constant 2.82842708 : f32
    %128 = vector.broadcast %cst_81 : f32 to vector<8x8x8xf32>
    %129 = arith.divf %127, %128 : vector<8x8x8xf32>
    %130 = vector.broadcast %87 : vector<1x8x8xf32> to vector<8x8x8xf32>
    %131 = arith.addf %129, %130 : vector<8x8x8xf32>
    %cst_82 = arith.constant dense<0xFF800000> : vector<8x8xf32>
    %132 = vector.multi_reduction <maximumf>, %131, %cst_82 [2] : vector<8x8x8xf32> to vector<8x8xf32>
    %133 = vector.shape_cast %132 : vector<8x8xf32> to vector<8x8x1xf32>
    %134 = vector.broadcast %133 : vector<8x8x1xf32> to vector<8x8x8xf32>
    %135 = arith.subf %131, %134 : vector<8x8x8xf32>
    %136 = math.exp %135 : vector<8x8x8xf32>
    %cst_83 = arith.constant dense<0.000000e+00> : vector<8x8xf32>
    %137 = vector.multi_reduction <add>, %136, %cst_83 [2] : vector<8x8x8xf32> to vector<8x8xf32>
    %138 = vector.shape_cast %137 : vector<8x8xf32> to vector<8x8x1xf32>
    %139 = vector.broadcast %138 : vector<8x8x1xf32> to vector<8x8x8xf32>
    %140 = arith.divf %136, %139 : vector<8x8x8xf32>
    %cst_84 = arith.constant dense<0.000000e+00> : vector<8x8x8xf32>
    %141 = tpu.matmul %140, %126, %cst_84 {dimension_numbers = #tpu.dot_dimension_numbers<[2], [1], [1], [2], [0, 0, 0, 1, 1, 2], [0], [0]>} : vector<8x8x8xf32>, vector<8x8x8xf32>, vector<8x8x8xf32> -> vector<8x8x8xf32>
    %142 = vector.extract_strided_slice %78 {offsets = [0, 0, 24], sizes = [8, 8, 8], strides = [1, 1, 1]} : vector<8x8x32xf32> to vector<8x8x8xf32>
    %143 = vector.extract_strided_slice %79 {offsets = [0, 0, 24], sizes = [8, 8, 8], strides = [1, 1, 1]} : vector<8x8x32xf32> to vector<8x8x8xf32>
    %144 = vector.extract_strided_slice %80 {offsets = [0, 0, 24], sizes = [8, 8, 8], strides = [1, 1, 1]} : vector<8x8x32xf32> to vector<8x8x8xf32>
    %cst_85 = arith.constant dense<0.000000e+00> : vector<8x8x8xf32>
    %145 = tpu.matmul %142, %143, %cst_85 {dimension_numbers = #tpu.dot_dimension_numbers<[2], [2], [1], [1], [0, 0, 0, 1, 1, 1], [0], [0]>} : vector<8x8x8xf32>, vector<8x8x8xf32>, vector<8x8x8xf32> -> vector<8x8x8xf32>
    %cst_86 = arith.constant 2.82842708 : f32
    %146 = vector.broadcast %cst_86 : f32 to vector<8x8x8xf32>
    %147 = arith.divf %145, %146 : vector<8x8x8xf32>
    %148 = vector.broadcast %87 : vector<1x8x8xf32> to vector<8x8x8xf32>
    %149 = arith.addf %147, %148 : vector<8x8x8xf32>
    %cst_87 = arith.constant dense<0xFF800000> : vector<8x8xf32>
    %150 = vector.multi_reduction <maximumf>, %149, %cst_87 [2] : vector<8x8x8xf32> to vector<8x8xf32>
    %151 = vector.shape_cast %150 : vector<8x8xf32> to vector<8x8x1xf32>
    %152 = vector.broadcast %151 : vector<8x8x1xf32> to vector<8x8x8xf32>
    %153 = arith.subf %149, %152 : vector<8x8x8xf32>
    %154 = math.exp %153 : vector<8x8x8xf32>
    %cst_88 = arith.constant dense<0.000000e+00> : vector<8x8xf32>
    %155 = vector.multi_reduction <add>, %154, %cst_88 [2] : vector<8x8x8xf32> to vector<8x8xf32>
    %156 = vector.shape_cast %155 : vector<8x8xf32> to vector<8x8x1xf32>
    %157 = vector.broadcast %156 : vector<8x8x1xf32> to vector<8x8x8xf32>
    %158 = arith.divf %154, %157 : vector<8x8x8xf32>
    %cst_89 = arith.constant dense<0.000000e+00> : vector<8x8x8xf32>
    %159 = tpu.matmul %158, %144, %cst_89 {dimension_numbers = #tpu.dot_dimension_numbers<[2], [1], [1], [2], [0, 0, 0, 1, 1, 2], [0], [0]>} : vector<8x8x8xf32>, vector<8x8x8xf32>, vector<8x8x8xf32> -> vector<8x8x8xf32>
    %160 = tpu.concatenate %105, %123, %141, %159 in 2 : vector<8x8x8xf32>, vector<8x8x8xf32>, vector<8x8x8xf32>, vector<8x8x8xf32> -> vector<8x8x32xf32>
    %161 = arith.addf %50, %160 : vector<8x8x32xf32>
    %cst_90 = arith.constant dense<0.000000e+00> : vector<8x8xf32>
    %162 = vector.multi_reduction <add>, %161, %cst_90 [2] : vector<8x8x32xf32> to vector<8x8xf32>
    %163 = vector.shape_cast %162 : vector<8x8xf32> to vector<8x8x1xf32>
    %cst_91 = arith.constant 3.200000e+01 : f32
    %164 = vector.broadcast %cst_91 : f32 to vector<8x8x1xf32>
    %165 = arith.divf %163, %164 : vector<8x8x1xf32>
    %166 = vector.broadcast %165 : vector<8x8x1xf32> to vector<8x8x32xf32>
    %167 = arith.subf %161, %166 : vector<8x8x32xf32>
    %168 = arith.mulf %167, %167 : vector<8x8x32xf32>
    %cst_92 = arith.constant dense<0.000000e+00> : vector<8x8xf32>
    %169 = vector.multi_reduction <add>, %168, %cst_92 [2] : vector<8x8x32xf32> to vector<8x8xf32>
    %170 = vector.shape_cast %169 : vector<8x8xf32> to vector<8x8x1xf32>
    %cst_93 = arith.constant 3.200000e+01 : f32
    %171 = vector.broadcast %cst_93 : f32 to vector<8x8x1xf32>
    %172 = arith.divf %170, %171 : vector<8x8x1xf32>
    %173 = vector.broadcast %165 : vector<8x8x1xf32> to vector<8x8x32xf32>
    %174 = arith.subf %161, %173 : vector<8x8x32xf32>
    %cst_94 = arith.constant 9.99999974E-6 : f32
    %175 = vector.broadcast %cst_94 : f32 to vector<8x8x1xf32>
    %176 = arith.addf %172, %175 : vector<8x8x1xf32>
    %177 = math.rsqrt %176 : vector<8x8x1xf32>
    %178 = vector.broadcast %177 : vector<8x8x1xf32> to vector<8x8x32xf32>
    %179 = arith.mulf %174, %178 : vector<8x8x32xf32>
    %180 = vector.shape_cast %8 : vector<1x32xf32> to vector<1x1x32xf32>
    %181 = vector.broadcast %180 : vector<1x1x32xf32> to vector<8x8x32xf32>
    %182 = arith.mulf %179, %181 : vector<8x8x32xf32>
    %183 = vector.shape_cast %9 : vector<1x32xf32> to vector<1x1x32xf32>
    %184 = vector.broadcast %183 : vector<1x1x32xf32> to vector<8x8x32xf32>
    %185 = arith.addf %182, %184 : vector<8x8x32xf32>
    %186 = vector.shape_cast %185 : vector<8x8x32xf32> to vector<64x32xf32>
    %cst_95 = arith.constant dense<0.000000e+00> : vector<64x32xf32>
    %187 = tpu.matmul %186, %10, %cst_95 {dimension_numbers = #tpu.dot_dimension_numbers<[1], [0], [0], [1], [0, 0, 1, 1], [], []>} : vector<64x32xf32>, vector<32x32xf32>, vector<64x32xf32> -> vector<64x32xf32>
    %188 = vector.broadcast %11 : vector<1x32xf32> to vector<64x32xf32>
    %189 = arith.addf %187, %188 : vector<64x32xf32>
    %cst_96 = arith.constant 0.000000e+00 : f32
    %190 = vector.broadcast %cst_96 : f32 to vector<64x32xf32>
    %191 = arith.maximumf %189, %190 : vector<64x32xf32>
    %cst_97 = arith.constant dense<0.000000e+00> : vector<64x32xf32>
    %192 = tpu.matmul %191, %12, %cst_97 {dimension_numbers = #tpu.dot_dimension_numbers<[1], [0], [0], [1], [0, 0, 1, 1], [], []>} : vector<64x32xf32>, vector<32x32xf32>, vector<64x32xf32> -> vector<64x32xf32>
    %193 = vector.broadcast %13 : vector<1x32xf32> to vector<64x32xf32>
    %194 = arith.addf %192, %193 : vector<64x32xf32>
    %195 = vector.shape_cast %194 : vector<64x32xf32> to vector<8x8x32xf32>
    %196 = arith.addf %161, %195 : vector<8x8x32xf32>
    %cst_98 = arith.constant dense<0.000000e+00> : vector<8x8xf32>
    %197 = vector.multi_reduction <add>, %196, %cst_98 [2] : vector<8x8x32xf32> to vector<8x8xf32>
    %198 = vector.shape_cast %197 : vector<8x8xf32> to vector<8x8x1xf32>
    %cst_99 = arith.constant 3.200000e+01 : f32
    %199 = vector.broadcast %cst_99 : f32 to vector<8x8x1xf32>
    %200 = arith.divf %198, %199 : vector<8x8x1xf32>
    %201 = vector.broadcast %200 : vector<8x8x1xf32> to vector<8x8x32xf32>
    %202 = arith.subf %196, %201 : vector<8x8x32xf32>
    %203 = arith.mulf %202, %202 : vector<8x8x32xf32>
    %cst_100 = arith.constant dense<0.000000e+00> : vector<8x8xf32>
    %204 = vector.multi_reduction <add>, %203, %cst_100 [2] : vector<8x8x32xf32> to vector<8x8xf32>
    %205 = vector.shape_cast %204 : vector<8x8xf32> to vector<8x8x1xf32>
    %cst_101 = arith.constant 3.200000e+01 : f32
    %206 = vector.broadcast %cst_101 : f32 to vector<8x8x1xf32>
    %207 = arith.divf %205, %206 : vector<8x8x1xf32>
    %208 = vector.broadcast %200 : vector<8x8x1xf32> to vector<8x8x32xf32>
    %209 = arith.subf %196, %208 : vector<8x8x32xf32>
    %cst_102 = arith.constant 9.99999974E-6 : f32
    %210 = vector.broadcast %cst_102 : f32 to vector<8x8x1xf32>
    %211 = arith.addf %207, %210 : vector<8x8x1xf32>
    %212 = math.rsqrt %211 : vector<8x8x1xf32>
    %213 = vector.broadcast %212 : vector<8x8x1xf32> to vector<8x8x32xf32>
    %214 = arith.mulf %209, %213 : vector<8x8x32xf32>
    %215 = vector.shape_cast %14 : vector<1x32xf32> to vector<1x1x32xf32>
    %216 = vector.broadcast %215 : vector<1x1x32xf32> to vector<8x8x32xf32>
    %217 = arith.mulf %214, %216 : vector<8x8x32xf32>
    %218 = vector.shape_cast %15 : vector<1x32xf32> to vector<1x1x32xf32>
    %219 = vector.broadcast %218 : vector<1x1x32xf32> to vector<8x8x32xf32>
    %220 = arith.addf %217, %219 : vector<8x8x32xf32>
    %221 = vector.shape_cast %220 : vector<8x8x32xf32> to vector<64x32xf32>
    %cst_103 = arith.constant dense<0.000000e+00> : vector<64x96xf32>
    %222 = tpu.matmul %221, %16, %cst_103 {dimension_numbers = #tpu.dot_dimension_numbers<[1], [0], [0], [1], [0, 0, 1, 1], [], []>} : vector<64x32xf32>, vector<32x96xf32>, vector<64x96xf32> -> vector<64x96xf32>
    %223 = vector.shape_cast %222 : vector<64x96xf32> to vector<8x8x96xf32>
    %224 = tpu.transpose %223, [1, 0, 2] : vector<8x8x96xf32> -> vector<8x8x96xf32>
    %225 = vector.extract_strided_slice %224 {offsets = [0, 0, 0], sizes = [8, 8, 32], strides = [1, 1, 1]} : vector<8x8x96xf32> to vector<8x8x32xf32>
    %226 = vector.extract_strided_slice %224 {offsets = [0, 0, 32], sizes = [8, 8, 32], strides = [1, 1, 1]} : vector<8x8x96xf32> to vector<8x8x32xf32>
    %227 = vector.extract_strided_slice %224 {offsets = [0, 0, 64], sizes = [8, 8, 32], strides = [1, 1, 1]} : vector<8x8x96xf32> to vector<8x8x32xf32>
    %228 = vector.extract_strided_slice %225 {offsets = [0, 0, 0], sizes = [8, 8, 16], strides = [1, 1, 1]} : vector<8x8x32xf32> to vector<8x8x16xf32>
    %229 = vector.extract_strided_slice %226 {offsets = [0, 0, 0], sizes = [8, 8, 16], strides = [1, 1, 1]} : vector<8x8x32xf32> to vector<8x8x16xf32>
    %230 = vector.extract_strided_slice %227 {offsets = [0, 0, 0], sizes = [8, 8, 16], strides = [1, 1, 1]} : vector<8x8x32xf32> to vector<8x8x16xf32>
    %cst_104 = arith.constant dense<0.000000e+00> : vector<8x8x8xf32>
    %231 = tpu.matmul %228, %229, %cst_104 {dimension_numbers = #tpu.dot_dimension_numbers<[2], [2], [1], [1], [0, 0, 0, 1, 1, 1], [0], [0]>} : vector<8x8x16xf32>, vector<8x8x16xf32>, vector<8x8x8xf32> -> vector<8x8x8xf32>
    %cst_105 = arith.constant 4.000000e+00 : f32
    %232 = vector.broadcast %cst_105 : f32 to vector<8x8x8xf32>
    %233 = arith.divf %231, %232 : vector<8x8x8xf32>
    %cst_106 = arith.constant dense<0xFF800000> : vector<8x8xf32>
    %234 = vector.multi_reduction <maximumf>, %233, %cst_106 [2] : vector<8x8x8xf32> to vector<8x8xf32>
    %235 = vector.shape_cast %234 : vector<8x8xf32> to vector<8x8x1xf32>
    %236 = vector.broadcast %235 : vector<8x8x1xf32> to vector<8x8x8xf32>
    %237 = arith.subf %233, %236 : vector<8x8x8xf32>
    %238 = math.exp %237 : vector<8x8x8xf32>
    %cst_107 = arith.constant dense<0.000000e+00> : vector<8x8xf32>
    %239 = vector.multi_reduction <add>, %238, %cst_107 [2] : vector<8x8x8xf32> to vector<8x8xf32>
    %240 = vector.shape_cast %239 : vector<8x8xf32> to vector<8x8x1xf32>
    %241 = vector.broadcast %240 : vector<8x8x1xf32> to vector<8x8x8xf32>
    %242 = arith.divf %238, %241 : vector<8x8x8xf32>
    %cst_108 = arith.constant dense<0.000000e+00> : vector<8x8x16xf32>
    %243 = tpu.matmul %242, %230, %cst_108 {dimension_numbers = #tpu.dot_dimension_numbers<[2], [1], [1], [2], [0, 0, 0, 1, 1, 2], [0], [0]>} : vector<8x8x8xf32>, vector<8x8x16xf32>, vector<8x8x16xf32> -> vector<8x8x16xf32>
    %244 = vector.extract_strided_slice %225 {offsets = [0, 0, 16], sizes = [8, 8, 16], strides = [1, 1, 1]} : vector<8x8x32xf32> to vector<8x8x16xf32>
    %245 = vector.extract_strided_slice %226 {offsets = [0, 0, 16], sizes = [8, 8, 16], strides = [1, 1, 1]} : vector<8x8x32xf32> to vector<8x8x16xf32>
    %246 = vector.extract_strided_slice %227 {offsets = [0, 0, 16], sizes = [8, 8, 16], strides = [1, 1, 1]} : vector<8x8x32xf32> to vector<8x8x16xf32>
    %cst_109 = arith.constant dense<0.000000e+00> : vector<8x8x8xf32>
    %247 = tpu.matmul %244, %245, %cst_109 {dimension_numbers = #tpu.dot_dimension_numbers<[2], [2], [1], [1], [0, 0, 0, 1, 1, 1], [0], [0]>} : vector<8x8x16xf32>, vector<8x8x16xf32>, vector<8x8x8xf32> -> vector<8x8x8xf32>
    %cst_110 = arith.constant 4.000000e+00 : f32
    %248 = vector.broadcast %cst_110 : f32 to vector<8x8x8xf32>
    %249 = arith.divf %247, %248 : vector<8x8x8xf32>
    %cst_111 = arith.constant dense<0xFF800000> : vector<8x8xf32>
    %250 = vector.multi_reduction <maximumf>, %249, %cst_111 [2] : vector<8x8x8xf32> to vector<8x8xf32>
    %251 = vector.shape_cast %250 : vector<8x8xf32> to vector<8x8x1xf32>
    %252 = vector.broadcast %251 : vector<8x8x1xf32> to vector<8x8x8xf32>
    %253 = arith.subf %249, %252 : vector<8x8x8xf32>
    %254 = math.exp %253 : vector<8x8x8xf32>
    %cst_112 = arith.constant dense<0.000000e+00> : vector<8x8xf32>
    %255 = vector.multi_reduction <add>, %254, %cst_112 [2] : vector<8x8x8xf32> to vector<8x8xf32>
    %256 = vector.shape_cast %255 : vector<8x8xf32> to vector<8x8x1xf32>
    %257 = vector.broadcast %256 : vector<8x8x1xf32> to vector<8x8x8xf32>
    %258 = arith.divf %254, %257 : vector<8x8x8xf32>
    %cst_113 = arith.constant dense<0.000000e+00> : vector<8x8x16xf32>
    %259 = tpu.matmul %258, %246, %cst_113 {dimension_numbers = #tpu.dot_dimension_numbers<[2], [1], [1], [2], [0, 0, 0, 1, 1, 2], [0], [0]>} : vector<8x8x8xf32>, vector<8x8x16xf32>, vector<8x8x16xf32> -> vector<8x8x16xf32>
    %260 = tpu.concatenate %243, %259 in 2 : vector<8x8x16xf32>, vector<8x8x16xf32> -> vector<8x8x32xf32>
    %261 = tpu.transpose %260, [1, 0, 2] : vector<8x8x32xf32> -> vector<8x8x32xf32>
    %262 = arith.addf %196, %261 : vector<8x8x32xf32>
    %cst_114 = arith.constant dense<0.000000e+00> : vector<8x8xf32>
    %263 = vector.multi_reduction <add>, %262, %cst_114 [2] : vector<8x8x32xf32> to vector<8x8xf32>
    %264 = vector.shape_cast %263 : vector<8x8xf32> to vector<8x8x1xf32>
    %cst_115 = arith.constant 3.200000e+01 : f32
    %265 = vector.broadcast %cst_115 : f32 to vector<8x8x1xf32>
    %266 = arith.divf %264, %265 : vector<8x8x1xf32>
    %267 = vector.broadcast %266 : vector<8x8x1xf32> to vector<8x8x32xf32>
    %268 = arith.subf %262, %267 : vector<8x8x32xf32>
    %269 = arith.mulf %268, %268 : vector<8x8x32xf32>
    %cst_116 = arith.constant dense<0.000000e+00> : vector<8x8xf32>
    %270 = vector.multi_reduction <add>, %269, %cst_116 [2] : vector<8x8x32xf32> to vector<8x8xf32>
    %271 = vector.shape_cast %270 : vector<8x8xf32> to vector<8x8x1xf32>
    %cst_117 = arith.constant 3.200000e+01 : f32
    %272 = vector.broadcast %cst_117 : f32 to vector<8x8x1xf32>
    %273 = arith.divf %271, %272 : vector<8x8x1xf32>
    %274 = vector.broadcast %266 : vector<8x8x1xf32> to vector<8x8x32xf32>
    %275 = arith.subf %262, %274 : vector<8x8x32xf32>
    %cst_118 = arith.constant 9.99999974E-6 : f32
    %276 = vector.broadcast %cst_118 : f32 to vector<8x8x1xf32>
    %277 = arith.addf %273, %276 : vector<8x8x1xf32>
    %278 = math.rsqrt %277 : vector<8x8x1xf32>
    %279 = vector.broadcast %278 : vector<8x8x1xf32> to vector<8x8x32xf32>
    %280 = arith.mulf %275, %279 : vector<8x8x32xf32>
    %281 = vector.shape_cast %17 : vector<1x32xf32> to vector<1x1x32xf32>
    %282 = vector.broadcast %281 : vector<1x1x32xf32> to vector<8x8x32xf32>
    %283 = arith.mulf %280, %282 : vector<8x8x32xf32>
    %284 = vector.shape_cast %18 : vector<1x32xf32> to vector<1x1x32xf32>
    %285 = vector.broadcast %284 : vector<1x1x32xf32> to vector<8x8x32xf32>
    %286 = arith.addf %283, %285 : vector<8x8x32xf32>
    %287 = vector.shape_cast %286 : vector<8x8x32xf32> to vector<64x32xf32>
    %cst_119 = arith.constant dense<0.000000e+00> : vector<64x32xf32>
    %288 = tpu.matmul %287, %19, %cst_119 {dimension_numbers = #tpu.dot_dimension_numbers<[1], [0], [0], [1], [0, 0, 1, 1], [], []>} : vector<64x32xf32>, vector<32x32xf32>, vector<64x32xf32> -> vector<64x32xf32>
    %289 = vector.broadcast %20 : vector<1x32xf32> to vector<64x32xf32>
    %290 = arith.addf %288, %289 : vector<64x32xf32>
    %cst_120 = arith.constant 0.000000e+00 : f32
    %291 = vector.broadcast %cst_120 : f32 to vector<64x32xf32>
    %292 = arith.maximumf %290, %291 : vector<64x32xf32>
    %cst_121 = arith.constant dense<0.000000e+00> : vector<64x32xf32>
    %293 = tpu.matmul %292, %21, %cst_121 {dimension_numbers = #tpu.dot_dimension_numbers<[1], [0], [0], [1], [0, 0, 1, 1], [], []>} : vector<64x32xf32>, vector<32x32xf32>, vector<64x32xf32> -> vector<64x32xf32>
    %294 = vector.broadcast %22 : vector<1x32xf32> to vector<64x32xf32>
    %295 = arith.addf %293, %294 : vector<64x32xf32>
    %296 = vector.shape_cast %295 : vector<64x32xf32> to vector<8x8x32xf32>
    %297 = arith.addf %262, %296 : vector<8x8x32xf32>
    %298 = vector.shape_cast %297 : vector<8x8x32xf32> to vector<64x32xf32>
    %cst_122 = arith.constant dense<0.000000e+00> : vector<64x32xf32>
    %299 = tpu.matmul %298, %23, %cst_122 {dimension_numbers = #tpu.dot_dimension_numbers<[1], [0], [0], [1], [0, 0, 1, 1], [], []>} : vector<64x32xf32>, vector<32x32xf32>, vector<64x32xf32> -> vector<64x32xf32>
    %300 = vector.shape_cast %299 : vector<64x32xf32> to vector<8x8x32xf32>
    %301 = vector.extract_strided_slice %300 {offsets = [0, 7, 0], sizes = [8, 1, 32], strides = [1, 1, 1]} : vector<8x8x32xf32> to vector<8x1x32xf32>
    %cst_123 = arith.constant dense<0.000000e+00> : vector<8x1x8xf32>
    %302 = tpu.matmul %301, %300, %cst_123 {dimension_numbers = #tpu.dot_dimension_numbers<[2], [2], [1], [1], [0, 0, 0, 1, 1, 1], [0], [0]>} : vector<8x1x32xf32>, vector<8x8x32xf32>, vector<8x1x8xf32> -> vector<8x1x8xf32>
    %cst_124 = arith.constant dense<0xFF800000> : vector<8x1xf32>
    %303 = vector.multi_reduction <maximumf>, %302, %cst_124 [2] : vector<8x1x8xf32> to vector<8x1xf32>
    %304 = vector.shape_cast %303 : vector<8x1xf32> to vector<8x1x1xf32>
    %305 = vector.broadcast %304 : vector<8x1x1xf32> to vector<8x1x8xf32>
    %306 = arith.subf %302, %305 : vector<8x1x8xf32>
    %307 = math.exp %306 : vector<8x1x8xf32>
    %cst_125 = arith.constant dense<0.000000e+00> : vector<8x1xf32>
    %308 = vector.multi_reduction <add>, %307, %cst_125 [2] : vector<8x1x8xf32> to vector<8x1xf32>
    %309 = vector.shape_cast %308 : vector<8x1xf32> to vector<8x1x1xf32>
    %310 = vector.broadcast %309 : vector<8x1x1xf32> to vector<8x1x8xf32>
    %311 = arith.divf %307, %310 : vector<8x1x8xf32>
    %cst_126 = arith.constant dense<0.000000e+00> : vector<8x1x32xf32>
    %312 = tpu.matmul %311, %297, %cst_126 {dimension_numbers = #tpu.dot_dimension_numbers<[2], [1], [1], [2], [0, 0, 0, 1, 1, 2], [0], [0]>} : vector<8x1x8xf32>, vector<8x8x32xf32>, vector<8x1x32xf32> -> vector<8x1x32xf32>
    %313 = vector.shape_cast %312 : vector<8x1x32xf32> to vector<8x32xf32>
    %cst_127 = arith.constant dense<0.000000e+00> : vector<8x1xf32>
    %314 = tpu.matmul %313, %24, %cst_127 {dimension_numbers = #tpu.dot_dimension_numbers<[1], [0], [0], [1], [0, 0, 1, 1], [], []>} : vector<8x32xf32>, vector<32x1xf32>, vector<8x1xf32> -> vector<8x1xf32>
    %315 = vector.broadcast %25 : vector<1x1xf32> to vector<8x1xf32>
    %316 = arith.addf %314, %315 : vector<8x1xf32>
    %c0_128 = arith.constant 0 : index
    %c0_129 = arith.constant 0 : index
    %317 = vector.load %arg28[%c0_128, %c0_129] : memref<8x1xf32, #tpu.memory_space<vmem>>, vector<8x1xf32>
    tpu.vector_store %arg28[%c0_128, %c0_129], %316 {strides = array<i32>} : memref<8x1xf32, #tpu.memory_space<vmem>>, vector<8x1xf32>,
    return
  }
}

</mosaic_0001>

<bundles_post_ra>
// kernel: tpu_custom_call.1
= control target key start
LH: loop header
LB: loop body
LE: loop exit
PB: predicated region body
PF: predicated region fallthrough
CT: control target
= control target key end

     0   :  { %s10267_s0 = inlined_call_operand.hbm [shape: f32[8,8,8], index: 0, kind: input, shape index: {}]   ;;  %s10268_s1 = inlined_call_operand.hbm [shape: f32[8,8,8], index: 1, kind: input, shape index: {}]   ;;  %s10269_s2 = inlined_call_operand.vmem [shape: f32[8,8], index: 2, kind: input, shape index: {}]   ;;  %s10270_s3 = inlined_call_operand.vmem [shape: f32[1,8], index: 3, kind: input, shape index: {}]   ;;  %s10271_s4 = inlined_call_operand.hbm [shape: f32[8,32], index: 4, kind: input, shape index: {}]   ;;  %s10272_s5 = inlined_call_operand.vmem [shape: f32[1,32], index: 5, kind: input, shape index: {}]   ;;  %s10273_s6 = inlined_call_operand.hbm [shape: f32[1,8,32], index: 6, kind: input, shape index: {}]   ;;  %s10274_s7 = inlined_call_operand.vmem [shape: f32[1,32], index: 7, kind: input, shape index: {}]   ;;  %s10275_s8 = inlined_call_operand.hbm [shape: f32[1,32], index: 8, kind: input, shape index: {}]   ;;  %s10276_s9 = inlined_call_operand.vmem [shape: f32[32,96], index: 9, kind: input, shape index: {}]   ;;  %s10277_s10 = inlined_call_operand.hbm [shape: f32[1,32], index: 10, kind: input, shape index: {}]   ;;  %s10278_s11 = inlined_call_operand.vmem [shape: f32[1,32], index: 11, kind: input, shape index: {}]   ;;  %s10279_s12 = inlined_call_operand.hbm [shape: f32[32,32], index: 12, kind: input, shape index: {}]   ;;  %s10280_s13 = inlined_call_operand.vmem [shape: f32[1,32], index: 13, kind: input, shape index: {}]   ;;  %s10281_s14 = inlined_call_operand.hbm [shape: f32[32,32], index: 14, kind: input, shape index: {}]   ;;  %s10282_s15 = inlined_call_operand.vmem [shape: f32[1,32], index: 15, kind: input, shape index: {}]   ;;  %s10283_s16 = inlined_call_operand.vmem [shape: f32[1,32], index: 16, kind: input, shape index: {}]   ;;  %s10284_s17 = inlined_call_operand.vmem [shape: f32[1,32], index: 17, kind: input, shape index: {}]   ;;  %s10285_s18 = inlined_call_operand.hbm [shape: f32[32,96], index: 18, kind: input, shape index: {}]   ;;  %s10286_s19 = inlined_call_operand.vmem [shape: f32[1,32], index: 19, kind: input, shape index: {}]   ;;  %s10287_s20 = inlined_call_operand.vmem [shape: f32[1,32], index: 20, kind: input, shape index: {}]   ;;  %s10288_s21 = inlined_call_operand.hbm [shape: f32[32,32], index: 21, kind: input, shape index: {}]   ;;  %s10289_s22 = inlined_call_operand.vmem [shape: f32[1,32], index: 22, kind: input, shape index: {}]   ;;  %s10290_s23 = inlined_call_operand.hbm [shape: f32[32,32], index: 23, kind: input, shape index: {}]   ;;  %s10291_s24 = inlined_call_operand.vmem [shape: f32[1,32], index: 24, kind: input, shape index: {}]   ;;  %s10292_s25 = inlined_call_operand.hbm [shape: f32[32,32], index: 25, kind: input, shape index: {}]   ;;  %s10293_s26 = inlined_call_operand.vmem [shape: f32[32,1], index: 26, kind: input, shape index: {}]   ;;  %s10294_s27 = inlined_call_operand.<no memory space> [shape: f32[1,1], index: 27, kind: input, shape index: {}]   ;;  %s10295_s28 = inlined_call_operand.vmem [shape: f32[8,1], index: 28, kind: output, shape index: {}]  }
   0x1   :  { %10305 = sst [smem:[#allocation33_spill]] %s10267_s0  ;;  %v33_v0 = vstv %s10294_s27 }
   0x2   :  { %10306 = sst [smem:[#allocation34_spill]] %s10268_s1  ;;  %34 = vst [vmem:[#allocation2] sm:$0x1] %v33_v0 }
   0x3   :  { %10307 = sst [smem:[#allocation35_spill]] %s10269_s2 }
   0x4   :  { %10308 = sst [smem:[#allocation36_spill]] %s10270_s3 }
   0x5   :  { %10309 = sst [smem:[#allocation37_spill]] %s10271_s4 }
   0x6   :  { %10310 = sst [smem:[#allocation38_spill]] %s10272_s5 }
   0x7   :  { %10311 = sst [smem:[#allocation39_spill]] %s10273_s6 }
   0x8   :  { %10312 = sst [smem:[#allocation40_spill]] %s10274_s7 }
   0x9   :  { %10313 = sst [smem:[#allocation41_spill]] %s10275_s8 }
   0xa   :  { %10314 = sst [smem:[#allocation42_spill]] %s10276_s9 }
   0xb   :  { %10315 = sst [smem:[#allocation43_spill]] %s10277_s10 }
   0xc   :  { %10316 = sst [smem:[#allocation44_spill]] %s10278_s11 }
   0xd   :  { %10317 = sst [smem:[#allocation45_spill]] %s10279_s12 }
   0xe   :  { %35 = vsyncpa [#allocation4], 0 }
   0xf   :  { %36 = vsyncpa [#allocation6], 0 }
  0x10   :  { %37 = vsyncpa [#allocation9], 0 }
  0x11   :  { %38 = vsyncpa [#allocation12], 0 }
  0x12   :  { %39 = vsyncpa [#allocation15], 0 }
  0x13   :  { %40 = vsyncpa [#allocation18], 0 }
  0x14   :  { %41 = vsyncpa [#allocation21], 0  ;;  %s10318_s3 = sld [smem:[#allocation34_spill]]  ;;  %s7903_s10 = smov [#allocation5]  }
  0x15   :  { %s61_s0 = sshll.u32 %s7903_s10, 4  ;;  %s10319_s2 = sld [smem:[#allocation39_spill]]  ;;  %s62_s0 = int_to_ptr.vmem [resolvable:$true] %s61_s0 }
  0x16   :  { %s10297_s7 = smov 128   ;;  %s10299_s12 = smov 8  }
  0x17   :  { %s7906_s1 = smov [#allocation8]   ;;  %s10320_s9 = sld [smem:[#allocation43_spill]] }
  0x18   :  { %s92_s4 = sshll.u32 %s7906_s1, 4  ;;  %s143_s11 = sshll.u32 %s10281_s14, 4  ;;  %s93_s4 = int_to_ptr.vmem [resolvable:$true] %s92_s4  ;;  %s144_s11 = int_to_ptr.hbm [resolvable:$true] %s143_s11 }
  0x19   :  { %s7907_s29 = smov [#allocation11]   ;;  %s10321_s8 = smov 8  }
  0x1a   :  { %s59_s6 = sshll.u32 %s10318_s3, 4  ;;  %s10322_s5 = smov 128   ;;  %s60_s6 = int_to_ptr.hbm [resolvable:$true] %s59_s6 }
  0x1b   :  { %s90_s27 = sshll.u32 %s10319_s2, 4  ;;  %s118_s2 = sshll.u32 %s7907_s29, 4  ;;  %s91_s27 = int_to_ptr.hbm [resolvable:$true] %s90_s27  ;;  %s119_s2 = int_to_ptr.vmem [resolvable:$true] %s118_s2 }
  0x1c   :  { %67 = dma.hbm_to_vmem [thread:$0]  %s60_s6, 1024, %s62_s0, [#allocation6], %s10297_s7, %s10297_s7, %s10299_s12  }
  0x1d   :  { %s116_s30 = sshll.u32 %s10320_s9, 4  ;;  %s7908_s6 = smov [#allocation14]   ;;  %s117_s30 = int_to_ptr.hbm [resolvable:$true] %s116_s30 }
  0x1e   :  { %95 = dma.hbm_to_vmem [thread:$0]  %s91_s27, 128, %s93_s4, [#allocation9]  }
  0x1f   :  { %121 = dma.hbm_to_vmem [thread:$0]  %s117_s30, 16, %s119_s2, [#allocation12]  }
  0x20   :  { %s145_s0 = sshll.u32 %s7908_s6, 4  ;;  %s179_s12 = sshll.u32 %s10288_s21, 4  ;;  %s146_s0 = int_to_ptr.vmem [resolvable:$true] %s145_s0  ;;  %s180_s12 = int_to_ptr.hbm [resolvable:$true] %s179_s12 }
  0x21   :  { %151 = dma.hbm_to_vmem [thread:$0]  %s144_s11, 512, %s146_s0, [#allocation15], %s10322_s5, %s10322_s5, %s10321_s8  }
  0x22   :  { %s10323_s14 = sld [smem:[#allocation33_spill]]  ;;  %s7909_s3 = smov [#allocation17]  }
  0x23   :  { %s181_s10 = sshll.u32 %s7909_s3, 4  ;;  %s7910_s7 = smov [#allocation3]   ;;  %s182_s10 = int_to_ptr.vmem [resolvable:$true] %s181_s10 }
  0x24   :  { %187 = dma.hbm_to_vmem [thread:$0]  %s180_s12, 512, %s182_s10, [#allocation18], %s10322_s5, %s10322_s5, %s10321_s8  }
  0x25   :  { %s48_s21 = sshll.u32 %s7910_s7, 4  ;;  %s10324_s2 = sld [smem:[#allocation37_spill]]  ;;  %s49_s21 = int_to_ptr.vmem [resolvable:$true] %s48_s21 }
  0x26   :  { %s10325_s1 = sld [smem:[#allocation41_spill]]  ;;  %s7911_s4 = smov [#allocation7]  }
  0x27   :  { %s7912_s12 = smov [#allocation10]   ;;  %s10326_s30 = sld [smem:[#allocation45_spill]] }
  0x28   :  { %s46_s9 = sshll.u32 %s10323_s14, 4  ;;  %s79_s14 = sshll.u32 %s7911_s4, 4  ;;  %s47_s9 = int_to_ptr.hbm [resolvable:$true] %s46_s9  ;;  %s80_s14 = int_to_ptr.vmem [resolvable:$true] %s79_s14 }
  0x29   :  { %54 = dma.hbm_to_vmem [thread:$0]  %s47_s9, 1024, %s49_s21, [#allocation4], %s10322_s5, %s10322_s5, %s10321_s8  }
  0x2a   :  { %s105_s3 = sshll.u32 %s7912_s12, 4  ;;  %s162_s21 = sshll.u32 %s10285_s18, 4  ;;  %s106_s3 = int_to_ptr.vmem [resolvable:$true] %s105_s3  ;;  %s163_s21 = int_to_ptr.hbm [resolvable:$true] %s162_s21 }
  0x2b   :  { %s77_s6 = sshll.u32 %s10324_s2, 4  ;;  %s7913_s11 = smov [#allocation13]   ;;  %s78_s6 = int_to_ptr.hbm [resolvable:$true] %s77_s6 }
  0x2c   :  { %s103_s27 = sshll.u32 %s10325_s1, 4  ;;  %s130_s0 = sshll.u32 %s7913_s11, 4  ;;  %s104_s27 = int_to_ptr.hbm [resolvable:$true] %s103_s27  ;;  %s131_s0 = int_to_ptr.vmem [resolvable:$true] %s130_s0 }
  0x2d   :  { %82 = dma.hbm_to_vmem [thread:$0]  %s78_s6, 128, %s80_s14, [#allocation6]  }
  0x2e   :  { %s128_s29 = sshll.u32 %s10326_s30, 4  ;;  %s7914_s6 = smov [#allocation16]   ;;  %s129_s29 = int_to_ptr.hbm [resolvable:$true] %s128_s29 }
  0x2f   :  { %108 = dma.hbm_to_vmem [thread:$0]  %s104_s27, 16, %s106_s3, [#allocation9]  }
  0x30   :  { %136 = dma.hbm_to_vmem [thread:$0]  %s129_s29, 512, %s131_s0, [#allocation12], %s10322_s5, %s10322_s5, %s10321_s8  }
  0x31   :  { %s164_s1 = sshll.u32 %s7914_s6, 4  ;;  %s194_s12 = sshll.u32 %s10290_s23, 4  ;;  %s165_s1 = int_to_ptr.vmem [resolvable:$true] %s164_s1  ;;  %s195_s12 = int_to_ptr.hbm [resolvable:$true] %s194_s12 }
  0x32   :  { %170 = dma.hbm_to_vmem [thread:$0]  %s163_s21, 512, %s165_s1, [#allocation15], %s10322_s5, %s10322_s5, %s10321_s8  }
  0x33   :  { %s209_s3 = sshll.u32 %s10292_s25, 4  ;;  %s7915_s10 = smov [#allocation19]   ;;  %s210_s3 = int_to_ptr.hbm [resolvable:$true] %s209_s3 }
  0x34   :  { %s196_s7 = sshll.u32 %s7915_s10, 4  ;;  %s7916_s30 = smov [#allocation20]   ;;  %s197_s7 = int_to_ptr.vmem [resolvable:$true] %s196_s7 }
  0x35   :  { %202 = dma.hbm_to_vmem [thread:$0]  %s195_s12, 512, %s197_s7, [#allocation18], %s10322_s5, %s10322_s5, %s10321_s8  }
  0x36   :  { %s211_s23 = sshll.u32 %s7916_s30, 4  ;;  %s212_s23 = int_to_ptr.vmem [resolvable:$true] %s211_s23 }
  0x37   :  { %217 = dma.hbm_to_vmem [thread:$0]  %s210_s3, 512, %s212_s23, [#allocation21], %s10322_s5, %s10322_s5, %s10321_s8  }
  0x38   :  { %7889 = dma.done.wait [#allocation4], 1024  }
  0x39   :  { %7890 = vsyncadd [#allocation4], 4294966272 }
  0x3a   :  { %7891 = dma.done.wait [#allocation6], 1152  }
  0x3b   :  { %7892 = vsyncadd [#allocation6], 4294966144 }
  0x3c   :  { %7893 = dma.done.wait [#allocation9], 144  }
  0x3d   :  { %7894 = vsyncadd [#allocation9], 4294967152 }
  0x3e   :  { %7895 = dma.done.wait [#allocation12], 528  }
  0x3f   :  { %7896 = vsyncadd [#allocation12], 4294966768 }
  0x40   :  { %7897 = dma.done.wait [#allocation15], 1024  }
  0x41   :  { %7898 = vsyncadd [#allocation15], 4294966272 }
  0x42   :  { %7899 = dma.done.wait [#allocation18], 1024  }
  0x43   :  { %7900 = vsyncadd [#allocation18], 4294966272 }
  0x44   :  { %7901 = dma.done.wait [#allocation21], 512  }
  0x45   :  { %7902 = vsyncadd [#allocation21], 4294966784  ;;  %vm339_vm0 = vcmask 64512   ;;  %s10327_s2 = sld [smem:[#allocation35_spill]]  ;;  %v328_v2 = vld [vmem:[#allocation5] sm:$0xff]  ;;  %v329_v3 = vld [vmem:[#allocation5 + $0x8] sm:$0xff] }
  0x46   :  { %v330_v4 = vld [vmem:[#allocation5 + $0x10] sm:$0xff]  ;;  %v331_v5 = vld [vmem:[#allocation5 + $0x18] sm:$0xff]  ;;  %v332_v6 = vld [vmem:[#allocation5 + $0x20] sm:$0xff]  ;;  %s10328_s21 = sld [smem:[#allocation36_spill]]  ;;  %s7918_s29 = smov 96  }
  0x47   :  { %v333_v7 = vld [vmem:[#allocation5 + $0x28] sm:$0xff]  ;;  %v334_v8 = vld [vmem:[#allocation5 + $0x30] sm:$0xff]  ;;  %v335_v9 = vld [vmem:[#allocation5 + $0x38] sm:$0xff]  ;;  %s10329_s6 = sld [smem:[#allocation38_spill]]  ;;  %s7920_s5 = smov 88  }
  0x48   :  { %s10333_s14 = sld [smem:[#allocation42_spill]]  ;;  %s7921_s9 = smov 120  }
  0x49   :  { %s10334_s25 = sld [smem:[#allocation40_spill]]  ;;  %s7925_s11 = smov 112  }
  0x4a   :  { %s7926_s0 = smov 80   ;;  %s7928_s1 = smov 72  }
  0x4b   :  { %v270_v1 = vld [vmem:[%s10327_s2] sm:$0xff]  ;;  %s7919_s2 = smov 64   ;;  %s7929_s4 = smov 104  }
  0x4c   :  { %379 = vmatpush.msra.mxu0 %v270_v1  ;;  %v7260_v10 = vld [vmem:[%s10328_s21] ss:$0 sm:$0xff]  ;;  %s7924_s21 = smov 56   ;;  %s7931_s12 = smov 16  }
  0x4d   :  { %6871 = vmatmul.msk.f32.vlgmr.msra.gmra.mxu0 %vm339_vm0, %v328_v2  ;;  %s7932_s18 = smov 24   ;;  %s10346_s3 = sld [smem:[#allocation44_spill]] }
  0x55   :  { %6872 = vmatmul.msk.f32.gmra.mxu0 %vm339_vm0, %v329_v3 }
  0x5d   :  { %6873 = vmatmul.msk.f32.gmra.mxu0 %vm339_vm0, %v330_v4 }
  0x65   :  { %6874 = vmatmul.msk.f32.gmra.mxu0 %vm339_vm0, %v331_v5 }
  0x6d   :  { %6875 = vmatmul.msk.f32.gmra.mxu0 %vm339_vm0, %v332_v6 }
  0x75   :  { %6876 = vmatmul.msk.f32.gmra.mxu0 %vm339_vm0, %v333_v7 }
  0x7d   :  { %6877 = vmatmul.msk.f32.gmra.mxu0 %vm339_vm0, %v334_v8 }
  0x85   :  { %6878 = vmatmul.msk.f32.gmra.mxu0 %vm339_vm0, %v335_v9 }
  0xca   :  { %v381_v11 = vpop.f32.mrf.mxu0 }
  0xcb   :  { %v382_v12 = vadd.f32 %v7260_v10, %v381_v11  ;;  %v272_v11 = vld [vmem:[#allocation7] sm:$0xff] }
  0xcc   :  { %655 = vmatpush.msra.mxu1 %v272_v11 }
  0xcd   :  { %v405_v13 = vsel %vm339_vm0, %v382_v12, -inf }
  0xce   :  { %406 = vmax.xlane.f32.xlu0 %v405_v13 }
  0xd2   :  { %v384_v14 = vpop.f32.mrf.mxu0 }
  0xd3   :  { %v385_v15 = vadd.f32 %v7260_v10, %v384_v14 }
  0xd5   :  { %v408_v16 = vsel %vm339_vm0, %v385_v15, -inf }
  0xd6   :  { %409 = vmax.xlane.f32.xlu0 %v408_v16 }
  0xda   :  { %v387_v17 = vpop.f32.mrf.mxu0 }
  0xdb   :  { %v388_v18 = vadd.f32 %v7260_v10, %v387_v17 }
  0xdd   :  { %v411_v19 = vsel %vm339_vm0, %v388_v18, -inf }
  0xde   :  { %412 = vmax.xlane.f32.xlu1 %v411_v19 }
  0xe2   :  { %v390_v20 = vpop.f32.mrf.mxu0 }
  0xe3   :  { %v391_v21 = vadd.f32 %v7260_v10, %v390_v20 }
  0xe5   :  { %v414_v22 = vsel %vm339_vm0, %v391_v21, -inf }
  0xe6   :  { %415 = vmax.xlane.f32.xlu1 %v414_v22 }
  0xea   :  { %v393_v23 = vpop.f32.mrf.mxu0 }
  0xeb   :  { %v394_v24 = vadd.f32 %v7260_v10, %v393_v23 }
  0xed   :  { %v417_v25 = vsel %vm339_vm0, %v394_v24, -inf }
  0xee   :  { %418 = vmax.xlane.f32.xlu2 %v417_v25 }
  0xf2   :  { %v396_v26 = vpop.f32.mrf.mxu0 }
  0xf3   :  { %v397_v27 = vadd.f32 %v7260_v10, %v396_v26 }
  0xf5   :  { %v420_v28 = vsel %vm339_vm0, %v397_v27, -inf }
  0xf6   :  { %421 = vmax.xlane.f32.xlu2 %v420_v28 }
  0xfa   :  { %v399_v29 = vpop.f32.mrf.mxu0 }
  0xfb   :  { %v400_v30 = vadd.f32 %v7260_v10, %v399_v29 }
  0xfd   :  { %v423_v31 = vsel %vm339_vm0, %v400_v30, -inf }
  0xfe   :  { %424 = vmax.xlane.f32.xlu0 %v423_v31 }
 0x102   :  { %v402_v32 = vpop.f32.mrf.mxu0 }
 0x103   :  { %v403_v33 = vadd.f32 %v7260_v10, %v402_v32 }
 0x105   :  { %v426_v34 = vsel %vm339_vm0, %v403_v33, -inf }
 0x106   :  { %427 = vmax.xlane.f32.xlu2 %v426_v34 }
 0x141   :  { %v407_v35 = vpop.xlane.xlu0 %406 }
 0x142   :  { %v429_v36 = vsub.f32 %v382_v12, %v407_v35 }
 0x144   :  { %v437_v37 = vmul.f32 1.442695, %v429_v36 }
 0x146   :  { %7275 = vpow2.f32 %v437_v37 }
 0x149   :  { %v410_v38 = vpop.xlane.xlu0 %409 }
 0x14a   :  { %v430_v39 = vsub.f32 %v385_v15, %v410_v38 }
 0x14c   :  { %v8166_v40 = vpop.eup %7275  ;;  %v439_v41 = vmul.f32 1.442695, %v430_v39 }
 0x14d   :  { %v453_v42 = vsel %vm339_vm0, %v8166_v40, 0.0 }
 0x14e   :  { %7277 = vpow2.f32 %v439_v41  ;;  %454 = vadd.xlane.f32.xlu1 %v453_v42 }
 0x151   :  { %v413_v43 = vpop.xlane.xlu1 %412 }
 0x152   :  { %v431_v44 = vsub.f32 %v388_v18, %v413_v43 }
 0x154   :  { %v8170_v45 = vpop.eup %7277  ;;  %v441_v46 = vmul.f32 1.442695, %v431_v44 }
 0x155   :  { %v456_v47 = vsel %vm339_vm0, %v8170_v45, 0.0 }
 0x156   :  { %7279 = vpow2.f32 %v441_v46  ;;  %457 = vadd.xlane.f32.xlu0 %v456_v47  ;;  %v321_v46 = vld [vmem:[#allocation3 + $0x8] sm:$0xff] }
 0x159   :  { %v416_v48 = vpop.xlane.xlu1 %415 }
 0x15a   :  { %v432_v49 = vsub.f32 %v391_v21, %v416_v48 }
 0x15c   :  { %v8174_v50 = vpop.eup %7279  ;;  %v443_v51 = vmul.f32 1.442695, %v432_v49 }
 0x15d   :  { %v459_v52 = vsel %vm339_vm0, %v8174_v50, 0.0 }
 0x15e   :  { %7281 = vpow2.f32 %v443_v51  ;;  %460 = vadd.xlane.f32.xlu1 %v459_v52 }
 0x161   :  { %v419_v53 = vpop.xlane.xlu2 %418 }
 0x162   :  { %v433_v54 = vsub.f32 %v394_v24, %v419_v53 }
 0x164   :  { %v8178_v55 = vpop.eup %7281  ;;  %v445_v56 = vmul.f32 1.442695, %v433_v54 }
 0x165   :  { %v462_v57 = vsel %vm339_vm0, %v8178_v55, 0.0 }
 0x166   :  { %7283 = vpow2.f32 %v445_v56  ;;  %463 = vadd.xlane.f32.xlu2 %v462_v57 }
 0x169   :  { %v422_v58 = vpop.xlane.xlu2 %421 }
 0x16a   :  { %v434_v59 = vsub.f32 %v397_v27, %v422_v58 }
 0x16c   :  { %v8182_v60 = vpop.eup %7283  ;;  %v447_v61 = vmul.f32 1.442695, %v434_v59 }
 0x16d   :  { %v465_v62 = vsel %vm339_vm0, %v8182_v60, 0.0 }
 0x16e   :  { %7285 = vpow2.f32 %v447_v61  ;;  %466 = vadd.xlane.f32.xlu0 %v465_v62 }
 0x171   :  { %v425_v63 = vpop.xlane.xlu0 %424 }
 0x172   :  { %v435_v0 = vsub.f32 %v400_v30, %v425_v63  ;;  %v320_v30 = vld [vmem:[#allocation3] sm:$0xff]  ;;  %v322_v63 = vld [vmem:[#allocation3 + $0x10] sm:$0xff] }
 0x174   :  { %v8186_v1 = vpop.eup %7285  ;;  %v449_v2 = vmul.f32 1.442695, %v435_v0 }
 0x175   :  { %v468_v3 = vsel %vm339_vm0, %v8186_v1, 0.0 }
 0x176   :  { %7287 = vpow2.f32 %v449_v2  ;;  %469 = vadd.xlane.f32.xlu1 %v468_v3 }
 0x179   :  { %v428_v4 = vpop.xlane.xlu2 %427 }
 0x17a   :  { %v436_v5 = vsub.f32 %v403_v33, %v428_v4 }
 0x17c   :  { %v8190_v6 = vpop.eup %7287  ;;  %v451_v7 = vmul.f32 1.442695, %v436_v5 }
 0x17d   :  { %v471_v8 = vsel %vm339_vm0, %v8190_v6, 0.0 }
 0x17e   :  { %7289 = vpow2.f32 %v451_v7  ;;  %472 = vadd.xlane.f32.xlu2 %v471_v8 }
 0x184   :  { %v8194_v9 = vpop.eup %7289 }
 0x185   :  { %v474_v10 = vsel %vm339_vm0, %v8194_v9, 0.0 }
 0x186   :  { %475 = vadd.xlane.f32.xlu0 %v474_v10 }
 0x1c1   :  { %v455_v12 = vpop.xlane.xlu1 %454 }
 0x1c2   :  { %7291 = vrcp.f32 %v455_v12  ;;  %v488_v17 = vand.u32 2147483648, %v455_v12  ;;  %v486_v19 = vand.u32 2147483647, %v455_v12  ;;  %vm482_vm2 = vweird.f32 %v455_v12 }
 0x1c4   :  { %v489_v22 = vor.u32 1.1754944e-38, %v488_v17  ;;  %vm487_vm4 = vcmp.eq.f32.partialorder %v486_v19, 8.507059e+37 }
 0x1c8   :  { %v7292_v13 = vpop.eup %7291 }
 0x1c9   :  { %v478_v14 = vmul.f32 %v7292_v13, %v455_v12  ;;  %v458_v15 = vpop.xlane.xlu0 %457  ;;  %vm483_vm1 = vweird.f32 %v7292_v13 }
 0x1ca   :  { %7293 = vrcp.f32 %v458_v15  ;;  %vm484_vm3 = vmor %vm482_vm2, %vm483_vm1  ;;  %v503_v29 = vand.u32 2147483648, %v458_v15  ;;  %v501_v33 = vand.u32 2147483647, %v458_v15  ;;  %vm497_vm6 = vweird.f32 %v458_v15 }
 0x1cb   :  { %v479_v16 = vsub.f32 1.0, %v478_v14 }
 0x1cc   :  { %v504_v37 = vor.u32 1.1754944e-38, %v503_v29  ;;  %vm502_vm8 = vcmp.eq.f32.partialorder %v501_v33, 8.507059e+37 }
 0x1cd   :  { %v480_v18 = vmul.f32 %v7292_v13, %v479_v16  ;;  %v323_v16 = vld [vmem:[#allocation3 + $0x18] sm:$0xff] }
 0x1cf   :  { %v481_v20 = vadd.f32 %v7292_v13, %v480_v18 }
 0x1d0   :  { %v7294_v21 = vpop.eup %7293 }
 0x1d1   :  { %v493_v23 = vmul.f32 %v7294_v21, %v458_v15  ;;  %v461_v24 = vpop.xlane.xlu1 %460  ;;  %v485_v25 = vsel %vm484_vm3, %v7292_v13, %v481_v20  ;;  %vm498_vm5 = vweird.f32 %v7294_v21 }
 0x1d2   :  { %7295 = vrcp.f32 %v461_v24  ;;  %v490_v26 = vsel %vm487_vm4, %v489_v22, %v485_v25  ;;  %vm499_vm7 = vmor %vm497_vm6, %vm498_vm5  ;;  %v518_v44 = vand.u32 2147483648, %v461_v24  ;;  %v516_v49 = vand.u32 2147483647, %v461_v24 }
 0x1d3   :  { %v494_v27 = vsub.f32 1.0, %v493_v23  ;;  %v491_v28 = vmul.f32 %v8166_v40, %v490_v26  ;;  %vm512_vm10 = vweird.f32 %v461_v24 }
 0x1d4   :  { %v519_v54 = vor.u32 1.1754944e-38, %v518_v44  ;;  %vm517_vm12 = vcmp.eq.f32.partialorder %v516_v49, 8.507059e+37  ;;  %v325_v44 = vld [vmem:[#allocation3 + $0x28] sm:$0xff] }
 0x1d5   :  { %v495_v31 = vmul.f32 %v7294_v21, %v494_v27  ;;  %v597_v32 = vmul.f32 8.0, %v491_v28 }
 0x1d7   :  { %v605_v34 = vmul.f32 %v597_v32, %v320_v30  ;;  %v496_v35 = vadd.f32 %v7294_v21, %v495_v31  ;;  %v324_v30 = vld [vmem:[#allocation3 + $0x20] sm:$0xff] }
 0x1d8   :  { %v7296_v36 = vpop.eup %7295 }
 0x1d9   :  { %v508_v38 = vmul.f32 %v7296_v36, %v461_v24  ;;  %v464_v39 = vpop.xlane.xlu2 %463  ;;  %6879 = vmatmul.msk.f32.vlgmr.msra.gmra.mxu1 %vm339_vm0, %v605_v34  ;;  %v500_v41 = vsel %vm499_vm7, %v7294_v21, %v496_v35  ;;  %vm513_vm9 = vweird.f32 %v7296_v36 }
 0x1da   :  { %7297 = vrcp.f32 %v464_v39  ;;  %v505_v40 = vsel %vm502_vm8, %v504_v37, %v500_v41  ;;  %vm514_vm11 = vmor %vm512_vm10, %vm513_vm9  ;;  %v533_v62 = vand.u32 2147483648, %v464_v39  ;;  %v531_v3 = vand.u32 2147483647, %v464_v39 }
 0x1db   :  { %v509_v42 = vsub.f32 1.0, %v508_v38  ;;  %v506_v43 = vmul.f32 %v8170_v45, %v505_v40  ;;  %vm527_vm14 = vweird.f32 %v464_v39 }
 0x1dc   :  { %v534_v8 = vor.u32 1.1754944e-38, %v533_v62  ;;  %vm532_vm1 = vcmp.eq.f32.partialorder %v531_v3, 8.507059e+37 }
 0x1dd   :  { %v510_v47 = vmul.f32 %v7296_v36, %v509_v42  ;;  %v598_v48 = vmul.f32 8.0, %v506_v43 }
 0x1df   :  { %v606_v51 = vmul.f32 %v598_v48, %v321_v46  ;;  %v511_v52 = vadd.f32 %v7296_v36, %v510_v47 }
 0x1e0   :  { %v7298_v53 = vpop.eup %7297 }
 0x1e1   :  { %v523_v56 = vmul.f32 %v7298_v53, %v464_v39  ;;  %6880 = vmatmul.msk.f32.gmra.mxu1 %vm339_vm0, %v606_v51  ;;  %v467_v57 = vpop.xlane.xlu0 %466  ;;  %v515_v58 = vsel %vm514_vm11, %v7296_v36, %v511_v52  ;;  %vm528_vm13 = vweird.f32 %v7298_v53 }
 0x1e2   :  { %7299 = vrcp.f32 %v467_v57  ;;  %v520_v45 = vsel %vm517_vm12, %v519_v54, %v515_v58  ;;  %vm529_vm15 = vmor %vm527_vm14, %vm528_vm13  ;;  %v548_v15 = vand.u32 2147483648, %v467_v57  ;;  %v546_v19 = vand.u32 2147483647, %v467_v57 }
 0x1e3   :  { %v524_v59 = vsub.f32 1.0, %v523_v56  ;;  %v521_v61 = vmul.f32 %v8174_v50, %v520_v45  ;;  %vm542_vm3 = vweird.f32 %v467_v57 }
 0x1e4   :  { %v549_v23 = vor.u32 1.1754944e-38, %v548_v15  ;;  %vm547_vm5 = vcmp.eq.f32.partialorder %v546_v19, 8.507059e+37 }
 0x1e5   :  { %v525_v0 = vmul.f32 %v7298_v53, %v524_v59  ;;  %v599_v2 = vmul.f32 8.0, %v521_v61  ;;  %v326_v59 = vld [vmem:[#allocation3 + $0x30] sm:$0xff] }
 0x1e7   :  { %v607_v4 = vmul.f32 %v599_v2, %v322_v63  ;;  %v526_v5 = vadd.f32 %v7298_v53, %v525_v0 }
 0x1e8   :  { %v7300_v7 = vpop.eup %7299 }
 0x1e9   :  { %v538_v10 = vmul.f32 %v7300_v7, %v467_v57  ;;  %v470_v11 = vpop.xlane.xlu1 %469  ;;  %6881 = vmatmul.msk.f32.gmra.mxu1 %vm339_vm0, %v607_v4  ;;  %v530_v12 = vsel %vm529_vm15, %v7298_v53, %v526_v5  ;;  %vm543_vm2 = vweird.f32 %v7300_v7 }
 0x1ea   :  { %7301 = vrcp.f32 %v470_v11  ;;  %v535_v50 = vsel %vm532_vm1, %v534_v8, %v530_v12  ;;  %vm544_vm4 = vmor %vm542_vm3, %vm543_vm2  ;;  %v563_v29 = vand.u32 2147483648, %v470_v11  ;;  %v561_v33 = vand.u32 2147483647, %v470_v11  ;;  %v327_v8 = vld [vmem:[#allocation3 + $0x38] sm:$0xff]  ;;  %v274_v12 = vld [vmem:[#allocation8] sm:$0xff] }
 0x1eb   :  { %v539_v13 = vsub.f32 1.0, %v538_v10  ;;  %v536_v14 = vmul.f32 %v8178_v55, %v535_v50  ;;  %vm557_vm7 = vweird.f32 %v470_v11  ;;  %vm689_vm3 = vcmask 261120  }
 0x1ec   :  { %v564_v37 = vor.u32 1.1754944e-38, %v563_v29  ;;  %vm562_vm9 = vcmp.eq.f32.partialorder %v561_v33, 8.507059e+37 }
 0x1ed   :  { %v540_v17 = vmul.f32 %v7300_v7, %v539_v13  ;;  %v600_v18 = vmul.f32 8.0, %v536_v14 }
 0x1ef   :  { %v608_v20 = vmul.f32 %v600_v18, %v323_v16  ;;  %v541_v21 = vadd.f32 %v7300_v7, %v540_v17 }
 0x1f0   :  { %v7302_v22 = vpop.eup %7301 }
 0x1f1   :  { %v553_v24 = vmul.f32 %v7302_v22, %v470_v11  ;;  %v473_v25 = vpop.xlane.xlu2 %472  ;;  %6882 = vmatmul.msk.f32.gmra.mxu1 %vm339_vm0, %v608_v20  ;;  %v545_v26 = vsel %vm544_vm4, %v7300_v7, %v541_v21  ;;  %vm558_vm6 = vweird.f32 %v7302_v22  ;;  %v7261_v11 = vld [vmem:[%s10329_s6] ss:$0 sm:$0xff]  ;;  %s7927_s6 = smov 48  }
 0x1f2   :  { %7303 = vrcp.f32 %v473_v25  ;;  %v550_v55 = vsel %vm547_vm5, %v549_v23, %v545_v26  ;;  %vm559_vm8 = vmor %vm557_vm7, %vm558_vm6  ;;  %v578_v43 = vand.u32 2147483648, %v473_v25  ;;  %v576_v48 = vand.u32 2147483647, %v473_v25 }
 0x1f3   :  { %v554_v27 = vsub.f32 1.0, %v553_v24  ;;  %v551_v28 = vmul.f32 %v8182_v60, %v550_v55  ;;  %vm572_vm11 = vweird.f32 %v473_v25 }
 0x1f4   :  { %v579_v53 = vor.u32 1.1754944e-38, %v578_v43  ;;  %vm577_vm13 = vcmp.eq.f32.partialorder %v576_v48, 8.507059e+37 }
 0x1f5   :  { %v555_v31 = vmul.f32 %v7302_v22, %v554_v27  ;;  %v601_v32 = vmul.f32 8.0, %v551_v28 }
 0x1f7   :  { %v609_v34 = vmul.f32 %v601_v32, %v324_v30  ;;  %v556_v35 = vadd.f32 %v7302_v22, %v555_v31 }
 0x1f8   :  { %v7304_v36 = vpop.eup %7303 }
 0x1f9   :  { %v568_v38 = vmul.f32 %v7304_v36, %v473_v25  ;;  %6883 = vmatmul.msk.f32.gmra.mxu1 %vm339_vm0, %v609_v34  ;;  %v476_v39 = vpop.xlane.xlu0 %475  ;;  %v560_v41 = vsel %vm559_vm8, %v7302_v22, %v556_v35  ;;  %vm573_vm10 = vweird.f32 %v7304_v36 }
 0x1fa   :  { %7305 = vrcp.f32 %v476_v39  ;;  %v565_v60 = vsel %vm562_vm9, %v564_v37, %v560_v41  ;;  %vm574_vm12 = vmor %vm572_vm11, %vm573_vm10  ;;  %v593_v45 = vand.u32 2147483648, %v476_v39  ;;  %v591_v63 = vand.u32 2147483647, %v476_v39 }
 0x1fb   :  { %v569_v40 = vsub.f32 1.0, %v568_v38  ;;  %v566_v42 = vmul.f32 %v8186_v1, %v565_v60  ;;  %vm587_vm15 = vweird.f32 %v476_v39  ;;  %v7917_v60 = vmov 32.0  }
 0x1fc   :  { %v594_v3 = vor.u32 1.1754944e-38, %v593_v45  ;;  %vm592_vm2 = vcmp.eq.f32.partialorder %v591_v63, 8.507059e+37  ;;  %7307 = vrcp.f32 %v7917_v60 }
 0x1fd   :  { %v570_v46 = vmul.f32 %v7304_v36, %v569_v40  ;;  %v602_v47 = vmul.f32 8.0, %v566_v42 }
 0x1ff   :  { %v610_v49 = vmul.f32 %v602_v47, %v325_v44  ;;  %v571_v51 = vadd.f32 %v7304_v36, %v570_v46 }
 0x200   :  { %v7306_v52 = vpop.eup %7305 }
 0x201   :  { %v583_v54 = vmul.f32 %v7306_v52, %v476_v39  ;;  %6884 = vmatmul.msk.f32.gmra.mxu1 %vm339_vm0, %v610_v49  ;;  %v575_v56 = vsel %vm574_vm12, %v7304_v36, %v571_v51  ;;  %vm588_vm14 = vweird.f32 %v7306_v52 }
 0x202   :  { %v580_v57 = vsel %vm577_vm13, %v579_v53, %v575_v56  ;;  %vm589_vm1 = vmor %vm587_vm15, %vm588_vm14  ;;  %v7308_v40 = vpop.eup %7307 }
 0x203   :  { %v584_v58 = vsub.f32 1.0, %v583_v54  ;;  %v581_v1 = vmul.f32 %v8190_v6, %v580_v57  ;;  %v715_v42 = vmul.f32 32.0, %v7308_v40  ;;  %vm719_vm4 = vweird.f32 %v7308_v40 }
 0x205   :  { %v585_v61 = vmul.f32 %v7306_v52, %v584_v58  ;;  %v603_v62 = vmul.f32 8.0, %v581_v1  ;;  %v716_v43 = vsub.f32 1.0, %v715_v42 }
 0x207   :  { %v611_v0 = vmul.f32 %v603_v62, %v326_v59  ;;  %v586_v2 = vadd.f32 %v7306_v52, %v585_v61  ;;  %v717_v44 = vmul.f32 %v7308_v40, %v716_v43 }
 0x209   :  { %6885 = vmatmul.msk.f32.gmra.mxu1 %vm339_vm0, %v611_v0  ;;  %v590_v4 = vsel %vm589_vm1, %v7306_v52, %v586_v2  ;;  %v718_v46 = vadd.f32 %v7308_v40, %v717_v44 }
 0x20a   :  { %v595_v5 = vsel %vm592_vm2, %v594_v3, %v590_v4 }
 0x20b   :  { %v596_v7 = vmul.f32 %v8194_v9, %v595_v5  ;;  %v8247_v47 = vsel %vm719_vm4, %v7308_v40, %v718_v46 }
 0x20c   :  { %10332 = vst [vmem:[#allocation31_spill] sm:$0xff] %v8247_v47 }
 0x20d   :  { %v604_v6 = vmul.f32 8.0, %v596_v7 }
 0x20f   :  { %v612_v10 = vmul.f32 %v604_v6, %v327_v8 }
 0x211   :  { %6886 = vmatmul.msk.f32.gmra.mxu1 %vm339_vm0, %v612_v10 }
 0x256   :  { %v657_v50 = vpop.f32.mrf.mxu1 }
 0x257   :  { %v658_v13 = vadd.f32 %v7261_v11, %v657_v50 }
 0x259   :  { %v8217_v14 = vadd.f32 %v658_v13, %v274_v12 }
 0x25b   :  { %v690_v15 = vsel %vm689_vm3, %v8217_v14, 0.0 }
 0x25c   :  { %691 = vadd.xlane.f32.xlu1 %v690_v15 }
 0x25e   :  { %v660_v9 = vpop.f32.mrf.mxu1 }
 0x25f   :  { %v661_v16 = vadd.f32 %v7261_v11, %v660_v9 }
 0x261   :  { %v8221_v17 = vadd.f32 %v661_v16, %v274_v12 }
 0x263   :  { %v693_v18 = vsel %vm689_vm3, %v8221_v17, 0.0 }
 0x264   :  { %694 = vadd.xlane.f32.xlu2 %v693_v18 }
 0x266   :  { %v663_v19 = vpop.f32.mrf.mxu1 }
 0x267   :  { %v664_v20 = vadd.f32 %v7261_v11, %v663_v19 }
 0x269   :  { %v8225_v21 = vadd.f32 %v664_v20, %v274_v12 }
 0x26b   :  { %v696_v22 = vsel %vm689_vm3, %v8225_v21, 0.0 }
 0x26c   :  { %697 = vadd.xlane.f32.xlu0 %v696_v22 }
 0x26e   :  { %v666_v23 = vpop.f32.mrf.mxu1 }
 0x26f   :  { %v667_v24 = vadd.f32 %v7261_v11, %v666_v23 }
 0x271   :  { %v8229_v25 = vadd.f32 %v667_v24, %v274_v12  ;;  %v280_v24 = vld [vmem:[%s10333_s14 + $0x18] sm:$0xff] }
 0x272   :  { %931 = vmatpush.msra.mxu2 %v280_v24 }
 0x273   :  { %v699_v26 = vsel %vm689_vm3, %v8229_v25, 0.0 }
 0x274   :  { %700 = vadd.xlane.f32.xlu1 %v699_v26  ;;  %v279_v26 = vld [vmem:[%s10333_s14 + $0x10] sm:$0xff] }
 0x275   :  { %932 = vmatpush.msra.mxu2 %v279_v26 }
 0x276   :  { %v669_v55 = vpop.f32.mrf.mxu1 }
 0x277   :  { %v670_v27 = vadd.f32 %v7261_v11, %v669_v55  ;;  %v278_v55 = vld [vmem:[%s10333_s14 + $0x8] sm:$0xff] }
 0x278   :  { %933 = vmatpush.msra.mxu2 %v278_v55 }
 0x279   :  { %v8233_v28 = vadd.f32 %v670_v27, %v274_v12  ;;  %v277_v27 = vld [vmem:[%s10333_s14] sm:$0xff]  ;;  %s7930_s14 = smov 40  }
 0x27a   :  { %934 = vmatpush.msra.mxu2 %v277_v27 }
 0x27b   :  { %v702_v29 = vsel %vm689_vm3, %v8233_v28, 0.0 }
 0x27c   :  { %703 = vadd.xlane.f32.xlu2 %v702_v29 }
 0x27e   :  { %v672_v30 = vpop.f32.mrf.mxu1 }
 0x27f   :  { %v673_v31 = vadd.f32 %v7261_v11, %v672_v30 }
 0x281   :  { %v8237_v32 = vadd.f32 %v673_v31, %v274_v12 }
 0x283   :  { %v705_v33 = vsel %vm689_vm3, %v8237_v32, 0.0 }
 0x284   :  { %706 = vadd.xlane.f32.xlu0 %v705_v33 }
 0x286   :  { %v675_v34 = vpop.f32.mrf.mxu1 }
 0x287   :  { %v676_v35 = vadd.f32 %v7261_v11, %v675_v34 }
 0x289   :  { %v8241_v36 = vadd.f32 %v676_v35, %v274_v12 }
 0x28b   :  { %10330 = vst [vmem:[#allocation29_spill] sm:$0xff] %v8241_v36  ;;  %v708_v37 = vsel %vm689_vm3, %v8241_v36, 0.0 }
 0x28c   :  { %709 = vadd.xlane.f32.xlu2 %v708_v37 }
 0x28e   :  { %v678_v38 = vpop.f32.mrf.mxu1 }
 0x28f   :  { %v679_v39 = vadd.f32 %v7261_v11, %v678_v38 }
 0x291   :  { %v8245_v41 = vadd.f32 %v679_v39, %v274_v12 }
 0x293   :  { %10331 = vst [vmem:[#allocation30_spill] sm:$0xff] %v8245_v41  ;;  %v711_v45 = vsel %vm689_vm3, %v8245_v41, 0.0 }
 0x2cf   :  { %v692_v48 = vpop.xlane.xlu1 %691 }
 0x2d0   :  { %v721_v49 = vmul.f32 %v8247_v47, %v692_v48 }
 0x2d2   :  { %v8251_v51 = vsub.f32 %v8217_v14, %v721_v49 }
 0x2d4   :  { %v737_v52 = vmul.f32 %v8251_v51, %v8251_v51 }
 0x2d6   :  { %v745_v53 = vsel %vm689_vm3, %v737_v52, 0.0 }
 0x2d7   :  { %746 = vadd.xlane.f32.xlu1 %v745_v53  ;;  %v695_v54 = vpop.xlane.xlu2 %694 }
 0x2d8   :  { %v722_v56 = vmul.f32 %v8247_v47, %v695_v54 }
 0x2da   :  { %v8258_v57 = vsub.f32 %v8221_v17, %v722_v56 }
 0x2dc   :  { %v738_v58 = vmul.f32 %v8258_v57, %v8258_v57 }
 0x2de   :  { %v748_v1 = vsel %vm689_vm3, %v738_v58, 0.0 }
 0x2df   :  { %749 = vadd.xlane.f32.xlu0 %v748_v1  ;;  %712 = vadd.xlane.f32.xlu1 %v711_v45  ;;  %v698_v59 = vpop.xlane.xlu0 %697  ;;  %v8325_v1 = vld [vmem:[%s10334_s25] ss:$0 sm:$0xff] }
 0x2e0   :  { %v723_v61 = vmul.f32 %v8247_v47, %v698_v59 }
 0x2e2   :  { %v8267_v62 = vsub.f32 %v8225_v21, %v723_v61 }
 0x2e4   :  { %v739_v63 = vmul.f32 %v8267_v62, %v8267_v62 }
 0x2e6   :  { %v751_v0 = vsel %vm689_vm3, %v739_v63, 0.0  ;;  %v8328_v63 = vld [vmem:[#allocation10] ss:$0 sm:$0xff] }
 0x2e7   :  { %v701_v2 = vpop.xlane.xlu1 %700  ;;  %752 = vadd.xlane.f32.xlu2 %v751_v0 }
 0x2e8   :  { %v724_v3 = vmul.f32 %v8247_v47, %v701_v2 }
 0x2ea   :  { %v8274_v4 = vsub.f32 %v8229_v25, %v724_v3 }
 0x2ec   :  { %v740_v5 = vmul.f32 %v8274_v4, %v8274_v4 }
 0x2ee   :  { %v754_v7 = vsel %vm689_vm3, %v740_v5, 0.0 }
 0x2ef   :  { %755 = vadd.xlane.f32.xlu0 %v754_v7  ;;  %v704_v8 = vpop.xlane.xlu2 %703 }
 0x2f0   :  { %v725_v6 = vmul.f32 %v8247_v47, %v704_v8 }
 0x2f2   :  { %v8281_v10 = vsub.f32 %v8233_v28, %v725_v6 }
 0x2f4   :  { %v741_v11 = vmul.f32 %v8281_v10, %v8281_v10 }
 0x2f6   :  { %v757_v12 = vsel %vm689_vm3, %v741_v11, 0.0 }
 0x2f7   :  { %758 = vadd.xlane.f32.xlu1 %v757_v12  ;;  %v707_v50 = vpop.xlane.xlu0 %706 }
 0x2f8   :  { %v726_v13 = vmul.f32 %v8247_v47, %v707_v50 }
 0x2fa   :  { %v8288_v15 = vsub.f32 %v8237_v32, %v726_v13 }
 0x2fc   :  { %v742_v9 = vmul.f32 %v8288_v15, %v8288_v15 }
 0x2fe   :  { %v760_v16 = vsel %vm689_vm3, %v742_v9, 0.0 }
 0x2ff   :  { %v710_v18 = vpop.xlane.xlu2 %709  ;;  %761 = vadd.xlane.f32.xlu2 %v760_v16 }
 0x300   :  { %v727_v19 = vmul.f32 %v8247_v47, %v710_v18 }
 0x302   :  { %v8295_v20 = vsub.f32 %v8241_v36, %v727_v19 }
 0x304   :  { %v743_v22 = vmul.f32 %v8295_v20, %v8295_v20 }
 0x306   :  { %v763_v23 = vsel %vm689_vm3, %v743_v22, 0.0 }
 0x307   :  { %764 = vadd.xlane.f32.xlu0 %v763_v23 }
 0x34a   :  { %v747_v29 = vpop.xlane.xlu1 %746 }
 0x34b   :  { %v769_v30 = vmul.f32 %v747_v29, %v8247_v47 }
 0x34d   :  { %v777_v31 = vadd.f32 1e-05, %v769_v30 }
 0x34f   :  { %7309 = vrsqrt.f32 %v777_v31  ;;  %vm791_vm6 = vweird.f32 %v777_v31 }
 0x352   :  { %v713_v33 = vpop.xlane.xlu1 %712  ;;  %v750_v34 = vpop.xlane.xlu0 %749 }
 0x353   :  { %v728_v35 = vmul.f32 %v8247_v47, %v713_v33  ;;  %v770_v37 = vmul.f32 %v750_v34, %v8247_v47 }
 0x355   :  { %v7310_v38 = vpop.eup %7309  ;;  %v8316_v39 = vsub.f32 %v8245_v41, %v728_v35  ;;  %v778_v60 = vadd.f32 1e-05, %v770_v37 }
 0x356   :  { %v786_v40 = vmul.f32 %v7310_v38, %v777_v31  ;;  %vm792_vm5 = vweird.f32 %v7310_v38 }
 0x357   :  { %7311 = vrsqrt.f32 %v778_v60  ;;  %v744_v42 = vmul.f32 %v8316_v39, %v8316_v39  ;;  %vm793_vm7 = vmor %vm791_vm6, %vm792_vm5  ;;  %vm801_vm9 = vweird.f32 %v778_v60 }
 0x358   :  { %v787_v43 = vmul.f32 %v7310_v38, %v786_v40 }
 0x359   :  { %v766_v44 = vsel %vm689_vm3, %v744_v42, 0.0 }
 0x35a   :  { %v788_v46 = vmul.f32 0.5, %v787_v43  ;;  %767 = vadd.xlane.f32.xlu1 %v766_v44  ;;  %v753_v48 = vpop.xlane.xlu2 %752 }
 0x35b   :  { %v771_v49 = vmul.f32 %v753_v48, %v8247_v47 }
 0x35c   :  { %v789_v52 = vsub.f32 1.5, %v788_v46 }
 0x35d   :  { %v7312_v53 = vpop.eup %7311  ;;  %v779_v54 = vadd.f32 1e-05, %v771_v49 }
 0x35e   :  { %v790_v56 = vmul.f32 %v7310_v38, %v789_v52  ;;  %v796_v58 = vmul.f32 %v7312_v53, %v778_v60  ;;  %vm802_vm8 = vweird.f32 %v7312_v53 }
 0x35f   :  { %7313 = vrsqrt.f32 %v779_v54  ;;  %vm803_vm10 = vmor %vm801_vm9, %vm802_vm8  ;;  %vm811_vm12 = vweird.f32 %v779_v54 }
 0x360   :  { %v797_v45 = vmul.f32 %v7312_v53, %v796_v58  ;;  %v794_v59 = vsel %vm793_vm7, %v7310_v38, %v790_v56 }
 0x361   :  { %v865_v61 = vmul.f32 %v794_v59, %v8251_v51 }
 0x362   :  { %v798_v0 = vmul.f32 0.5, %v797_v45  ;;  %v756_v2 = vpop.xlane.xlu0 %755 }
 0x363   :  { %v772_v3 = vmul.f32 %v756_v2, %v8247_v47  ;;  %v876_v5 = vmul.f32 %v8325_v1, %v865_v61 }
 0x364   :  { %v799_v7 = vsub.f32 1.5, %v798_v0 }
 0x365   :  { %v7314_v8 = vpop.eup %7313  ;;  %v780_v6 = vadd.f32 1e-05, %v772_v3  ;;  %v887_v11 = vadd.f32 %v8328_v63, %v876_v5 }
 0x366   :  { %v800_v12 = vmul.f32 %v7312_v53, %v799_v7  ;;  %v806_v50 = vmul.f32 %v7314_v8, %v779_v54  ;;  %vm812_vm11 = vweird.f32 %v7314_v8 }
 0x367   :  { %7315 = vrsqrt.f32 %v780_v6  ;;  %6887 = vmatmul.msk.f32.vlgmr.msra.gmra.mxu2 %vm689_vm3, %v887_v11  ;;  %vm813_vm13 = vmor %vm811_vm12, %vm812_vm11  ;;  %vm821_vm15 = vweird.f32 %v780_v6 }
 0x368   :  { %v807_v51 = vmul.f32 %v7314_v8, %v806_v50  ;;  %v804_v13 = vsel %vm803_vm10, %v7312_v53, %v800_v12 }
 0x369   :  { %v866_v9 = vmul.f32 %v804_v13, %v8258_v57 }
 0x36a   :  { %v808_v16 = vmul.f32 0.5, %v807_v51  ;;  %v759_v18 = vpop.xlane.xlu1 %758 }
 0x36b   :  { %v773_v19 = vmul.f32 %v759_v18, %v8247_v47  ;;  %v877_v22 = vmul.f32 %v8325_v1, %v866_v9 }
 0x36c   :  { %v809_v23 = vsub.f32 1.5, %v808_v16 }
 0x36d   :  { %v7316_v24 = vpop.eup %7315  ;;  %v781_v26 = vadd.f32 1e-05, %v773_v19  ;;  %v888_v55 = vadd.f32 %v8328_v63, %v877_v22 }
 0x36e   :  { %v810_v27 = vmul.f32 %v7314_v8, %v809_v23  ;;  %v816_v29 = vmul.f32 %v7316_v24, %v780_v6  ;;  %vm822_vm14 = vweird.f32 %v7316_v24 }
 0x36f   :  { %7317 = vrsqrt.f32 %v781_v26  ;;  %6888 = vmatmul.msk.f32.gmra.mxu2 %vm689_vm3, %v888_v55  ;;  %vm823_vm1 = vmor %vm821_vm15, %vm822_vm14  ;;  %vm831_vm4 = vweird.f32 %v781_v26 }
 0x370   :  { %v817_v57 = vmul.f32 %v7316_v24, %v816_v29  ;;  %v814_v30 = vsel %vm813_vm13, %v7314_v8, %v810_v27 }
 0x371   :  { %v867_v31 = vmul.f32 %v814_v30, %v8267_v62 }
 0x372   :  { %v818_v33 = vmul.f32 0.5, %v817_v57  ;;  %v762_v34 = vpop.xlane.xlu2 %761 }
 0x373   :  { %v774_v35 = vmul.f32 %v762_v34, %v8247_v47  ;;  %v878_v37 = vmul.f32 %v8325_v1, %v867_v31 }
 0x374   :  { %v819_v38 = vsub.f32 1.5, %v818_v33 }
 0x375   :  { %v7318_v60 = vpop.eup %7317  ;;  %v782_v40 = vadd.f32 1e-05, %v774_v35  ;;  %v889_v42 = vadd.f32 %v8328_v63, %v878_v37 }
 0x376   :  { %v820_v43 = vmul.f32 %v7316_v24, %v819_v38  ;;  %v826_v44 = vmul.f32 %v7318_v60, %v781_v26  ;;  %vm832_vm2 = vweird.f32 %v7318_v60 }
 0x377   :  { %7319 = vrsqrt.f32 %v782_v40  ;;  %6889 = vmatmul.msk.f32.gmra.mxu2 %vm689_vm3, %v889_v42  ;;  %vm833_vm5 = vmor %vm831_vm4, %vm832_vm2  ;;  %vm841_vm7 = vweird.f32 %v782_v40 }
 0x378   :  { %v827_v62 = vmul.f32 %v7318_v60, %v826_v44  ;;  %v824_v46 = vsel %vm823_vm1, %v7316_v24, %v820_v43 }
 0x379   :  { %v868_v48 = vmul.f32 %v824_v46, %v8274_v4 }
 0x37a   :  { %v828_v49 = vmul.f32 0.5, %v827_v62  ;;  %v765_v52 = vpop.xlane.xlu0 %764 }
 0x37b   :  { %v775_v53 = vmul.f32 %v765_v52, %v8247_v47  ;;  %v879_v54 = vmul.f32 %v8325_v1, %v868_v48 }
 0x37c   :  { %v829_v56 = vsub.f32 1.5, %v828_v49 }
 0x37d   :  { %v7320_v58 = vpop.eup %7319  ;;  %v783_v45 = vadd.f32 1e-05, %v775_v53  ;;  %v890_v59 = vadd.f32 %v8328_v63, %v879_v54 }
 0x37e   :  { %v830_v61 = vmul.f32 %v7318_v60, %v829_v56  ;;  %v836_v0 = vmul.f32 %v7320_v58, %v782_v40  ;;  %vm842_vm6 = vweird.f32 %v7320_v58 }
 0x37f   :  { %7321 = vrsqrt.f32 %v783_v45  ;;  %6890 = vmatmul.msk.f32.gmra.mxu2 %vm689_vm3, %v890_v59  ;;  %vm843_vm8 = vmor %vm841_vm7, %vm842_vm6  ;;  %vm851_vm10 = vweird.f32 %v783_v45 }
 0x380   :  { %v837_v4 = vmul.f32 %v7320_v58, %v836_v0  ;;  %v834_v2 = vsel %vm833_vm5, %v7318_v60, %v830_v61 }
 0x381   :  { %v869_v3 = vmul.f32 %v834_v2, %v8281_v10 }
 0x382   :  { %v838_v5 = vmul.f32 0.5, %v837_v4 }
 0x383   :  { %v880_v7 = vmul.f32 %v8325_v1, %v869_v3 }
 0x384   :  { %v839_v8 = vsub.f32 1.5, %v838_v5 }
 0x385   :  { %v7322_v6 = vpop.eup %7321  ;;  %v891_v11 = vadd.f32 %v8328_v63, %v880_v7  ;;  %v7922_v7 = vmov 2.828427  }
 0x386   :  { %v840_v12 = vmul.f32 %v7320_v58, %v839_v8  ;;  %v846_v50 = vmul.f32 %v7322_v6, %v783_v45  ;;  %vm852_vm9 = vweird.f32 %v7322_v6 }
 0x387   :  { %6891 = vmatmul.msk.f32.gmra.mxu2 %vm689_vm3, %v891_v11  ;;  %vm853_vm11 = vmor %vm851_vm10, %vm852_vm9 }
 0x388   :  { %v847_v51 = vmul.f32 %v7322_v6, %v846_v50  ;;  %v844_v13 = vsel %vm843_vm8, %v7320_v58, %v840_v12  ;;  %v960_v12 = vlaneseq }
 0x389   :  { %v870_v9 = vmul.f32 %v844_v13, %v8288_v15 }
 0x38a   :  { %v848_v16 = vmul.f32 0.5, %v847_v51  ;;  %v961_v51 = vshrl.u32 %v960_v12, 7  ;;  %v963_v13 = vand.u32 127, %v960_v12 }
 0x38b   :  { %v881_v10 = vmul.f32 %v8325_v1, %v870_v9 }
 0x38c   :  { %v849_v18 = vsub.f32 1.5, %v848_v16  ;;  %vm964_vm1 = vcmp.gt.s32.totalorder %v963_v13, %v961_v51 }
 0x38d   :  { %v892_v19 = vadd.f32 %v8328_v63, %v881_v10 }
 0x38e   :  { %v850_v22 = vmul.f32 %v7322_v6, %v849_v18  ;;  %v7923_v18 = vmov 0.0  }
 0x38f   :  { %6892 = vmatmul.msk.f32.gmra.mxu2 %vm689_vm3, %v892_v19  ;;  %v8465_v19 = vsel %vm964_vm1, -1e+30, %v7923_v18 }
 0x390   :  { %v854_v23 = vsel %vm853_vm11, %v7322_v6, %v850_v22 }
 0x391   :  { %v871_v24 = vmul.f32 %v854_v23, %v8295_v20 }
 0x393   :  { %v882_v26 = vmul.f32 %v8325_v1, %v871_v24 }
 0x395   :  { %v893_v55 = vadd.f32 %v8328_v63, %v882_v26 }
 0x397   :  { %6893 = vmatmul.msk.f32.gmra.mxu2 %vm689_vm3, %v893_v55 }
 0x3cd   :  { %v768_v15 = vpop.xlane.xlu1 %767 }
 0x3ce   :  { %v776_v27 = vmul.f32 %v768_v15, %v8247_v47 }
 0x3d0   :  { %v784_v29 = vadd.f32 1e-05, %v776_v27 }
 0x3d2   :  { %7323 = vrsqrt.f32 %v784_v29  ;;  %vm861_vm13 = vweird.f32 %v784_v29 }
 0x3d3   :  { %7325 = vrcp.f32 %v7922_v7 }
 0x3d8   :  { %v7324_v57 = vpop.eup %7323 }
 0x3d9   :  { %v856_v30 = vmul.f32 %v7324_v57, %v784_v29  ;;  %vm862_vm12 = vweird.f32 %v7324_v57  ;;  %v7326_v8 = vpop.eup %7325 }
 0x3da   :  { %vm863_vm14 = vmor %vm861_vm13, %vm862_vm12  ;;  %v1183_v6 = vmul.f32 2.828427, %v7326_v8  ;;  %vm1187_vm15 = vweird.f32 %v7326_v8 }
 0x3db   :  { %v857_v31 = vmul.f32 %v7324_v57, %v856_v30 }
 0x3dc   :  { %v1184_v11 = vsub.f32 1.0, %v1183_v6 }
 0x3dd   :  { %v858_v33 = vmul.f32 0.5, %v857_v31 }
 0x3de   :  { %v1185_v50 = vmul.f32 %v7326_v8, %v1184_v11 }
 0x3df   :  { %v859_v34 = vsub.f32 1.5, %v858_v33 }
 0x3e0   :  { %v1186_v9 = vadd.f32 %v7326_v8, %v1185_v50 }
 0x3e1   :  { %v860_v35 = vmul.f32 %v7324_v57, %v859_v34 }
 0x3e2   :  { %v8463_v16 = vsel %vm1187_vm15, %v7326_v8, %v1186_v9 }
 0x3e3   :  { %v864_v20 = vsel %vm863_vm14, %v7324_v57, %v860_v35 }
 0x3e4   :  { %v872_v37 = vmul.f32 %v864_v20, %v8316_v39 }
 0x3e6   :  { %v883_v38 = vmul.f32 %v8325_v1, %v872_v37 }
 0x3e8   :  { %v894_v60 = vadd.f32 %v8328_v63, %v883_v38 }
 0x3ea   :  { %v8365_v40 = vpop.f32.mrf.mxu2  ;;  %6894 = vmatmul.msk.f32.gmra.mxu2 %vm689_vm3, %v894_v60 }
 0x3eb   :  { %967 = vrot.lane.b32.xlu2 %v8365_v40, %s7918_s29 }
 0x3f2   :  { %v8370_v42 = vpop.f32.mrf.mxu2 }
 0x3f3   :  { %994 = vrot.lane.b32.xlu0 %v8370_v42, %s7918_s29 }
 0x3fa   :  { %v8374_v43 = vpop.f32.mrf.mxu2 }
 0x3fb   :  { %1021 = vrot.lane.b32.xlu1 %v8374_v43, %s7918_s29  ;;  %v8392_v44 = vpack.i.bf16 %v8365_v40, %v8374_v43 }
 0x402   :  { %v8378_v39 = vpop.f32.mrf.mxu2 }
 0x403   :  { %1048 = vrot.lane.b32.xlu2 %v8378_v39, %s7918_s29 }
 0x40a   :  { %v8382_v1 = vpop.f32.mrf.mxu2 }
 0x40b   :  { %1075 = vrot.lane.b32.xlu0 %v8382_v1, %s7918_s29  ;;  %v8402_v46 = vpack.i.bf16 %v8382_v1, %v8370_v42 }
 0x412   :  { %v8386_v63 = vpop.f32.mrf.mxu2 }
 0x413   :  { %1102 = vrot.lane.b32.xlu2 %v8386_v63, %s7918_s29 }
 0x41a   :  { %v8394_v62 = vpop.f32.mrf.mxu2 }
 0x41b   :  { %7146 = vrot.lane.b32.xlu2 %v8392_v44, %s7919_s2  ;;  %1129 = vrot.lane.b32.xlu1 %v8394_v62, %s7918_s29  ;;  %v8436_v45 = vpack.i.bf16 %v8394_v62, %v8378_v39 }
 0x423   :  { %7156 = vrot.lane.b32.xlu2 %v8402_v46, %s7919_s2  ;;  %1663 = vrot.lane.b32.xlu1 %v8374_v43, %s7920_s5 }
 0x42b   :  { %1661 = vrot.lane.b32.xlu2 %v8374_v43, %s7921_s9  ;;  %1691 = vrot.lane.b32.xlu1 %v8378_v39, %s7920_s5 }
 0x433   :  { %1775 = vrot.lane.b32.xlu2 %v8394_v62, %s7920_s5  ;;  %1689 = vrot.lane.b32.xlu1 %v8378_v39, %s7921_s9 }
 0x43b   :  { %1773 = vrot.lane.b32.xlu2 %v8394_v62, %s7921_s9  ;;  %1719 = vrot.lane.b32.xlu1 %v8382_v1, %s7920_s5 }
 0x445   :  { %v968_v48 = vpop.permute.xlu2 %967 }
 0x446   :  { %6895 = vmatpush.xpose.msk.msra.mxu3 %vm339_vm0, %v968_v48 }
 0x449   :  { %6896 = vmatmul.msk.f32.vlgmr.msra.gmra.mxu3 %vm339_vm0, %v8365_v40 }
 0x45d   :  { %v1049_v49 = vpop.permute.xlu2 %1048 }
 0x465   :  { %v995_v52 = vpop.permute.xlu0 %994 }
 0x466   :  { %6897 = vmatpush.xpose.msk.msrb.mxu3 %vm339_vm0, %v995_v52 }
 0x469   :  { %6898 = vmatmul.msk.f32.vlgmr.msrb.gmra.mxu3 %vm339_vm0, %v8370_v42 }
 0x46d   :  { %v1022_v53 = vpop.permute.xlu1 %1021  ;;  %v1103_v54 = vpop.permute.xlu2 %1102 }
 0x46e   :  { %v8426_v56 = vpop.f32.mrf.mxu2  ;;  %6899 = vmatpush.xpose.msk.msra.mxu3 %vm339_vm0, %v1022_v53 }
 0x46f   :  { %1156 = vrot.lane.b32.xlu0 %v8426_v56, %s7918_s29  ;;  %v8459_v5 = vpack.i.bf16 %v8386_v63, %v8426_v56 }
 0x471   :  { %6900 = vmatmul.msk.f32.vlgmr.msra.gmra.mxu3 %vm339_vm0, %v8374_v43 }
 0x472   :  { %6901 = vmatpush.xpose.msk.msrb.mxu3 %vm339_vm0, %v1049_v49 }
 0x475   :  { %v7147_v58 = vpop.permute.xlu2 %7146 }
 0x476   :  { %v7149_v59 = vunpack.i.h.bf16 %v7147_v58  ;;  %v7148_v26 = vunpack.i.l.bf16 %v7147_v58 }
 0x477   :  { %7151 = vrot.lane.b32.xlu0 %v8436_v45, %s7919_s2 }
 0x478   :  { %1418 = vmatpush.msrb.mxu0 %v7149_v59 }
 0x479   :  { %6902 = vmatmul.msk.f32.vlgmr.msrb.gmra.mxu3 %vm339_vm0, %v8378_v39 }
 0x47d   :  { %v7157_v61 = vpop.permute.xlu2 %7156  ;;  %v1076_v0 = vpop.permute.xlu0 %1075 }
 0x47e   :  { %v7159_v4 = vunpack.i.h.bf16 %v7157_v61  ;;  %6903 = vmatpush.xpose.msk.msra.mxu3 %vm339_vm0, %v1076_v0  ;;  %v7158_v2 = vunpack.i.l.bf16 %v7157_v61 }
 0x47f   :  { %1607 = vrot.lane.b32.xlu0 %v8365_v40, %s7920_s5 }
 0x480   :  { %1444 = vmatpush.msrb.mxu1 %v7158_v2  ;;  %1522 = vmatpush.msra.mxu0 %v7159_v4 }
 0x481   :  { %6904 = vmatmul.msk.f32.vlgmr.msra.gmra.mxu3 %vm339_vm0, %v8382_v1 }
 0x482   :  { %6905 = vmatpush.xpose.msk.msrb.mxu3 %vm339_vm0, %v1103_v54 }
 0x487   :  { %1605 = vrot.lane.b32.xlu0 %v8365_v40, %s7921_s9 }
 0x489   :  { %6906 = vmatmul.msk.f32.vlgmr.msrb.gmra.mxu3 %vm339_vm0, %v8386_v63 }
 0x48d   :  { %v1130_v3 = vpop.permute.xlu1 %1129 }
 0x48e   :  { %6907 = vmatpush.xpose.msk.msra.mxu3 %vm339_vm0, %v1130_v3 }
 0x48f   :  { %1635 = vrot.lane.b32.xlu0 %v8370_v42, %s7920_s5 }
 0x491   :  { %6908 = vmatmul.msk.f32.vlgmr.msra.gmra.mxu3 %vm339_vm0, %v8394_v62 }
 0x495   :  { %v8507_v9 = vpop.permute.xlu1 %1663 }
 0x497   :  { %7161 = vrot.lane.b32.xlu0 %v8459_v5, %s7919_s2 }
 0x49d   :  { %v8511_v18 = vpop.permute.xlu1 %1691 }
 0x4cc   :  { %v990_v10 = vpop.f32.mrf.mxu3 }
 0x4cd   :  { %v1189_v22 = vmul.f32 %v8463_v16, %v990_v10  ;;  %v8509_v10 = vpop.permute.xlu2 %1661 }
 0x4cf   :  { %v8469_v23 = vadd.f32 %v1189_v22, %v8465_v19 }
 0x4d1   :  { %v1205_v24 = vsel %vm339_vm0, %v8469_v23, -inf }
 0x4d2   :  { %1206 = vmax.xlane.f32.xlu1 %v1205_v24  ;;  %v8515_v24 = vpop.permute.xlu1 %1689 }
 0x4d5   :  { %v8513_v22 = vpop.permute.xlu2 %1775 }
 0x4e1   :  { %v1157_v55 = vpop.permute.xlu0 %1156 }
 0x4e2   :  { %6909 = vmatpush.xpose.msk.msrb.mxu3 %vm339_vm0, %v1157_v55 }
 0x4e5   :  { %6910 = vmatmul.msk.f32.vlgmr.msrb.gmra.mxu3 %vm339_vm0, %v8426_v56 }
 0x4e6   :  { %1470 = vmatpush.msra.mxu3 %v7148_v26  ;;  %v8517_v26 = vpop.permute.xlu2 %1773 }
 0x4e9   :  { %v7152_v15 = vpop.permute.xlu0 %7151 }
 0x4ea   :  { %v7154_v27 = vunpack.i.h.bf16 %v7152_v15  ;;  %v7153_v29 = vunpack.i.l.bf16 %v7152_v15 }
 0x4ec   :  { %1496 = vmatpush.msrb.mxu2 %v7153_v29  ;;  %1574 = vmatpush.msrb.mxu3 %v7154_v27  ;;  %v1017_v57 = vpop.f32.mrf.mxu3  ;;  %v8523_v29 = vpop.permute.xlu1 %1719 }
 0x4ed   :  { %v1190_v30 = vmul.f32 %v8463_v16, %v1017_v57 }
 0x4ef   :  { %v8478_v31 = vadd.f32 %v1190_v30, %v8465_v19 }
 0x4f1   :  { %v8480_v33 = vpop.permute.xlu0 %1607  ;;  %v1208_v34 = vsel %vm339_vm0, %v8478_v31, -inf }
 0x4f2   :  { %1209 = vmax.xlane.f32.xlu1 %v1208_v34 }
 0x4f4   :  { %v1044_v35 = vpop.f32.mrf.mxu3 }
 0x4f5   :  { %v1191_v20 = vmul.f32 %v8463_v16, %v1044_v35 }
 0x4f7   :  { %v1199_v37 = vadd.f32 %v1191_v20, %v8465_v19 }
 0x4f9   :  { %v8486_v38 = vpop.permute.xlu0 %1605  ;;  %v1211_v60 = vsel %vm339_vm0, %v1199_v37, -inf }
 0x4fa   :  { %1212 = vmax.xlane.f32.xlu2 %v1211_v60 }
 0x4fc   :  { %v1071_v48 = vpop.f32.mrf.mxu3 }
 0x4fd   :  { %v1192_v49 = vmul.f32 %v8463_v16, %v1071_v48 }
 0x4ff   :  { %v1200_v52 = vadd.f32 %v1192_v49, %v8465_v19 }
 0x501   :  { %v8491_v53 = vpop.permute.xlu0 %1635  ;;  %v1214_v54 = vsel %vm339_vm0, %v1200_v52, -inf }
 0x502   :  { %1215 = vmax.xlane.f32.xlu0 %v1214_v54 }
 0x504   :  { %v1098_v58 = vpop.f32.mrf.mxu3 }
 0x505   :  { %v1193_v59 = vmul.f32 %v8463_v16, %v1098_v58 }
 0x507   :  { %v1201_v61 = vadd.f32 %v1193_v59, %v8465_v19 }
 0x509   :  { %v7162_v0 = vpop.permute.xlu0 %7161  ;;  %v1217_v4 = vsel %vm339_vm0, %v1201_v61, -inf }
 0x50a   :  { %v7164_v2 = vunpack.i.h.bf16 %v7162_v0  ;;  %v7163_v3 = vunpack.i.l.bf16 %v7162_v0  ;;  %1218 = vmax.xlane.f32.xlu0 %v1217_v4 }
 0x50c   :  { %1548 = vmatpush.msra.mxu1 %v7164_v2  ;;  %1600 = vmatpush.msra.mxu2 %v7163_v3  ;;  %v1125_v7 = vpop.f32.mrf.mxu3 }
 0x50d   :  { %v1194_v8 = vmul.f32 %v8463_v16, %v1125_v7 }
 0x50f   :  { %v1202_v6 = vadd.f32 %v1194_v8, %v8465_v19 }
 0x511   :  { %v1220_v11 = vsel %vm339_vm0, %v1202_v6, -inf }
 0x512   :  { %1221 = vmax.xlane.f32.xlu1 %v1220_v11 }
 0x514   :  { %v1152_v12 = vpop.f32.mrf.mxu3 }
 0x515   :  { %v1195_v50 = vmul.f32 %v8463_v16, %v1152_v12 }
 0x517   :  { %v1203_v51 = vadd.f32 %v1195_v50, %v8465_v19 }
 0x519   :  { %v1223_v13 = vsel %vm339_vm0, %v1203_v51, -inf }
 0x51a   :  { %1224 = vmax.xlane.f32.xlu2 %v1223_v13 }
 0x51e   :  { %1633 = vrot.lane.b32.xlu0 %v8370_v42, %s7921_s9 }
 0x52b   :  { %1717 = vrot.lane.b32.xlu1 %v8382_v1, %s7921_s9 }
 0x545   :  { %v1207_v20 = vpop.xlane.xlu1 %1206 }
 0x565   :  { %v1210_v59 = vpop.xlane.xlu1 %1209 }
 0x568   :  { %v1179_v55 = vpop.f32.mrf.mxu3 }
 0x569   :  { %v1196_v15 = vmul.f32 %v8463_v16, %v1179_v55 }
 0x56b   :  { %v8521_v27 = vadd.f32 %v1196_v15, %v8465_v19 }
 0x56d   :  { %v1213_v57 = vpop.xlane.xlu2 %1212  ;;  %v1226_v30 = vsel %vm339_vm0, %v8521_v27, -inf }
 0x56e   :  { %v1231_v34 = vsub.f32 %v1199_v37, %v1213_v57  ;;  %1227 = vmax.xlane.f32.xlu2 %v1226_v30  ;;  %v1229_v30 = vsub.f32 %v8469_v23, %v1207_v20 }
 0x570   :  { %v1241_v35 = vmul.f32 1.442695, %v1231_v34  ;;  %v1237_v34 = vmul.f32 1.442695, %v1229_v30 }
 0x572   :  { %7327 = vpow2.f32 %v1241_v35 }
 0x575   :  { %v1216_v60 = vpop.xlane.xlu0 %1215 }
 0x576   :  { %v1232_v48 = vsub.f32 %v1200_v52, %v1216_v60 }
 0x578   :  { %v8527_v49 = vpop.eup %7327  ;;  %v1243_v54 = vmul.f32 1.442695, %v1232_v48 }
 0x579   :  { %v1259_v58 = vsel %vm339_vm0, %v8527_v49, 0.0 }
 0x57a   :  { %7329 = vpow2.f32 %v1243_v54  ;;  %1260 = vadd.xlane.f32.xlu0 %v1259_v58 }
 0x57d   :  { %v1219_v0 = vpop.xlane.xlu0 %1218 }
 0x57e   :  { %v1233_v4 = vsub.f32 %v1201_v61, %v1219_v0 }
 0x580   :  { %v8531_v2 = vpop.eup %7329  ;;  %v1245_v37 = vmul.f32 1.442695, %v1233_v4 }
 0x581   :  { %v1262_v3 = vsel %vm339_vm0, %v8531_v2, 0.0 }
 0x582   :  { %7331 = vpow2.f32 %v1245_v37  ;;  %1263 = vadd.xlane.f32.xlu1 %v1262_v3 }
 0x585   :  { %v1222_v52 = vpop.xlane.xlu1 %1221 }
 0x586   :  { %v1234_v7 = vsub.f32 %v1202_v6, %v1222_v52  ;;  %1803 = vrot.lane.b32.xlu2 %v8426_v56, %s7920_s5 }
 0x588   :  { %v8537_v8 = vpop.eup %7331  ;;  %v1247_v11 = vmul.f32 1.442695, %v1234_v7 }
 0x589   :  { %v1265_v12 = vsel %vm339_vm0, %v8537_v8, 0.0 }
 0x58a   :  { %7333 = vpow2.f32 %v1247_v11  ;;  %1266 = vadd.xlane.f32.xlu1 %v1265_v12 }
 0x58d   :  { %v1225_v61 = vpop.xlane.xlu2 %1224 }
 0x58e   :  { %v1235_v50 = vsub.f32 %v1203_v51, %v1225_v61  ;;  %v1230_v51 = vsub.f32 %v8478_v31, %v1210_v59 }
 0x590   :  { %v8541_v13 = vpop.eup %7333  ;;  %v1249_v55 = vmul.f32 1.442695, %v1235_v50  ;;  %v1239_v35 = vmul.f32 1.442695, %v1230_v51  ;;  %v8576_v58 = vpop.permute.xlu0 %1633 }
 0x591   :  { %v1268_v15 = vsel %vm339_vm0, %v8541_v13, 0.0 }
 0x592   :  { %7335 = vpow2.f32 %v1249_v55  ;;  %1269 = vadd.xlane.f32.xlu1 %v1268_v15 }
 0x593   :  { %7337 = vpow2.f32 %v1237_v34 }
 0x594   :  { %7339 = vpow2.f32 %v1239_v35 }
 0x598   :  { %v8545_v6 = vpop.eup %7335 }
 0x599   :  { %v1271_v57 = vsel %vm339_vm0, %v8545_v6, 0.0  ;;  %v8551_v60 = vpop.eup %7337 }
 0x59a   :  { %1272 = vadd.xlane.f32.xlu0 %v1271_v57  ;;  %v1253_v48 = vsel %vm339_vm0, %v8551_v60, 0.0  ;;  %v8557_v54 = vpop.eup %7339 }
 0x59b   :  { %v1256_v23 = vsel %vm339_vm0, %v8557_v54, 0.0 }
 0x59d   :  { %v8582_v0 = vpop.permute.xlu1 %1717 }
 0x5ab   :  { %1745 = vrot.lane.b32.xlu1 %v8386_v63, %s7921_s9 }
 0x5af   :  { %1254 = vadd.xlane.f32.xlu2 %v1253_v48 }
 0x5b3   :  { %7171 = vrot.lane.b32.xlu1 %v8436_v45, %s7924_s21 }
 0x5b7   :  { %1257 = vadd.xlane.f32.xlu2 %v1256_v23 }
 0x5bb   :  { %7181 = vrot.lane.b32.xlu1 %v8459_v5, %s7924_s21 }
 0x5c3   :  { %2245 = vrot.lane.b32.xlu1 %v8365_v40, %s7925_s11 }
 0x5cb   :  { %2275 = vrot.lane.b32.xlu1 %v8370_v42, %s7926_s0 }
 0x5cf   :  { %1801 = vrot.lane.b32.xlu2 %v8426_v56, %s7921_s9 }
 0x5d7   :  { %7176 = vrot.lane.b32.xlu2 %v8402_v46, %s7924_s21 }
 0x5df   :  { %2301 = vrot.lane.b32.xlu2 %v8374_v43, %s7925_s11 }
 0x5e1   :  { %v1228_v31 = vpop.xlane.xlu2 %1227 }
 0x5e2   :  { %v1236_v5 = vsub.f32 %v8521_v27, %v1228_v31 }
 0x5e4   :  { %v1251_v20 = vmul.f32 1.442695, %v1236_v5 }
 0x5e6   :  { %7341 = vpow2.f32 %v1251_v20 }
 0x5e7   :  { %2415 = vrot.lane.b32.xlu2 %v8394_v62, %s7926_s0 }
 0x5ec   :  { %v8580_v59 = vpop.eup %7341 }
 0x5ed   :  { %v1274_v4 = vsel %vm339_vm0, %v8580_v59, 0.0  ;;  %v1261_v37 = vpop.xlane.xlu0 %1260 }
 0x5ee   :  { %1275 = vadd.xlane.f32.xlu0 %v1274_v4  ;;  %7343 = vrcp.f32 %v1261_v37  ;;  %v1318_v12 = vand.u32 2147483648, %v1261_v37  ;;  %v1316_v61 = vand.u32 2147483647, %v1261_v37  ;;  %vm1312_vm4 = vweird.f32 %v1261_v37 }
 0x5f0   :  { %v1319_v57 = vor.u32 1.1754944e-38, %v1318_v12  ;;  %vm1317_vm6 = vcmp.eq.f32.partialorder %v1316_v61, 8.507059e+37 }
 0x5f4   :  { %v7344_v3 = vpop.eup %7343 }
 0x5f5   :  { %v1308_v52 = vmul.f32 %v7344_v3, %v1261_v37  ;;  %v1264_v27 = vpop.xlane.xlu1 %1263  ;;  %vm1313_vm2 = vweird.f32 %v7344_v3 }
 0x5f6   :  { %7345 = vrcp.f32 %v1264_v27  ;;  %vm1314_vm5 = vmor %vm1312_vm4, %vm1313_vm2  ;;  %v1333_v23 = vand.u32 2147483648, %v1264_v27  ;;  %v1331_v31 = vand.u32 2147483647, %v1264_v27  ;;  %vm1327_vm8 = vweird.f32 %v1264_v27 }
 0x5f7   :  { %v1309_v7 = vsub.f32 1.0, %v1308_v52 }
 0x5f8   :  { %v1334_v20 = vor.u32 1.1754944e-38, %v1333_v23  ;;  %vm1332_vm10 = vcmp.eq.f32.partialorder %v1331_v31, 8.507059e+37 }
 0x5f9   :  { %v1310_v11 = vmul.f32 %v7344_v3, %v1309_v7 }
 0x5fb   :  { %v1311_v50 = vadd.f32 %v7344_v3, %v1310_v11 }
 0x5fc   :  { %v7346_v55 = vpop.eup %7345 }
 0x5fd   :  { %v1315_v15 = vsel %vm1314_vm5, %v7344_v3, %v1311_v50  ;;  %v1323_v30 = vmul.f32 %v7346_v55, %v1264_v27  ;;  %vm1328_vm7 = vweird.f32 %v7346_v55  ;;  %v8600_v7 = vpop.xlane.xlu1 %1266 }
 0x5fe   :  { %v1320_v51 = vsel %vm1317_vm6, %v1319_v57, %v1315_v15  ;;  %vm1329_vm9 = vmor %vm1327_vm8, %vm1328_vm7  ;;  %vm1342_vm6 = vweird.f32 %v8600_v7 }
 0x5ff   :  { %v1324_v34 = vsub.f32 1.0, %v1323_v30  ;;  %v1321_v35 = vmul.f32 %v8527_v49, %v1320_v51 }
 0x601   :  { %v1325_v48 = vmul.f32 %v7346_v55, %v1324_v34  ;;  %6913 = vmatmul.msk.f32.vlgmr.msra.gmra.mxu3 %vm339_vm0, %v1321_v35 }
 0x602   :  { %1747 = vrot.lane.b32.xlu0 %v8386_v63, %s7920_s5  ;;  %6923 = vmatpush.xpose.msk.msra.mxu3 %vm339_vm0, %v8507_v9 }
 0x603   :  { %v1326_v5 = vadd.f32 %v7346_v55, %v1325_v48 }
 0x605   :  { %v1330_v4 = vsel %vm1329_vm9, %v7346_v55, %v1326_v5  ;;  %v8609_v30 = vpop.xlane.xlu1 %1269 }
 0x606   :  { %v1335_v37 = vsel %vm1332_vm10, %v1334_v20, %v1330_v4 }
 0x607   :  { %v1336_v49 = vmul.f32 %v8531_v2, %v1335_v37 }
 0x609   :  { %6914 = vmatmul.msk.f32.vlgmr.msrb.gmra.mxu2 %vm339_vm0, %v1336_v49 }
 0x60a   :  { %7166 = vrot.lane.b32.xlu0 %v8392_v44, %s7924_s21  ;;  %6925 = vmatpush.xpose.msk.msrb.mxu2 %vm339_vm0, %v8511_v18  ;;  %v8602_v44 = vpop.permute.xlu2 %1803 }
 0x60d   :  { %v1273_v3 = vpop.xlane.xlu0 %1272 }
 0x60e   :  { %7347 = vrcp.f32 %v1273_v3  ;;  %v1378_v11 = vand.u32 2147483648, %v1273_v3  ;;  %v1376_v12 = vand.u32 2147483647, %v1273_v3  ;;  %vm1372_vm12 = vweird.f32 %v1273_v3 }
 0x60f   :  { %7349 = vrcp.f32 %v8600_v7 }
 0x610   :  { %v1379_v61 = vor.u32 1.1754944e-38, %v1378_v11  ;;  %vm1377_vm14 = vcmp.eq.f32.partialorder %v1376_v12, 8.507059e+37  ;;  %v1348_v12 = vand.u32 2147483648, %v8600_v7 }
 0x612   :  { %2303 = vrot.lane.b32.xlu0 %v8374_v43, %s7926_s0 }
 0x614   :  { %v7348_v9 = vpop.eup %7347 }
 0x615   :  { %v1368_v52 = vmul.f32 %v7348_v9, %v1273_v3  ;;  %vm1373_vm11 = vweird.f32 %v7348_v9  ;;  %v7350_v57 = vpop.eup %7349 }
 0x616   :  { %vm1374_vm13 = vmor %vm1372_vm12, %vm1373_vm11  ;;  %v1338_v51 = vmul.f32 %v7350_v57, %v8600_v7  ;;  %vm1343_vm2 = vweird.f32 %v7350_v57 }
 0x617   :  { %v1369_v27 = vsub.f32 1.0, %v1368_v52  ;;  %vm8627_vm7 = vmor %vm1342_vm6, %vm1343_vm2 }
 0x618   :  { %v1339_v48 = vsub.f32 1.0, %v1338_v51 }
 0x619   :  { %v1370_v2 = vmul.f32 %v7348_v9, %v1369_v27 }
 0x61a   :  { %2247 = vrot.lane.b32.xlu0 %v8365_v40, %s7926_s0  ;;  %v1340_v20 = vmul.f32 %v7350_v57, %v1339_v48 }
 0x61b   :  { %v1371_v18 = vadd.f32 %v7348_v9, %v1370_v2 }
 0x61c   :  { %v1341_v52 = vadd.f32 %v7350_v57, %v1340_v20 }
 0x61d   :  { %v1375_v50 = vsel %vm1374_vm13, %v7348_v9, %v1371_v18 }
 0x61e   :  { %v1380_v55 = vsel %vm1377_vm14, %v1379_v61, %v1375_v50  ;;  %v1346_v50 = vand.u32 2147483647, %v8600_v7  ;;  %vm1357_vm14 = vweird.f32 %v8609_v30 }
 0x61f   :  { %v1381_v15 = vmul.f32 %v8545_v6, %v1380_v55 }
 0x620   :  { %vm1347_vm9 = vcmp.eq.f32.partialorder %v1346_v50, 8.507059e+37 }
 0x621   :  { %6917 = vmatmul.msk.f32.vlgmr.msrb.gmra.mxu3 %vm339_vm0, %v1381_v15 }
 0x622   :  { %2331 = vrot.lane.b32.xlu0 %v8378_v39, %s7926_s0  ;;  %v1255_v34 = vpop.xlane.xlu2 %1254  ;;  %6931 = vmatpush.xpose.msk.msrb.mxu3 %vm339_vm0, %v8513_v22 }
 0x623   :  { %7351 = vrcp.f32 %v1255_v34  ;;  %v1288_v4 = vand.u32 2147483648, %v1255_v34  ;;  %v1286_v49 = vand.u32 2147483647, %v1255_v34  ;;  %vm1282_vm1 = vweird.f32 %v1255_v34 }
 0x624   :  { %7353 = vrcp.f32 %v8609_v30 }
 0x625   :  { %vm1287_vm5 = vcmp.eq.f32.partialorder %v1286_v49, 8.507059e+37 }
 0x629   :  { %v7352_v35 = vpop.eup %7351  ;;  %6924 = vmatmul.msk.f32.vlgmr.msra.gmra.mxu3 %vm339_vm0, %v8509_v10  ;;  %v1289_v10 = vor.u32 1.1754944e-38, %v1288_v4  ;;  %v1363_v4 = vand.u32 2147483648, %v8609_v30 }
 0x62a   :  { %v1278_v6 = vmul.f32 %v7352_v35, %v1255_v34  ;;  %v1258_v23 = vpop.xlane.xlu2 %1257  ;;  %v8619_v31 = vpop.eup %7353  ;;  %vm1283_vm15 = vweird.f32 %v7352_v35 }
 0x62b   :  { %7355 = vrcp.f32 %v1258_v23  ;;  %v1353_v22 = vmul.f32 %v8619_v31, %v8609_v30  ;;  %vm1284_vm4 = vmor %vm1282_vm1, %vm1283_vm15  ;;  %v1303_v34 = vand.u32 2147483648, %v1258_v23  ;;  %v1301_v48 = vand.u32 2147483647, %v1258_v23 }
 0x62c   :  { %v1279_v5 = vsub.f32 1.0, %v1278_v6  ;;  %v1349_v6 = vor.u32 1.1754944e-38, %v1348_v12  ;;  %vm1297_vm10 = vweird.f32 %v1258_v23  ;;  %vm1358_vm12 = vweird.f32 %v8619_v31 }
 0x62d   :  { %v1354_v27 = vsub.f32 1.0, %v1353_v22  ;;  %vm1302_vm13 = vcmp.eq.f32.partialorder %v1301_v48, 8.507059e+37  ;;  %vm1359_vm15 = vmor %vm1357_vm14, %vm1358_vm12 }
 0x62e   :  { %v1280_v37 = vmul.f32 %v7352_v35, %v1279_v5 }
 0x62f   :  { %v1355_v51 = vmul.f32 %v8619_v31, %v1354_v27 }
 0x630   :  { %v1281_v3 = vadd.f32 %v7352_v35, %v1280_v37  ;;  %v1361_v37 = vand.u32 2147483647, %v8609_v30 }
 0x631   :  { %v7356_v9 = vpop.eup %7355  ;;  %6932 = vmatmul.msk.f32.vlgmr.msrb.gmra.mxu3 %vm339_vm0, %v8517_v26  ;;  %v1345_v26 = vsel %vm8627_vm7, %v7350_v57, %v1341_v52  ;;  %v1356_v57 = vadd.f32 %v8619_v31, %v1355_v51 }
 0x632   :  { %v1293_v11 = vmul.f32 %v7356_v9, %v1258_v23  ;;  %v1285_v2 = vsel %vm1284_vm4, %v7352_v35, %v1281_v3  ;;  %vm1298_vm8 = vweird.f32 %v7356_v9  ;;  %v1350_v5 = vsel %vm1347_vm9, %v1349_v6, %v1345_v26 }
 0x633   :  { %v1290_v18 = vsel %vm1287_vm5, %v1289_v10, %v1285_v2  ;;  %vm1299_vm11 = vmor %vm1297_vm10, %vm1298_vm8  ;;  %v1351_v23 = vmul.f32 %v8537_v8, %v1350_v5  ;;  %v1360_v49 = vsel %vm1359_vm15, %v8619_v31, %v1356_v57  ;;  %v1364_v3 = vor.u32 1.1754944e-38, %v1363_v4  ;;  %v1746_v8 = vpop.permute.xlu1 %1745  ;;  %v1802_v31 = vpop.permute.xlu2 %1801 }
 0x634   :  { %v1294_v55 = vsub.f32 1.0, %v1293_v11  ;;  %v1291_v15 = vmul.f32 %v8551_v60, %v1290_v18  ;;  %v1304_v60 = vor.u32 1.1754944e-38, %v1303_v34  ;;  %vm1362_vm1 = vcmp.eq.f32.partialorder %v1361_v37, 8.507059e+37 }
 0x635   :  { %v1365_v30 = vsel %vm1362_vm1, %v1364_v3, %v1360_v49 }
 0x636   :  { %v1295_v35 = vmul.f32 %v7356_v9, %v1294_v55  ;;  %6911 = vmatmul.msk.f32.vlgmr.msrb.gmra.mxu0 %vm339_vm0, %v1291_v15 }
 0x637   :  { %6919 = vmatpush.xpose.msk.msrb.mxu0 %vm339_vm0, %v8480_v33 }
 0x638   :  { %v1296_v7 = vadd.f32 %v7356_v9, %v1295_v35 }
 0x63a   :  { %v1300_v20 = vsel %vm1299_vm11, %v7356_v9, %v1296_v7 }
 0x63b   :  { %v1305_v22 = vsel %vm1302_vm13, %v1304_v60, %v1300_v20  ;;  %v7172_v52 = vpop.permute.xlu1 %7171 }
 0x63c   :  { %v1306_v33 = vmul.f32 %v8557_v54, %v1305_v22  ;;  %v1366_v54 = vmul.f32 %v8541_v13, %v1365_v30  ;;  %v7173_v26 = vunpack.i.l.bf16 %v7172_v52 }
 0x63e   :  { %6912 = vmatmul.msk.f32.vlgmr.msrb.gmra.mxu1 %vm339_vm0, %v1306_v33  ;;  %6915 = vmatmul.msk.f32.vlgmr.msra.gmra.mxu0 %vm339_vm0, %v1351_v23 }
 0x63f   :  { %6927 = vmatpush.xpose.msk.msra.mxu0 %vm339_vm0, %v8523_v29  ;;  %6921 = vmatpush.xpose.msk.msrb.mxu1 %vm339_vm0, %v8491_v53 }
 0x643   :  { %v7182_v61 = vpop.permute.xlu1 %7181 }
 0x644   :  { %v7184_v15 = vunpack.i.h.bf16 %v7182_v61 }
 0x646   :  { %6916 = vmatmul.msk.f32.vlgmr.msra.gmra.mxu1 %vm339_vm0, %v1366_v54  ;;  %6920 = vmatmul.msk.f32.vlgmr.msrb.gmra.mxu0 %vm339_vm0, %v8486_v38 }
 0x64e   :  { %6922 = vmatmul.msk.f32.vlgmr.msrb.gmra.mxu1 %vm339_vm0, %v8576_v58  ;;  %6928 = vmatmul.msk.f32.vlgmr.msra.gmra.mxu0 %vm339_vm0, %v8582_v0  ;;  %v7177_v58 = vpop.permute.xlu2 %7176 }
 0x64f   :  { %v7178_v50 = vunpack.i.l.bf16 %v7177_v58  ;;  %v7179_v48 = vunpack.i.h.bf16 %v7177_v58 }
 0x661   :  { %v1276_v29 = vpop.xlane.xlu0 %1275 }
 0x662   :  { %7357 = vrcp.f32 %v1276_v29  ;;  %v1393_v13 = vand.u32 2147483648, %v1276_v29  ;;  %v1391_v11 = vand.u32 2147483647, %v1276_v29  ;;  %vm1387_vm4 = vweird.f32 %v1276_v29 }
 0x664   :  { %v1394_v38 = vor.u32 1.1754944e-38, %v1393_v13  ;;  %vm1392_vm6 = vcmp.eq.f32.partialorder %v1391_v11, 8.507059e+37 }
 0x668   :  { %v7358_v53 = vpop.eup %7357 }
 0x669   :  { %v1383_v9 = vmul.f32 %v7358_v53, %v1276_v29  ;;  %vm1388_vm2 = vweird.f32 %v7358_v53 }
 0x66a   :  { %vm1389_vm5 = vmor %vm1387_vm4, %vm1388_vm2 }
 0x66b   :  { %v1384_v10 = vsub.f32 1.0, %v1383_v9 }
 0x66d   :  { %v1385_v27 = vmul.f32 %v7358_v53, %v1384_v10 }
 0x66f   :  { %v1386_v2 = vadd.f32 %v7358_v53, %v1385_v27 }
 0x671   :  { %v1390_v12 = vsel %vm1389_vm5, %v7358_v53, %v1386_v2 }
 0x672   :  { %v1395_v0 = vsel %vm1392_vm6, %v1394_v38, %v1390_v12 }
 0x673   :  { %v1396_v18 = vmul.f32 %v8580_v59, %v1395_v0  ;;  %v7174_v59 = vunpack.i.h.bf16 %v7172_v52 }
 0x674   :  { %v1748_v55 = vpop.permute.xlu0 %1747 }
 0x675   :  { %6918 = vmatmul.msk.f32.vlgmr.msra.gmra.mxu2 %vm339_vm0, %v1396_v18  ;;  %6929 = vmatpush.xpose.msk.msra.mxu1 %vm339_vm0, %v1748_v55 }
 0x676   :  { %6933 = vmatpush.xpose.msk.msra.mxu2 %vm339_vm0, %v8602_v44  ;;  %v7183_v44 = vunpack.i.l.bf16 %v7182_v61 }
 0x678   :  { %6930 = vmatmul.msk.f32.vlgmr.msra.gmra.mxu1 %vm339_vm0, %v1746_v8 }
 0x679   :  { %2084 = vmatpush.msrb.mxu1 %v7178_v50 }
 0x67b   :  { %2188 = vmatpush.msra.mxu1 %v7184_v15 }
 0x67c   :  { %v7167_v34 = vpop.permute.xlu0 %7166 }
 0x67d   :  { %v7169_v51 = vunpack.i.h.bf16 %v7167_v34  ;;  %v7168_v35 = vunpack.i.l.bf16 %v7167_v34  ;;  %6926 = vmatmul.msk.f32.vlgmr.msrb.gmra.mxu2 %vm339_vm0, %v8515_v24 }
 0x67e   :  { %2136 = vmatpush.msrb.mxu2 %v7173_v26 }
 0x67f   :  { %2058 = vmatpush.msrb.mxu0 %v7169_v51  ;;  %2110 = vmatpush.msra.mxu3 %v7168_v35 }
 0x681   :  { %2162 = vmatpush.msra.mxu0 %v7179_v48  ;;  %2214 = vmatpush.msrb.mxu3 %v7174_v59  ;;  %v8719_v48 = vpop.permute.xlu2 %2301 }
 0x684   :  { %v8670_v6 = vpop.f32.mrf.mxu3  ;;  %v8717_v59 = vpop.permute.xlu0 %2303 }
 0x685   :  { %6934 = vmatmul.msk.f32.vlgmr.msra.gmra.mxu2 %vm339_vm0, %v1802_v31 }
 0x686   :  { %2240 = vmatpush.msra.mxu2 %v7183_v44 }
 0x68c   :  { %v8700_v2 = vpop.f32.mrf.mxu2  ;;  %v8723_v44 = vpop.permute.xlu0 %2247 }
 0x6a4   :  { %v8672_v7 = vpop.f32.mrf.mxu3 }
 0x6ac   :  { %v1686_v60 = vpop.f32.mrf.mxu3 }
 0x6ad   :  { %v1831_v5 = vmul.f32 %v1686_v60, %v8463_v16  ;;  %v8725_v60 = vpop.permute.xlu2 %2415 }
 0x6af   :  { %v1839_v24 = vadd.f32 %v1831_v5, %v8465_v19  ;;  %v8727_v5 = vpop.permute.xlu1 %2245 }
 0x6b1   :  { %v1851_v57 = vsel %vm339_vm0, %v1839_v24, -inf }
 0x6b2   :  { %1852 = vmax.xlane.f32.xlu2 %v1851_v57  ;;  %v8729_v57 = vpop.permute.xlu0 %2331 }
 0x6b3   :  { %v8677_v20 = vpop.f32.mrf.mxu0 }
 0x6b4   :  { %v1798_v4 = vpop.f32.mrf.mxu3 }
 0x6b5   :  { %v1835_v22 = vmul.f32 %v1798_v4, %v8463_v16 }
 0x6b7   :  { %v8681_v37 = vadd.f32 %v1835_v22, %v8465_v19 }
 0x6b9   :  { %v1863_v33 = vsel %vm339_vm0, %v8681_v37, -inf }
 0x6ba   :  { %1864 = vmax.xlane.f32.xlu2 %v1863_v33 }
 0x6bb   :  { %v8685_v23 = vpop.f32.mrf.mxu1  ;;  %v8687_v49 = vpop.f32.mrf.mxu0 }
 0x6c3   :  { %v8689_v3 = vpop.f32.mrf.mxu1  ;;  %v1630_v30 = vpop.f32.mrf.mxu0 }
 0x6c4   :  { %v1829_v54 = vmul.f32 %v1630_v30, %v8463_v16  ;;  %v8731_v30 = vpop.permute.xlu1 %2275 }
 0x6c6   :  { %v1837_v8 = vadd.f32 %v1829_v54, %v8465_v19 }
 0x6c8   :  { %v1845_v29 = vsel %vm339_vm0, %v1837_v8, -inf }
 0x6c9   :  { %1846 = vmax.xlane.f32.xlu0 %v1845_v29 }
 0x6cb   :  { %v1658_v31 = vpop.f32.mrf.mxu1  ;;  %v1742_v53 = vpop.f32.mrf.mxu0 }
 0x6cc   :  { %v1830_v9 = vmul.f32 %v1658_v31, %v8463_v16  ;;  %v1833_v52 = vmul.f32 %v1742_v53, %v8463_v16 }
 0x6ce   :  { %v1841_v10 = vadd.f32 %v1833_v52, %v8465_v19  ;;  %v1838_v13 = vadd.f32 %v1830_v9, %v8465_v19 }
 0x6d0   :  { %v1857_v27 = vsel %vm339_vm0, %v1841_v10, -inf  ;;  %v1848_v11 = vsel %vm339_vm0, %v1838_v13, -inf }
 0x6d1   :  { %1858 = vmax.xlane.f32.xlu1 %v1857_v27  ;;  %1849 = vmax.xlane.f32.xlu0 %v1848_v11 }
 0x6f5   :  { %v1770_v38 = vpop.f32.mrf.mxu1 }
 0x6f6   :  { %v1834_v58 = vmul.f32 %v1770_v38, %v8463_v16 }
 0x6f8   :  { %v8703_v12 = vpop.f32.mrf.mxu2  ;;  %v1842_v0 = vadd.f32 %v1834_v58, %v8465_v19 }
 0x6f9   :  { %10337 = vst [vmem:[#allocation32_spill] sm:$0xff] %v8703_v12 }
 0x6fa   :  { %v1860_v18 = vsel %vm339_vm0, %v1842_v0, -inf }
 0x6fb   :  { %1861 = vmax.xlane.f32.xlu0 %v1860_v18 }
 0x700   :  { %v1714_v61 = vpop.f32.mrf.mxu2 }
 0x701   :  { %v1832_v50 = vmul.f32 %v1714_v61, %v8463_v16 }
 0x703   :  { %v1840_v55 = vadd.f32 %v1832_v50, %v8465_v19 }
 0x705   :  { %v1854_v15 = vsel %vm339_vm0, %v1840_v55, -inf }
 0x706   :  { %1855 = vmax.xlane.f32.xlu1 %v1854_v15 }
 0x708   :  { %v1826_v26 = vpop.f32.mrf.mxu2 }
 0x709   :  { %v1836_v34 = vmul.f32 %v1826_v26, %v8463_v16 }
 0x70b   :  { %v1844_v51 = vadd.f32 %v1836_v34, %v8465_v19 }
 0x70d   :  { %v1866_v35 = vsel %vm339_vm0, %v1844_v51, -inf }
 0x70e   :  { %1867 = vmax.xlane.f32.xlu2 %v1866_v35 }
 0x70f   :  { %2359 = vrot.lane.b32.xlu0 %v8382_v1, %s7926_s0 }
 0x71f   :  { %2413 = vrot.lane.b32.xlu1 %v8394_v62, %s7925_s11 }
 0x725   :  { %v1853_v4 = vpop.xlane.xlu2 %1852 }
 0x726   :  { %2329 = vrot.lane.b32.xlu2 %v8378_v39, %s7925_s11  ;;  %v1871_v22 = vsub.f32 %v1839_v24, %v1853_v4 }
 0x728   :  { %v1881_v33 = vmul.f32 1.442695, %v1871_v22 }
 0x72a   :  { %7359 = vpow2.f32 %v1881_v33 }
 0x72d   :  { %v1865_v35 = vpop.xlane.xlu2 %1864 }
 0x72e   :  { %v1875_v33 = vsub.f32 %v8681_v37, %v1865_v35 }
 0x730   :  { %v8733_v52 = vpop.eup %7359 }
 0x731   :  { %v1899_v58 = vsel %vm339_vm0, %v8733_v52, 0.0 }
 0x73c   :  { %v1847_v54 = vpop.xlane.xlu0 %1846 }
 0x73d   :  { %v1869_v29 = vsub.f32 %v1837_v8, %v1847_v54 }
 0x73f   :  { %v1877_v31 = vmul.f32 1.442695, %v1869_v29 }
 0x741   :  { %7361 = vpow2.f32 %v1877_v31 }
 0x744   :  { %v1859_v53 = vpop.xlane.xlu1 %1858  ;;  %v1850_v9 = vpop.xlane.xlu0 %1849 }
 0x745   :  { %v1873_v27 = vsub.f32 %v1841_v10, %v1859_v53  ;;  %v1870_v11 = vsub.f32 %v1838_v13, %v1850_v9  ;;  %v1889_v53 = vmul.f32 1.442695, %v1875_v33 }
 0x747   :  { %v1885_v38 = vmul.f32 1.442695, %v1873_v27  ;;  %v1879_v24 = vmul.f32 1.442695, %v1870_v11  ;;  %v8737_v18 = vpop.eup %7361 }
 0x748   :  { %v1893_v8 = vsel %vm339_vm0, %v8737_v18, 0.0 }
 0x749   :  { %7363 = vpow2.f32 %v1885_v38  ;;  %1900 = vadd.xlane.f32.xlu1 %v1899_v58 }
 0x74a   :  { %7365 = vpow2.f32 %v1879_v24  ;;  %v7185_v24 = vpack.i.bf16 %v8374_v43, %v8365_v40 }
 0x74f   :  { %v8741_v61 = vpop.eup %7363  ;;  %1894 = vadd.xlane.f32.xlu2 %v1893_v8 }
 0x750   :  { %v1905_v10 = vsel %vm339_vm0, %v8741_v61, 0.0  ;;  %v8745_v13 = vpop.eup %7365 }
 0x751   :  { %1906 = vadd.xlane.f32.xlu0 %v1905_v10  ;;  %v1896_v50 = vsel %vm339_vm0, %v8745_v13, 0.0 }
 0x757   :  { %1897 = vadd.xlane.f32.xlu2 %v1896_v50 }
 0x762   :  { %2443 = vrot.lane.b32.xlu1 %v8426_v56, %s7926_s0 }
 0x76e   :  { %v1862_v15 = vpop.xlane.xlu0 %1861 }
 0x76f   :  { %v1874_v26 = vsub.f32 %v1842_v0, %v1862_v15 }
 0x771   :  { %v1887_v34 = vmul.f32 1.442695, %v1874_v26 }
 0x773   :  { %7367 = vpow2.f32 %v1887_v34 }
 0x779   :  { %v8751_v4 = vpop.eup %7367  ;;  %v1856_v22 = vpop.xlane.xlu1 %1855 }
 0x77a   :  { %v1872_v54 = vsub.f32 %v1840_v55, %v1856_v22  ;;  %v1908_v29 = vsel %vm339_vm0, %v8751_v4, 0.0 }
 0x77b   :  { %1909 = vadd.xlane.f32.xlu2 %v1908_v29 }
 0x77c   :  { %v1883_v31 = vmul.f32 1.442695, %v1872_v54 }
 0x77e   :  { %7369 = vpow2.f32 %v1883_v31 }
 0x77f   :  { %7371 = vpow2.f32 %v1889_v53 }
 0x781   :  { %v1868_v9 = vpop.xlane.xlu2 %1867  ;;  %v8796_v50 = vpop.permute.xlu0 %2359 }
 0x782   :  { %v1876_v27 = vsub.f32 %v1844_v51, %v1868_v9 }
 0x784   :  { %v8756_v0 = vpop.eup %7369  ;;  %v1891_v38 = vmul.f32 1.442695, %v1876_v27 }
 0x785   :  { %v1902_v11 = vsel %vm339_vm0, %v8756_v0, 0.0  ;;  %v8760_v58 = vpop.eup %7371 }
 0x786   :  { %1903 = vadd.xlane.f32.xlu0 %v1902_v11  ;;  %7373 = vpow2.f32 %v1891_v38  ;;  %v1911_v37 = vsel %vm339_vm0, %v8760_v58, 0.0 }
 0x789   :  { %v8793_v10 = vpop.permute.xlu2 %2329 }
 0x78c   :  { %1912 = vadd.xlane.f32.xlu1 %v1911_v37  ;;  %v8764_v55 = vpop.eup %7373 }
 0x78d   :  { %v1914_v51 = vsel %vm339_vm0, %v8764_v55, 0.0 }
 0x791   :  { %v8787_v8 = vpop.permute.xlu1 %2413 }
 0x793   :  { %2357 = vrot.lane.b32.xlu2 %v8382_v1, %s7925_s11 }
 0x794   :  { %1915 = vadd.xlane.f32.xlu1 %v1914_v51 }
 0x79a   :  { %2273 = vrot.lane.b32.xlu0 %v8370_v42, %s7925_s11 }
 0x79b   :  { %2441 = vrot.lane.b32.xlu2 %v8426_v56, %s7925_s11 }
 0x7a2   :  { %2387 = vrot.lane.b32.xlu0 %v8386_v63, %s7926_s0 }
 0x7a3   :  { %7196 = vrot.lane.b32.xlu2 %v8436_v45, %s7927_s6  ;;  %v7200_v45 = vpack.i.bf16 %v8426_v56, %v8386_v63 }
 0x7aa   :  { %7186 = vrot.lane.b32.xlu0 %v7185_v24, %s7927_s6 }
 0x7ab   :  { %2943 = vrot.lane.b32.xlu2 %v8374_v43, %s7928_s1 }
 0x7ad   :  { %2385 = vrot.lane.b32.xlu1 %v8386_v63, %s7925_s11 }
 0x7b2   :  { %2887 = vrot.lane.b32.xlu0 %v8365_v40, %s7928_s1 }
 0x7b5   :  { %7191 = vrot.lane.b32.xlu1 %v8402_v46, %s7927_s6 }
 0x7ba   :  { %7201 = vrot.lane.b32.xlu0 %v7200_v45, %s7927_s6 }
 0x7bc   :  { %v1901_v15 = vpop.xlane.xlu1 %1900 }
 0x7bd   :  { %7375 = vrcp.f32 %v1901_v15  ;;  %2885 = vrot.lane.b32.xlu1 %v8365_v40, %s7929_s4  ;;  %v1958_v33 = vand.u32 2147483648, %v1901_v15  ;;  %v1956_v29 = vand.u32 2147483647, %v1901_v15  ;;  %vm1952_vm8 = vweird.f32 %v1901_v15 }
 0x7bf   :  { %v1959_v38 = vor.u32 1.1754944e-38, %v1958_v33  ;;  %vm1957_vm10 = vcmp.eq.f32.partialorder %v1956_v29, 8.507059e+37 }
 0x7c2   :  { %v1895_v26 = vpop.xlane.xlu2 %1894 }
 0x7c3   :  { %v7376_v34 = vpop.eup %7375  ;;  %7377 = vrcp.f32 %v1895_v26  ;;  %v1926_v45 = vand.u32 2147483647, %v1895_v26  ;;  %v1928_v47 = vand.u32 2147483648, %v1895_v26  ;;  %vm1922_vm12 = vweird.f32 %v1895_v26 }
 0x7c4   :  { %v1948_v35 = vmul.f32 %v7376_v34, %v1901_v15  ;;  %v1907_v46 = vpop.xlane.xlu0 %1906  ;;  %vm1953_vm7 = vweird.f32 %v7376_v34 }
 0x7c5   :  { %7379 = vrcp.f32 %v1907_v46  ;;  %vm1954_vm9 = vmor %vm1952_vm8, %vm1953_vm7  ;;  %vm1927_vm14 = vcmp.eq.f32.partialorder %v1926_v45, 8.507059e+37  ;;  %vm1982_vm1 = vweird.f32 %v1907_v46 }
 0x7c6   :  { %v1949_v22 = vsub.f32 1.0, %v1948_v35 }
 0x7c8   :  { %v1950_v54 = vmul.f32 %v7376_v34, %v1949_v22 }
 0x7c9   :  { %v7378_v31 = vpop.eup %7377 }
 0x7ca   :  { %v1951_v53 = vadd.f32 %v7376_v34, %v1950_v54  ;;  %v1918_v9 = vmul.f32 %v7378_v31, %v1895_v26  ;;  %v1898_v27 = vpop.xlane.xlu2 %1897  ;;  %vm1923_vm11 = vweird.f32 %v7378_v31 }
 0x7cb   :  { %v7380_v11 = vpop.eup %7379  ;;  %7381 = vrcp.f32 %v1898_v27  ;;  %vm1924_vm13 = vmor %vm1922_vm12, %vm1923_vm11  ;;  %vm1937_vm6 = vweird.f32 %v1898_v27 }
 0x7cc   :  { %v1955_v37 = vsel %vm1954_vm9, %v7376_v34, %v1951_v53  ;;  %v1919_v51 = vsub.f32 1.0, %v1918_v9  ;;  %v1978_v24 = vmul.f32 %v7380_v11, %v1907_v46  ;;  %v1929_v34 = vor.u32 1.1754944e-38, %v1928_v47 }
 0x7cd   :  { %v1960_v35 = vsel %vm1957_vm10, %v1959_v38, %v1955_v37  ;;  %vm1983_vm15 = vweird.f32 %v7380_v11  ;;  %v1988_v9 = vand.u32 2147483648, %v1907_v46  ;;  %v1941_v47 = vand.u32 2147483647, %v1898_v27 }
 0x7ce   :  { %v1920_v41 = vmul.f32 %v7378_v31, %v1919_v51  ;;  %v1979_v22 = vsub.f32 1.0, %v1978_v24  ;;  %v1961_v12 = vmul.f32 %v8733_v52, %v1960_v35  ;;  %v1986_v52 = vand.u32 2147483647, %v1907_v46  ;;  %vm1984_vm2 = vmor %vm1982_vm1, %vm1983_vm15 }
 0x7cf   :  { %vm1942_vm8 = vcmp.eq.f32.partialorder %v1941_v47, 8.507059e+37 }
 0x7d0   :  { %v1921_v54 = vadd.f32 %v7378_v31, %v1920_v41  ;;  %v1980_v15 = vmul.f32 %v7380_v11, %v1979_v22  ;;  %6937 = vmatmul.msk.f32.vlgmr.msra.gmra.mxu3 %vm339_vm0, %v1961_v12  ;;  %v1943_v12 = vand.u32 2147483648, %v1898_v27  ;;  %vm1987_vm5 = vcmp.eq.f32.partialorder %v1986_v52, 8.507059e+37 }
 0x7d1   :  { %v7382_v36 = vpop.eup %7381  ;;  %6947 = vmatpush.xpose.msk.msra.mxu3 %vm339_vm0, %v8717_v59  ;;  %v1989_v59 = vor.u32 1.1754944e-38, %v1988_v9 }
 0x7d2   :  { %v1925_v33 = vsel %vm1924_vm13, %v7378_v31, %v1921_v54  ;;  %v1981_v29 = vadd.f32 %v7380_v11, %v1980_v15  ;;  %v1933_v53 = vmul.f32 %v7382_v36, %v1898_v27  ;;  %vm1938_vm4 = vweird.f32 %v7382_v36 }
 0x7d3   :  { %v1930_v38 = vsel %vm1927_vm14, %v1929_v34, %v1925_v33  ;;  %vm1939_vm7 = vmor %vm1937_vm6, %vm1938_vm4  ;;  %v1944_v46 = vor.u32 1.1754944e-38, %v1943_v12 }
 0x7d4   :  { %v1934_v41 = vsub.f32 1.0, %v1933_v53  ;;  %v1931_v26 = vmul.f32 %v8737_v18, %v1930_v38  ;;  %v1985_v37 = vsel %vm1984_vm2, %v7380_v11, %v1981_v29  ;;  %v8818_v22 = vpop.permute.xlu1 %2443 }
 0x7d5   :  { %v1990_v24 = vsel %vm1987_vm5, %v1989_v59, %v1985_v37 }
 0x7d6   :  { %v1935_v51 = vmul.f32 %v7382_v36, %v1934_v41  ;;  %6935 = vmatmul.msk.f32.vlgmr.msrb.gmra.mxu0 %vm339_vm0, %v1931_v26  ;;  %v1991_v35 = vmul.f32 %v8741_v61, %v1990_v24 }
 0x7d7   :  { %6943 = vmatpush.xpose.msk.msrb.mxu0 %vm339_vm0, %v8723_v44 }
 0x7d8   :  { %v1936_v31 = vadd.f32 %v7382_v36, %v1935_v51 }
 0x7da   :  { %v1940_v45 = vsel %vm1939_vm7, %v7382_v36, %v1936_v31 }
 0x7db   :  { %v1945_v18 = vsel %vm1942_vm8, %v1944_v46, %v1940_v45 }
 0x7dc   :  { %v1946_v11 = vmul.f32 %v8745_v13, %v1945_v18 }
 0x7de   :  { %6936 = vmatmul.msk.f32.vlgmr.msrb.gmra.mxu1 %vm339_vm0, %v1946_v11  ;;  %6939 = vmatmul.msk.f32.vlgmr.msra.gmra.mxu0 %vm339_vm0, %v1991_v35 }
 0x7df   :  { %6945 = vmatpush.xpose.msk.msrb.mxu1 %vm339_vm0, %v8731_v30  ;;  %6951 = vmatpush.xpose.msk.msra.mxu0 %vm339_vm0, %v8796_v50 }
 0x7e6   :  { %6944 = vmatmul.msk.f32.vlgmr.msrb.gmra.mxu0 %vm339_vm0, %v8727_v5 }
 0x7ee   :  { %v1910_v36 = vpop.xlane.xlu2 %1909 }
 0x7ef   :  { %7383 = vrcp.f32 %v1910_v36  ;;  %v2003_v54 = vand.u32 2147483648, %v1910_v36  ;;  %v2001_v30 = vand.u32 2147483647, %v1910_v36  ;;  %vm1997_vm10 = vweird.f32 %v1910_v36 }
 0x7f1   :  { %v2004_v5 = vor.u32 1.1754944e-38, %v2003_v54  ;;  %vm2002_vm12 = vcmp.eq.f32.partialorder %v2001_v30, 8.507059e+37 }
 0x7f5   :  { %v7384_v44 = vpop.eup %7383 }
 0x7f6   :  { %v1993_v27 = vmul.f32 %v7384_v44, %v1910_v36  ;;  %v2358_v13 = vpop.permute.xlu2 %2357  ;;  %vm1998_vm9 = vweird.f32 %v7384_v44 }
 0x7f7   :  { %6952 = vmatmul.msk.f32.vlgmr.msra.gmra.mxu0 %vm339_vm0, %v2358_v13  ;;  %vm1999_vm11 = vmor %vm1997_vm10, %vm1998_vm9 }
 0x7f8   :  { %v1994_v61 = vsub.f32 1.0, %v1993_v27 }
 0x7f9   :  { %v1904_v15 = vpop.xlane.xlu0 %1903 }
 0x7fa   :  { %v1995_v34 = vmul.f32 %v7384_v44, %v1994_v61  ;;  %7385 = vrcp.f32 %v1904_v15  ;;  %v1973_v26 = vand.u32 2147483648, %v1904_v15  ;;  %v1971_v37 = vand.u32 2147483647, %v1904_v15 }
 0x7fb   :  { %vm1967_vm14 = vweird.f32 %v1904_v15 }
 0x7fc   :  { %v1996_v50 = vadd.f32 %v7384_v44, %v1995_v34  ;;  %v1974_v46 = vor.u32 1.1754944e-38, %v1973_v26  ;;  %vm1972_vm1 = vcmp.eq.f32.partialorder %v1971_v37, 8.507059e+37 }
 0x7fe   :  { %v2000_v33 = vsel %vm1999_vm11, %v7384_v44, %v1996_v50 }
 0x7ff   :  { %v1913_v29 = vpop.xlane.xlu1 %1912  ;;  %v2005_v53 = vsel %vm2002_vm12, %v2004_v5, %v2000_v33 }
 0x800   :  { %v7386_v9 = vpop.eup %7385  ;;  %7387 = vrcp.f32 %v1913_v29  ;;  %v2006_v52 = vmul.f32 %v8751_v4, %v2005_v53  ;;  %v2018_v18 = vand.u32 2147483648, %v1913_v29  ;;  %v2016_v35 = vand.u32 2147483647, %v1913_v29  ;;  %v2442_v53 = vpop.permute.xlu2 %2441 }
 0x801   :  { %v1963_v38 = vmul.f32 %v7386_v9, %v1904_v15  ;;  %vm1968_vm13 = vweird.f32 %v7386_v9  ;;  %vm2012_vm4 = vweird.f32 %v1913_v29 }
 0x802   :  { %6940 = vmatmul.msk.f32.vlgmr.msra.gmra.mxu1 %vm339_vm0, %v2006_v52  ;;  %vm1969_vm15 = vmor %vm1967_vm14, %vm1968_vm13  ;;  %v2019_v61 = vor.u32 1.1754944e-38, %v2018_v18  ;;  %vm2017_vm6 = vcmp.eq.f32.partialorder %v2016_v35, 8.507059e+37 }
 0x803   :  { %v1964_v41 = vsub.f32 1.0, %v1963_v38 }
 0x805   :  { %v1965_v12 = vmul.f32 %v7386_v9, %v1964_v41 }
 0x806   :  { %v7388_v51 = vpop.eup %7387 }
 0x807   :  { %v1966_v47 = vadd.f32 %v7386_v9, %v1965_v12  ;;  %v2008_v59 = vmul.f32 %v7388_v51, %v1913_v29  ;;  %v1916_v31 = vpop.xlane.xlu1 %1915  ;;  %vm2013_vm2 = vweird.f32 %v7388_v51 }
 0x808   :  { %7389 = vrcp.f32 %v1916_v31  ;;  %vm2014_vm5 = vmor %vm2012_vm4, %vm2013_vm2  ;;  %v2033_v50 = vand.u32 2147483648, %v1916_v31  ;;  %v2031_v33 = vand.u32 2147483647, %v1916_v31  ;;  %vm2027_vm8 = vweird.f32 %v1916_v31  ;;  %v7197_v12 = vpop.permute.xlu2 %7196 }
 0x809   :  { %v1970_v24 = vsel %vm1969_vm15, %v7386_v9, %v1966_v47  ;;  %v2009_v45 = vsub.f32 1.0, %v2008_v59  ;;  %v7198_v47 = vunpack.i.l.bf16 %v7197_v12 }
 0x80a   :  { %v1975_v4 = vsel %vm1972_vm1, %v1974_v46, %v1970_v24  ;;  %vm2032_vm10 = vcmp.eq.f32.partialorder %v2031_v33, 8.507059e+37 }
 0x80b   :  { %v2010_v11 = vmul.f32 %v7388_v51, %v2009_v45  ;;  %v1976_v36 = vmul.f32 %v8756_v0, %v1975_v4 }
 0x80c   :  { %v2274_v44 = vpop.permute.xlu0 %2273 }
 0x80d   :  { %v2011_v27 = vadd.f32 %v7388_v51, %v2010_v11  ;;  %6938 = vmatmul.msk.f32.vlgmr.msrb.gmra.mxu2 %vm339_vm0, %v1976_v36  ;;  %6946 = vmatmul.msk.f32.vlgmr.msrb.gmra.mxu1 %vm339_vm0, %v2274_v44 }
 0x80e   :  { %v7390_v13 = vpop.eup %7389  ;;  %6949 = vmatpush.xpose.msk.msrb.mxu2 %vm339_vm0, %v8729_v57  ;;  %v2034_v57 = vor.u32 1.1754944e-38, %v2033_v50 }
 0x80f   :  { %v2015_v54 = vsel %vm2014_vm5, %v7388_v51, %v2011_v27  ;;  %v2023_v15 = vmul.f32 %v7390_v13, %v1916_v31  ;;  %vm2028_vm7 = vweird.f32 %v7390_v13  ;;  %v7199_v51 = vunpack.i.h.bf16 %v7197_v12 }
 0x810   :  { %v2020_v34 = vsel %vm2017_vm6, %v2019_v61, %v2015_v54  ;;  %vm2029_vm9 = vmor %vm2027_vm8, %vm2028_vm7 }
 0x811   :  { %v2024_v30 = vsub.f32 1.0, %v2023_v15  ;;  %v2021_v0 = vmul.f32 %v8760_v58, %v2020_v34 }
 0x813   :  { %v2025_v5 = vmul.f32 %v7390_v13, %v2024_v30  ;;  %6941 = vmatmul.msk.f32.vlgmr.msrb.gmra.mxu3 %vm339_vm0, %v2021_v0 }
 0x814   :  { %6955 = vmatpush.xpose.msk.msrb.mxu3 %vm339_vm0, %v8725_v60  ;;  %v2388_v29 = vpop.permute.xlu0 %2387 }
 0x815   :  { %v2026_v9 = vadd.f32 %v7390_v13, %v2025_v5  ;;  %6953 = vmatpush.xpose.msk.msra.mxu1 %vm339_vm0, %v2388_v29 }
 0x817   :  { %v2030_v38 = vsel %vm2029_vm9, %v7390_v13, %v2026_v9 }
 0x818   :  { %v2035_v58 = vsel %vm2032_vm10, %v2034_v57, %v2030_v38 }
 0x819   :  { %v2036_v52 = vmul.f32 %v8764_v55, %v2035_v58 }
 0x81b   :  { %6942 = vmatmul.msk.f32.vlgmr.msra.gmra.mxu2 %vm339_vm0, %v2036_v52  ;;  %6948 = vmatmul.msk.f32.vlgmr.msra.gmra.mxu3 %vm339_vm0, %v8719_v48 }
 0x81c   :  { %6957 = vmatpush.xpose.msk.msra.mxu2 %vm339_vm0, %v8818_v22  ;;  %v7187_v60 = vpop.permute.xlu0 %7186 }
 0x81d   :  { %v7189_v41 = vunpack.i.h.bf16 %v7187_v60  ;;  %v7188_v26 = vunpack.i.l.bf16 %v7187_v60 }
 0x81f   :  { %2750 = vmatpush.msra.mxu3 %v7189_v41  ;;  %v2386_v37 = vpop.permute.xlu1 %2385  ;;  %2698 = vmatpush.msrb.mxu0 %v7188_v26 }
 0x820   :  { %6954 = vmatmul.msk.f32.vlgmr.msra.gmra.mxu1 %vm339_vm0, %v2386_v37 }
 0x823   :  { %6950 = vmatmul.msk.f32.vlgmr.msrb.gmra.mxu2 %vm339_vm0, %v8793_v10  ;;  %6956 = vmatmul.msk.f32.vlgmr.msrb.gmra.mxu3 %vm339_vm0, %v8787_v8 }
 0x824   :  { %2776 = vmatpush.msrb.mxu2 %v7198_v47  ;;  %2854 = vmatpush.msrb.mxu3 %v7199_v51  ;;  %v8844_v48 = vpop.permute.xlu0 %2887 }
 0x827   :  { %v7192_v55 = vpop.permute.xlu1 %7191 }
 0x828   :  { %v7194_v22 = vunpack.i.h.bf16 %v7192_v55  ;;  %v7193_v59 = vunpack.i.l.bf16 %v7192_v55 }
 0x82a   :  { %2724 = vmatpush.msrb.mxu1 %v7193_v59  ;;  %2802 = vmatpush.msra.mxu0 %v7194_v22 }
 0x82b   :  { %6958 = vmatmul.msk.f32.vlgmr.msra.gmra.mxu2 %vm339_vm0, %v2442_v53 }
 0x82c   :  { %v7202_v31 = vpop.permute.xlu0 %7201 }
 0x82d   :  { %v7204_v46 = vunpack.i.h.bf16 %v7202_v31  ;;  %v7203_v24 = vunpack.i.l.bf16 %v7202_v31 }
 0x82f   :  { %2828 = vmatpush.msra.mxu1 %v7203_v24  ;;  %2880 = vmatpush.msra.mxu2 %v7204_v46 }
 0x853   :  { %v8847_v10 = vpop.f32.mrf.mxu0  ;;  %v8863_v30 = vpop.f32.mrf.mxu3 }
 0x85b   :  { %v8849_v45 = vpop.f32.mrf.mxu0  ;;  %v8857_v13 = vpop.f32.mrf.mxu1 }
 0x863   :  { %v2270_v8 = vpop.f32.mrf.mxu0 }
 0x864   :  { %v2469_v18 = vmul.f32 %v2270_v8, %v8463_v16 }
 0x866   :  { %v2477_v4 = vadd.f32 %v2469_v18, %v8465_v19 }
 0x868   :  { %v2485_v11 = vsel %vm339_vm0, %v2477_v4, -inf }
 0x869   :  { %2486 = vmax.xlane.f32.xlu0 %v2485_v11 }
 0x874   :  { %v2382_v35 = vpop.f32.mrf.mxu0 }
 0x875   :  { %v2473_v36 = vmul.f32 %v2382_v35, %v8463_v16 }
 0x877   :  { %v2481_v44 = vadd.f32 %v2473_v36, %v8465_v19 }
 0x879   :  { %v2497_v27 = vsel %vm339_vm0, %v2481_v44, -inf }
 0x87a   :  { %2498 = vmax.xlane.f32.xlu0 %v2497_v27 }
 0x87f   :  { %v8859_v61 = vpop.f32.mrf.mxu1 }
 0x88a   :  { %v2298_v54 = vpop.f32.mrf.mxu1 }
 0x88b   :  { %v2470_v15 = vmul.f32 %v2298_v54, %v8463_v16 }
 0x88d   :  { %v2478_v34 = vadd.f32 %v2470_v15, %v8465_v19 }
 0x88f   :  { %v2488_v0 = vsel %vm339_vm0, %v2478_v34, -inf }
 0x890   :  { %2489 = vmax.xlane.f32.xlu1 %v2488_v0  ;;  %v8866_v50 = vpop.f32.mrf.mxu2 }
 0x896   :  { %v8868_v5 = vpop.f32.mrf.mxu3 }
 0x89d   :  { %v2410_v33 = vpop.f32.mrf.mxu1 }
 0x89e   :  { %v2474_v29 = vmul.f32 %v2410_v33, %v8463_v16  ;;  %v8871_v53 = vpop.f32.mrf.mxu2  ;;  %v2326_v9 = vpop.f32.mrf.mxu3 }
 0x89f   :  { %v2471_v57 = vmul.f32 %v2326_v9, %v8463_v16 }
 0x8a0   :  { %v2482_v38 = vadd.f32 %v2474_v29, %v8465_v19  ;;  %v8901_v29 = vpop.permute.xlu1 %2885 }
 0x8a1   :  { %v2479_v58 = vadd.f32 %v2471_v57, %v8465_v19 }
 0x8a2   :  { %v2500_v52 = vsel %vm339_vm0, %v2482_v38, -inf }
 0x8a3   :  { %2501 = vmax.xlane.f32.xlu0 %v2500_v52  ;;  %v2491_v60 = vsel %vm339_vm0, %v2479_v58, -inf }
 0x8a4   :  { %2492 = vmax.xlane.f32.xlu2 %v2491_v60 }
 0x8a6   :  { %v2354_v41 = vpop.f32.mrf.mxu2  ;;  %v2438_v26 = vpop.f32.mrf.mxu3 }
 0x8a7   :  { %v2472_v12 = vmul.f32 %v2354_v41, %v8463_v16  ;;  %v2475_v37 = vmul.f32 %v2438_v26, %v8463_v16 }
 0x8a9   :  { %v2480_v51 = vadd.f32 %v2472_v12, %v8465_v19  ;;  %v2483_v47 = vadd.f32 %v2475_v37, %v8465_v19 }
 0x8ab   :  { %v2494_v55 = vsel %vm339_vm0, %v2480_v51, -inf  ;;  %v2503_v22 = vsel %vm339_vm0, %v2483_v47, -inf }
 0x8ac   :  { %2495 = vmax.xlane.f32.xlu2 %v2494_v55  ;;  %2504 = vmax.xlane.f32.xlu1 %v2503_v22 }
 0x8ae   :  { %v2466_v59 = vpop.f32.mrf.mxu2 }
 0x8af   :  { %v2476_v31 = vmul.f32 %v2466_v59, %v8463_v16 }
 0x8b1   :  { %v2484_v46 = vadd.f32 %v2476_v31, %v8465_v19 }
 0x8b3   :  { %v2506_v24 = vsel %vm339_vm0, %v2484_v46, -inf }
 0x8b4   :  { %2507 = vmax.xlane.f32.xlu2 %v2506_v24 }
 0x8b7   :  { %2941 = vrot.lane.b32.xlu0 %v8374_v43, %s7929_s4 }
 0x8c5   :  { %2915 = vrot.lane.b32.xlu1 %v8370_v42, %s7928_s1 }
 0x8cc   :  { %2913 = vrot.lane.b32.xlu2 %v8370_v42, %s7929_s4 }
 0x8dc   :  { %v2487_v8 = vpop.xlane.xlu0 %2486 }
 0x8dd   :  { %v2509_v18 = vsub.f32 %v2477_v4, %v2487_v8 }
 0x8df   :  { %v2517_v11 = vmul.f32 1.442695, %v2509_v18 }
 0x8e1   :  { %7391 = vpow2.f32 %v2517_v11 }
 0x8e7   :  { %v8893_v35 = vpop.eup %7391 }
 0x8e8   :  { %v2533_v54 = vsel %vm339_vm0, %v8893_v35, 0.0 }
 0x8ed   :  { %v2499_v36 = vpop.xlane.xlu0 %2498 }
 0x8ee   :  { %v2513_v27 = vsub.f32 %v2481_v44, %v2499_v36  ;;  %v8905_v44 = vpop.permute.xlu2 %2943 }
 0x8ef   :  { %2534 = vadd.xlane.f32.xlu1 %v2533_v54 }
 0x8f0   :  { %v2525_v15 = vmul.f32 1.442695, %v2513_v27 }
 0x8f2   :  { %7393 = vpow2.f32 %v2525_v15 }
 0x8f8   :  { %v8897_v0 = vpop.eup %7393 }
 0x8f9   :  { %v2545_v33 = vsel %vm339_vm0, %v8897_v0, 0.0 }
 0x8fa   :  { %2546 = vadd.xlane.f32.xlu1 %v2545_v33 }
 0x903   :  { %v2490_v4 = vpop.xlane.xlu1 %2489 }
 0x904   :  { %v2510_v9 = vsub.f32 %v2478_v34, %v2490_v4 }
 0x906   :  { %v2519_v57 = vmul.f32 1.442695, %v2510_v9 }
 0x908   :  { %7395 = vpow2.f32 %v2519_v57 }
 0x90e   :  { %v8903_v52 = vpop.eup %7395 }
 0x90f   :  { %v2536_v60 = vsel %vm339_vm0, %v8903_v52, 0.0 }
 0x910   :  { %2537 = vadd.xlane.f32.xlu2 %v2536_v60 }
 0x916   :  { %v2502_v41 = vpop.xlane.xlu0 %2501 }
 0x917   :  { %v2514_v26 = vsub.f32 %v2482_v38, %v2502_v41  ;;  %v2493_v12 = vpop.xlane.xlu2 %2492 }
 0x918   :  { %v2511_v37 = vsub.f32 %v2479_v58, %v2493_v12 }
 0x919   :  { %v2527_v55 = vmul.f32 1.442695, %v2514_v26 }
 0x91a   :  { %v2521_v22 = vmul.f32 1.442695, %v2511_v37 }
 0x91b   :  { %7397 = vpow2.f32 %v2527_v55 }
 0x91c   :  { %7399 = vpow2.f32 %v2521_v22 }
 0x91f   :  { %v2505_v59 = vpop.xlane.xlu1 %2504  ;;  %v2496_v34 = vpop.xlane.xlu2 %2495 }
 0x920   :  { %v2515_v31 = vsub.f32 %v2483_v47, %v2505_v59  ;;  %v2512_v24 = vsub.f32 %v2480_v51, %v2496_v34 }
 0x921   :  { %v8909_v8 = vpop.eup %7397 }
 0x922   :  { %v8911_v18 = vpop.eup %7399  ;;  %v2529_v11 = vmul.f32 1.442695, %v2515_v31  ;;  %v2523_v36 = vmul.f32 1.442695, %v2512_v24  ;;  %v2548_v27 = vsel %vm339_vm0, %v8909_v8, 0.0 }
 0x923   :  { %2549 = vadd.xlane.f32.xlu1 %v2548_v27  ;;  %v2539_v38 = vsel %vm339_vm0, %v8911_v18, 0.0 }
 0x924   :  { %7401 = vpow2.f32 %v2529_v11  ;;  %2540 = vadd.xlane.f32.xlu0 %v2539_v38 }
 0x925   :  { %7403 = vpow2.f32 %v2523_v36 }
 0x927   :  { %v2508_v58 = vpop.xlane.xlu2 %2507 }
 0x928   :  { %v2516_v54 = vsub.f32 %v2484_v46, %v2508_v58 }
 0x92a   :  { %v8917_v47 = vpop.eup %7401  ;;  %v2531_v51 = vmul.f32 1.442695, %v2516_v54 }
 0x92b   :  { %v8919_v15 = vpop.eup %7403  ;;  %v2551_v33 = vsel %vm339_vm0, %v8917_v47, 0.0 }
 0x92c   :  { %7405 = vpow2.f32 %v2531_v51  ;;  %2552 = vadd.xlane.f32.xlu2 %v2551_v33  ;;  %v2542_v4 = vsel %vm339_vm0, %v8919_v15, 0.0 }
 0x92d   :  { %2543 = vadd.xlane.f32.xlu0 %v2542_v4 }
 0x92f   :  { %v8955_v4 = vpop.permute.xlu2 %2913 }
 0x932   :  { %v8925_v9 = vpop.eup %7405 }
 0x933   :  { %v2554_v57 = vsel %vm339_vm0, %v8925_v9, 0.0 }
 0x934   :  { %2555 = vadd.xlane.f32.xlu2 %v2554_v57 }
 0x937   :  { %v8947_v46 = vpop.permute.xlu1 %2915 }
 0x93c   :  { %2969 = vrot.lane.b32.xlu1 %v8378_v39, %s7929_s4 }
 0x941   :  { %2971 = vrot.lane.b32.xlu0 %v8378_v39, %s7928_s1 }
 0x944   :  { %3055 = vrot.lane.b32.xlu1 %v8394_v62, %s7928_s1 }
 0x949   :  { %2997 = vrot.lane.b32.xlu0 %v8382_v1, %s7929_s4 }
 0x94c   :  { %3025 = vrot.lane.b32.xlu1 %v8386_v63, %s7929_s4  ;;  %2999 = vrot.lane.b32.xlu2 %v8382_v1, %s7928_s1 }
 0x951   :  { %3027 = vrot.lane.b32.xlu0 %v8386_v63, %s7928_s1 }
 0x954   :  { %3053 = vrot.lane.b32.xlu2 %v8394_v62, %s7929_s4 }
 0x959   :  { %3081 = vrot.lane.b32.xlu0 %v8426_v56, %s7929_s4 }
 0x95c   :  { %3083 = vrot.lane.b32.xlu2 %v8426_v56, %s7928_s1 }
 0x962   :  { %v2535_v60 = vpop.xlane.xlu1 %2534 }
 0x963   :  { %7407 = vrcp.f32 %v2535_v60  ;;  %v2568_v37 = vand.u32 2147483648, %v2535_v60  ;;  %v2566_v59 = vand.u32 2147483647, %v2535_v60  ;;  %vm2562_vm12 = vweird.f32 %v2535_v60 }
 0x965   :  { %v2569_v31 = vor.u32 1.1754944e-38, %v2568_v37  ;;  %vm2567_vm14 = vcmp.eq.f32.partialorder %v2566_v59, 8.507059e+37 }
 0x969   :  { %v7408_v41 = vpop.eup %7407 }
 0x96a   :  { %v2558_v26 = vmul.f32 %v7408_v41, %v2535_v60  ;;  %vm2563_vm11 = vweird.f32 %v7408_v41 }
 0x96b   :  { %vm2564_vm13 = vmor %vm2562_vm12, %vm2563_vm11 }
 0x96c   :  { %v2559_v12 = vsub.f32 1.0, %v2558_v26 }
 0x96d   :  { %v2547_v55 = vpop.xlane.xlu1 %2546 }
 0x96e   :  { %v2560_v22 = vmul.f32 %v7408_v41, %v2559_v12  ;;  %7409 = vrcp.f32 %v2547_v55  ;;  %v2628_v54 = vand.u32 2147483648, %v2547_v55  ;;  %v2626_v33 = vand.u32 2147483647, %v2547_v55 }
 0x96f   :  { %vm2622_vm1 = vweird.f32 %v2547_v55 }
 0x970   :  { %v2561_v34 = vadd.f32 %v7408_v41, %v2560_v22  ;;  %v2629_v60 = vor.u32 1.1754944e-38, %v2628_v54  ;;  %vm2627_vm4 = vcmp.eq.f32.partialorder %v2626_v33, 8.507059e+37 }
 0x972   :  { %v2565_v24 = vsel %vm2564_vm13, %v7408_v41, %v2561_v34  ;;  %v8961_v34 = vpop.permute.xlu0 %2941 }
 0x973   :  { %v2570_v11 = vsel %vm2567_vm14, %v2569_v31, %v2565_v24 }
 0x974   :  { %v7410_v36 = vpop.eup %7409  ;;  %v2571_v27 = vmul.f32 %v8893_v35, %v2570_v11 }
 0x975   :  { %v2618_v38 = vmul.f32 %v7410_v36, %v2547_v55  ;;  %vm2623_vm15 = vweird.f32 %v7410_v36 }
 0x976   :  { %6959 = vmatmul.msk.f32.vlgmr.msrb.gmra.mxu0 %vm339_vm0, %v2571_v27  ;;  %vm2624_vm2 = vmor %vm2622_vm1, %vm2623_vm15 }
 0x977   :  { %v2619_v58 = vsub.f32 1.0, %v2618_v38  ;;  %6967 = vmatpush.xpose.msk.msrb.mxu0 %vm339_vm0, %v8844_v48 }
 0x979   :  { %v2620_v51 = vmul.f32 %v7410_v36, %v2619_v58 }
 0x97b   :  { %v2621_v57 = vadd.f32 %v7410_v36, %v2620_v51 }
 0x97d   :  { %v2625_v41 = vsel %vm2624_vm2, %v7410_v36, %v2621_v57 }
 0x97e   :  { %v2630_v35 = vsel %vm2627_vm4, %v2629_v60, %v2625_v41 }
 0x97f   :  { %v2631_v26 = vmul.f32 %v8897_v0, %v2630_v35 }
 0x981   :  { %6963 = vmatmul.msk.f32.vlgmr.msra.gmra.mxu0 %vm339_vm0, %v2631_v26 }
 0x983   :  { %v2538_v12 = vpop.xlane.xlu2 %2537 }
 0x984   :  { %7411 = vrcp.f32 %v2538_v12  ;;  %v2583_v59 = vand.u32 2147483648, %v2538_v12  ;;  %v2581_v31 = vand.u32 2147483647, %v2538_v12  ;;  %vm2577_vm6 = vweird.f32 %v2538_v12 }
 0x986   :  { %v2584_v0 = vor.u32 1.1754944e-38, %v2583_v59  ;;  %vm2582_vm8 = vcmp.eq.f32.partialorder %v2581_v31, 8.507059e+37 }
 0x989   :  { %6968 = vmatmul.msk.f32.vlgmr.msrb.gmra.mxu0 %vm339_vm0, %v8901_v29 }
 0x98a   :  { %v7412_v48 = vpop.eup %7411 }
 0x98b   :  { %v2573_v37 = vmul.f32 %v7412_v48, %v2538_v12  ;;  %vm2578_vm5 = vweird.f32 %v7412_v48 }
 0x98c   :  { %vm2579_vm7 = vmor %vm2577_vm6, %vm2578_vm5 }
 0x98d   :  { %v2574_v22 = vsub.f32 1.0, %v2573_v37 }
 0x98f   :  { %v2575_v55 = vmul.f32 %v7412_v48, %v2574_v22 }
 0x991   :  { %v2576_v24 = vadd.f32 %v7412_v48, %v2575_v55 }
 0x993   :  { %v2580_v11 = vsel %vm2579_vm7, %v7412_v48, %v2576_v24 }
 0x994   :  { %v2585_v36 = vsel %vm2582_vm8, %v2584_v0, %v2580_v11 }
 0x995   :  { %v2586_v27 = vmul.f32 %v8903_v52, %v2585_v36 }
 0x996   :  { %v2550_v38 = vpop.xlane.xlu1 %2549 }
 0x997   :  { %7413 = vrcp.f32 %v2550_v38  ;;  %v2541_v29 = vpop.xlane.xlu0 %2540  ;;  %6960 = vmatmul.msk.f32.vlgmr.msrb.gmra.mxu1 %vm339_vm0, %v2586_v27  ;;  %v2643_v35 = vand.u32 2147483648, %v2550_v38  ;;  %v2641_v12 = vand.u32 2147483647, %v2550_v38  ;;  %vm2637_vm11 = vweird.f32 %v2550_v38 }
 0x998   :  { %7415 = vrcp.f32 %v2541_v29  ;;  %6969 = vmatpush.xpose.msk.msrb.mxu1 %vm339_vm0, %v8947_v46  ;;  %v2598_v46 = vand.u32 2147483648, %v2541_v29  ;;  %vm2592_vm13 = vweird.f32 %v2541_v29  ;;  %v2596_v55 = vand.u32 2147483647, %v2541_v29 }
 0x999   :  { %v2644_v22 = vor.u32 1.1754944e-38, %v2643_v35  ;;  %vm2642_vm14 = vcmp.eq.f32.partialorder %v2641_v12, 8.507059e+37 }
 0x99a   :  { %vm2597_vm1 = vcmp.eq.f32.partialorder %v2596_v55, 8.507059e+37 }
 0x99d   :  { %v7414_v58 = vpop.eup %7413 }
 0x99e   :  { %v7416_v54 = vpop.eup %7415  ;;  %v2633_v51 = vmul.f32 %v7414_v58, %v2550_v38  ;;  %vm2638_vm9 = vweird.f32 %v7414_v58 }
 0x99f   :  { %v2588_v33 = vmul.f32 %v7416_v54, %v2541_v29  ;;  %v2553_v57 = vpop.xlane.xlu2 %2552  ;;  %vm2593_vm10 = vweird.f32 %v7416_v54  ;;  %vm2639_vm12 = vmor %vm2637_vm11, %vm2638_vm9 }
 0x9a0   :  { %v2634_v60 = vsub.f32 1.0, %v2633_v51  ;;  %v8967_v41 = vpop.xlane.xlu0 %2543  ;;  %7417 = vrcp.f32 %v2553_v57  ;;  %vm8970_vm15 = vmor %vm2592_vm13, %vm2593_vm10  ;;  %vm2652_vm5 = vweird.f32 %v2553_v57 }
 0x9a1   :  { %v2589_v52 = vsub.f32 1.0, %v2588_v33  ;;  %7419 = vrcp.f32 %v8967_v41  ;;  %v2599_v33 = vor.u32 1.1754944e-38, %v2598_v46  ;;  %vm2607_vm6 = vweird.f32 %v8967_v41 }
 0x9a2   :  { %v2635_v26 = vmul.f32 %v7414_v58, %v2634_v60 }
 0x9a3   :  { %v2590_v48 = vmul.f32 %v7416_v54, %v2589_v52  ;;  %v2656_v52 = vand.u32 2147483647, %v2553_v57 }
 0x9a4   :  { %v2636_v37 = vadd.f32 %v7414_v58, %v2635_v26  ;;  %v2658_v26 = vand.u32 2147483648, %v2553_v57 }
 0x9a5   :  { %v2591_v59 = vadd.f32 %v7416_v54, %v2590_v48  ;;  %v2613_v48 = vand.u32 2147483648, %v8967_v41  ;;  %vm2657_vm9 = vcmp.eq.f32.partialorder %v2656_v52, 8.507059e+37 }
 0x9a6   :  { %v7418_v31 = vpop.eup %7417  ;;  %v2640_v24 = vsel %vm2639_vm12, %v7414_v58, %v2636_v37 }
 0x9a7   :  { %v7420_v11 = vpop.eup %7419  ;;  %v2595_v36 = vsel %vm8970_vm15, %v7416_v54, %v2591_v59  ;;  %v2648_v27 = vmul.f32 %v7418_v31, %v2553_v57  ;;  %v2556_v51 = vpop.xlane.xlu2 %2555  ;;  %v2645_v38 = vsel %vm2642_vm14, %v2644_v22, %v2640_v24  ;;  %vm2653_vm2 = vweird.f32 %v7418_v31 }
 0x9a8   :  { %v2603_v60 = vmul.f32 %v7420_v11, %v8967_v41  ;;  %7421 = vrcp.f32 %v2556_v51  ;;  %v2646_v58 = vmul.f32 %v8909_v8, %v2645_v38  ;;  %v2600_v12 = vsel %vm2597_vm1, %v2599_v33, %v2595_v36  ;;  %vm2654_vm7 = vmor %vm2652_vm5, %vm2653_vm2 }
 0x9a9   :  { %v2649_v29 = vsub.f32 1.0, %v2648_v27  ;;  %v2601_v54 = vmul.f32 %v8911_v18, %v2600_v12  ;;  %vm2608_vm4 = vweird.f32 %v7420_v11  ;;  %v2611_v22 = vand.u32 2147483647, %v8967_v41 }
 0x9aa   :  { %v2604_v35 = vsub.f32 1.0, %v2603_v60  ;;  %6964 = vmatmul.msk.f32.vlgmr.msra.gmra.mxu1 %vm339_vm0, %v2646_v58  ;;  %v2659_v24 = vor.u32 1.1754944e-38, %v2658_v26  ;;  %vm2609_vm8 = vmor %vm2607_vm6, %vm2608_vm4  ;;  %v2614_v18 = vor.u32 1.1754944e-38, %v2613_v48  ;;  %v2673_v58 = vand.u32 2147483648, %v2556_v51 }
 0x9ab   :  { %v2650_v37 = vmul.f32 %v7418_v31, %v2649_v29  ;;  %6961 = vmatmul.msk.f32.vlgmr.msra.gmra.mxu3 %vm339_vm0, %v2601_v54  ;;  %vm2612_vm10 = vcmp.eq.f32.partialorder %v2611_v22, 8.507059e+37  ;;  %v2671_v26 = vand.u32 2147483647, %v2556_v51  ;;  %vm2667_vm12 = vweird.f32 %v2556_v51 }
 0x9ac   :  { %v2605_v46 = vmul.f32 %v7420_v11, %v2604_v35  ;;  %6971 = vmatpush.xpose.msk.msra.mxu3 %vm339_vm0, %v8905_v44 }
 0x9ad   :  { %v2651_v59 = vadd.f32 %v7418_v31, %v2650_v37  ;;  %vm2672_vm14 = vcmp.eq.f32.partialorder %v2671_v26, 8.507059e+37 }
 0x9ae   :  { %v7422_v8 = vpop.eup %7421  ;;  %v2606_v55 = vadd.f32 %v7420_v11, %v2605_v46  ;;  %v2970_v0 = vpop.permute.xlu1 %2969 }
 0x9af   :  { %v2655_v36 = vsel %vm2654_vm7, %v7418_v31, %v2651_v59  ;;  %v2663_v27 = vmul.f32 %v7422_v8, %v2556_v51  ;;  %v3000_v38 = vpop.permute.xlu2 %2999  ;;  %vm2668_vm11 = vweird.f32 %v7422_v8 }
 0x9b0   :  { %v2610_v33 = vsel %vm2609_vm8, %v7420_v11, %v2606_v55  ;;  %6975 = vmatpush.xpose.msk.msra.mxu0 %vm339_vm0, %v3000_v38  ;;  %v2660_v57 = vsel %vm2657_vm9, %v2659_v24, %v2655_v36  ;;  %vm2669_vm13 = vmor %vm2667_vm12, %vm2668_vm11 }
 0x9b1   :  { %v2664_v60 = vsub.f32 1.0, %v2663_v27  ;;  %v2615_v29 = vsel %vm2612_vm10, %v2614_v18, %v2610_v33  ;;  %v2661_v41 = vmul.f32 %v8917_v47, %v2660_v57  ;;  %v2674_v47 = vor.u32 1.1754944e-38, %v2673_v58 }
 0x9b2   :  { %v2616_v35 = vmul.f32 %v8919_v15, %v2615_v29  ;;  %6970 = vmatmul.msk.f32.vlgmr.msrb.gmra.mxu1 %vm339_vm0, %v8955_v4 }
 0x9b3   :  { %v2665_v44 = vmul.f32 %v7422_v8, %v2664_v60  ;;  %v2972_v12 = vpop.permute.xlu0 %2971  ;;  %6965 = vmatmul.msk.f32.vlgmr.msrb.gmra.mxu3 %vm339_vm0, %v2661_v41 }
 0x9b4   :  { %6962 = vmatmul.msk.f32.vlgmr.msrb.gmra.mxu2 %vm339_vm0, %v2616_v35 }
 0x9b5   :  { %v2666_v31 = vadd.f32 %v7422_v8, %v2665_v44  ;;  %6973 = vmatpush.xpose.msk.msrb.mxu2 %vm339_vm0, %v2972_v12 }
 0x9b6   :  { %v3056_v11 = vpop.permute.xlu1 %3055 }
 0x9b7   :  { %v2670_v52 = vsel %vm2669_vm13, %v7422_v8, %v2666_v31  ;;  %v3054_v15 = vpop.permute.xlu2 %3053  ;;  %6979 = vmatpush.xpose.msk.msrb.mxu3 %vm339_vm0, %v3056_v11 }
 0x9b8   :  { %v2675_v48 = vsel %vm2672_vm14, %v2674_v47, %v2670_v52 }
 0x9b9   :  { %v2676_v37 = vmul.f32 %v8925_v9, %v2675_v48 }
 0x9bb   :  { %v2998_v4 = vpop.permute.xlu0 %2997  ;;  %6972 = vmatmul.msk.f32.vlgmr.msra.gmra.mxu3 %vm339_vm0, %v8961_v34 }
 0x9bc   :  { %6966 = vmatmul.msk.f32.vlgmr.msra.gmra.mxu2 %vm339_vm0, %v2676_v37  ;;  %6976 = vmatmul.msk.f32.vlgmr.msra.gmra.mxu0 %vm339_vm0, %v2998_v4 }
 0x9be   :  { %v3026_v46 = vpop.permute.xlu1 %3025 }
 0x9bf   :  { %v3084_v51 = vpop.permute.xlu2 %3083 }
 0x9c0   :  { %6981 = vmatpush.xpose.msk.msra.mxu2 %vm339_vm0, %v3084_v51 }
 0x9c3   :  { %v3028_v54 = vpop.permute.xlu0 %3027  ;;  %6980 = vmatmul.msk.f32.vlgmr.msrb.gmra.mxu3 %vm339_vm0, %v3054_v15 }
 0x9c4   :  { %6974 = vmatmul.msk.f32.vlgmr.msrb.gmra.mxu2 %vm339_vm0, %v2970_v0  ;;  %6977 = vmatpush.xpose.msk.msra.mxu1 %vm339_vm0, %v3028_v54 }
 0x9c7   :  { %6978 = vmatmul.msk.f32.vlgmr.msra.gmra.mxu1 %vm339_vm0, %v3026_v46 }
 0x9cb   :  { %v3082_v9 = vpop.permute.xlu0 %3081 }
 0x9cc   :  { %6982 = vmatmul.msk.f32.vlgmr.msra.gmra.mxu2 %vm339_vm0, %v3082_v9 }
 0x9f3   :  { %v9006_v22 = vpop.f32.mrf.mxu0 }
 0x9fe   :  { %v9008_v59 = vpop.f32.mrf.mxu0 }
 0xa06   :  { %v2910_v34 = vpop.f32.mrf.mxu0 }
 0xa07   :  { %v3109_v8 = vmul.f32 %v2910_v34, %v8463_v16 }
 0xa09   :  { %v3117_v55 = vadd.f32 %v3109_v8, %v8465_v19 }
 0xa0b   :  { %v3125_v24 = vsel %vm339_vm0, %v3117_v55, -inf }
 0xa0c   :  { %3126 = vmax.xlane.f32.xlu1 %v3125_v24 }
 0xa14   :  { %v9013_v0 = vpop.f32.mrf.mxu1 }
 0xa27   :  { %v9015_v18 = vpop.f32.mrf.mxu1 }
 0xa2e   :  { %v9017_v36 = vpop.f32.mrf.mxu3 }
 0xa2f   :  { %v2938_v27 = vpop.f32.mrf.mxu1 }
 0xa30   :  { %v3110_v38 = vmul.f32 %v2938_v27, %v8463_v16 }
 0xa32   :  { %v3118_v33 = vadd.f32 %v3110_v38, %v8465_v19 }
 0xa34   :  { %v3128_v57 = vsel %vm339_vm0, %v3118_v33, -inf }
 0xa35   :  { %3129 = vmax.xlane.f32.xlu2 %v3128_v57 }
 0xa36   :  { %v9024_v29 = vpop.f32.mrf.mxu3 }
 0xa37   :  { %v9022_v60 = vpop.f32.mrf.mxu2 }
 0xa39   :  { %v3022_v41 = vpop.f32.mrf.mxu0 }
 0xa3a   :  { %v3113_v58 = vmul.f32 %v3022_v41, %v8463_v16 }
 0xa3c   :  { %v3121_v35 = vadd.f32 %v3113_v58, %v8465_v19 }
 0xa3e   :  { %v3137_v44 = vsel %vm339_vm0, %v3121_v35, -inf  ;;  %v2966_v12 = vpop.f32.mrf.mxu3 }
 0xa3f   :  { %3138 = vmax.xlane.f32.xlu2 %v3137_v44  ;;  %v9029_v26 = vpop.f32.mrf.mxu2  ;;  %v3111_v31 = vmul.f32 %v2966_v12, %v8463_v16 }
 0xa41   :  { %v3119_v47 = vadd.f32 %v3111_v31, %v8465_v19 }
 0xa43   :  { %v3131_v15 = vsel %vm339_vm0, %v3119_v47, -inf }
 0xa44   :  { %v3050_v11 = vpop.f32.mrf.mxu1  ;;  %3132 = vmax.xlane.f32.xlu0 %v3131_v15 }
 0xa45   :  { %v3114_v52 = vmul.f32 %v3050_v11, %v8463_v16 }
 0xa46   :  { %v3078_v4 = vpop.f32.mrf.mxu3 }
 0xa47   :  { %v2994_v48 = vpop.f32.mrf.mxu2  ;;  %v3122_v51 = vadd.f32 %v3114_v52, %v8465_v19  ;;  %v3115_v46 = vmul.f32 %v3078_v4, %v8463_v16 }
 0xa48   :  { %v3112_v37 = vmul.f32 %v2994_v48, %v8463_v16 }
 0xa49   :  { %v3140_v34 = vsel %vm339_vm0, %v3122_v51, -inf  ;;  %v3123_v27 = vadd.f32 %v3115_v46, %v8465_v19 }
 0xa4a   :  { %v3120_v54 = vadd.f32 %v3112_v37, %v8465_v19 }
 0xa4b   :  { %v3143_v57 = vsel %vm339_vm0, %v3123_v27, -inf }
 0xa4c   :  { %v3134_v9 = vsel %vm339_vm0, %v3120_v54, -inf  ;;  %3141 = vmax.xlane.f32.xlu0 %v3140_v34 }
 0xa4d   :  { %3135 = vmax.xlane.f32.xlu1 %v3134_v9 }
 0xa4f   :  { %v3106_v8 = vpop.f32.mrf.mxu2 }
 0xa50   :  { %v3116_v24 = vmul.f32 %v3106_v8, %v8463_v16 }
 0xa52   :  { %v9044_v38 = vadd.f32 %v3116_v24, %v8465_v19 }
 0xa54   :  { %v3146_v41 = vsel %vm339_vm0, %v9044_v38, -inf }
 0xa55   :  { %3144 = vmax.xlane.f32.xlu1 %v3143_v57  ;;  %3147 = vmax.xlane.f32.xlu2 %v3146_v41 }
 0xa7f   :  { %v3127_v58 = vpop.xlane.xlu1 %3126 }
 0xa80   :  { %v3149_v44 = vsub.f32 %v3117_v55, %v3127_v58 }
 0xa82   :  { %v3157_v12 = vmul.f32 1.442695, %v3149_v44 }
 0xa84   :  { %7423 = vpow2.f32 %v3157_v12 }
 0xa8a   :  { %v9049_v31 = vpop.eup %7423 }
 0xa8b   :  { %v3173_v16 = vsel %vm339_vm0, %v9049_v31, 0.0 }
 0xa8c   :  { %3174 = vadd.xlane.f32.xlu0 %v3173_v16 }
 0xaa8   :  { %v3130_v11 = vpop.xlane.xlu2 %3129 }
 0xaa9   :  { %v3150_v19 = vsub.f32 %v3118_v33, %v3130_v11 }
 0xaab   :  { %v3159_v52 = vmul.f32 1.442695, %v3150_v19 }
 0xaad   :  { %7425 = vpow2.f32 %v3159_v52 }
 0xab2   :  { %v3139_v15 = vpop.xlane.xlu2 %3138 }
 0xab3   :  { %v3153_v48 = vsub.f32 %v3121_v35, %v3139_v15  ;;  %v9053_v37 = vpop.eup %7425 }
 0xab4   :  { %v3176_v55 = vsel %vm339_vm0, %v9053_v37, 0.0 }
 0xab5   :  { %v3165_v4 = vmul.f32 1.442695, %v3153_v48  ;;  %3177 = vadd.xlane.f32.xlu1 %v3176_v55 }
 0xab7   :  { %7427 = vpow2.f32 %v3165_v4  ;;  %v3133_v46 = vpop.xlane.xlu0 %3132  ;;  %v7210_v4 = vpack.i.bf16 %v8378_v39, %v8374_v43 }
 0xab8   :  { %v3151_v9 = vsub.f32 %v3119_v47, %v3133_v46 }
 0xaba   :  { %v3161_v34 = vmul.f32 1.442695, %v3151_v9 }
 0xabc   :  { %7429 = vpow2.f32 %v3161_v34 }
 0xabd   :  { %v9057_v8 = vpop.eup %7427 }
 0xabe   :  { %v3185_v33 = vsel %vm339_vm0, %v9057_v8, 0.0 }
 0xabf   :  { %3186 = vadd.xlane.f32.xlu0 %v3185_v33  ;;  %v3142_v35 = vpop.xlane.xlu0 %3141 }
 0xac0   :  { %v3136_v24 = vpop.xlane.xlu1 %3135  ;;  %v3154_v57 = vsub.f32 %v3122_v51, %v3142_v35  ;;  %v7205_v51 = vpack.i.bf16 %v8370_v42, %v8365_v40  ;;  %v7215_v42 = vpack.i.bf16 %v8394_v62, %v8386_v63 }
 0xac1   :  { %v3152_v44 = vsub.f32 %v3120_v54, %v3136_v24 }
 0xac2   :  { %v9061_v41 = vpop.eup %7429  ;;  %v3167_v58 = vmul.f32 1.442695, %v3154_v57 }
 0xac3   :  { %v3179_v12 = vsel %vm339_vm0, %v9061_v41, 0.0  ;;  %v3163_v47 = vmul.f32 1.442695, %v3152_v44 }
 0xac4   :  { %7431 = vpow2.f32 %v3167_v58  ;;  %3180 = vadd.xlane.f32.xlu2 %v3179_v12 }
 0xac5   :  { %7433 = vpow2.f32 %v3163_v47 }
 0xac8   :  { %v3145_v16 = vpop.xlane.xlu1 %3144 }
 0xac9   :  { %v3155_v19 = vsub.f32 %v3123_v27, %v3145_v16 }
 0xaca   :  { %v9065_v11 = vpop.eup %7431 }
 0xacb   :  { %v3188_v52 = vsel %vm339_vm0, %v9065_v11, 0.0  ;;  %v3169_v54 = vmul.f32 1.442695, %v3155_v19  ;;  %v9071_v15 = vpop.eup %7433 }
 0xacc   :  { %3189 = vadd.xlane.f32.xlu0 %v3188_v52  ;;  %v3182_v48 = vsel %vm339_vm0, %v9071_v15, 0.0 }
 0xacd   :  { %7435 = vpow2.f32 %v3169_v54 }
 0xace   :  { %7206 = vrot.lane.b32.xlu1 %v7205_v51, %s7930_s14 }
 0xad3   :  { %v9076_v27 = vpop.eup %7435 }
 0xad4   :  { %3183 = vadd.xlane.f32.xlu0 %v3182_v48  ;;  %v3191_v40 = vsel %vm339_vm0, %v9076_v27, 0.0 }
 0xad6   :  { %3421 = vrot.lane.b32.xlu1 %v8382_v1, %s7930_s14  ;;  %v3148_v1 = vpop.xlane.xlu2 %3147 }
 0xad7   :  { %v3156_v43 = vsub.f32 %v9044_v38, %v3148_v1 }
 0xad9   :  { %v3171_v39 = vmul.f32 1.442695, %v3156_v43 }
 0xadb   :  { %7437 = vpow2.f32 %v3171_v39 }
 0xadc   :  { %3192 = vadd.xlane.f32.xlu0 %v3191_v40  ;;  %7211 = vrot.lane.b32.xlu2 %v7210_v4, %s7930_s14 }
 0xade   :  { %3499 = vrot.lane.b32.xlu1 %v8426_v56, %s7930_s14 }
 0xae1   :  { %v9098_v56 = vpop.eup %7437 }
 0xae2   :  { %v3194_v63 = vsel %vm339_vm0, %v9098_v56, 0.0 }
 0xae6   :  { %3533 = vrot.lane.b32.xlu1 %v8847_v10, %s10321_s8 }
 0xaee   :  { %3567 = vrot.lane.b32.xlu1 %v9013_v0, %s7931_s12 }
 0xaf0   :  { %7216 = vrot.lane.b32.xlu0 %v7215_v42, %s7930_s14 }
 0xaf6   :  { %3537 = vrot.lane.b32.xlu1 %v8863_v30, %s10321_s8 }
 0xaf8   :  { %3565 = vrot.lane.b32.xlu0 %v9006_v22, %s7931_s12 }
 0xafe   :  { %3539 = vrot.lane.b32.xlu1 %v8866_v50, %s10321_s8 }
 0xaff   :  { %v3175_v62 = vpop.xlane.xlu0 %3174 }
 0xb00   :  { %3535 = vrot.lane.b32.xlu0 %v8857_v13, %s10321_s8  ;;  %7439 = vrcp.f32 %v3175_v62  ;;  %vm3202_vm1 = vweird.f32 %v3175_v62  ;;  %v3206_v34 = vand.u32 2147483647, %v3175_v62 }
 0xb02   :  { %vm3207_vm6 = vcmp.eq.f32.partialorder %v3206_v34, 8.507059e+37 }
 0xb05   :  { %3195 = vadd.xlane.f32.xlu2 %v3194_v63 }
 0xb06   :  { %3573 = vrot.lane.b32.xlu1 %v9008_v59, %s7931_s12  ;;  %v7440_v10 = vpop.eup %7439 }
 0xb07   :  { %v3198_v30 = vmul.f32 %v7440_v10, %v3175_v62  ;;  %vm3203_vm15 = vweird.f32 %v7440_v10 }
 0xb08   :  { %3571 = vrot.lane.b32.xlu0 %v9022_v60, %s7931_s12  ;;  %vm3204_vm2 = vmor %vm3202_vm1, %vm3203_vm15 }
 0xb09   :  { %v3199_v22 = vsub.f32 1.0, %v3198_v30 }
 0xb0b   :  { %v3200_v60 = vmul.f32 %v7440_v10, %v3199_v22 }
 0xb10   :  { %3541 = vrot.lane.b32.xlu0 %v8849_v45, %s10321_s8  ;;  %v3201_v45 = vadd.f32 %v7440_v10, %v3200_v60 }
 0xb12   :  { %v3205_v35 = vsel %vm3204_vm2, %v7440_v10, %v3201_v45 }
 0xb1d   :  { %3569 = vrot.lane.b32.xlu2 %v9017_v36, %s7931_s12  ;;  %v3208_v36 = vand.u32 2147483648, %v3175_v62 }
 0xb1f   :  { %v3209_v44 = vor.u32 1.1754944e-38, %v3208_v36 }
 0xb21   :  { %v3210_v19 = vsel %vm3207_vm6, %v3209_v44, %v3205_v35 }
 0xb22   :  { %v3211_v42 = vmul.f32 %v9049_v31, %v3210_v19 }
 0xb28   :  { %v3178_v13 = vpop.xlane.xlu1 %3177 }
 0xb29   :  { %7441 = vrcp.f32 %v3178_v13  ;;  %v3223_v57 = vand.u32 2147483648, %v3178_v13  ;;  %vm3217_vm5 = vweird.f32 %v3178_v13  ;;  %v3221_v12 = vand.u32 2147483647, %v3178_v13 }
 0xb2b   :  { %v3224_v51 = vor.u32 1.1754944e-38, %v3223_v57  ;;  %vm3222_vm8 = vcmp.eq.f32.partialorder %v3221_v12, 8.507059e+37 }
 0xb2f   :  { %v7442_v50 = vpop.eup %7441 }
 0xb30   :  { %v3213_v0 = vmul.f32 %v7442_v50, %v3178_v13  ;;  %vm3218_vm4 = vweird.f32 %v7442_v50 }
 0xb31   :  { %vm3219_vm7 = vmor %vm3217_vm5, %vm3218_vm4 }
 0xb32   :  { %v9110_v38 = vpop.xlane.xlu0 %3186  ;;  %v3214_v59 = vsub.f32 1.0, %v3213_v0 }
 0xb33   :  { %7443 = vrcp.f32 %v9110_v38  ;;  %vm3262_vm9 = vweird.f32 %v9110_v38  ;;  %v3266_v10 = vand.u32 2147483647, %v9110_v38  ;;  %v3268_v13 = vand.u32 2147483648, %v9110_v38 }
 0xb34   :  { %v3215_v55 = vmul.f32 %v7442_v50, %v3214_v59 }
 0xb35   :  { %vm3267_vm15 = vcmp.eq.f32.partialorder %v3266_v10, 8.507059e+37 }
 0xb36   :  { %v3216_v24 = vadd.f32 %v7442_v50, %v3215_v55 }
 0xb37   :  { %v3181_v9 = vpop.xlane.xlu2 %3180 }
 0xb38   :  { %7445 = vrcp.f32 %v3181_v9  ;;  %v3220_v47 = vsel %vm3219_vm7, %v7442_v50, %v3216_v24  ;;  %v3238_v0 = vand.u32 2147483648, %v3181_v9  ;;  %v3236_v60 = vand.u32 2147483647, %v3181_v9 }
 0xb39   :  { %v9113_v46 = vpop.eup %7443  ;;  %v3225_v1 = vsel %vm3222_vm8, %v3224_v51, %v3220_v47  ;;  %vm3232_vm13 = vweird.f32 %v3181_v9 }
 0xb3a   :  { %v3258_v33 = vmul.f32 %v9113_v46, %v9110_v38  ;;  %vm3263_vm10 = vweird.f32 %v9113_v46  ;;  %v3226_v59 = vmul.f32 %v9053_v37, %v3225_v1  ;;  %v3269_v37 = vor.u32 1.1754944e-38, %v3268_v13 }
 0xb3b   :  { %vm9131_vm12 = vmor %vm3262_vm9, %vm3263_vm10  ;;  %v3239_v36 = vor.u32 1.1754944e-38, %v3238_v0  ;;  %vm3237_vm1 = vcmp.eq.f32.partialorder %v3236_v60, 8.507059e+37 }
 0xb3c   :  { %v3259_v58 = vsub.f32 1.0, %v3258_v33 }
 0xb3e   :  { %v3260_v16 = vmul.f32 %v9113_v46, %v3259_v58  ;;  %v7446_v52 = vpop.eup %7445 }
 0xb3f   :  { %v3228_v54 = vmul.f32 %v7446_v52, %v3181_v9  ;;  %v9118_v48 = vpop.xlane.xlu0 %3189  ;;  %v7212_v4 = vpop.permute.xlu2 %7211  ;;  %vm3233_vm11 = vweird.f32 %v7446_v52 }
 0xb40   :  { %v7207_v40 = vpop.permute.xlu1 %7206  ;;  %v3261_v43 = vadd.f32 %v9113_v46, %v3260_v16  ;;  %v7214_v63 = vunpack.i.h.bf16 %v7212_v4  ;;  %v7213_v62 = vunpack.i.l.bf16 %v7212_v4  ;;  %7447 = vrcp.f32 %v9118_v48  ;;  %vm3234_vm14 = vmor %vm3232_vm13, %vm3233_vm11 }
 0xb41   :  { %v3229_v39 = vsub.f32 1.0, %v3228_v54  ;;  %v7209_v30 = vunpack.i.h.bf16 %v7207_v40  ;;  %v7208_v50 = vunpack.i.l.bf16 %v7207_v40  ;;  %v3283_v13 = vand.u32 2147483648, %v9118_v48 }
 0xb42   :  { %3390 = vmatpush.msra.mxu3 %v7213_v62  ;;  %3416 = vmatpush.msrb.mxu2 %v7214_v63  ;;  %v3265_v55 = vsel %vm9131_vm12, %v9113_v46, %v3261_v43  ;;  %vm3277_vm9 = vweird.f32 %v9118_v48 }
 0xb43   :  { %v3230_v22 = vmul.f32 %v7446_v52, %v3229_v39  ;;  %3338 = vmatpush.msrb.mxu0 %v7208_v50  ;;  %3364 = vmatpush.msrb.mxu1 %v7209_v30  ;;  %v3270_v24 = vsel %vm3267_vm15, %v3269_v37, %v3265_v55 }
 0xb44   :  { %6983 = vmatmul.msk.f32.vlgmr.msrb.gmra.mxu0 %vm339_vm0, %v3211_v42  ;;  %6984 = vmatmul.msk.f32.vlgmr.msrb.gmra.mxu1 %vm339_vm0, %v3226_v59  ;;  %v3271_v57 = vmul.f32 %v9057_v8, %v3270_v24 }
 0xb45   :  { %v3231_v45 = vadd.f32 %v7446_v52, %v3230_v22  ;;  %v3281_v22 = vand.u32 2147483647, %v9118_v48 }
 0xb46   :  { %v7448_v35 = vpop.eup %7447 }
 0xb47   :  { %v3235_v38 = vsel %vm3234_vm14, %v7446_v52, %v3231_v45  ;;  %v3184_v34 = vpop.xlane.xlu0 %3183  ;;  %v3273_v44 = vmul.f32 %v7448_v35, %v9118_v48  ;;  %vm3278_vm7 = vweird.f32 %v7448_v35  ;;  %vm3282_vm13 = vcmp.eq.f32.partialorder %v3281_v22, 8.507059e+37 }
 0xb48   :  { %7449 = vrcp.f32 %v3184_v34  ;;  %v3422_v33 = vpop.permute.xlu1 %3421  ;;  %v3240_v46 = vsel %vm3237_vm1, %v3239_v36, %v3235_v38  ;;  %v3253_v51 = vand.u32 2147483648, %v3184_v34  ;;  %vm3247_vm4 = vweird.f32 %v3184_v34  ;;  %vm3279_vm10 = vmor %vm3277_vm9, %vm3278_vm7 }
 0xb49   :  { %3442 = vmatpush.msra.mxu0 %v3422_v33  ;;  %v3241_v9 = vmul.f32 %v9061_v41, %v3240_v46  ;;  %v3274_v52 = vsub.f32 1.0, %v3273_v44  ;;  %v3251_v41 = vand.u32 2147483647, %v3184_v34 }
 0xb4a   :  { %v3254_v42 = vor.u32 1.1754944e-38, %v3253_v51 }
 0xb4b   :  { %6985 = vmatmul.msk.f32.vlgmr.msra.gmra.mxu3 %vm339_vm0, %v3241_v9  ;;  %v3275_v40 = vmul.f32 %v7448_v35, %v3274_v52  ;;  %vm3252_vm6 = vcmp.eq.f32.partialorder %v3251_v41, 8.507059e+37 }
 0xb4c   :  { %6987 = vmatmul.msk.f32.vlgmr.msra.gmra.mxu0 %vm339_vm0, %v3271_v57 }
 0xb4d   :  { %v3276_v10 = vadd.f32 %v7448_v35, %v3275_v40 }
 0xb4e   :  { %v7450_v58 = vpop.eup %7449 }
 0xb4f   :  { %v3243_v12 = vmul.f32 %v7450_v58, %v3184_v34  ;;  %v3193_v47 = vpop.xlane.xlu0 %3192  ;;  %vm3248_vm2 = vweird.f32 %v7450_v58  ;;  %v3280_v31 = vsel %vm3279_vm10, %v7448_v35, %v3276_v10 }
 0xb50   :  { %7451 = vrcp.f32 %v3193_v47  ;;  %v3500_v16 = vpop.permute.xlu1 %3499  ;;  %vm3249_vm5 = vmor %vm3247_vm4, %vm3248_vm2  ;;  %v3298_v50 = vand.u32 2147483648, %v3193_v47  ;;  %v3296_v0 = vand.u32 2147483647, %v3193_v47  ;;  %vm3292_vm11 = vweird.f32 %v3193_v47 }
 0xb51   :  { %v3244_v19 = vsub.f32 1.0, %v3243_v12  ;;  %3520 = vmatpush.msra.mxu2 %v3500_v16 }
 0xb52   :  { %v3299_v55 = vor.u32 1.1754944e-38, %v3298_v50  ;;  %vm3297_vm14 = vcmp.eq.f32.partialorder %v3296_v0, 8.507059e+37 }
 0xb53   :  { %v3245_v54 = vmul.f32 %v7450_v58, %v3244_v19 }
 0xb55   :  { %v3246_v4 = vadd.f32 %v7450_v58, %v3245_v54 }
 0xb56   :  { %v7452_v8 = vpop.eup %7451 }
 0xb57   :  { %v3250_v1 = vsel %vm3249_vm5, %v7450_v58, %v3246_v4  ;;  %v3288_v43 = vmul.f32 %v7452_v8, %v3193_v47  ;;  %vm3293_vm8 = vweird.f32 %v7452_v8  ;;  %vm3629_vm5 = vcmask 130048  }
 0xb58   :  { %v3255_v39 = vsel %vm3252_vm6, %v3254_v42, %v3250_v1  ;;  %vm3294_vm12 = vmor %vm3292_vm11, %vm3293_vm8  ;;  %vm3638_vm6 = vcmask 195584  }
 0xb59   :  { %v3289_v63 = vsub.f32 1.0, %v3288_v43  ;;  %v3256_v62 = vmul.f32 %v9071_v15, %v3255_v39  ;;  %v3284_v15 = vor.u32 1.1754944e-38, %v3283_v13 }
 0xb5b   :  { %v3290_v30 = vmul.f32 %v7452_v8, %v3289_v63  ;;  %6986 = vmatmul.msk.f32.vlgmr.msrb.gmra.mxu2 %vm339_vm0, %v3256_v62  ;;  %v3285_v45 = vsel %vm3282_vm13, %v3284_v15, %v3280_v31 }
 0xb5c   :  { %v3286_v33 = vmul.f32 %v9065_v11, %v3285_v45 }
 0xb5d   :  { %v3291_v59 = vadd.f32 %v7452_v8, %v3290_v30 }
 0xb5f   :  { %v3295_v60 = vsel %vm3294_vm12, %v7452_v8, %v3291_v59 }
 0xb60   :  { %v3300_v37 = vsel %vm3297_vm14, %v3299_v55, %v3295_v60 }
 0xb61   :  { %v3301_v48 = vmul.f32 %v9076_v27, %v3300_v37 }
 0xb62   :  { %v7217_v38 = vpop.permute.xlu0 %7216 }
 0xb63   :  { %v7219_v36 = vunpack.i.h.bf16 %v7217_v38  ;;  %v7218_v34 = vunpack.i.l.bf16 %v7217_v38 }
 0xb65   :  { %3468 = vmatpush.msra.mxu1 %v7218_v34  ;;  %3494 = vmatpush.msrb.mxu3 %v7219_v36 }
 0xb66   :  { %6988 = vmatmul.msk.f32.vlgmr.msra.gmra.mxu1 %vm339_vm0, %v3286_v33  ;;  %6989 = vmatmul.msk.f32.vlgmr.msrb.gmra.mxu3 %vm339_vm0, %v3301_v48 }
 0xb6a   :  { %v3566_v8 = vpop.permute.xlu0 %3565 }
 0xb72   :  { %v3536_v1 = vpop.permute.xlu0 %3535 }
 0xb78   :  { %v3196_v24 = vpop.xlane.xlu2 %3195 }
 0xb79   :  { %7453 = vrcp.f32 %v3196_v24  ;;  %v3313_v57 = vand.u32 2147483648, %v3196_v24  ;;  %v3311_v44 = vand.u32 2147483647, %v3196_v24  ;;  %vm3307_vm1 = vweird.f32 %v3196_v24 }
 0xb7b   :  { %v3314_v11 = vor.u32 1.1754944e-38, %v3313_v57  ;;  %vm3312_vm4 = vcmp.eq.f32.partialorder %v3311_v44, 8.507059e+37 }
 0xb7f   :  { %v7454_v46 = vpop.eup %7453 }
 0xb80   :  { %v3303_v9 = vmul.f32 %v7454_v46, %v3196_v24  ;;  %vm3308_vm15 = vweird.f32 %v7454_v46  ;;  %v3570_v59 = vpop.permute.xlu2 %3569 }
 0xb81   :  { %vm3309_vm2 = vmor %vm3307_vm1, %vm3308_vm15 }
 0xb82   :  { %v3304_v35 = vsub.f32 1.0, %v3303_v9 }
 0xb84   :  { %v3305_v58 = vmul.f32 %v7454_v46, %v3304_v35 }
 0xb86   :  { %v3306_v12 = vadd.f32 %v7454_v46, %v3305_v58 }
 0xb88   :  { %v3310_v27 = vsel %vm3309_vm2, %v7454_v46, %v3306_v12 }
 0xb89   :  { %v3315_v47 = vsel %vm3312_vm4, %v3314_v11, %v3310_v27 }
 0xb8a   :  { %v3316_v16 = vmul.f32 %v9098_v56, %v3315_v47 }
 0xb8c   :  { %6990 = vmatmul.msk.f32.vlgmr.msra.gmra.mxu2 %vm339_vm0, %v3316_v16 }
 0xbc1   :  { %v3340_v19 = vpop.f32.mrf.mxu0  ;;  %v3366_v52 = vpop.f32.mrf.mxu1 }
 0xbc2   :  { %3599 = vrot.lane.b32.xlu0 %v3366_v52, %s7932_s18  ;;  %3597 = vrot.lane.b32.xlu1 %v3340_v19, %s7932_s18  ;;  %v10342_v19 = vld [vmem:[#allocation29_spill] sm:$0xff] }
 0xbc9   :  { %v3444_v51 = vpop.f32.mrf.mxu0 }
 0xbca   :  { %3575 = vrot.lane.b32.xlu1 %v9015_v18, %s7931_s12  ;;  %3605 = vrot.lane.b32.xlu2 %v3444_v51, %s7932_s18  ;;  %v3534_v18 = vpop.permute.xlu1 %3533 }
 0xbce   :  { %v3392_v54 = vpop.f32.mrf.mxu3 }
 0xbcf   :  { %3601 = vrot.lane.b32.xlu0 %v3392_v54, %s7932_s18 }
 0xbd7   :  { %3543 = vrot.lane.b32.xlu0 %v8859_v61, %s10321_s8  ;;  %v3568_v61 = vpop.permute.xlu1 %3567 }
 0xbde   :  { %v3418_v41 = vpop.f32.mrf.mxu2 }
 0xbdf   :  { %3603 = vrot.lane.b32.xlu1 %v3418_v41, %s7932_s18  ;;  %v3538_v42 = vpop.permute.xlu1 %3537  ;;  %v10343_v41 = vld [vmem:[#allocation32_spill] sm:$0xff] }
 0xbe0   :  { %v3623_v31 = vsel %vm339_vm0, %v8670_v6, %v3538_v42 }
 0xbe1   :  { %v3632_v15 = vsel %vm3629_vm5, %v3623_v31, %v3570_v59 }
 0xbe3   :  { %v3470_v56 = vpop.f32.mrf.mxu1 }
 0xbe4   :  { %3607 = vrot.lane.b32.xlu2 %v3470_v56, %s7932_s18 }
 0xbe7   :  { %3545 = vrot.lane.b32.xlu1 %v8868_v5, %s10321_s8  ;;  %v3540_v43 = vpop.permute.xlu1 %3539  ;;  %v3572_v5 = vpop.permute.xlu0 %3571 }
 0xbe9   :  { %v3496_v4 = vpop.f32.mrf.mxu3 }
 0xbec   :  { %3577 = vrot.lane.b32.xlu2 %v9024_v29, %s7931_s12  ;;  %v3622_v29 = vsel %vm339_vm0, %v8685_v23, %v3536_v1 }
 0xbed   :  { %v3631_v62 = vsel %vm3629_vm5, %v3622_v29, %v3568_v61  ;;  %v10344_v61 = vld [vmem:[#allocation30_spill] sm:$0xff] }
 0xbef   :  { %3609 = vrot.lane.b32.xlu1 %v3496_v4, %s7932_s18  ;;  %v3574_v39 = vpop.permute.xlu1 %3573  ;;  %v3542_v63 = vpop.permute.xlu0 %3541 }
 0xbf7   :  { %3547 = vrot.lane.b32.xlu1 %v8871_v53, %s10321_s8  ;;  %v3621_v53 = vsel %vm339_vm0, %v8677_v20, %v3534_v18 }
 0xbff   :  { %3579 = vrot.lane.b32.xlu1 %v9029_v26, %s7931_s12  ;;  %v3630_v26 = vsel %vm3629_vm5, %v3621_v53, %v3566_v8 }
 0xc0f   :  { %v3522_v40 = vpop.f32.mrf.mxu2 }
 0xc10   :  { %3611 = vrot.lane.b32.xlu1 %v3522_v40, %s7932_s18 }
 0xc24   :  { %v3606_v55 = vpop.permute.xlu2 %3605 }
 0xc34   :  { %v3600_v10 = vpop.permute.xlu0 %3599  ;;  %v3598_v13 = vpop.permute.xlu1 %3597 }
 0xc35   :  { %v3640_v30 = vsel %vm3638_vm6, %v3631_v62, %v3600_v10  ;;  %v3639_v50 = vsel %vm3638_vm6, %v3630_v26, %v3598_v13 }
 0xc36   :  { %v9179_v22 = vadd.f32 %v3640_v30, %v8221_v17  ;;  %v9182_v0 = vadd.f32 %v3639_v50, %v8217_v14 }
 0xc38   :  { %v3658_v20 = vsel %vm689_vm3, %v9179_v22, 0.0  ;;  %v3655_v23 = vsel %vm689_vm3, %v9182_v0, 0.0 }
 0xc39   :  { %3659 = vadd.xlane.f32.xlu2 %v3658_v20  ;;  %3656 = vadd.xlane.f32.xlu0 %v3655_v23 }
 0xc3c   :  { %v3576_v37 = vpop.permute.xlu1 %3575 }
 0xc3e   :  { %v3608_v34 = vpop.permute.xlu2 %3607 }
 0xc41   :  { %v3602_v60 = vpop.permute.xlu0 %3601 }
 0xc42   :  { %v3641_v17 = vsel %vm3638_vm6, %v3632_v15, %v3602_v60 }
 0xc43   :  { %v9193_v14 = vadd.f32 %v3641_v17, %v8225_v21  ;;  %v3624_v21 = vsel %vm339_vm0, %v8700_v2, %v3540_v43  ;;  %v10345_v43 = vld [vmem:[#allocation31_spill] sm:$0xff] }
 0xc44   :  { %v3633_v46 = vsel %vm3629_vm5, %v3624_v21, %v3572_v5 }
 0xc45   :  { %v3661_v45 = vsel %vm689_vm3, %v9193_v14, 0.0 }
 0xc46   :  { %3662 = vadd.xlane.f32.xlu1 %v3661_v45 }
 0xc49   :  { %v3544_v38 = vpop.permute.xlu0 %3543 }
 0xc4a   :  { %v3626_v36 = vsel %vm339_vm0, %v8689_v3, %v3544_v38  ;;  %v3625_v3 = vsel %vm339_vm0, %v8687_v49, %v3542_v63 }
 0xc4b   :  { %v3635_v6 = vsel %vm3629_vm5, %v3626_v36, %v3576_v37 }
 0xc4c   :  { %v3644_v33 = vsel %vm3638_vm6, %v3635_v6, %v3608_v34 }
 0xc4d   :  { %v9202_v48 = vadd.f32 %v3644_v33, %v8237_v32  ;;  %v3634_v32 = vsel %vm3629_vm5, %v3625_v3, %v3574_v39 }
 0xc4e   :  { %v3643_v58 = vsel %vm3638_vm6, %v3634_v32, %v3606_v55 }
 0xc4f   :  { %v3670_v24 = vsel %vm689_vm3, %v9202_v48, 0.0  ;;  %v9220_v44 = vadd.f32 %v3643_v58, %v8233_v28 }
 0xc50   :  { %3671 = vadd.xlane.f32.xlu2 %v3670_v24 }
 0xc51   :  { %v3604_v9 = vpop.permute.xlu1 %3603  ;;  %v3667_v49 = vsel %vm689_vm3, %v9220_v44, 0.0 }
 0xc52   :  { %v3642_v35 = vsel %vm3638_vm6, %v3633_v46, %v3604_v9 }
 0xc53   :  { %v9213_v57 = vadd.f32 %v3642_v35, %v8229_v25  ;;  %v3578_v25 = vpop.permute.xlu2 %3577 }
 0xc55   :  { %v3664_v2 = vsel %vm689_vm3, %v9213_v57, 0.0 }
 0xc56   :  { %3665 = vadd.xlane.f32.xlu0 %v3664_v2 }
 0xc59   :  { %v3546_v12 = vpop.permute.xlu1 %3545 }
 0xc5a   :  { %v3627_v11 = vsel %vm339_vm0, %v8672_v7, %v3546_v12 }
 0xc5b   :  { %v3636_v27 = vsel %vm3629_vm5, %v3627_v11, %v3578_v25  ;;  %v286_v25 = vld [vmem:[#allocation13 + $0x18] sm:$0xff] }
 0xc5c   :  { %3892 = vmatpush.msrb.mxu0 %v286_v25 }
 0xc5e   :  { %3668 = vadd.xlane.f32.xlu0 %v3667_v49 }
 0xc61   :  { %v3610_v47 = vpop.permute.xlu1 %3609 }
 0xc62   :  { %v3645_v16 = vsel %vm3638_vm6, %v3636_v27, %v3610_v47  ;;  %v285_v27 = vld [vmem:[#allocation13 + $0x10] sm:$0xff]  ;;  %v284_v47 = vld [vmem:[#allocation13 + $0x8] sm:$0xff] }
 0xc63   :  { %v9229_v52 = vadd.f32 %v3645_v16, %v10342_v19  ;;  %3893 = vmatpush.msrb.mxu0 %v285_v27  ;;  %v283_v16 = vld [vmem:[#allocation13] sm:$0xff] }
 0xc65   :  { %v3673_v28 = vsel %vm689_vm3, %v9229_v52, 0.0  ;;  %3894 = vmatpush.msrb.mxu0 %v284_v47 }
 0xc66   :  { %3674 = vadd.xlane.f32.xlu2 %v3673_v28 }
 0xc67   :  { %3895 = vmatpush.msrb.mxu0 %v283_v16 }
 0xc69   :  { %v3548_v51 = vpop.permute.xlu1 %3547 }
 0xc6a   :  { %v3628_v56 = vsel %vm339_vm0, %v10343_v41, %v3548_v51 }
 0xc71   :  { %v3580_v54 = vpop.permute.xlu1 %3579 }
 0xc72   :  { %v3637_v7 = vsel %vm3629_vm5, %v3628_v56, %v3580_v54 }
 0xc82   :  { %v3612_v4 = vpop.permute.xlu1 %3611 }
 0xc83   :  { %v3646_v18 = vsel %vm3638_vm6, %v3637_v7, %v3612_v4 }
 0xc84   :  { %v9238_v8 = vadd.f32 %v3646_v18, %v10344_v61 }
 0xc86   :  { %v3676_v40 = vsel %vm689_vm3, %v9238_v8, 0.0 }
 0xc87   :  { %3677 = vadd.xlane.f32.xlu2 %v3676_v40 }
 0xcac   :  { %v3660_v42 = vpop.xlane.xlu2 %3659  ;;  %v3657_v1 = vpop.xlane.xlu0 %3656 }
 0xcad   :  { %v3679_v5 = vmul.f32 %v3657_v1, %v10345_v43  ;;  %v3680_v39 = vmul.f32 %v3660_v42, %v10345_v43 }
 0xcaf   :  { %v9245_v63 = vsub.f32 %v9182_v0, %v3679_v5  ;;  %v9250_v53 = vsub.f32 %v9179_v22, %v3680_v39 }
 0xcb1   :  { %v3695_v29 = vmul.f32 %v9245_v63, %v9245_v63  ;;  %v3696_v62 = vmul.f32 %v9250_v53, %v9250_v53 }
 0xcb3   :  { %v3703_v26 = vsel %vm689_vm3, %v3695_v29, 0.0  ;;  %v3706_v30 = vsel %vm689_vm3, %v3696_v62, 0.0  ;;  %v9301_v62 = vld [vmem:[#allocation11] ss:$0 sm:$0xff] }
 0xcb4   :  { %3704 = vadd.xlane.f32.xlu0 %v3703_v26 }
 0xcb9   :  { %v3663_v10 = vpop.xlane.xlu1 %3662 }
 0xcba   :  { %v3681_v13 = vmul.f32 %v3663_v10, %v10345_v43 }
 0xcbc   :  { %v9258_v50 = vsub.f32 %v9193_v14, %v3681_v13  ;;  %3707 = vadd.xlane.f32.xlu0 %v3706_v30 }
 0xcbe   :  { %v3697_v20 = vmul.f32 %v9258_v50, %v9258_v50 }
 0xcc0   :  { %v3709_v23 = vsel %vm689_vm3, %v3697_v20, 0.0  ;;  %v9307_v20 = vld [vmem:[%s10346_s3] ss:$0 sm:$0xff] }
 0xcc3   :  { %v3672_v59 = vpop.xlane.xlu2 %3671 }
 0xcc4   :  { %3710 = vadd.xlane.f32.xlu0 %v3709_v23  ;;  %v3684_v60 = vmul.f32 %v3672_v59, %v10345_v43 }
 0xcc6   :  { %v9271_v45 = vsub.f32 %v9202_v48, %v3684_v60 }
 0xcc8   :  { %v3700_v6 = vmul.f32 %v9271_v45, %v9271_v45 }
 0xcc9   :  { %v3666_v31 = vpop.xlane.xlu0 %3665 }
 0xcca   :  { %v3682_v15 = vmul.f32 %v3666_v31, %v10345_v43  ;;  %v3718_v21 = vsel %vm689_vm3, %v3700_v6, 0.0 }
 0xccc   :  { %v9266_v17 = vsub.f32 %v9213_v57, %v3682_v15 }
 0xcce   :  { %v3698_v55 = vmul.f32 %v9266_v17, %v9266_v17 }
 0xcd0   :  { %v3712_v37 = vsel %vm689_vm3, %v3698_v55, 0.0 }
 0xcd1   :  { %v3669_v38 = vpop.xlane.xlu0 %3668  ;;  %3713 = vadd.xlane.f32.xlu2 %v3712_v37 }
 0xcd2   :  { %v3683_v36 = vmul.f32 %v3669_v38, %v10345_v43 }
 0xcd4   :  { %v9276_v34 = vsub.f32 %v9220_v44, %v3683_v36 }
 0xcd6   :  { %v3699_v33 = vmul.f32 %v9276_v34, %v9276_v34 }
 0xcd8   :  { %v3715_v24 = vsel %vm689_vm3, %v3699_v33, 0.0 }
 0xcd9   :  { %v3675_v46 = vpop.xlane.xlu2 %3674  ;;  %3719 = vadd.xlane.f32.xlu2 %v3718_v21  ;;  %3716 = vadd.xlane.f32.xlu0 %v3715_v24 }
 0xcda   :  { %v3685_v9 = vmul.f32 %v3675_v46, %v10345_v43 }
 0xcdc   :  { %v9286_v3 = vsub.f32 %v9229_v52, %v3685_v9 }
 0xcde   :  { %v3701_v35 = vmul.f32 %v9286_v3, %v9286_v3 }
 0xce0   :  { %v3721_v32 = vsel %vm689_vm3, %v3701_v35, 0.0 }
 0xce1   :  { %3722 = vadd.xlane.f32.xlu1 %v3721_v32 }
 0xcfa   :  { %v3678_v2 = vpop.xlane.xlu2 %3677 }
 0xcfb   :  { %v3686_v58 = vmul.f32 %v3678_v2, %v10345_v43 }
 0xcfd   :  { %v9293_v12 = vsub.f32 %v9238_v8, %v3686_v58 }
 0xcff   :  { %v3702_v49 = vmul.f32 %v9293_v12, %v9293_v12 }
 0xd01   :  { %v3724_v11 = vsel %vm689_vm3, %v3702_v49, 0.0 }
 0xd02   :  { %3725 = vadd.xlane.f32.xlu0 %v3724_v11 }
 0xd27   :  { %v3705_v19 = vpop.xlane.xlu0 %3704 }
 0xd28   :  { %v3727_v28 = vmul.f32 %v3705_v19, %v10345_v43 }
 0xd2a   :  { %v3735_v51 = vadd.f32 1e-05, %v3727_v28 }
 0xd2c   :  { %7455 = vrsqrt.f32 %v3735_v51  ;;  %vm3749_vm8 = vweird.f32 %v3735_v51 }
 0xd2f   :  { %v3708_v54 = vpop.xlane.xlu0 %3707 }
 0xd30   :  { %v3728_v41 = vmul.f32 %v3708_v54, %v10345_v43 }
 0xd32   :  { %v7456_v56 = vpop.eup %7455  ;;  %v3736_v7 = vadd.f32 1e-05, %v3728_v41 }
 0xd33   :  { %v3744_v4 = vmul.f32 %v7456_v56, %v3735_v51  ;;  %vm3750_vm7 = vweird.f32 %v7456_v56 }
 0xd34   :  { %7457 = vrsqrt.f32 %v3736_v7  ;;  %vm3751_vm9 = vmor %vm3749_vm8, %vm3750_vm7  ;;  %vm3759_vm11 = vweird.f32 %v3736_v7 }
 0xd35   :  { %v3745_v18 = vmul.f32 %v7456_v56, %v3744_v4 }
 0xd37   :  { %v3746_v61 = vmul.f32 0.5, %v3745_v18  ;;  %v3711_v40 = vpop.xlane.xlu0 %3710 }
 0xd38   :  { %v3729_v42 = vmul.f32 %v3711_v40, %v10345_v43 }
 0xd39   :  { %v3747_v1 = vsub.f32 1.5, %v3746_v61 }
 0xd3a   :  { %v7458_v5 = vpop.eup %7457  ;;  %v3737_v39 = vadd.f32 1e-05, %v3729_v42 }
 0xd3b   :  { %v3748_v29 = vmul.f32 %v7456_v56, %v3747_v1  ;;  %v3754_v26 = vmul.f32 %v7458_v5, %v3736_v7  ;;  %vm3760_vm10 = vweird.f32 %v7458_v5 }
 0xd3c   :  { %7459 = vrsqrt.f32 %v3737_v39  ;;  %vm3761_vm12 = vmor %vm3759_vm11, %vm3760_vm10  ;;  %vm3769_vm14 = vweird.f32 %v3737_v39 }
 0xd3d   :  { %v3752_v10 = vsel %vm3751_vm9, %v7456_v56, %v3748_v29  ;;  %v3755_v13 = vmul.f32 %v7458_v5, %v3754_v26 }
 0xd3e   :  { %v3823_v30 = vmul.f32 %v3752_v10, %v9245_v63 }
 0xd3f   :  { %v3756_v23 = vmul.f32 0.5, %v3755_v13 }
 0xd40   :  { %v3834_v59 = vmul.f32 %v9301_v62, %v3823_v30 }
 0xd41   :  { %v3757_v31 = vsub.f32 1.5, %v3756_v23 }
 0xd42   :  { %v7460_v15 = vpop.eup %7459  ;;  %v3845_v60 = vadd.f32 %v9307_v20, %v3834_v59 }
 0xd43   :  { %v3758_v55 = vmul.f32 %v7458_v5, %v3757_v31  ;;  %v3764_v37 = vmul.f32 %v7460_v15, %v3737_v39  ;;  %vm3770_vm13 = vweird.f32 %v7460_v15 }
 0xd44   :  { %v3714_v38 = vpop.xlane.xlu2 %3713  ;;  %6991 = vmatmul.msk.f32.vlgmr.msrb.gmra.mxu0 %vm689_vm3, %v3845_v60  ;;  %vm3771_vm15 = vmor %vm3769_vm14, %vm3770_vm13 }
 0xd45   :  { %v3730_v63 = vmul.f32 %v3714_v38, %v10345_v43  ;;  %v3762_v36 = vsel %vm3761_vm12, %v7458_v5, %v3758_v55  ;;  %v3765_v6 = vmul.f32 %v7460_v15, %v3764_v37 }
 0xd46   :  { %v3824_v21 = vmul.f32 %v3762_v36, %v9250_v53 }
 0xd47   :  { %v3738_v33 = vadd.f32 1e-05, %v3730_v63  ;;  %v3766_v24 = vmul.f32 0.5, %v3765_v6 }
 0xd48   :  { %v3835_v46 = vmul.f32 %v9301_v62, %v3824_v21 }
 0xd49   :  { %7461 = vrsqrt.f32 %v3738_v33  ;;  %v3767_v9 = vsub.f32 1.5, %v3766_v24  ;;  %vm3779_vm2 = vweird.f32 %v3738_v33 }
 0xd4a   :  { %v3846_v35 = vadd.f32 %v9307_v20, %v3835_v46 }
 0xd4b   :  { %v3768_v32 = vmul.f32 %v7460_v15, %v3767_v9 }
 0xd4c   :  { %v3720_v2 = vpop.xlane.xlu2 %3719  ;;  %v3717_v58 = vpop.xlane.xlu0 %3716  ;;  %6992 = vmatmul.msk.f32.gmra.mxu0 %vm689_vm3, %v3846_v35 }
 0xd4d   :  { %v3732_v49 = vmul.f32 %v3720_v2, %v10345_v43  ;;  %v3731_v11 = vmul.f32 %v3717_v58, %v10345_v43  ;;  %v3772_v53 = vsel %vm3771_vm15, %v7460_v15, %v3768_v32  ;;  %v291_v58 = vld [vmem:[#allocation14 + $0x18] sm:$0xff] }
 0xd4e   :  { %v3825_v27 = vmul.f32 %v3772_v53, %v9258_v50  ;;  %3968 = vmatpush.msrb.mxu1 %v291_v58 }
 0xd4f   :  { %v7462_v25 = vpop.eup %7461  ;;  %v3740_v47 = vadd.f32 1e-05, %v3732_v49  ;;  %v3739_v16 = vadd.f32 1e-05, %v3731_v11 }
 0xd50   :  { %v3774_v19 = vmul.f32 %v7462_v25, %v3738_v33  ;;  %v3836_v28 = vmul.f32 %v9301_v62, %v3825_v27  ;;  %vm3780_vm1 = vweird.f32 %v7462_v25 }
 0xd51   :  { %7463 = vrsqrt.f32 %v3740_v47  ;;  %vm3781_vm4 = vmor %vm3779_vm2, %vm3780_vm1  ;;  %vm3789_vm8 = vweird.f32 %v3739_v16  ;;  %vm3799_vm10 = vweird.f32 %v3740_v47 }
 0xd52   :  { %v3775_v51 = vmul.f32 %v7462_v25, %v3774_v19  ;;  %7465 = vrsqrt.f32 %v3739_v16  ;;  %v3847_v54 = vadd.f32 %v9307_v20, %v3836_v28 }
 0xd54   :  { %v3776_v41 = vmul.f32 0.5, %v3775_v51  ;;  %v3723_v56 = vpop.xlane.xlu1 %3722  ;;  %6993 = vmatmul.msk.f32.gmra.mxu0 %vm689_vm3, %v3847_v54 }
 0xd55   :  { %v3733_v7 = vmul.f32 %v3723_v56, %v10345_v43 }
 0xd56   :  { %v3777_v4 = vsub.f32 1.5, %v3776_v41 }
 0xd57   :  { %v7464_v18 = vpop.eup %7463  ;;  %v3741_v50 = vadd.f32 1e-05, %v3733_v7  ;;  %v290_v7 = vld [vmem:[#allocation14 + $0x10] sm:$0xff] }
 0xd58   :  { %v7466_v61 = vpop.eup %7465  ;;  %v3778_v40 = vmul.f32 %v7462_v25, %v3777_v4  ;;  %v3794_v42 = vmul.f32 %v7464_v18, %v3740_v47  ;;  %vm3800_vm7 = vweird.f32 %v7464_v18  ;;  %3969 = vmatpush.msrb.mxu1 %v290_v7  ;;  %v289_v4 = vld [vmem:[#allocation14 + $0x8] sm:$0xff] }
 0xd59   :  { %v3784_v1 = vmul.f32 %v7466_v61, %v3739_v16  ;;  %7467 = vrsqrt.f32 %v3741_v50  ;;  %vm3790_vm6 = vweird.f32 %v7466_v61  ;;  %vm3801_vm11 = vmor %vm3799_vm10, %vm3800_vm7  ;;  %vm3809_vm13 = vweird.f32 %v3741_v50 }
 0xd5a   :  { %v3782_v5 = vsel %vm3781_vm4, %v7462_v25, %v3778_v40  ;;  %v3795_v39 = vmul.f32 %v7464_v18, %v3794_v42  ;;  %vm3791_vm9 = vmor %vm3789_vm8, %vm3790_vm6  ;;  %3970 = vmatpush.msrb.mxu1 %v289_v4 }
 0xd5b   :  { %v3826_v29 = vmul.f32 %v3782_v5, %v9266_v17  ;;  %v3785_v26 = vmul.f32 %v7466_v61, %v3784_v1 }
 0xd5c   :  { %v3796_v10 = vmul.f32 0.5, %v3795_v39 }
 0xd5d   :  { %v3786_v13 = vmul.f32 0.5, %v3785_v26  ;;  %v3837_v30 = vmul.f32 %v9301_v62, %v3826_v29 }
 0xd5e   :  { %v3797_v23 = vsub.f32 1.5, %v3796_v10 }
 0xd5f   :  { %v7468_v59 = vpop.eup %7467  ;;  %v3787_v31 = vsub.f32 1.5, %v3786_v13  ;;  %v3848_v15 = vadd.f32 %v9307_v20, %v3837_v30 }
 0xd60   :  { %v3804_v60 = vmul.f32 %v7468_v59, %v3741_v50  ;;  %v3798_v55 = vmul.f32 %v7464_v18, %v3797_v23  ;;  %vm3810_vm12 = vweird.f32 %v7468_v59  ;;  %v7266_v50 = vld [vmem:[%s10280_s13] ss:$0 sm:$0xff] }
 0xd61   :  { %v3788_v37 = vmul.f32 %v7466_v61, %v3787_v31  ;;  %6994 = vmatmul.msk.f32.gmra.mxu0 %vm689_vm3, %v3848_v15  ;;  %vm3811_vm14 = vmor %vm3809_vm13, %vm3810_vm12 }
 0xd62   :  { %v3805_v17 = vmul.f32 %v7468_v59, %v3804_v60  ;;  %v3802_v6 = vsel %vm3801_vm11, %v7464_v18, %v3798_v55  ;;  %v288_v18 = vld [vmem:[#allocation14] sm:$0xff] }
 0xd63   :  { %v3792_v38 = vsel %vm3791_vm9, %v7466_v61, %v3788_v37  ;;  %v3828_v24 = vmul.f32 %v3802_v6, %v9271_v45  ;;  %3971 = vmatpush.msrb.mxu1 %v288_v18 }
 0xd64   :  { %v3827_v63 = vmul.f32 %v3792_v38, %v9276_v34  ;;  %v3806_v36 = vmul.f32 0.5, %v3805_v17 }
 0xd65   :  { %v3839_v35 = vmul.f32 %v9301_v62, %v3828_v24 }
 0xd66   :  { %v3807_v33 = vsub.f32 1.5, %v3806_v36  ;;  %v3838_v21 = vmul.f32 %v9301_v62, %v3827_v63  ;;  %v7267_v36 = vld [vmem:[%s10282_s15] ss:$0 sm:$0xff] }
 0xd67   :  { %v3850_v2 = vadd.f32 %v9307_v20, %v3839_v35 }
 0xd68   :  { %v3849_v46 = vadd.f32 %v9307_v20, %v3838_v21  ;;  %v3808_v9 = vmul.f32 %v7468_v59, %v3807_v33 }
 0xd6a   :  { %6995 = vmatmul.msk.f32.gmra.mxu0 %vm689_vm3, %v3849_v46  ;;  %v3812_v32 = vsel %vm3811_vm14, %v7468_v59, %v3808_v9 }
 0xd6b   :  { %v3829_v34 = vmul.f32 %v3812_v32, %v9286_v3 }
 0xd6d   :  { %v3840_v45 = vmul.f32 %v9301_v62, %v3829_v34 }
 0xd6f   :  { %v3851_v25 = vadd.f32 %v9307_v20, %v3840_v45 }
 0xd72   :  { %6996 = vmatmul.msk.f32.gmra.mxu0 %vm689_vm3, %v3850_v2 }
 0xd75   :  { %v3726_v49 = vpop.xlane.xlu0 %3725 }
 0xd76   :  { %v3734_v11 = vmul.f32 %v3726_v49, %v10345_v43 }
 0xd78   :  { %v3742_v53 = vadd.f32 1e-05, %v3734_v11 }
 0xd7a   :  { %7469 = vrsqrt.f32 %v3742_v53  ;;  %6997 = vmatmul.msk.f32.gmra.mxu0 %vm689_vm3, %v3851_v25  ;;  %vm3819_vm1 = vweird.f32 %v3742_v53 }
 0xd80   :  { %v7470_v27 = vpop.eup %7469 }
 0xd81   :  { %v3814_v47 = vmul.f32 %v7470_v27, %v3742_v53  ;;  %vm3820_vm15 = vweird.f32 %v7470_v27 }
 0xd82   :  { %vm3821_vm2 = vmor %vm3819_vm1, %vm3820_vm15 }
 0xd83   :  { %v3815_v3 = vmul.f32 %v7470_v27, %v3814_v47 }
 0xd85   :  { %v3816_v16 = vmul.f32 0.5, %v3815_v3 }
 0xd87   :  { %v3817_v19 = vsub.f32 1.5, %v3816_v16 }
 0xd89   :  { %v3818_v28 = vmul.f32 %v7470_v27, %v3817_v19 }
 0xd8b   :  { %v3822_v51 = vsel %vm3821_vm2, %v7470_v27, %v3818_v28 }
 0xd8c   :  { %v3830_v54 = vmul.f32 %v3822_v51, %v9293_v12 }
 0xd8e   :  { %v3841_v41 = vmul.f32 %v9301_v62, %v3830_v54 }
 0xd90   :  { %v3852_v56 = vadd.f32 %v9307_v20, %v3841_v41 }
 0xd92   :  { %6998 = vmatmul.msk.f32.gmra.mxu0 %vm689_vm3, %v3852_v56 }
 0xdc1   :  { %v3897_v61 = vpop.f32.mrf.mxu0 }
 0xdc2   :  { %v3898_v40 = vadd.f32 %v7266_v50, %v3897_v61 }
 0xdc4   :  { %v3921_v42 = vmax.f32 %v3898_v40, 0.0 }
 0xdc6   :  { %6999 = vmatmul.msk.f32.vlgmr.msrb.gmra.mxu1 %vm689_vm3, %v3921_v42 }
 0xdc9   :  { %v3900_v12 = vpop.f32.mrf.mxu0 }
 0xdca   :  { %v3901_v62 = vadd.f32 %v7266_v50, %v3900_v12 }
 0xdcc   :  { %v3922_v20 = vmax.f32 %v3901_v62, 0.0 }
 0xdce   :  { %7000 = vmatmul.msk.f32.gmra.mxu1 %vm689_vm3, %v3922_v20 }
 0xdd1   :  { %v3903_v1 = vpop.f32.mrf.mxu0 }
 0xdd2   :  { %v3904_v5 = vadd.f32 %v7266_v50, %v3903_v1 }
 0xdd4   :  { %v3923_v39 = vmax.f32 %v3904_v5, 0.0 }
 0xdd6   :  { %7001 = vmatmul.msk.f32.gmra.mxu1 %vm689_vm3, %v3923_v39 }
 0xdde   :  { %v3906_v29 = vpop.f32.mrf.mxu0 }
 0xddf   :  { %v3907_v26 = vadd.f32 %v7266_v50, %v3906_v29 }
 0xde1   :  { %v3924_v10 = vmax.f32 %v3907_v26, 0.0 }
 0xde3   :  { %7002 = vmatmul.msk.f32.gmra.mxu1 %vm689_vm3, %v3924_v10 }
 0xde7   :  { %v3909_v13 = vpop.f32.mrf.mxu0 }
 0xde8   :  { %v3910_v30 = vadd.f32 %v7266_v50, %v3909_v13 }
 0xdea   :  { %v3925_v23 = vmax.f32 %v3910_v30, 0.0 }
 0xdec   :  { %7003 = vmatmul.msk.f32.gmra.mxu1 %vm689_vm3, %v3925_v23 }
 0xdef   :  { %v3912_v59 = vpop.f32.mrf.mxu0 }
 0xdf0   :  { %v3913_v31 = vadd.f32 %v7266_v50, %v3912_v59 }
 0xdf2   :  { %v3926_v15 = vmax.f32 %v3913_v31, 0.0 }
 0xdf4   :  { %7004 = vmatmul.msk.f32.gmra.mxu1 %vm689_vm3, %v3926_v15 }
 0xdf7   :  { %v3915_v60 = vpop.f32.mrf.mxu0 }
 0xdf8   :  { %v3916_v55 = vadd.f32 %v7266_v50, %v3915_v60 }
 0xdfa   :  { %v3927_v37 = vmax.f32 %v3916_v55, 0.0 }
 0xdfc   :  { %7005 = vmatmul.msk.f32.gmra.mxu1 %vm689_vm3, %v3927_v37 }
 0xe0f   :  { %v3918_v17 = vpop.f32.mrf.mxu0 }
 0xe10   :  { %v3919_v38 = vadd.f32 %v7266_v50, %v3918_v17 }
 0xe12   :  { %v3928_v63 = vmax.f32 %v3919_v38, 0.0 }
 0xe14   :  { %7006 = vmatmul.msk.f32.gmra.mxu1 %vm689_vm3, %v3928_v63 }
 0xe43   :  { %v3973_v6 = vpop.f32.mrf.mxu1 }
 0xe44   :  { %v3974_v33 = vadd.f32 %v7267_v36, %v3973_v6 }
 0xe46   :  { %v9360_v21 = vadd.f32 %v3974_v33, %v9182_v0 }
 0xe48   :  { %v4005_v24 = vsel %vm689_vm3, %v9360_v21, 0.0 }
 0xe49   :  { %4006 = vadd.xlane.f32.xlu2 %v4005_v24 }
 0xe4b   :  { %v3976_v46 = vpop.f32.mrf.mxu1 }
 0xe4c   :  { %v3977_v9 = vadd.f32 %v7267_v36, %v3976_v46 }
 0xe4e   :  { %v9365_v35 = vadd.f32 %v3977_v9, %v9179_v22  ;;  %v298_v9 = vld [vmem:[#allocation16 + $0x18] sm:$0xff] }
 0xe4f   :  { %4239 = vmatpush.msra.mxu3 %v298_v9 }
 0xe50   :  { %v4008_v32 = vsel %vm689_vm3, %v9365_v35, 0.0 }
 0xe51   :  { %4009 = vadd.xlane.f32.xlu1 %v4008_v32  ;;  %v297_v32 = vld [vmem:[#allocation16 + $0x10] sm:$0xff] }
 0xe52   :  { %4240 = vmatpush.msra.mxu3 %v297_v32 }
 0xe53   :  { %v3979_v34 = vpop.f32.mrf.mxu1 }
 0xe54   :  { %v3980_v2 = vadd.f32 %v7267_v36, %v3979_v34  ;;  %v296_v34 = vld [vmem:[#allocation16 + $0x8] sm:$0xff] }
 0xe55   :  { %4241 = vmatpush.msra.mxu3 %v296_v34 }
 0xe56   :  { %v9370_v58 = vadd.f32 %v3980_v2, %v9193_v14  ;;  %v295_v2 = vld [vmem:[#allocation16] sm:$0xff] }
 0xe57   :  { %4242 = vmatpush.msra.mxu3 %v295_v2 }
 0xe58   :  { %v4011_v0 = vsel %vm689_vm3, %v9370_v58, 0.0 }
 0xe59   :  { %4012 = vadd.xlane.f32.xlu0 %v4011_v0 }
 0xe60   :  { %v3982_v45 = vpop.f32.mrf.mxu1 }
 0xe61   :  { %v3983_v49 = vadd.f32 %v7267_v36, %v3982_v45 }
 0xe63   :  { %v9375_v11 = vadd.f32 %v3983_v49, %v9213_v57 }
 0xe65   :  { %v4014_v22 = vsel %vm689_vm3, %v9375_v11, 0.0 }
 0xe66   :  { %4015 = vadd.xlane.f32.xlu2 %v4014_v22 }
 0xe69   :  { %v3985_v53 = vpop.f32.mrf.mxu1 }
 0xe6a   :  { %v3986_v25 = vadd.f32 %v7267_v36, %v3985_v53 }
 0xe6c   :  { %v9380_v27 = vadd.f32 %v3986_v25, %v9220_v44 }
 0xe6e   :  { %v4017_v14 = vsel %vm689_vm3, %v9380_v27, 0.0 }
 0xe6f   :  { %4018 = vadd.xlane.f32.xlu1 %v4017_v14 }
 0xe71   :  { %v3988_v47 = vpop.f32.mrf.mxu1 }
 0xe72   :  { %v3989_v3 = vadd.f32 %v7267_v36, %v3988_v47 }
 0xe74   :  { %v9385_v16 = vadd.f32 %v3989_v3, %v9202_v48 }
 0xe76   :  { %v4020_v57 = vsel %vm689_vm3, %v9385_v16, 0.0 }
 0xe77   :  { %4021 = vadd.xlane.f32.xlu0 %v4020_v57 }
 0xe79   :  { %v3991_v19 = vpop.f32.mrf.mxu1 }
 0xe7a   :  { %v3992_v28 = vadd.f32 %v7267_v36, %v3991_v19 }
 0xe7c   :  { %v9390_v51 = vadd.f32 %v3992_v28, %v9229_v52 }
 0xe7e   :  { %v4023_v44 = vsel %vm689_vm3, %v9390_v51, 0.0 }
 0xe7f   :  { %4024 = vadd.xlane.f32.xlu1 %v4023_v44 }
 0xe91   :  { %v3994_v48 = vpop.f32.mrf.mxu1 }
 0xe92   :  { %v3995_v4 = vadd.f32 %v7267_v36, %v3994_v48 }
 0xe94   :  { %v9403_v61 = vadd.f32 %v3995_v4, %v9238_v8 }
 0xe96   :  { %v4026_v12 = vsel %vm689_vm3, %v9403_v61, 0.0 }
 0xebc   :  { %v4007_v54 = vpop.xlane.xlu2 %4006 }
 0xebd   :  { %v4029_v41 = vmul.f32 %v4007_v54, %v10345_v43 }
 0xebf   :  { %v9396_v56 = vsub.f32 %v9360_v21, %v4029_v41 }
 0xec1   :  { %v4045_v7 = vmul.f32 %v9396_v56, %v9396_v56 }
 0xec3   :  { %v4053_v18 = vsel %vm689_vm3, %v4045_v7, 0.0 }
 0xec4   :  { %4054 = vadd.xlane.f32.xlu2 %v4053_v18  ;;  %v4010_v52 = vpop.xlane.xlu1 %4009 }
 0xec5   :  { %v4030_v50 = vmul.f32 %v4010_v52, %v10345_v43 }
 0xec7   :  { %v9406_v40 = vsub.f32 %v9365_v35, %v4030_v50 }
 0xec9   :  { %v4046_v42 = vmul.f32 %v9406_v40, %v9406_v40 }
 0xecb   :  { %v4056_v62 = vsel %vm689_vm3, %v4046_v42, 0.0 }
 0xecc   :  { %v4013_v20 = vpop.xlane.xlu0 %4012  ;;  %4027 = vadd.xlane.f32.xlu2 %v4026_v12  ;;  %4057 = vadd.xlane.f32.xlu0 %v4056_v62  ;;  %v9461_v12 = vld [vmem:[%s10283_s16] ss:$0 sm:$0xff] }
 0xecd   :  { %v4031_v1 = vmul.f32 %v4013_v20, %v10345_v43 }
 0xecf   :  { %v9415_v5 = vsub.f32 %v9370_v58, %v4031_v1 }
 0xed1   :  { %v4047_v8 = vmul.f32 %v9415_v5, %v9415_v5 }
 0xed3   :  { %v4059_v39 = vsel %vm689_vm3, %v4047_v8, 0.0  ;;  %v9467_v8 = vld [vmem:[%s10284_s17] ss:$0 sm:$0xff] }
 0xed4   :  { %4060 = vadd.xlane.f32.xlu1 %v4059_v39 }
 0xed9   :  { %v4016_v29 = vpop.xlane.xlu2 %4015 }
 0xeda   :  { %v4032_v26 = vmul.f32 %v4016_v29, %v10345_v43 }
 0xedc   :  { %v9422_v10 = vsub.f32 %v9375_v11, %v4032_v26 }
 0xede   :  { %v4048_v13 = vmul.f32 %v9422_v10, %v9422_v10 }
 0xee0   :  { %v4062_v30 = vsel %vm689_vm3, %v4048_v13, 0.0 }
 0xee1   :  { %4063 = vadd.xlane.f32.xlu0 %v4062_v30 }
 0xee2   :  { %v4019_v23 = vpop.xlane.xlu1 %4018 }
 0xee3   :  { %v4033_v59 = vmul.f32 %v4019_v23, %v10345_v43 }
 0xee5   :  { %v9429_v31 = vsub.f32 %v9380_v27, %v4033_v59 }
 0xee7   :  { %v4049_v15 = vmul.f32 %v9429_v31, %v9429_v31 }
 0xee9   :  { %v4065_v60 = vsel %vm689_vm3, %v4049_v15, 0.0 }
 0xeea   :  { %v4022_v55 = vpop.xlane.xlu0 %4021  ;;  %4066 = vadd.xlane.f32.xlu2 %v4065_v60 }
 0xeeb   :  { %v4034_v37 = vmul.f32 %v4022_v55, %v10345_v43 }
 0xeed   :  { %v9436_v17 = vsub.f32 %v9385_v16, %v4034_v37 }
 0xeef   :  { %v4050_v38 = vmul.f32 %v9436_v17, %v9436_v17 }
 0xef1   :  { %v4068_v63 = vsel %vm689_vm3, %v4050_v38, 0.0 }
 0xef2   :  { %4069 = vadd.xlane.f32.xlu1 %v4068_v63  ;;  %v4025_v36 = vpop.xlane.xlu1 %4024 }
 0xef3   :  { %v4035_v6 = vmul.f32 %v4025_v36, %v10345_v43 }
 0xef5   :  { %v9443_v33 = vsub.f32 %v9390_v51, %v4035_v6 }
 0xef7   :  { %v4051_v24 = vmul.f32 %v9443_v33, %v9443_v33 }
 0xef9   :  { %v4071_v46 = vsel %vm689_vm3, %v4051_v24, 0.0 }
 0xefa   :  { %4072 = vadd.xlane.f32.xlu0 %v4071_v46 }
 0xf37   :  { %v4055_v0 = vpop.xlane.xlu2 %4054 }
 0xf38   :  { %v4077_v45 = vmul.f32 %v4055_v0, %v10345_v43 }
 0xf3a   :  { %v4085_v49 = vadd.f32 1e-05, %v4077_v45 }
 0xf3c   :  { %7471 = vrsqrt.f32 %v4085_v49  ;;  %vm4099_vm6 = vweird.f32 %v4085_v49 }
 0xf3f   :  { %v4028_v22 = vpop.xlane.xlu2 %4027  ;;  %v4058_v53 = vpop.xlane.xlu0 %4057 }
 0xf40   :  { %v4036_v25 = vmul.f32 %v4028_v22, %v10345_v43  ;;  %v4078_v14 = vmul.f32 %v4058_v53, %v10345_v43 }
 0xf42   :  { %v7472_v47 = vpop.eup %7471  ;;  %v9452_v3 = vsub.f32 %v9403_v61, %v4036_v25  ;;  %v4086_v57 = vadd.f32 1e-05, %v4078_v14 }
 0xf43   :  { %v4094_v19 = vmul.f32 %v7472_v47, %v4085_v49  ;;  %vm4100_vm4 = vweird.f32 %v7472_v47 }
 0xf44   :  { %7473 = vrsqrt.f32 %v4086_v57  ;;  %v4052_v28 = vmul.f32 %v9452_v3, %v9452_v3  ;;  %vm4101_vm7 = vmor %vm4099_vm6, %vm4100_vm4  ;;  %vm4109_vm9 = vweird.f32 %v4086_v57 }
 0xf45   :  { %v4095_v44 = vmul.f32 %v7472_v47, %v4094_v19 }
 0xf46   :  { %v4074_v54 = vsel %vm689_vm3, %v4052_v28, 0.0 }
 0xf47   :  { %v4096_v41 = vmul.f32 0.5, %v4095_v44  ;;  %4075 = vadd.xlane.f32.xlu2 %v4074_v54  ;;  %v4061_v48 = vpop.xlane.xlu1 %4060 }
 0xf48   :  { %v4079_v7 = vmul.f32 %v4061_v48, %v10345_v43 }
 0xf49   :  { %v4097_v4 = vsub.f32 1.5, %v4096_v41 }
 0xf4a   :  { %v7474_v18 = vpop.eup %7473  ;;  %v4087_v52 = vadd.f32 1e-05, %v4079_v7 }
 0xf4b   :  { %v4098_v50 = vmul.f32 %v7472_v47, %v4097_v4  ;;  %v4104_v42 = vmul.f32 %v7474_v18, %v4086_v57  ;;  %vm4110_vm8 = vweird.f32 %v7474_v18 }
 0xf4c   :  { %7475 = vrsqrt.f32 %v4087_v52  ;;  %vm4111_vm10 = vmor %vm4109_vm9, %vm4110_vm8  ;;  %vm4119_vm12 = vweird.f32 %v4087_v52 }
 0xf4d   :  { %v4102_v62 = vsel %vm4101_vm7, %v7472_v47, %v4098_v50  ;;  %v4105_v20 = vmul.f32 %v7474_v18, %v4104_v42 }
 0xf4e   :  { %v4173_v1 = vmul.f32 %v4102_v62, %v9396_v56 }
 0xf4f   :  { %v4106_v39 = vmul.f32 0.5, %v4105_v20 }
 0xf50   :  { %v4184_v29 = vmul.f32 %v9461_v12, %v4173_v1 }
 0xf51   :  { %v4107_v26 = vsub.f32 1.5, %v4106_v39 }
 0xf52   :  { %v7476_v13 = vpop.eup %7475  ;;  %v4195_v30 = vadd.f32 %v9467_v8, %v4184_v29 }
 0xf53   :  { %v4108_v23 = vmul.f32 %v7474_v18, %v4107_v26  ;;  %v4114_v59 = vmul.f32 %v7476_v13, %v4087_v52  ;;  %vm4120_vm11 = vweird.f32 %v7476_v13 }
 0xf54   :  { %v4064_v15 = vpop.xlane.xlu0 %4063  ;;  %7007 = vmatmul.msk.f32.vlgmr.msra.gmra.mxu3 %vm689_vm3, %v4195_v30  ;;  %vm4121_vm13 = vmor %vm4119_vm12, %vm4120_vm11 }
 0xf55   :  { %v4080_v56 = vmul.f32 %v4064_v15, %v10345_v43  ;;  %v4112_v60 = vsel %vm4111_vm10, %v7474_v18, %v4108_v23  ;;  %v4115_v55 = vmul.f32 %v7476_v13, %v4114_v59 }
 0xf56   :  { %v4174_v38 = vmul.f32 %v4112_v60, %v9406_v40 }
 0xf57   :  { %v4088_v37 = vadd.f32 1e-05, %v4080_v56  ;;  %v4116_v63 = vmul.f32 0.5, %v4115_v55 }
 0xf58   :  { %v4185_v36 = vmul.f32 %v9461_v12, %v4174_v38 }
 0xf59   :  { %7477 = vrsqrt.f32 %v4088_v37  ;;  %v4117_v6 = vsub.f32 1.5, %v4116_v63  ;;  %vm4129_vm15 = vweird.f32 %v4088_v37 }
 0xf5a   :  { %v4196_v24 = vadd.f32 %v9467_v8, %v4185_v36 }
 0xf5b   :  { %v4118_v46 = vmul.f32 %v7476_v13, %v4117_v6 }
 0xf5c   :  { %7008 = vmatmul.msk.f32.gmra.mxu3 %vm689_vm3, %v4196_v24 }
 0xf5d   :  { %v4067_v9 = vpop.xlane.xlu2 %4066  ;;  %v4122_v32 = vsel %vm4121_vm13, %v7476_v13, %v4118_v46 }
 0xf5e   :  { %v4081_v34 = vmul.f32 %v4067_v9, %v10345_v43  ;;  %v4175_v40 = vmul.f32 %v4122_v32, %v9415_v5 }
 0xf5f   :  { %v7478_v2 = vpop.eup %7477 }
 0xf60   :  { %v4124_v0 = vmul.f32 %v7478_v2, %v4088_v37  ;;  %v4089_v45 = vadd.f32 1e-05, %v4081_v34  ;;  %v4186_v49 = vmul.f32 %v9461_v12, %v4175_v40  ;;  %vm4130_vm14 = vweird.f32 %v7478_v2 }
 0xf61   :  { %vm4131_vm1 = vmor %vm4129_vm15, %vm4130_vm14 }
 0xf62   :  { %v4125_v22 = vmul.f32 %v7478_v2, %v4124_v0  ;;  %7479 = vrsqrt.f32 %v4089_v45  ;;  %v4197_v53 = vadd.f32 %v9467_v8, %v4186_v49  ;;  %vm4139_vm4 = vweird.f32 %v4089_v45 }
 0xf64   :  { %v4126_v25 = vmul.f32 0.5, %v4125_v22  ;;  %7009 = vmatmul.msk.f32.gmra.mxu3 %vm689_vm3, %v4197_v53 }
 0xf65   :  { %v4070_v14 = vpop.xlane.xlu1 %4069 }
 0xf66   :  { %v4127_v47 = vsub.f32 1.5, %v4126_v25  ;;  %v4082_v57 = vmul.f32 %v4070_v14, %v10345_v43 }
 0xf68   :  { %v7480_v19 = vpop.eup %7479  ;;  %v4128_v28 = vmul.f32 %v7478_v2, %v4127_v47  ;;  %v4090_v5 = vadd.f32 1e-05, %v4082_v57 }
 0xf69   :  { %v4134_v44 = vmul.f32 %v7480_v19, %v4089_v45  ;;  %vm4140_vm2 = vweird.f32 %v7480_v19 }
 0xf6a   :  { %v4132_v54 = vsel %vm4131_vm1, %v7478_v2, %v4128_v28  ;;  %7481 = vrsqrt.f32 %v4090_v5  ;;  %vm4141_vm6 = vmor %vm4139_vm4, %vm4140_vm2  ;;  %vm4149_vm8 = vweird.f32 %v4090_v5  ;;  %vm4269_vm1 = vcmask 1047556  }
 0xf6b   :  { %v4176_v41 = vmul.f32 %v4132_v54, %v9422_v10  ;;  %v4135_v48 = vmul.f32 %v7480_v19, %v4134_v44 }
 0xf6d   :  { %v4136_v7 = vmul.f32 0.5, %v4135_v48  ;;  %v4073_v4 = vpop.xlane.xlu0 %4072  ;;  %v4187_v18 = vmul.f32 %v9461_v12, %v4176_v41 }
 0xf6e   :  { %v4083_v52 = vmul.f32 %v4073_v4, %v10345_v43 }
 0xf6f   :  { %v4137_v50 = vsub.f32 1.5, %v4136_v7  ;;  %v4198_v42 = vadd.f32 %v9467_v8, %v4187_v18  ;;  %v7933_v7 = vmov 1983009808  }
 0xf70   :  { %v7482_v62 = vpop.eup %7481  ;;  %v4091_v20 = vadd.f32 1e-05, %v4083_v52  ;;  %v4274_v4 = vunpack.c.l.s4 %v7933_v7 }
 0xf71   :  { %v4138_v1 = vmul.f32 %v7480_v19, %v4137_v50  ;;  %v4144_v39 = vmul.f32 %v7482_v62, %v4090_v5  ;;  %7010 = vmatmul.msk.f32.gmra.mxu3 %vm689_vm3, %v4198_v42  ;;  %vm4150_vm7 = vweird.f32 %v7482_v62 }
 0xf72   :  { %7483 = vrsqrt.f32 %v4091_v20  ;;  %vm4151_vm9 = vmor %vm4149_vm8, %vm4150_vm7  ;;  %vm4159_vm11 = vweird.f32 %v4091_v20 }
 0xf73   :  { %v4142_v10 = vsel %vm4141_vm6, %v7480_v19, %v4138_v1  ;;  %v4145_v29 = vmul.f32 %v7482_v62, %v4144_v39 }
 0xf74   :  { %v4177_v26 = vmul.f32 %v4142_v10, %v9429_v31  ;;  %v7934_v10 = vmov 1934713408  }
 0xf75   :  { %v4146_v13 = vmul.f32 0.5, %v4145_v29  ;;  %v4322_v29 = vunpack.c.l.s4 %v7934_v10 }
 0xf76   :  { %v4188_v30 = vmul.f32 %v9461_v12, %v4177_v26 }
 0xf77   :  { %v4147_v23 = vsub.f32 1.5, %v4146_v13 }
 0xf78   :  { %v7484_v59 = vpop.eup %7483  ;;  %v4199_v15 = vadd.f32 %v9467_v8, %v4188_v30 }
 0xf79   :  { %v4148_v56 = vmul.f32 %v7482_v62, %v4147_v23  ;;  %v4154_v60 = vmul.f32 %v7484_v59, %v4091_v20  ;;  %vm4160_vm10 = vweird.f32 %v7484_v59 }
 0xf7a   :  { %7011 = vmatmul.msk.f32.gmra.mxu3 %vm689_vm3, %v4199_v15  ;;  %vm4161_vm12 = vmor %vm4159_vm11, %vm4160_vm10 }
 0xf7b   :  { %v4152_v55 = vsel %vm4151_vm9, %v7482_v62, %v4148_v56  ;;  %v4155_v37 = vmul.f32 %v7484_v59, %v4154_v60 }
 0xf7c   :  { %v4178_v38 = vmul.f32 %v4152_v55, %v9436_v17 }
 0xf7d   :  { %v4156_v63 = vmul.f32 0.5, %v4155_v37 }
 0xf7e   :  { %v4189_v31 = vmul.f32 %v9461_v12, %v4178_v38 }
 0xf7f   :  { %v4157_v36 = vsub.f32 1.5, %v4156_v63  ;;  %v9518_v63 = vunpack.c.0.s8 %v4322_v29 }
 0xf80   :  { %v4200_v6 = vadd.f32 %v9467_v8, %v4189_v31 }
 0xf81   :  { %v4158_v24 = vmul.f32 %v7484_v59, %v4157_v36 }
 0xf82   :  { %7012 = vmatmul.msk.f32.gmra.mxu3 %vm689_vm3, %v4200_v6 }
 0xf83   :  { %v4162_v46 = vsel %vm4161_vm12, %v7484_v59, %v4158_v24 }
 0xf84   :  { %v4179_v9 = vmul.f32 %v4162_v46, %v9443_v33 }
 0xf86   :  { %v4190_v32 = vmul.f32 %v9461_v12, %v4179_v9 }
 0xf88   :  { %v4201_v34 = vadd.f32 %v9467_v8, %v4190_v32 }
 0xf8a   :  { %7013 = vmatmul.msk.f32.gmra.mxu3 %vm689_vm3, %v4201_v34 }
 0xfba   :  { %v4076_v17 = vpop.xlane.xlu2 %4075 }
 0xfbb   :  { %v4084_v2 = vmul.f32 %v4076_v17, %v10345_v43 }
 0xfbd   :  { %v4092_v40 = vadd.f32 1e-05, %v4084_v2 }
 0xfbf   :  { %7485 = vrsqrt.f32 %v4092_v40  ;;  %vm4169_vm14 = vweird.f32 %v4092_v40 }
 0xfc5   :  { %v7486_v0 = vpop.eup %7485 }
 0xfc6   :  { %v4164_v45 = vmul.f32 %v7486_v0, %v4092_v40  ;;  %vm4170_vm13 = vweird.f32 %v7486_v0 }
 0xfc7   :  { %vm4171_vm15 = vmor %vm4169_vm14, %vm4170_vm13 }
 0xfc8   :  { %v4165_v49 = vmul.f32 %v7486_v0, %v4164_v45 }
 0xfca   :  { %v4166_v22 = vmul.f32 0.5, %v4165_v49 }
 0xfcc   :  { %v4167_v53 = vsub.f32 1.5, %v4166_v22 }
 0xfce   :  { %v4168_v25 = vmul.f32 %v7486_v0, %v4167_v53 }
 0xfd0   :  { %v4172_v33 = vsel %vm4171_vm15, %v7486_v0, %v4168_v25 }
 0xfd1   :  { %v4180_v14 = vmul.f32 %v4172_v33, %v9452_v3  ;;  %v9506_v3 = vunpack.c.0.s8 %v4274_v4 }
 0xfd3   :  { %v4191_v47 = vmul.f32 %v9461_v12, %v4180_v14 }
 0xfd5   :  { %v4202_v57 = vadd.f32 %v9467_v8, %v4191_v47 }
 0xfd7   :  { %7014 = vmatmul.msk.f32.gmra.mxu3 %vm689_vm3, %v4202_v57  ;;  %v4244_v19 = vpop.f32.mrf.mxu3 }
 0xfd8   :  { %v4271_v38 = vrot.slane %v4244_v19, 4 }
 0xfdf   :  { %v4247_v28 = vpop.f32.mrf.mxu3 }
 0xfe0   :  { %v4283_v42 = vrot.slane %v4247_v28, 4 }
 0xfe7   :  { %v4250_v5 = vpop.f32.mrf.mxu3 }
 0xfe8   :  { %v4268_v12 = vrot.slane %v4250_v5, 4  ;;  %v4272_v32 = vsel %vm4269_vm1, %v4250_v5, %v4271_v38 }
 0xfe9   :  { %v4280_v22 = vperm.slane %v4272_v32, %v9506_v3 }
 0xfea   :  { %v4270_v62 = vsel %vm4269_vm1, %v4268_v12, %v4244_v19 }
 0xfeb   :  { %v4276_v13 = vperm.slane %v4270_v62, %v9506_v3  ;;  %v4331_v7 = vrot.slane %v4280_v22, 4 }
 0xfed   :  { %v4319_v6 = vrot.slane %v4276_v13, 4 }
 0xff4   :  { %v4253_v44 = vpop.f32.mrf.mxu3 }
 0xff5   :  { %v4281_v48 = vrot.slane %v4253_v44, 4  ;;  %v4284_v1 = vsel %vm4269_vm1, %v4253_v44, %v4283_v42 }
 0xff6   :  { %v4292_v59 = vperm.slane %v4284_v1, %v9506_v3 }
 0xff7   :  { %v4282_v52 = vsel %vm4269_vm1, %v4281_v48, %v4247_v28 }
 0xff8   :  { %v4288_v8 = vperm.slane %v4282_v52, %v9506_v3  ;;  %v4329_v17 = vrot.slane %v4292_v59, 4  ;;  %v4332_v52 = vsel %vm4269_vm1, %v4292_v59, %v4331_v7 }
 0xff9   :  { %v4340_v42 = vperm.slane %v4332_v52, %v9518_v63 }
 0xffa   :  { %v4317_v39 = vrot.slane %v4288_v8, 4  ;;  %v4320_v2 = vsel %vm4269_vm1, %v4288_v8, %v4319_v6  ;;  %v4330_v19 = vsel %vm4269_vm1, %v4329_v17, %v4280_v22 }
 0xffb   :  { %v4328_v33 = vperm.slane %v4320_v2, %v9518_v63  ;;  %v4336_v4 = vperm.slane %v4330_v19, %v9518_v63  ;;  %v4379_v29 = vrot.slane %v4340_v42, 4 }
 0xffc   :  { %v4318_v55 = vsel %vm4269_vm1, %v4317_v39, %v4276_v13 }
 0xffd   :  { %v4256_v54 = vpop.f32.mrf.mxu3  ;;  %v4324_v34 = vperm.slane %v4318_v55, %v9518_v63  ;;  %v4375_v8 = vrot.slane %v4336_v4, 4  ;;  %v4371_v39 = vrot.slane %v4328_v33, 4 }
 0xffe   :  { %v4295_v15 = vrot.slane %v4256_v54, 4 }
 0xfff   :  { %v4367_v57 = vrot.slane %v4324_v34, 4 }
0x1005   :  { %v4259_v41 = vpop.f32.mrf.mxu3 }
0x1006   :  { %v4307_v26 = vrot.slane %v4259_v41, 4 }
0x100d   :  { %v4262_v18 = vpop.f32.mrf.mxu3 }
0x100e   :  { %v4293_v50 = vrot.slane %v4262_v18, 4  ;;  %v4296_v31 = vsel %vm4269_vm1, %v4262_v18, %v4295_v15 }
0x100f   :  { %v4304_v40 = vperm.slane %v4296_v31, %v9506_v3 }
0x1010   :  { %v4294_v20 = vsel %vm4269_vm1, %v4293_v50, %v4256_v54 }
0x1011   :  { %v4300_v30 = vperm.slane %v4294_v20, %v9506_v3  ;;  %v4355_v28 = vrot.slane %v4304_v40, 4 }
0x1013   :  { %v4343_v24 = vrot.slane %v4300_v30, 4 }
0x105a   :  { %v4265_v23 = vpop.f32.mrf.mxu3 }
0x105b   :  { %v4305_v56 = vrot.slane %v4265_v23, 4  ;;  %v4308_v60 = vsel %vm4269_vm1, %v4265_v23, %v4307_v26 }
0x105c   :  { %v4316_v37 = vperm.slane %v4308_v60, %v9506_v3 }
0x105d   :  { %v4306_v36 = vsel %vm4269_vm1, %v4305_v56, %v4259_v41 }
0x105e   :  { %v4312_v46 = vperm.slane %v4306_v36, %v9506_v3  ;;  %v4353_v9 = vrot.slane %v4316_v37, 4  ;;  %v4356_v48 = vsel %vm4269_vm1, %v4316_v37, %v4355_v28 }
0x105f   :  { %v4364_v12 = vperm.slane %v4356_v48, %v9518_v63 }
0x1060   :  { %v4341_v0 = vrot.slane %v4312_v46, 4  ;;  %v4344_v45 = vsel %vm4269_vm1, %v4312_v46, %v4343_v24  ;;  %v4354_v25 = vsel %vm4269_vm1, %v4353_v9, %v4304_v40 }
0x1061   :  { %v4352_v49 = vperm.slane %v4344_v45, %v9518_v63  ;;  %v4360_v5 = vperm.slane %v4354_v25, %v9518_v63  ;;  %v4377_v62 = vrot.slane %v4364_v12, 4  ;;  %v9569_v13 = vsel %vm4269_vm1, %v4364_v12, %v4379_v29 }
0x1062   :  { %v4342_v53 = vsel %vm4269_vm1, %v4341_v0, %v4300_v30 }
0x1063   :  { %v4369_v14 = vrot.slane %v4352_v49, 4  ;;  %v4348_v47 = vperm.slane %v4342_v53, %v9518_v63  ;;  %v4373_v50 = vrot.slane %v4360_v5, 4  ;;  %v9554_v20 = vsel %vm4269_vm1, %v4360_v5, %v4375_v8 }
0x1064   :  { %v4372_v10 = vsel %vm4269_vm1, %v4352_v49, %v4371_v39  ;;  %v9566_v26 = vsel %vm4269_vm1, %v4377_v62, %v4340_v42  ;;  %v7935_v53 = vmov 4.0  }
0x1065   :  { %v4370_v44 = vsel %vm4269_vm1, %v4369_v14, %v4328_v33  ;;  %v9538_v54 = vsel %vm4269_vm1, %v4348_v47, %v4367_v57  ;;  %v4365_v41 = vrot.slane %v4348_v47, 4  ;;  %v9557_v1 = vsel %vm4269_vm1, %v4373_v50, %v4336_v4 }
0x1066   :  { %4436 = vrot.lane.b32.xlu2 %v4370_v44, %s7918_s29  ;;  %4409 = vrot.lane.b32.xlu0 %v9538_v54, %s7918_s29  ;;  %v7225_v30 = vpack.i.bf16 %v9566_v26, %v9569_v13  ;;  %v9578_v23 = vpack.i.bf16 %v4370_v44, %v4372_v10  ;;  %v9585_v59 = vpack.i.bf16 %v9557_v1, %v9554_v20  ;;  %7487 = vrcp.f32 %v7935_v53 }
0x1067   :  { %v9546_v18 = vsel %vm4269_vm1, %v4365_v41, %v4324_v34 }
0x1068   :  { %4382 = vrot.lane.b32.xlu1 %v9546_v18, %s7918_s29  ;;  %v7235_v15 = vpack.i.bf16 %v9546_v18, %v9538_v54 }
0x106c   :  { %v7488_v25 = vpop.eup %7487 }
0x106d   :  { %v4598_v33 = vmul.f32 4.0, %v7488_v25  ;;  %vm4602_vm2 = vweird.f32 %v7488_v25 }
0x106e   :  { %4517 = vrot.lane.b32.xlu2 %v9554_v20, %s7918_s29  ;;  %4490 = vrot.lane.b32.xlu0 %v9557_v1, %s7918_s29 }
0x106f   :  { %v4599_v14 = vsub.f32 1.0, %v4598_v33 }
0x1070   :  { %4463 = vrot.lane.b32.xlu1 %v4372_v10, %s7918_s29 }
0x1071   :  { %v4600_v47 = vmul.f32 %v7488_v25, %v4599_v14 }
0x1073   :  { %v4601_v57 = vadd.f32 %v7488_v25, %v4600_v47 }
0x1075   :  { %v9621_v19 = vsel %vm4602_vm2, %v7488_v25, %v4601_v57 }
0x1076   :  { %7226 = vrot.lane.b32.xlu2 %v7225_v30, %s7919_s2  ;;  %4571 = vrot.lane.b32.xlu0 %v9569_v13, %s7918_s29 }
0x1078   :  { %4544 = vrot.lane.b32.xlu1 %v9566_v26, %s7918_s29 }
0x107e   :  { %5096 = vrot.lane.b32.xlu2 %v4372_v10, %s7925_s11  ;;  %7221 = vrot.lane.b32.xlu0 %v9578_v23, %s7919_s2 }
0x1080   :  { %7231 = vrot.lane.b32.xlu1 %v9585_v59, %s7919_s2 }
0x1086   :  { %5210 = vrot.lane.b32.xlu2 %v9569_v13, %s7926_s0  ;;  %5098 = vrot.lane.b32.xlu0 %v4372_v10, %s7926_s0 }
0x1088   :  { %7236 = vrot.lane.b32.xlu1 %v7235_v15, %s7919_s2 }
0x108e   :  { %5070 = vrot.lane.b32.xlu0 %v4370_v44, %s7926_s0 }
0x1096   :  { %5068 = vrot.lane.b32.xlu0 %v4370_v44, %s7925_s11 }
0x109e   :  { %5182 = vrot.lane.b32.xlu0 %v9566_v26, %s7926_s0 }
0x10c0   :  { %v4437_v55 = vpop.permute.xlu2 %4436 }
0x10c8   :  { %v4518_v31 = vpop.permute.xlu2 %4517 }
0x10d0   :  { %v7227_v24 = vpop.permute.xlu2 %7226 }
0x10d1   :  { %v7229_v32 = vunpack.i.h.bf16 %v7227_v24  ;;  %v7228_v22 = vunpack.i.l.bf16 %v7227_v24 }
0x10d8   :  { %v4410_v56 = vpop.permute.xlu0 %4409 }
0x10da   :  { %v4383_v60 = vpop.permute.xlu1 %4382 }
0x10db   :  { %7015 = vmatpush.xpose.msk.msrb.mxu2 %vm3629_vm5, %v4383_v60 }
0x10de   :  { %7016 = vmatmul.msk.f32.vlgmr.msrb.gmra.mxu2 %vm3629_vm5, %v9546_v18 }
0x10df   :  { %7017 = vmatpush.xpose.msk.msra.mxu2 %vm3629_vm5, %v4410_v56 }
0x10e0   :  { %v4491_v37 = vpop.permute.xlu0 %4490 }
0x10e2   :  { %v4464_v38 = vpop.permute.xlu1 %4463 }
0x10e3   :  { %7019 = vmatpush.xpose.msk.msrb.mxu2 %vm3629_vm5, %v4437_v55 }
0x10e6   :  { %7018 = vmatmul.msk.f32.vlgmr.msra.gmra.mxu2 %vm3629_vm5, %v9538_v54 }
0x10e7   :  { %7021 = vmatpush.xpose.msk.msra.mxu2 %vm3629_vm5, %v4464_v38 }
0x10e8   :  { %v4572_v36 = vpop.permute.xlu0 %4571 }
0x10ea   :  { %v4545_v6 = vpop.permute.xlu1 %4544 }
0x10ee   :  { %7020 = vmatmul.msk.f32.vlgmr.msrb.gmra.mxu2 %vm3629_vm5, %v4370_v44 }
0x10ef   :  { %7023 = vmatpush.xpose.msk.msrb.mxu2 %vm3629_vm5, %v4491_v37 }
0x10f0   :  { %v7222_v46 = vpop.permute.xlu0 %7221 }
0x10f1   :  { %v7224_v9 = vunpack.i.h.bf16 %v7222_v46  ;;  %v7223_v49 = vunpack.i.l.bf16 %v7222_v46 }
0x10f2   :  { %v7232_v34 = vpop.permute.xlu1 %7231 }
0x10f3   :  { %4877 = vmatpush.msrb.mxu3 %v7224_v9  ;;  %v7234_v0 = vunpack.i.h.bf16 %v7232_v34  ;;  %v7233_v45 = vunpack.i.l.bf16 %v7232_v34 }
0x10f5   :  { %4981 = vmatpush.msra.mxu3 %v7229_v32 }
0x10f6   :  { %7022 = vmatmul.msk.f32.vlgmr.msra.gmra.mxu2 %vm3629_vm5, %v4372_v10 }
0x10f7   :  { %7025 = vmatpush.xpose.msk.msra.mxu2 %vm3629_vm5, %v4518_v31 }
0x10fa   :  { %v7237_v17 = vpop.permute.xlu1 %7236 }
0x10fb   :  { %v7239_v2 = vunpack.i.h.bf16 %v7237_v17  ;;  %v7238_v40 = vunpack.i.l.bf16 %v7237_v17  ;;  %v9653_v17 = vpop.permute.xlu2 %5096 }
0x10fd   :  { %4825 = vmatpush.msra.mxu0 %v7239_v2  ;;  %4851 = vmatpush.msra.mxu1 %v7238_v40 }
0x10fe   :  { %7024 = vmatmul.msk.f32.vlgmr.msrb.gmra.mxu2 %vm3629_vm5, %v9557_v1 }
0x10ff   :  { %4929 = vmatpush.msrb.mxu0 %v7234_v0  ;;  %7027 = vmatpush.xpose.msk.msrb.mxu2 %vm3629_vm5, %v4545_v6 }
0x1100   :  { %4955 = vmatpush.msrb.mxu1 %v7233_v45 }
0x1106   :  { %7026 = vmatmul.msk.f32.vlgmr.msra.gmra.mxu2 %vm3629_vm5, %v9554_v20 }
0x1107   :  { %7029 = vmatpush.xpose.msk.msra.mxu2 %vm3629_vm5, %v4572_v36  ;;  %v9645_v36 = vpop.permute.xlu0 %5098 }
0x110e   :  { %7028 = vmatmul.msk.f32.vlgmr.msrb.gmra.mxu2 %vm3629_vm5, %v9566_v26 }
0x110f   :  { %4903 = vmatpush.msrb.mxu2 %v7223_v49  ;;  %v9647_v6 = vpop.permute.xlu0 %5070 }
0x1116   :  { %7030 = vmatmul.msk.f32.vlgmr.msra.gmra.mxu2 %vm3629_vm5, %v9569_v13 }
0x1117   :  { %5007 = vmatpush.msra.mxu2 %v7228_v22  ;;  %v9649_v24 = vpop.permute.xlu0 %5068  ;;  %v9659_v22 = vpop.permute.xlu2 %5210 }
0x111f   :  { %v9651_v46 = vpop.permute.xlu0 %5182 }
0x1161   :  { %v4405_v28 = vpop.f32.mrf.mxu2 }
0x1162   :  { %v4604_v5 = vmul.f32 %v9621_v19, %v4405_v28 }
0x1164   :  { %v4612_v44 = vsel %vm339_vm0, %v4604_v5, -inf }
0x1165   :  { %4613 = vmax.xlane.f32.xlu0 %v4612_v44 }
0x1169   :  { %v4432_v41 = vpop.f32.mrf.mxu2 }
0x116a   :  { %v4605_v48 = vmul.f32 %v9621_v19, %v4432_v41 }
0x116c   :  { %v4615_v7 = vsel %vm339_vm0, %v4605_v48, -inf }
0x116d   :  { %4616 = vmax.xlane.f32.xlu1 %v4615_v7 }
0x1171   :  { %v4459_v4 = vpop.f32.mrf.mxu2 }
0x1172   :  { %v4606_v52 = vmul.f32 %v9621_v19, %v4459_v4 }
0x1174   :  { %v4618_v12 = vsel %vm339_vm0, %v4606_v52, -inf }
0x1175   :  { %4619 = vmax.xlane.f32.xlu1 %v4618_v12 }
0x1179   :  { %v4486_v50 = vpop.f32.mrf.mxu2 }
0x117a   :  { %v4607_v8 = vmul.f32 %v9621_v19, %v4486_v50 }
0x117c   :  { %v4621_v42 = vsel %vm339_vm0, %v4607_v8, -inf }
0x117d   :  { %4622 = vmax.xlane.f32.xlu2 %v4621_v42 }
0x1181   :  { %v4513_v62 = vpop.f32.mrf.mxu2 }
0x1182   :  { %v4608_v39 = vmul.f32 %v9621_v19, %v4513_v62 }
0x1184   :  { %v4624_v10 = vsel %vm339_vm0, %v4608_v39, -inf }
0x1185   :  { %4625 = vmax.xlane.f32.xlu1 %v4624_v10 }
0x1189   :  { %v4540_v29 = vpop.f32.mrf.mxu2 }
0x118a   :  { %v4609_v30 = vmul.f32 %v9621_v19, %v4540_v29 }
0x118c   :  { %v4627_v15 = vsel %vm339_vm0, %v4609_v30, -inf }
0x118d   :  { %4628 = vmax.xlane.f32.xlu2 %v4627_v15 }
0x1191   :  { %v4567_v56 = vpop.f32.mrf.mxu2 }
0x1192   :  { %v4610_v60 = vmul.f32 %v9621_v19, %v4567_v56 }
0x1194   :  { %v4630_v55 = vsel %vm339_vm0, %v4610_v60, -inf }
0x1195   :  { %4631 = vmax.xlane.f32.xlu2 %v4630_v55 }
0x1199   :  { %v4594_v37 = vpop.f32.mrf.mxu2 }
0x119a   :  { %v4611_v38 = vmul.f32 %v9621_v19, %v4594_v37 }
0x119c   :  { %v4633_v31 = vsel %vm339_vm0, %v4611_v38, -inf }
0x119d   :  { %4634 = vmax.xlane.f32.xlu0 %v4633_v31 }
0x119e   :  { %5208 = vrot.lane.b32.xlu1 %v9569_v13, %s7925_s11 }
0x11ad   :  { %5180 = vrot.lane.b32.xlu2 %v9566_v26, %s7925_s11 }
0x11b1   :  { %5042 = vrot.lane.b32.xlu0 %v9538_v54, %s7926_s0 }
0x11d8   :  { %v4614_v9 = vpop.xlane.xlu0 %4613 }
0x11d9   :  { %v4636_v32 = vsub.f32 %v4604_v5, %v4614_v9 }
0x11db   :  { %v4644_v34 = vmul.f32 1.442695, %v4636_v32 }
0x11dd   :  { %7489 = vpow2.f32 %v4644_v34 }
0x11e0   :  { %v4617_v2 = vpop.xlane.xlu1 %4616 }
0x11e1   :  { %v4637_v40 = vsub.f32 %v4605_v48, %v4617_v2 }
0x11e3   :  { %v9655_v0 = vpop.eup %7489  ;;  %v4646_v45 = vmul.f32 1.442695, %v4637_v40 }
0x11e4   :  { %v4660_v49 = vsel %vm339_vm0, %v9655_v0, 0.0 }
0x11e5   :  { %7491 = vpow2.f32 %v4646_v45  ;;  %4661 = vadd.xlane.f32.xlu1 %v4660_v49 }
0x11e8   :  { %v4620_v53 = vpop.xlane.xlu1 %4619 }
0x11e9   :  { %v4638_v25 = vsub.f32 %v4606_v52, %v4620_v53 }
0x11eb   :  { %v9661_v33 = vpop.eup %7491  ;;  %v4648_v14 = vmul.f32 1.442695, %v4638_v25 }
0x11ec   :  { %v4663_v47 = vsel %vm339_vm0, %v9661_v33, 0.0 }
0x11ed   :  { %7493 = vpow2.f32 %v4648_v14  ;;  %4664 = vadd.xlane.f32.xlu2 %v4663_v47 }
0x11f0   :  { %v4623_v57 = vpop.xlane.xlu2 %4622 }
0x11f1   :  { %v4639_v28 = vsub.f32 %v4607_v8, %v4623_v57 }
0x11f3   :  { %v9665_v5 = vpop.eup %7493  ;;  %v4650_v44 = vmul.f32 1.442695, %v4639_v28 }
0x11f4   :  { %v4666_v41 = vsel %vm339_vm0, %v9665_v5, 0.0 }
0x11f5   :  { %7495 = vpow2.f32 %v4650_v44  ;;  %4667 = vadd.xlane.f32.xlu2 %v4666_v41 }
0x11f8   :  { %v4626_v48 = vpop.xlane.xlu1 %4625 }
0x11f9   :  { %v4640_v7 = vsub.f32 %v4608_v39, %v4626_v48 }
0x11fb   :  { %v9669_v4 = vpop.eup %7495  ;;  %v4652_v52 = vmul.f32 1.442695, %v4640_v7 }
0x11fc   :  { %v4669_v12 = vsel %vm339_vm0, %v9669_v4, 0.0 }
0x11fd   :  { %7497 = vpow2.f32 %v4652_v52  ;;  %4670 = vadd.xlane.f32.xlu0 %v4669_v12 }
0x1200   :  { %v4629_v50 = vpop.xlane.xlu2 %4628 }
0x1201   :  { %v4641_v8 = vsub.f32 %v4609_v30, %v4629_v50 }
0x1203   :  { %v9673_v42 = vpop.eup %7497  ;;  %v4654_v62 = vmul.f32 1.442695, %v4641_v8 }
0x1204   :  { %v4672_v10 = vsel %vm339_vm0, %v9673_v42, 0.0 }
0x1205   :  { %7499 = vpow2.f32 %v4654_v62  ;;  %4673 = vadd.xlane.f32.xlu1 %v4672_v10 }
0x1208   :  { %v4632_v29 = vpop.xlane.xlu2 %4631 }
0x1209   :  { %v4642_v39 = vsub.f32 %v4610_v60, %v4632_v29 }
0x120b   :  { %v9677_v15 = vpop.eup %7499  ;;  %v4656_v56 = vmul.f32 1.442695, %v4642_v39 }
0x120c   :  { %v4675_v55 = vsel %vm339_vm0, %v9677_v15, 0.0 }
0x120d   :  { %7501 = vpow2.f32 %v4656_v56  ;;  %4676 = vadd.xlane.f32.xlu2 %v4675_v55 }
0x1210   :  { %v4635_v37 = vpop.xlane.xlu0 %4634  ;;  %v9705_v2 = vpop.permute.xlu2 %5180 }
0x1211   :  { %v4643_v30 = vsub.f32 %v4611_v38, %v4635_v37  ;;  %v9703_v38 = vpop.permute.xlu1 %5208 }
0x1213   :  { %v9681_v31 = vpop.eup %7501  ;;  %v4658_v9 = vmul.f32 1.442695, %v4643_v30 }
0x1214   :  { %v4678_v32 = vsel %vm339_vm0, %v9681_v31, 0.0 }
0x1215   :  { %7503 = vpow2.f32 %v4658_v9  ;;  %4679 = vadd.xlane.f32.xlu0 %v4678_v32 }
0x121b   :  { %v9685_v34 = vpop.eup %7503 }
0x121c   :  { %v4681_v60 = vsel %vm339_vm0, %v9685_v34, 0.0 }
0x121d   :  { %4682 = vadd.xlane.f32.xlu1 %v4681_v60 }
0x1223   :  { %v5043_v44 = vpop.permute.xlu0 %5042 }
0x1225   :  { %5040 = vrot.lane.b32.xlu2 %v9538_v54, %s7925_s11 }
0x1229   :  { %5012 = vrot.lane.b32.xlu0 %v9546_v18, %s7925_s11 }
0x122d   :  { %5126 = vrot.lane.b32.xlu2 %v9557_v1, %s7926_s0 }
0x1231   :  { %5152 = vrot.lane.b32.xlu0 %v9554_v20, %s7925_s11 }
0x1236   :  { %5014 = vrot.lane.b32.xlu1 %v9546_v18, %s7926_s0 }
0x123e   :  { %5154 = vrot.lane.b32.xlu1 %v9554_v20, %s7926_s0 }
0x1246   :  { %5124 = vrot.lane.b32.xlu1 %v9557_v1, %s7925_s11 }
0x1258   :  { %v4662_v40 = vpop.xlane.xlu1 %4661 }
0x1259   :  { %7505 = vrcp.f32 %v4662_v40  ;;  %v4695_v14 = vand.u32 2147483648, %v4662_v40  ;;  %v4693_v57 = vand.u32 2147483647, %v4662_v40  ;;  %vm4689_vm6 = vweird.f32 %v4662_v40 }
0x125b   :  { %v4696_v1 = vor.u32 1.1754944e-38, %v4695_v14  ;;  %vm4694_vm8 = vcmp.eq.f32.partialorder %v4693_v57, 8.507059e+37 }
0x125f   :  { %v7506_v45 = vpop.eup %7505 }
0x1260   :  { %v4685_v49 = vmul.f32 %v7506_v45, %v4662_v40  ;;  %v4665_v53 = vpop.xlane.xlu2 %4664  ;;  %vm4690_vm4 = vweird.f32 %v7506_v45 }
0x1261   :  { %7507 = vrcp.f32 %v4665_v53  ;;  %vm4691_vm7 = vmor %vm4689_vm6, %vm4690_vm4  ;;  %v4710_v8 = vand.u32 2147483648, %v4665_v53  ;;  %v4708_v10 = vand.u32 2147483647, %v4665_v53  ;;  %vm4704_vm10 = vweird.f32 %v4665_v53 }
0x1262   :  { %v4686_v25 = vsub.f32 1.0, %v4685_v49 }
0x1263   :  { %v4711_v56 = vor.u32 1.1754944e-38, %v4710_v8  ;;  %vm4709_vm12 = vcmp.eq.f32.partialorder %v4708_v10, 8.507059e+37 }
0x1264   :  { %v4687_v47 = vmul.f32 %v7506_v45, %v4686_v25 }
0x1266   :  { %v4688_v28 = vadd.f32 %v7506_v45, %v4687_v47 }
0x1267   :  { %v7508_v20 = vpop.eup %7507 }
0x1268   :  { %v4692_v41 = vsel %vm4691_vm7, %v7506_v45, %v4688_v28  ;;  %v4700_v48 = vmul.f32 %v7508_v20, %v4665_v53  ;;  %v4668_v7 = vpop.xlane.xlu2 %4667  ;;  %vm4705_vm9 = vweird.f32 %v7508_v20 }
0x1269   :  { %v4697_v52 = vsel %vm4694_vm8, %v4696_v1, %v4692_v41  ;;  %7509 = vrcp.f32 %v4668_v7  ;;  %vm4706_vm11 = vmor %vm4704_vm10, %vm4705_vm9  ;;  %v4725_v60 = vand.u32 2147483648, %v4668_v7  ;;  %v4723_v45 = vand.u32 2147483647, %v4668_v7 }
0x126a   :  { %v4698_v12 = vmul.f32 %v9655_v0, %v4697_v52  ;;  %v4701_v50 = vsub.f32 1.0, %v4700_v48  ;;  %vm4719_vm14 = vweird.f32 %v4668_v7 }
0x126b   :  { %v4726_v25 = vor.u32 1.1754944e-38, %v4725_v60  ;;  %vm4724_vm2 = vcmp.eq.f32.partialorder %v4723_v45, 8.507059e+37 }
0x126c   :  { %v4702_v62 = vmul.f32 %v7508_v20, %v4701_v50  ;;  %7031 = vmatmul.msk.f32.vlgmr.msra.gmra.mxu0 %vm339_vm0, %v4698_v12 }
0x126e   :  { %v4703_v29 = vadd.f32 %v7508_v20, %v4702_v62 }
0x126f   :  { %v7510_v39 = vpop.eup %7509 }
0x1270   :  { %v4707_v55 = vsel %vm4706_vm11, %v7508_v20, %v4703_v29  ;;  %v4715_v37 = vmul.f32 %v7510_v39, %v4668_v7  ;;  %v4671_v30 = vpop.xlane.xlu0 %4670  ;;  %vm4720_vm13 = vweird.f32 %v7510_v39 }
0x1271   :  { %v4712_v9 = vsel %vm4709_vm12, %v4711_v56, %v4707_v55  ;;  %7511 = vrcp.f32 %v4671_v30  ;;  %vm4721_vm15 = vmor %vm4719_vm14, %vm4720_vm13  ;;  %v4740_v1 = vand.u32 2147483648, %v4671_v30  ;;  %v4738_v48 = vand.u32 2147483647, %v4671_v30 }
0x1272   :  { %v4713_v0 = vmul.f32 %v9661_v33, %v4712_v9  ;;  %v4716_v32 = vsub.f32 1.0, %v4715_v37  ;;  %vm4734_vm6 = vweird.f32 %v4671_v30 }
0x1273   :  { %v4741_v52 = vor.u32 1.1754944e-38, %v4740_v1  ;;  %vm4739_vm8 = vcmp.eq.f32.partialorder %v4738_v48, 8.507059e+37 }
0x1274   :  { %v4717_v40 = vmul.f32 %v7510_v39, %v4716_v32  ;;  %7032 = vmatmul.msk.f32.vlgmr.msra.gmra.mxu1 %vm339_vm0, %v4713_v0 }
0x1275   :  { %7041 = vmatpush.xpose.msk.msra.mxu1 %vm3629_vm5, %v5043_v44 }
0x1276   :  { %v4718_v49 = vadd.f32 %v7510_v39, %v4717_v40 }
0x1277   :  { %v7512_v53 = vpop.eup %7511 }
0x1278   :  { %v4722_v14 = vsel %vm4721_vm15, %v7510_v39, %v4718_v49  ;;  %v4730_v47 = vmul.f32 %v7512_v53, %v4671_v30  ;;  %v4674_v57 = vpop.xlane.xlu1 %4673  ;;  %vm4735_vm4 = vweird.f32 %v7512_v53 }
0x1279   :  { %v4727_v28 = vsel %vm4724_vm2, %v4726_v25, %v4722_v14  ;;  %7513 = vrcp.f32 %v4674_v57  ;;  %vm4736_vm7 = vmor %vm4734_vm6, %vm4735_vm4  ;;  %v4755_v29 = vand.u32 2147483648, %v4674_v57  ;;  %v4753_v56 = vand.u32 2147483647, %v4674_v57 }
0x127a   :  { %v4728_v33 = vmul.f32 %v9665_v5, %v4727_v28  ;;  %v4731_v20 = vsub.f32 1.0, %v4730_v47  ;;  %vm4749_vm10 = vweird.f32 %v4674_v57 }
0x127b   :  { %v4756_v37 = vor.u32 1.1754944e-38, %v4755_v29  ;;  %vm4754_vm12 = vcmp.eq.f32.partialorder %v4753_v56, 8.507059e+37 }
0x127c   :  { %v4732_v41 = vmul.f32 %v7512_v53, %v4731_v20  ;;  %7033 = vmatmul.msk.f32.vlgmr.msrb.gmra.mxu3 %vm339_vm0, %v4728_v33 }
0x127d   :  { %7043 = vmatpush.xpose.msk.msrb.mxu3 %vm3629_vm5, %v9647_v6 }
0x127e   :  { %v4733_v44 = vadd.f32 %v7512_v53, %v4732_v41 }
0x127f   :  { %v7514_v7 = vpop.eup %7513 }
0x1280   :  { %v4737_v12 = vsel %vm4736_vm7, %v7512_v53, %v4733_v44  ;;  %v4745_v50 = vmul.f32 %v7514_v7, %v4674_v57  ;;  %v4677_v8 = vpop.xlane.xlu2 %4676  ;;  %vm4750_vm9 = vweird.f32 %v7514_v7 }
0x1281   :  { %v4742_v5 = vsel %vm4739_vm8, %v4741_v52, %v4737_v12  ;;  %7515 = vrcp.f32 %v4677_v8  ;;  %vm4751_vm11 = vmor %vm4749_vm10, %vm4750_vm9  ;;  %v4770_v40 = vand.u32 2147483648, %v4677_v8  ;;  %v4768_v49 = vand.u32 2147483647, %v4677_v8 }
0x1282   :  { %v4743_v62 = vmul.f32 %v9669_v4, %v4742_v5  ;;  %v4746_v10 = vsub.f32 1.0, %v4745_v50  ;;  %vm4764_vm14 = vweird.f32 %v4677_v8 }
0x1283   :  { %v4771_v25 = vor.u32 1.1754944e-38, %v4770_v40  ;;  %vm4769_vm2 = vcmp.eq.f32.partialorder %v4768_v49, 8.507059e+37 }
0x1284   :  { %v4747_v39 = vmul.f32 %v7514_v7, %v4746_v10  ;;  %7034 = vmatmul.msk.f32.vlgmr.msrb.gmra.mxu2 %vm339_vm0, %v4743_v62 }
0x1285   :  { %7045 = vmatpush.xpose.msk.msrb.mxu2 %vm3629_vm5, %v9645_v36 }
0x1286   :  { %v4748_v6 = vadd.f32 %v7514_v7, %v4747_v39 }
0x1287   :  { %v7516_v55 = vpop.eup %7515 }
0x1288   :  { %v4752_v30 = vsel %vm4751_vm11, %v7514_v7, %v4748_v6  ;;  %v4760_v9 = vmul.f32 %v7516_v55, %v4677_v8  ;;  %v4680_v0 = vpop.xlane.xlu0 %4679  ;;  %vm4765_vm13 = vweird.f32 %v7516_v55 }
0x1289   :  { %v4757_v4 = vsel %vm4754_vm12, %v4756_v37, %v4752_v30  ;;  %7517 = vrcp.f32 %v4680_v0  ;;  %vm4766_vm15 = vmor %vm4764_vm14, %vm4765_vm13  ;;  %v4785_v20 = vand.u32 2147483648, %v4680_v0  ;;  %v4783_v41 = vand.u32 2147483647, %v4680_v0 }
0x128a   :  { %v4758_v32 = vmul.f32 %v9673_v42, %v4757_v4  ;;  %v4761_v60 = vsub.f32 1.0, %v4760_v9  ;;  %vm4779_vm6 = vweird.f32 %v4680_v0 }
0x128b   :  { %v4786_v7 = vor.u32 1.1754944e-38, %v4785_v20  ;;  %vm4784_vm8 = vcmp.eq.f32.partialorder %v4783_v41, 8.507059e+37 }
0x128c   :  { %v4762_v45 = vmul.f32 %v7516_v55, %v4761_v60  ;;  %7035 = vmatmul.msk.f32.vlgmr.msrb.gmra.mxu0 %vm339_vm0, %v4758_v32 }
0x128e   :  { %v4763_v36 = vadd.f32 %v7516_v55, %v4762_v45 }
0x128f   :  { %v7518_v53 = vpop.eup %7517 }
0x1290   :  { %v4767_v14 = vsel %vm4766_vm15, %v7516_v55, %v4763_v36  ;;  %v4775_v47 = vmul.f32 %v7518_v53, %v4680_v0  ;;  %v4683_v57 = vpop.xlane.xlu1 %4682  ;;  %vm4780_vm4 = vweird.f32 %v7518_v53 }
0x1291   :  { %v4772_v28 = vsel %vm4769_vm2, %v4771_v25, %v4767_v14  ;;  %7519 = vrcp.f32 %v4683_v57  ;;  %vm4781_vm7 = vmor %vm4779_vm6, %vm4780_vm4  ;;  %v4800_v62 = vand.u32 2147483648, %v4683_v57  ;;  %v4798_v29 = vand.u32 2147483647, %v4683_v57 }
0x1292   :  { %v4773_v42 = vmul.f32 %v9677_v15, %v4772_v28  ;;  %v4776_v33 = vsub.f32 1.0, %v4775_v47  ;;  %v5041_v15 = vpop.permute.xlu2 %5040  ;;  %vm4794_vm10 = vweird.f32 %v4683_v57 }
0x1293   :  { %v4801_v56 = vor.u32 1.1754944e-38, %v4800_v62  ;;  %vm4799_vm12 = vcmp.eq.f32.partialorder %v4798_v29, 8.507059e+37 }
0x1294   :  { %v4777_v1 = vmul.f32 %v7518_v53, %v4776_v33  ;;  %7036 = vmatmul.msk.f32.vlgmr.msrb.gmra.mxu1 %vm339_vm0, %v4773_v42 }
0x1296   :  { %v4778_v48 = vadd.f32 %v7518_v53, %v4777_v1 }
0x1297   :  { %v7520_v44 = vpop.eup %7519 }
0x1298   :  { %v4782_v52 = vsel %vm4781_vm7, %v7518_v53, %v4778_v48  ;;  %v4790_v12 = vmul.f32 %v7520_v44, %v4683_v57  ;;  %vm4795_vm9 = vweird.f32 %v7520_v44 }
0x1299   :  { %v4787_v50 = vsel %vm4784_vm8, %v4786_v7, %v4782_v52  ;;  %vm4796_vm11 = vmor %vm4794_vm10, %vm4795_vm9 }
0x129a   :  { %v4788_v8 = vmul.f32 %v9681_v31, %v4787_v50  ;;  %v4791_v5 = vsub.f32 1.0, %v4790_v12  ;;  %v5127_v30 = vpop.permute.xlu2 %5126 }
0x129c   :  { %v4792_v10 = vmul.f32 %v7520_v44, %v4791_v5  ;;  %7037 = vmatmul.msk.f32.vlgmr.msra.gmra.mxu3 %vm339_vm0, %v4788_v8  ;;  %7042 = vmatmul.msk.f32.vlgmr.msra.gmra.mxu1 %vm3629_vm5, %v5041_v15 }
0x129d   :  { %7051 = vmatpush.xpose.msk.msra.mxu3 %vm3629_vm5, %v9651_v46  ;;  %v5013_v46 = vpop.permute.xlu0 %5012 }
0x129e   :  { %v4793_v39 = vadd.f32 %v7520_v44, %v4792_v10 }
0x12a0   :  { %v4797_v6 = vsel %vm4796_vm11, %v7520_v44, %v4793_v39 }
0x12a1   :  { %v4802_v31 = vsel %vm4799_vm12, %v4801_v56, %v4797_v6 }
0x12a2   :  { %v4803_v55 = vmul.f32 %v9685_v34, %v4802_v31 }
0x12a4   :  { %7038 = vmatmul.msk.f32.vlgmr.msra.gmra.mxu2 %vm339_vm0, %v4803_v55  ;;  %7044 = vmatmul.msk.f32.vlgmr.msrb.gmra.mxu3 %vm3629_vm5, %v9649_v24 }
0x12a5   :  { %7053 = vmatpush.xpose.msk.msra.mxu2 %vm3629_vm5, %v9659_v22  ;;  %v5153_v24 = vpop.permute.xlu0 %5152 }
0x12a8   :  { %v5015_v37 = vpop.permute.xlu1 %5014 }
0x12a9   :  { %7039 = vmatpush.xpose.msk.msra.mxu0 %vm3629_vm5, %v5015_v37 }
0x12ac   :  { %7040 = vmatmul.msk.f32.vlgmr.msra.gmra.mxu0 %vm3629_vm5, %v5013_v46  ;;  %7046 = vmatmul.msk.f32.vlgmr.msrb.gmra.mxu2 %vm3629_vm5, %v9653_v17 }
0x12ad   :  { %7047 = vmatpush.xpose.msk.msrb.mxu0 %vm3629_vm5, %v5127_v30  ;;  %7052 = vmatmul.msk.f32.vlgmr.msra.gmra.mxu3 %vm3629_vm5, %v9705_v2 }
0x12b0   :  { %v5155_v34 = vpop.permute.xlu1 %5154 }
0x12b1   :  { %7049 = vmatpush.xpose.msk.msrb.mxu1 %vm3629_vm5, %v5155_v34 }
0x12b4   :  { %7050 = vmatmul.msk.f32.vlgmr.msrb.gmra.mxu1 %vm3629_vm5, %v5153_v24  ;;  %7054 = vmatmul.msk.f32.vlgmr.msra.gmra.mxu2 %vm3629_vm5, %v9703_v38 }
0x12b8   :  { %v5125_v22 = vpop.permute.xlu1 %5124 }
0x12b9   :  { %7048 = vmatmul.msk.f32.vlgmr.msrb.gmra.mxu0 %vm3629_vm5, %v5125_v22 }
0x12e9   :  { %v9753_v4 = vpop.f32.mrf.mxu0 }
0x12f1   :  { %v9747_v9 = vpop.f32.mrf.mxu1 }
0x12ff   :  { %v9751_v17 = vpop.f32.mrf.mxu3 }
0x1307   :  { %v9757_v40 = vpop.f32.mrf.mxu2 }
0x1309   :  { %v9761_v45 = vpop.f32.mrf.mxu0 }
0x1311   :  { %v9749_v0 = vpop.f32.mrf.mxu1 }
0x1319   :  { %v5065_v2 = vpop.f32.mrf.mxu1 }
0x131a   :  { %v5237_v32 = vmul.f32 %v5065_v2, %v9621_v19 }
0x131c   :  { %v5247_v60 = vsel %vm339_vm0, %v5237_v32, -inf }
0x131d   :  { %5248 = vmax.xlane.f32.xlu1 %v5247_v60 }
0x131f   :  { %v9759_v38 = vpop.f32.mrf.mxu3 }
0x1327   :  { %v9763_v49 = vpop.f32.mrf.mxu2  ;;  %v5093_v36 = vpop.f32.mrf.mxu3 }
0x1328   :  { %v5238_v57 = vmul.f32 %v5093_v36, %v9621_v19 }
0x1329   :  { %v5037_v53 = vpop.f32.mrf.mxu0 }
0x132a   :  { %v5236_v25 = vmul.f32 %v5037_v53, %v9621_v19  ;;  %v5250_v41 = vsel %vm339_vm0, %v5238_v57, -inf }
0x132c   :  { %v5244_v14 = vsel %vm339_vm0, %v5236_v25, -inf }
0x132d   :  { %5245 = vmax.xlane.f32.xlu0 %v5244_v14 }
0x132f   :  { %v5121_v47 = vpop.f32.mrf.mxu2 }
0x1330   :  { %v5239_v28 = vmul.f32 %v5121_v47, %v9621_v19  ;;  %v5205_v42 = vpop.f32.mrf.mxu3 }
0x1331   :  { %v5242_v33 = vmul.f32 %v5205_v42, %v9621_v19  ;;  %v5177_v50 = vpop.f32.mrf.mxu1 }
0x1332   :  { %v5253_v20 = vsel %vm339_vm0, %v5239_v28, -inf  ;;  %v5241_v5 = vmul.f32 %v5177_v50, %v9621_v19 }
0x1333   :  { %5254 = vmax.xlane.f32.xlu2 %v5253_v20  ;;  %v5262_v1 = vsel %vm339_vm0, %v5242_v33, -inf }
0x1334   :  { %5263 = vmax.xlane.f32.xlu1 %v5262_v1  ;;  %v5259_v15 = vsel %vm339_vm0, %v5241_v5, -inf }
0x1335   :  { %5251 = vmax.xlane.f32.xlu0 %v5250_v41 }
0x1336   :  { %v5149_v48 = vpop.f32.mrf.mxu0 }
0x1337   :  { %v5233_v44 = vpop.f32.mrf.mxu2  ;;  %v5240_v7 = vmul.f32 %v5149_v48, %v9621_v19 }
0x1338   :  { %v5243_v52 = vmul.f32 %v5233_v44, %v9621_v19 }
0x1339   :  { %v5256_v8 = vsel %vm339_vm0, %v5240_v7, -inf }
0x133a   :  { %v5265_v12 = vsel %vm339_vm0, %v5243_v52, -inf }
0x133b   :  { %5266 = vmax.xlane.f32.xlu2 %v5265_v12 }
0x133d   :  { %5257 = vmax.xlane.f32.xlu0 %v5256_v8 }
0x1343   :  { %5260 = vmax.xlane.f32.xlu2 %v5259_v15 }
0x1351   :  { %7241 = vrot.lane.b32.xlu0 %v9578_v23, %s7927_s6 }
0x1390   :  { %v5249_v62 = vpop.xlane.xlu1 %5248 }
0x1391   :  { %v5269_v10 = vsub.f32 %v5237_v32, %v5249_v62 }
0x1393   :  { %v5278_v29 = vmul.f32 1.442695, %v5269_v10 }
0x1395   :  { %7521 = vpow2.f32 %v5278_v29 }
0x139b   :  { %v9781_v39 = vpop.eup %7521 }
0x139c   :  { %v5295_v56 = vsel %vm339_vm0, %v9781_v39, 0.0 }
0x139d   :  { %5296 = vadd.xlane.f32.xlu0 %v5295_v56  ;;  %v7250_v56 = vpack.i.bf16 %v9566_v26, %v9546_v18 }
0x13a0   :  { %v5246_v6 = vpop.xlane.xlu0 %5245 }
0x13a1   :  { %v5268_v31 = vsub.f32 %v5236_v25, %v5246_v6  ;;  %v7245_v6 = vpack.i.bf16 %v9569_v13, %v9538_v54 }
0x13a3   :  { %v5276_v55 = vmul.f32 1.442695, %v5268_v31 }
0x13a5   :  { %7523 = vpow2.f32 %v5276_v55 }
0x13a6   :  { %v5255_v19 = vpop.xlane.xlu2 %5254 }
0x13a7   :  { %v5264_v37 = vpop.xlane.xlu1 %5263 }
0x13a8   :  { %v5274_v30 = vsub.f32 %v5242_v33, %v5264_v37  ;;  %v5252_v46 = vpop.xlane.xlu0 %5251  ;;  %v5271_v33 = vsub.f32 %v5239_v28, %v5255_v19 }
0x13a9   :  { %v5270_v36 = vsub.f32 %v5238_v57, %v5252_v46 }
0x13aa   :  { %v5288_v34 = vmul.f32 1.442695, %v5274_v30  ;;  %v5282_v48 = vmul.f32 1.442695, %v5271_v33 }
0x13ab   :  { %v9785_v23 = vpop.eup %7523  ;;  %v5280_v14 = vmul.f32 1.442695, %v5270_v36 }
0x13ac   :  { %7525 = vpow2.f32 %v5288_v34  ;;  %v5292_v24 = vsel %vm339_vm0, %v9785_v23, 0.0 }
0x13ad   :  { %5293 = vadd.xlane.f32.xlu2 %v5292_v24 }
0x13ae   :  { %v5267_v22 = vpop.xlane.xlu2 %5266 }
0x13b0   :  { %v5258_v2 = vpop.xlane.xlu0 %5257 }
0x13b1   :  { %v5272_v32 = vsub.f32 %v5240_v7, %v5258_v2  ;;  %v5275_v7 = vsub.f32 %v5243_v52, %v5267_v22 }
0x13b2   :  { %v9789_v60 = vpop.eup %7525 }
0x13b3   :  { %v5284_v53 = vmul.f32 1.442695, %v5272_v32  ;;  %v5310_v25 = vsel %vm339_vm0, %v9789_v60, 0.0  ;;  %v5290_v15 = vmul.f32 1.442695, %v5275_v7 }
0x13b4   :  { %5311 = vadd.xlane.f32.xlu0 %v5310_v25 }
0x13b5   :  { %7527 = vpow2.f32 %v5284_v53 }
0x13b6   :  { %v5261_v47 = vpop.xlane.xlu2 %5260  ;;  %7529 = vpow2.f32 %v5280_v14 }
0x13b7   :  { %v5273_v42 = vsub.f32 %v5241_v5, %v5261_v47 }
0x13b9   :  { %v5286_v20 = vmul.f32 1.442695, %v5273_v42 }
0x13bb   :  { %v9793_v1 = vpop.eup %7527  ;;  %7531 = vpow2.f32 %v5286_v20 }
0x13bc   :  { %v5304_v41 = vsel %vm339_vm0, %v9793_v1, 0.0  ;;  %v9797_v57 = vpop.eup %7529  ;;  %7533 = vpow2.f32 %v5282_v48 }
0x13bd   :  { %5305 = vadd.xlane.f32.xlu2 %v5304_v41  ;;  %v5298_v5 = vsel %vm339_vm0, %v9797_v57, 0.0  ;;  %7535 = vpow2.f32 %v5290_v15 }
0x13c1   :  { %v9799_v44 = vpop.eup %7531 }
0x13c2   :  { %v5307_v12 = vsel %vm339_vm0, %v9799_v44, 0.0  ;;  %v9805_v62 = vpop.eup %7533 }
0x13c3   :  { %v7242_v28 = vpop.permute.xlu0 %7241  ;;  %5308 = vadd.xlane.f32.xlu1 %v5307_v12  ;;  %v5301_v52 = vsel %vm339_vm0, %v9805_v62, 0.0  ;;  %v9811_v10 = vpop.eup %7535 }
0x13c4   :  { %v7244_v50 = vunpack.i.h.bf16 %v7242_v28  ;;  %v7243_v8 = vunpack.i.l.bf16 %v7242_v28  ;;  %v5313_v29 = vsel %vm339_vm0, %v9811_v10, 0.0 }
0x13c5   :  { %5299 = vadd.xlane.f32.xlu2 %v5298_v5 }
0x13c6   :  { %5509 = vmatpush.msrb.mxu3 %v7244_v50  ;;  %5535 = vmatpush.msrb.mxu2 %v7243_v8 }
0x13c8   :  { %7256 = vrot.lane.b32.xlu0 %v9585_v59, %s7927_s6 }
0x13cb   :  { %5302 = vadd.xlane.f32.xlu1 %v5301_v52 }
0x13d3   :  { %5314 = vadd.xlane.f32.xlu1 %v5313_v29 }
0x13dd   :  { %7251 = vrot.lane.b32.xlu2 %v7250_v56, %s7927_s6 }
0x13ec   :  { %7246 = vrot.lane.b32.xlu1 %v7245_v6, %s7927_s6 }
0x1410   :  { %v9821_v31 = vpop.xlane.xlu0 %5296 }
0x1420   :  { %v5294_v59 = vpop.xlane.xlu2 %5293 }
0x1421   :  { %7537 = vrcp.f32 %v5294_v59  ;;  %v5327_v2 = vand.u32 2147483648, %v5294_v59  ;;  %vm5321_vm14 = vweird.f32 %v5294_v59  ;;  %v5325_v36 = vand.u32 2147483647, %v5294_v59 }
0x1423   :  { %v5328_v42 = vor.u32 1.1754944e-38, %v5327_v2  ;;  %vm5326_vm2 = vcmp.eq.f32.partialorder %v5325_v36, 8.507059e+37 }
0x1427   :  { %v7538_v55 = vpop.eup %7537  ;;  %v9823_v37 = vpop.xlane.xlu0 %5311 }
0x1428   :  { %v5317_v19 = vmul.f32 %v7538_v55, %v5294_v59  ;;  %vm5322_vm13 = vweird.f32 %v7538_v55  ;;  %vm5411_vm9 = vweird.f32 %v9823_v37 }
0x1429   :  { %vm5323_vm15 = vmor %vm5321_vm14, %vm5322_vm13 }
0x142a   :  { %v5318_v46 = vsub.f32 1.0, %v5317_v19 }
0x142c   :  { %v5319_v18 = vmul.f32 %v7538_v55, %v5318_v46 }
0x142e   :  { %v5320_v22 = vadd.f32 %v7538_v55, %v5319_v18 }
0x1430   :  { %v9825_v30 = vpop.xlane.xlu2 %5305  ;;  %v5324_v25 = vsel %vm5323_vm15, %v7538_v55, %v5320_v22 }
0x1431   :  { %7539 = vrcp.f32 %v9825_v30  ;;  %v5329_v48 = vsel %vm5326_vm2, %v5328_v42, %v5324_v25  ;;  %vm5381_vm6 = vweird.f32 %v9825_v30  ;;  %v5387_v15 = vand.u32 2147483648, %v9825_v30 }
0x1432   :  { %7541 = vrcp.f32 %v9823_v37  ;;  %v5330_v56 = vmul.f32 %v9785_v23, %v5329_v48  ;;  %v5385_v59 = vand.u32 2147483647, %v9825_v30  ;;  %v5415_v23 = vand.u32 2147483647, %v9823_v37 }
0x1433   :  { %7543 = vrcp.f32 %v9821_v31  ;;  %v5388_v2 = vor.u32 1.1754944e-38, %v5387_v15  ;;  %v5417_v48 = vand.u32 2147483648, %v9823_v37 }
0x1434   :  { %vm5386_vm12 = vcmp.eq.f32.partialorder %v5385_v59, 8.507059e+37 }
0x1436   :  { %v9829_v26 = vpop.xlane.xlu1 %5308 }
0x1437   :  { %v9831_v54 = vpop.eup %7539 }
0x1438   :  { %v9833_v13 = vpop.eup %7541  ;;  %v5377_v34 = vmul.f32 %v9831_v54, %v9825_v30  ;;  %v5300_v24 = vpop.xlane.xlu2 %5299  ;;  %vm5382_vm4 = vweird.f32 %v9831_v54 }
0x1439   :  { %7545 = vrcp.f32 %v5300_v24  ;;  %v5407_v53 = vmul.f32 %v9833_v13, %v9823_v37  ;;  %v9841_v47 = vpop.eup %7543  ;;  %v5357_v55 = vand.u32 2147483648, %v5300_v24  ;;  %vm9859_vm7 = vmor %vm5381_vm6, %vm5382_vm4  ;;  %v5355_v18 = vand.u32 2147483647, %v5300_v24 }
0x143a   :  { %v5378_v32 = vsub.f32 1.0, %v5377_v34  ;;  %v9848_v28 = vmul.f32 %v9841_v47, %v9821_v31  ;;  %v9852_v8 = vpop.permute.xlu0 %7256  ;;  %vm5412_vm10 = vweird.f32 %v9833_v13  ;;  %vm5351_vm11 = vweird.f32 %v5300_v24 }
0x143b   :  { %v5408_v41 = vsub.f32 1.0, %v5407_v53  ;;  %v7259_v34 = vunpack.i.h.bf16 %v9852_v8  ;;  %vm5356_vm14 = vcmp.eq.f32.partialorder %v5355_v18, 8.507059e+37  ;;  %vm9886_vm2 = vmor %vm5411_vm9, %vm5412_vm10  ;;  %vm5337_vm9 = vweird.f32 %v9841_v47 }
0x143c   :  { %v5379_v14 = vmul.f32 %v9831_v54, %v5378_v32 }
0x143d   :  { %v5409_v6 = vmul.f32 %v9833_v13, %v5408_v41 }
0x143e   :  { %v9843_v33 = vpop.xlane.xlu1 %5302  ;;  %v5380_v50 = vadd.f32 %v9831_v54, %v5379_v14  ;;  %v5358_v14 = vor.u32 1.1754944e-38, %v5357_v55 }
0x143f   :  { %v7546_v20 = vpop.eup %7545  ;;  %7547 = vrcp.f32 %v9843_v33  ;;  %v5410_v25 = vadd.f32 %v9833_v13, %v5409_v6  ;;  %vm5366_vm4 = vweird.f32 %v9843_v33  ;;  %v5418_v6 = vor.u32 1.1754944e-38, %v5417_v48 }
0x1440   :  { %v5347_v7 = vmul.f32 %v7546_v20, %v5300_v24  ;;  %v7252_v12 = vpop.permute.xlu2 %7251  ;;  %vm5352_vm8 = vweird.f32 %v7546_v20  ;;  %v5384_v30 = vsel %vm9859_vm7, %v9831_v54, %v5380_v50  ;;  %vm5416_vm7 = vcmp.eq.f32.partialorder %v5415_v23, 8.507059e+37 }
0x1441   :  { %v7254_v5 = vunpack.i.h.bf16 %v7252_v12  ;;  %v7253_v29 = vunpack.i.l.bf16 %v7252_v12  ;;  %vm5353_vm13 = vmor %vm5351_vm11, %vm5352_vm8  ;;  %v5389_v42 = vsel %vm5386_vm12, %v5388_v2, %v5384_v30  ;;  %vm5336_vm11 = vweird.f32 %v9821_v31 }
0x1442   :  { %v5348_v52 = vsub.f32 1.0, %v5347_v7  ;;  %v5372_v7 = vand.u32 2147483648, %v9843_v33  ;;  %v5390_v15 = vmul.f32 %v9793_v1, %v5389_v42  ;;  %vm5338_vm12 = vmor %vm5336_vm11, %vm5337_vm9 }
0x1443   :  { %5613 = vmatpush.msra.mxu3 %v7254_v5  ;;  %5457 = vmatpush.msra.mxu0 %v7253_v29  ;;  %v5370_v5 = vand.u32 2147483647, %v9843_v33 }
0x1444   :  { %v5349_v46 = vmul.f32 %v7546_v20, %v5348_v52  ;;  %7055 = vmatmul.msk.f32.vlgmr.msra.gmra.mxu0 %vm339_vm0, %v5330_v56  ;;  %v5414_v52 = vsel %vm9886_vm2, %v9833_v13, %v5410_v25  ;;  %v5333_v56 = vsub.f32 1.0, %v9848_v28  ;;  %v5373_v37 = vor.u32 1.1754944e-38, %v5372_v7 }
0x1445   :  { %v7548_v22 = vpop.eup %7547  ;;  %5561 = vmatpush.msrb.mxu0 %v7259_v34  ;;  %vm5371_vm8 = vcmp.eq.f32.partialorder %v5370_v5, 8.507059e+37  ;;  %v5419_v13 = vsel %vm5416_vm7, %v5418_v6, %v5414_v52 }
0x1446   :  { %v5350_v32 = vadd.f32 %v7546_v20, %v5349_v46  ;;  %v5362_v36 = vmul.f32 %v7548_v22, %v9843_v33  ;;  %v9872_v53 = vpop.xlane.xlu1 %5314  ;;  %vm5367_vm15 = vweird.f32 %v7548_v22  ;;  %v5334_v18 = vmul.f32 %v9841_v47, %v5333_v56 }
0x1447   :  { %7549 = vrcp.f32 %v9872_v53  ;;  %vm5368_vm6 = vmor %vm5366_vm4, %vm5367_vm15  ;;  %v5420_v28 = vmul.f32 %v9789_v60, %v5419_v13  ;;  %v5432_v60 = vand.u32 2147483648, %v9872_v53 }
0x1448   :  { %v5354_v54 = vsel %vm5353_vm13, %v7546_v20, %v5350_v32  ;;  %v5363_v41 = vsub.f32 1.0, %v5362_v36  ;;  %7551 = vrcp.f32 %v9829_v26  ;;  %v5340_v32 = vand.u32 2147483647, %v9821_v31 }
0x1449   :  { %v5359_v24 = vsel %vm5356_vm14, %v5358_v14, %v5354_v54  ;;  %vm5426_vm13 = vweird.f32 %v9872_v53  ;;  %v5430_v36 = vand.u32 2147483647, %v9872_v53 }
0x144a   :  { %v5360_v12 = vmul.f32 %v9797_v57, %v5359_v24  ;;  %v5364_v50 = vmul.f32 %v7548_v22, %v5363_v41  ;;  %v5433_v41 = vor.u32 1.1754944e-38, %v5432_v60  ;;  %vm5341_vm15 = vcmp.eq.f32.partialorder %v5340_v32, 8.507059e+37 }
0x144b   :  { %vm5431_vm2 = vcmp.eq.f32.partialorder %v5430_v36, 8.507059e+37 }
0x144c   :  { %v5365_v29 = vadd.f32 %v7548_v22, %v5364_v50  ;;  %7057 = vmatmul.msk.f32.vlgmr.msrb.gmra.mxu3 %vm339_vm0, %v5360_v12  ;;  %7059 = vmatmul.msk.f32.vlgmr.msrb.gmra.mxu0 %vm339_vm0, %v5390_v15  ;;  %v7258_v15 = vunpack.i.l.bf16 %v9852_v8 }
0x144d   :  { %v7550_v57 = vpop.eup %7549 }
0x144e   :  { %v5369_v59 = vsel %vm5368_vm6, %v7548_v22, %v5365_v29  ;;  %v5422_v1 = vmul.f32 %v7550_v57, %v9872_v53  ;;  %v7552_v55 = vpop.eup %7551  ;;  %v5335_v22 = vadd.f32 %v9841_v47, %v5334_v18  ;;  %vm5427_vm10 = vweird.f32 %v7550_v57 }
0x144f   :  { %v5374_v19 = vsel %vm5371_vm8, %v5373_v37, %v5369_v59  ;;  %v5392_v34 = vmul.f32 %v7552_v55, %v9829_v26  ;;  %vm5428_vm14 = vmor %vm5426_vm13, %vm5427_vm10  ;;  %vm5397_vm4 = vweird.f32 %v7552_v55  ;;  %vm5396_vm6 = vweird.f32 %v9829_v26 }
0x1450   :  { %v5375_v33 = vmul.f32 %v9805_v62, %v5374_v19  ;;  %v5423_v46 = vsub.f32 1.0, %v5422_v1  ;;  %v5342_v62 = vand.u32 2147483648, %v9821_v31  ;;  %v5339_v25 = vsel %vm5338_vm12, %v9841_v47, %v5335_v22  ;;  %vm5398_vm7 = vmor %vm5396_vm6, %vm5397_vm4 }
0x1451   :  { %v5393_v23 = vsub.f32 1.0, %v5392_v34  ;;  %v5402_v31 = vand.u32 2147483648, %v9829_v26  ;;  %v5400_v47 = vand.u32 2147483647, %v9829_v26 }
0x1452   :  { %v5424_v30 = vmul.f32 %v7550_v57, %v5423_v46  ;;  %7058 = vmatmul.msk.f32.vlgmr.msrb.gmra.mxu2 %vm339_vm0, %v5375_v33  ;;  %v5343_v54 = vor.u32 1.1754944e-38, %v5342_v62 }
0x1453   :  { %v5394_v14 = vmul.f32 %v7552_v55, %v5393_v23  ;;  %v5403_v29 = vor.u32 1.1754944e-38, %v5402_v31  ;;  %vm5401_vm8 = vcmp.eq.f32.partialorder %v5400_v47, 8.507059e+37 }
0x1454   :  { %7061 = vmatmul.msk.f32.vlgmr.msra.gmra.mxu3 %vm339_vm0, %v5420_v28  ;;  %v5425_v2 = vadd.f32 %v7550_v57, %v5424_v30  ;;  %v5344_v48 = vsel %vm5341_vm15, %v5343_v54, %v5339_v25 }
0x1455   :  { %v5395_v7 = vadd.f32 %v7552_v55, %v5394_v14  ;;  %v5345_v53 = vmul.f32 %v9781_v39, %v5344_v48 }
0x1456   :  { %v5429_v42 = vsel %vm5428_vm14, %v7550_v57, %v5425_v2 }
0x1457   :  { %v5434_v24 = vsel %vm5431_vm2, %v5433_v41, %v5429_v42  ;;  %v5399_v52 = vsel %vm5398_vm7, %v7552_v55, %v5395_v7 }
0x1458   :  { %v5435_v20 = vmul.f32 %v9811_v10, %v5434_v24  ;;  %v5404_v39 = vsel %vm5401_vm8, %v5403_v29, %v5399_v52 }
0x1459   :  { %v5405_v57 = vmul.f32 %v9799_v44, %v5404_v39 }
0x145e   :  { %v7247_v12 = vpop.permute.xlu1 %7246 }
0x145f   :  { %v7249_v50 = vunpack.i.h.bf16 %v7247_v12  ;;  %v7248_v5 = vunpack.i.l.bf16 %v7247_v12 }
0x1461   :  { %5483 = vmatpush.msra.mxu1 %v7248_v5  ;;  %5639 = vmatpush.msra.mxu2 %v7249_v50 }
0x1462   :  { %7056 = vmatmul.msk.f32.vlgmr.msra.gmra.mxu1 %vm339_vm0, %v5345_v53  ;;  %7062 = vmatmul.msk.f32.vlgmr.msra.gmra.mxu2 %vm339_vm0, %v5435_v20 }
0x1463   :  { %5587 = vmatpush.msrb.mxu1 %v7258_v15 }
0x146a   :  { %7060 = vmatmul.msk.f32.vlgmr.msrb.gmra.mxu1 %vm339_vm0, %v5405_v57 }
0x14c1   :  { %v5459_v6 = vpop.f32.mrf.mxu0 }
0x14c9   :  { %v5563_v44 = vpop.f32.mrf.mxu0 }
0x14cf   :  { %v5511_v26 = vpop.f32.mrf.mxu3 }
0x14d5   :  { %v5537_v8 = vpop.f32.mrf.mxu2 }
0x14d7   :  { %v5615_v10 = vpop.f32.mrf.mxu3 }
0x14d8   :  { %5664 = vrot.lane.b32.xlu0 %v5615_v10, %s7931_s12 }
0x14df   :  { %v5485_v56 = vpop.f32.mrf.mxu1 }
0x14e0   :  { %5654 = vrot.lane.b32.xlu1 %v5485_v56, %s7931_s12 }
0x14e5   :  { %v5641_v37 = vpop.f32.mrf.mxu2 }
0x14e6   :  { %5666 = vrot.lane.b32.xlu0 %v5641_v37, %s7931_s12 }
0x14e7   :  { %v5589_v59 = vpop.f32.mrf.mxu1 }
0x14e8   :  { %5658 = vrot.lane.b32.xlu1 %v5537_v8, %s7931_s12  ;;  %5662 = vrot.lane.b32.xlu2 %v5589_v59, %s7931_s12 }
0x14ee   :  { %5660 = vrot.lane.b32.xlu0 %v5563_v44, %s7931_s12 }
0x14f0   :  { %5656 = vrot.lane.b32.xlu2 %v5511_v26, %s7931_s12  ;;  %5652 = vrot.lane.b32.xlu1 %v5459_v6, %s7931_s12 }
0x1542   :  { %v5663_v55 = vpop.permute.xlu2 %5662 }
0x1543   :  { %v5681_v46 = vsel %vm3629_vm5, %v9749_v0, %v5663_v55 }
0x1544   :  { %v5722_v62 = vrot.slane %v5681_v46, 4 }
0x154a   :  { %v5665_v1 = vpop.permute.xlu0 %5664  ;;  %v5657_v30 = vpop.permute.xlu2 %5656 }
0x154b   :  { %v5682_v60 = vsel %vm3629_vm5, %v9759_v38, %v5665_v1  ;;  %v5678_v0 = vsel %vm3629_vm5, %v9751_v17, %v5657_v30 }
0x154c   :  { %v5684_v54 = vrot.slane %v5678_v0, 4 }
0x1552   :  { %v5655_v13 = vpop.permute.xlu1 %5654 }
0x1553   :  { %v5677_v18 = vsel %vm3629_vm5, %v9747_v9, %v5655_v13 }
0x1558   :  { %v5667_v19 = vpop.permute.xlu0 %5666 }
0x1559   :  { %v5683_v33 = vsel %vm3629_vm5, %v9763_v49, %v5667_v19  ;;  %v5698_v49 = vrot.slane %v5677_v18, 4 }
0x155a   :  { %v5720_v28 = vrot.slane %v5683_v33, 4  ;;  %v5659_v34 = vpop.permute.xlu1 %5658  ;;  %v5723_v9 = vsel %vm4269_vm1, %v5683_v33, %v5722_v62 }
0x155b   :  { %v5679_v22 = vsel %vm3629_vm5, %v9757_v40, %v5659_v34  ;;  %v5708_v40 = vrot.slane %v5682_v60, 4  ;;  %v5731_v41 = vperm.slane %v5723_v9, %v9506_v3 }
0x155c   :  { %v5721_v23 = vsel %vm4269_vm1, %v5720_v28, %v5681_v46  ;;  %v5696_v2 = vrot.slane %v5679_v22, 4  ;;  %v5699_v25 = vsel %vm4269_vm1, %v5679_v22, %v5698_v49 }
0x155d   :  { %v5727_v36 = vperm.slane %v5721_v23, %v9506_v3  ;;  %v5707_v17 = vperm.slane %v5699_v25, %v9506_v3  ;;  %v5768_v39 = vrot.slane %v5731_v41, 4 }
0x155e   :  { %v5697_v32 = vsel %vm4269_vm1, %v5696_v2, %v5677_v18 }
0x155f   :  { %v5703_v14 = vperm.slane %v5697_v32, %v9506_v3  ;;  %v5756_v12 = vrot.slane %v5727_v36, 4  ;;  %v5744_v57 = vrot.slane %v5707_v17, 4 }
0x1560   :  { %v5661_v42 = vpop.permute.xlu0 %5660 }
0x1561   :  { %v5680_v38 = vsel %vm3629_vm5, %v9761_v45, %v5661_v42  ;;  %v5732_v5 = vrot.slane %v5703_v14, 4 }
0x1562   :  { %v5709_v48 = vsel %vm4269_vm1, %v5708_v40, %v5680_v38  ;;  %v5710_v24 = vrot.slane %v5680_v38, 4  ;;  %v5653_v7 = vpop.permute.xlu1 %5652 }
0x1563   :  { %v5715_v31 = vperm.slane %v5709_v48, %v9506_v3  ;;  %v5676_v50 = vsel %vm3629_vm5, %v9753_v4, %v5653_v7 }
0x1564   :  { %v5711_v53 = vsel %vm4269_vm1, %v5682_v60, %v5710_v24  ;;  %v5685_v47 = vsel %vm4269_vm1, %v5684_v54, %v5676_v50  ;;  %v5686_v45 = vrot.slane %v5676_v50, 4 }
0x1565   :  { %v5719_v20 = vperm.slane %v5711_v53, %v9506_v3  ;;  %v5757_v15 = vsel %vm4269_vm1, %v5756_v12, %v5715_v31  ;;  %v5758_v52 = vrot.slane %v5715_v31, 4  ;;  %v5691_v29 = vperm.slane %v5685_v47, %v9506_v3 }
0x1566   :  { %v5763_v26 = vperm.slane %v5757_v15, %v9518_v63  ;;  %v5687_v10 = vsel %vm4269_vm1, %v5678_v0, %v5686_v45 }
0x1567   :  { %v5759_v4 = vsel %vm4269_vm1, %v5727_v36, %v5758_v52  ;;  %v5770_v8 = vrot.slane %v5719_v20, 4  ;;  %v5695_v56 = vperm.slane %v5687_v10, %v9506_v3  ;;  %v5733_v6 = vsel %vm4269_vm1, %v5732_v5, %v5691_v29 }
0x1568   :  { %v5767_v37 = vperm.slane %v5759_v4, %v9518_v63  ;;  %v5734_v59 = vrot.slane %v5691_v29, 4  ;;  %v5739_v44 = vperm.slane %v5733_v6, %v9518_v63  ;;  %v5780_v1 = vrot.slane %v5763_v26, 4 }
0x1569   :  { %v5745_v55 = vsel %vm4269_vm1, %v5744_v57, %v5695_v56  ;;  %v5746_v13 = vrot.slane %v5695_v56, 4  ;;  %v5769_v19 = vsel %vm4269_vm1, %v5768_v39, %v5719_v20  ;;  %v5771_v62 = vsel %vm4269_vm1, %v5731_v41, %v5770_v8 }
0x156a   :  { %v5735_v33 = vsel %vm4269_vm1, %v5703_v14, %v5734_v59  ;;  %v5781_v46 = vsel %vm4269_vm1, %v5780_v1, %v5739_v44  ;;  %v5784_v18 = vrot.slane %v5767_v37, 4  ;;  %v5782_v28 = vrot.slane %v5739_v44, 4 }
0x156b   :  { %v9975_v3 = vadd.f32 %v5781_v46, %v9360_v21  ;;  %v5743_v34 = vperm.slane %v5735_v33, %v9518_v63  ;;  %v5751_v30 = vperm.slane %v5745_v55, %v9518_v63  ;;  %v5775_v22 = vperm.slane %v5769_v19, %v9518_v63 }
0x156c   :  { %v5783_v23 = vsel %vm4269_vm1, %v5763_v26, %v5782_v28  ;;  %v5747_v2 = vsel %vm4269_vm1, %v5707_v17, %v5746_v13  ;;  %v5779_v54 = vperm.slane %v5771_v62, %v9518_v63 }
0x156d   :  { %v5804_v60 = vsel %vm689_vm3, %v9975_v3, 0.0  ;;  %v5785_v49 = vsel %vm4269_vm1, %v5784_v18, %v5743_v34  ;;  %v9987_v21 = vadd.f32 %v5783_v23, %v9365_v35  ;;  %v5786_v0 = vrot.slane %v5743_v34, 4 }
0x156e   :  { %5805 = vadd.xlane.f32.xlu2 %v5804_v60  ;;  %v9990_v32 = vadd.f32 %v5785_v49, %v9370_v58  ;;  %v5790_v9 = vrot.slane %v5751_v30, 4  ;;  %v5788_v36 = vrot.slane %v5775_v22, 4  ;;  %v5755_v25 = vperm.slane %v5747_v2, %v9518_v63  ;;  %v304_v49 = vld [vmem:[#allocation17 + $0x18] sm:$0xff] }
0x156f   :  { %v5807_v40 = vsel %vm689_vm3, %v9987_v21, 0.0  ;;  %v5787_v14 = vsel %vm4269_vm1, %v5767_v37, %v5786_v0  ;;  %v5792_v7 = vrot.slane %v5779_v54, 4  ;;  %6041 = vmatpush.msra.mxu0 %v304_v49  ;;  %v303_v0 = vld [vmem:[#allocation17 + $0x10] sm:$0xff] }
0x1570   :  { %v5810_v42 = vsel %vm689_vm3, %v9990_v32, 0.0  ;;  %5808 = vadd.xlane.f32.xlu0 %v5807_v40  ;;  %v5789_v35 = vsel %vm4269_vm1, %v5788_v36, %v5751_v30  ;;  %v10001_v58 = vadd.f32 %v5787_v14, %v9375_v11  ;;  %v5791_v38 = vsel %vm4269_vm1, %v5775_v22, %v5790_v9  ;;  %v302_v9 = vld [vmem:[#allocation17 + $0x8] sm:$0xff]  ;;  %v301_v36 = vld [vmem:[#allocation17] sm:$0xff] }
0x1571   :  { %5811 = vadd.xlane.f32.xlu1 %v5810_v42  ;;  %v5794_v41 = vrot.slane %v5755_v25, 4  ;;  %v10005_v17 = vadd.f32 %v5789_v35, %v9380_v27  ;;  %v10009_v24 = vadd.f32 %v5791_v38, %v9385_v16  ;;  %v5793_v27 = vsel %vm4269_vm1, %v5792_v7, %v5755_v25  ;;  %6042 = vmatpush.msra.mxu0 %v303_v0 }
0x1572   :  { %v5813_v12 = vsel %vm689_vm3, %v10001_v58, 0.0  ;;  %v10019_v31 = vadd.f32 %v5793_v27, %v9390_v51 }
0x1573   :  { %v5795_v48 = vsel %vm4269_vm1, %v5779_v54, %v5794_v41  ;;  %v5816_v11 = vsel %vm689_vm3, %v10005_v17, 0.0  ;;  %v5819_v63 = vsel %vm689_vm3, %v10009_v24, 0.0  ;;  %6043 = vmatpush.msra.mxu0 %v302_v9 }
0x1574   :  { %v5822_v16 = vsel %vm689_vm3, %v10019_v31, 0.0  ;;  %v10050_v1 = vadd.f32 %v5795_v48, %v9403_v61 }
0x1575   :  { %6044 = vmatpush.msra.mxu0 %v301_v36 }
0x1576   :  { %5814 = vadd.xlane.f32.xlu2 %v5813_v12  ;;  %v5825_v46 = vsel %vm689_vm3, %v10050_v1, 0.0 }
0x1578   :  { %5817 = vadd.xlane.f32.xlu0 %v5816_v11 }
0x1579   :  { %5820 = vadd.xlane.f32.xlu1 %v5819_v63 }
0x1580   :  { %5823 = vadd.xlane.f32.xlu0 %v5822_v16 }
0x15e1   :  { %v5806_v50 = vpop.xlane.xlu2 %5805 }
0x15e2   :  { %v5828_v5 = vmul.f32 %v5806_v50, %v10345_v43 }
0x15e3   :  { %v5809_v53 = vpop.xlane.xlu0 %5808 }
0x15e4   :  { %v10025_v47 = vsub.f32 %v9975_v3, %v5828_v5  ;;  %v5812_v45 = vpop.xlane.xlu1 %5811  ;;  %v5829_v20 = vmul.f32 %v5809_v53, %v10345_v43 }
0x15e5   :  { %v5830_v15 = vmul.f32 %v5812_v45, %v10345_v43 }
0x15e6   :  { %v10030_v52 = vsub.f32 %v9987_v21, %v5829_v20  ;;  %v5844_v51 = vmul.f32 %v10025_v47, %v10025_v47 }
0x15e7   :  { %v10035_v29 = vsub.f32 %v9990_v32, %v5830_v15 }
0x15e8   :  { %v5852_v39 = vsel %vm689_vm3, %v5844_v51, 0.0  ;;  %v5845_v57 = vmul.f32 %v10030_v52, %v10030_v52 }
0x15e9   :  { %5853 = vadd.xlane.f32.xlu2 %v5852_v39  ;;  %v5815_v26 = vpop.xlane.xlu2 %5814  ;;  %v5846_v10 = vmul.f32 %v10035_v29, %v10035_v29 }
0x15ea   :  { %v5831_v4 = vmul.f32 %v5815_v26, %v10345_v43  ;;  %v5855_v8 = vsel %vm689_vm3, %v5845_v57, 0.0 }
0x15eb   :  { %v5858_v56 = vsel %vm689_vm3, %v5846_v10, 0.0  ;;  %5856 = vadd.xlane.f32.xlu1 %v5855_v8  ;;  %v5818_v6 = vpop.xlane.xlu0 %5817 }
0x15ec   :  { %v10046_v37 = vsub.f32 %v10001_v58, %v5831_v4  ;;  %v5821_v59 = vpop.xlane.xlu1 %5820  ;;  %5859 = vadd.xlane.f32.xlu0 %v5858_v56  ;;  %v5832_v44 = vmul.f32 %v5818_v6, %v10345_v43 }
0x15ed   :  { %v5833_v55 = vmul.f32 %v5821_v59, %v10345_v43 }
0x15ee   :  { %v5847_v13 = vmul.f32 %v10046_v37, %v10046_v37  ;;  %v10059_v33 = vsub.f32 %v10005_v17, %v5832_v44 }
0x15ef   :  { %v10056_v19 = vsub.f32 %v10009_v24, %v5833_v55 }
0x15f0   :  { %v5861_v61 = vsel %vm689_vm3, %v5847_v13, 0.0  ;;  %v5848_v22 = vmul.f32 %v10059_v33, %v10059_v33 }
0x15f1   :  { %5826 = vadd.xlane.f32.xlu2 %v5825_v46  ;;  %v5849_v18 = vmul.f32 %v10056_v19, %v10056_v19 }
0x15f2   :  { %v5864_v2 = vsel %vm689_vm3, %v5848_v22, 0.0 }
0x15f3   :  { %v5867_v28 = vsel %vm689_vm3, %v5849_v18, 0.0  ;;  %v5824_v34 = vpop.xlane.xlu0 %5823  ;;  %5862 = vadd.xlane.f32.xlu1 %v5861_v61 }
0x15f4   :  { %5868 = vadd.xlane.f32.xlu0 %v5867_v28  ;;  %v5834_v30 = vmul.f32 %v5824_v34, %v10345_v43  ;;  %v10102_v34 = vld [vmem:[%s10286_s19] ss:$0 sm:$0xff] }
0x15f6   :  { %v10071_v23 = vsub.f32 %v10019_v31, %v5834_v30 }
0x15f8   :  { %v5850_v62 = vmul.f32 %v10071_v23, %v10071_v23 }
0x15f9   :  { %5865 = vadd.xlane.f32.xlu2 %v5864_v2 }
0x15fa   :  { %v5870_v60 = vsel %vm689_vm3, %v5850_v62, 0.0  ;;  %v10109_v62 = vld [vmem:[%s10287_s20] ss:$0 sm:$0xff] }
0x15fb   :  { %5871 = vadd.xlane.f32.xlu1 %v5870_v60 }
0x165c   :  { %v5854_v25 = vpop.xlane.xlu2 %5853 }
0x165d   :  { %v5876_v40 = vmul.f32 %v5854_v25, %v10345_v43 }
0x165e   :  { %v5857_v14 = vpop.xlane.xlu1 %5856 }
0x165f   :  { %v5884_v42 = vadd.f32 1e-05, %v5876_v40  ;;  %v5877_v35 = vmul.f32 %v5857_v14, %v10345_v43  ;;  %v5860_v54 = vpop.xlane.xlu0 %5859 }
0x1660   :  { %v5878_v38 = vmul.f32 %v5860_v54, %v10345_v43 }
0x1661   :  { %7553 = vrsqrt.f32 %v5884_v42  ;;  %v5885_v41 = vadd.f32 1e-05, %v5877_v35  ;;  %vm5898_vm1 = vweird.f32 %v5884_v42 }
0x1662   :  { %v10080_v48 = vadd.f32 1e-05, %v5878_v38 }
0x1663   :  { %7555 = vrsqrt.f32 %v5885_v41  ;;  %vm5908_vm11 = vweird.f32 %v5885_v41 }
0x1664   :  { %7557 = vrsqrt.f32 %v10080_v48  ;;  %v5827_v7 = vpop.xlane.xlu2 %5826  ;;  %vm5918_vm14 = vweird.f32 %v10080_v48 }
0x1665   :  { %v5835_v12 = vmul.f32 %v5827_v7, %v10345_v43 }
0x1666   :  { %v5863_v11 = vpop.xlane.xlu1 %5862 }
0x1667   :  { %v7554_v63 = vpop.eup %7553  ;;  %v10085_v27 = vsub.f32 %v10050_v1, %v5835_v12  ;;  %v5879_v16 = vmul.f32 %v5863_v11, %v10345_v43  ;;  %v5869_v10 = vpop.xlane.xlu0 %5868 }
0x1668   :  { %v5893_v50 = vmul.f32 %v7554_v63, %v5884_v42  ;;  %vm5899_vm5 = vweird.f32 %v7554_v63  ;;  %v5881_v55 = vmul.f32 %v5869_v10, %v10345_v43 }
0x1669   :  { %v7556_v5 = vpop.eup %7555  ;;  %v10088_v53 = vadd.f32 1e-05, %v5879_v16  ;;  %v5851_v45 = vmul.f32 %v10085_v27, %v10085_v27  ;;  %vm5900_vm10 = vmor %vm5898_vm1, %vm5899_vm5 }
0x166a   :  { %v7558_v20 = vpop.eup %7557  ;;  %v5894_v15 = vmul.f32 %v7554_v63, %v5893_v50  ;;  %v5903_v51 = vmul.f32 %v7556_v5, %v5885_v41  ;;  %vm5909_vm9 = vweird.f32 %v7556_v5  ;;  %v5889_v49 = vadd.f32 1e-05, %v5881_v55 }
0x166b   :  { %v5913_v39 = vmul.f32 %v7558_v20, %v10080_v48  ;;  %7559 = vrsqrt.f32 %v10088_v53  ;;  %v5873_v56 = vsel %vm689_vm3, %v5851_v45, 0.0  ;;  %vm5910_vm12 = vmor %vm5908_vm11, %vm5909_vm9  ;;  %vm5919_vm13 = vweird.f32 %v7558_v20 }
0x166c   :  { %v5895_v57 = vmul.f32 0.5, %v5894_v15  ;;  %v5904_v26 = vmul.f32 %v7556_v5, %v5903_v51  ;;  %v5866_v4 = vpop.xlane.xlu2 %5865  ;;  %5874 = vadd.xlane.f32.xlu2 %v5873_v56  ;;  %vm5920_vm15 = vmor %vm5918_vm14, %vm5919_vm13  ;;  %vm5928_vm4 = vweird.f32 %v10088_v53  ;;  %vm5948_vm9 = vweird.f32 %v5889_v49 }
0x166d   :  { %v5914_v8 = vmul.f32 %v7558_v20, %v5913_v39  ;;  %v5880_v6 = vmul.f32 %v5866_v4, %v10345_v43 }
0x166e   :  { %v5896_v59 = vsub.f32 1.5, %v5895_v57  ;;  %v5905_v44 = vmul.f32 0.5, %v5904_v26  ;;  %v5872_v25 = vpop.xlane.xlu1 %5871 }
0x166f   :  { %v10097_v13 = vadd.f32 1e-05, %v5880_v6  ;;  %v5915_v61 = vmul.f32 0.5, %v5914_v8  ;;  %v5882_v54 = vmul.f32 %v5872_v25, %v10345_v43  ;;  %v308_v25 = vld [vmem:[#allocation19 + $0x10] sm:$0xff] }
0x1670   :  { %v5897_v46 = vmul.f32 %v7554_v63, %v5896_v59  ;;  %v5906_v18 = vsub.f32 1.5, %v5905_v44 }
0x1671   :  { %v7560_v28 = vpop.eup %7559  ;;  %7561 = vrsqrt.f32 %v10097_v13  ;;  %v5916_v9 = vsub.f32 1.5, %v5915_v61  ;;  %v5890_v7 = vadd.f32 1e-05, %v5882_v54  ;;  %vm5938_vm8 = vweird.f32 %v10097_v13 }
0x1672   :  { %v5901_v30 = vsel %vm5900_vm10, %v7554_v63, %v5897_v46  ;;  %v5907_v22 = vmul.f32 %v7556_v5, %v5906_v18  ;;  %v5923_v2 = vmul.f32 %v7560_v28, %v10088_v53  ;;  %7563 = vrsqrt.f32 %v5889_v49 }
0x1673   :  { %v5972_v60 = vmul.f32 %v5901_v30, %v10025_v47  ;;  %v5917_v38 = vmul.f32 %v7558_v20, %v5916_v9  ;;  %7565 = vrsqrt.f32 %v5890_v7  ;;  %vm5929_vm2 = vweird.f32 %v7560_v28 }
0x1674   :  { %v5911_v0 = vsel %vm5910_vm12, %v7556_v5, %v5907_v22  ;;  %v5924_v36 = vmul.f32 %v7560_v28, %v5923_v2  ;;  %vm5930_vm6 = vmor %vm5928_vm4, %vm5929_vm2  ;;  %vm5958_vm12 = vweird.f32 %v5890_v7  ;;  %vm6427_vm4 = vcmask 57344  }
0x1675   :  { %v5983_v40 = vmul.f32 %v10102_v34, %v5972_v60  ;;  %v5973_v35 = vmul.f32 %v5911_v0, %v10030_v52  ;;  %v5921_v11 = vsel %vm5920_vm15, %v7558_v20, %v5917_v38 }
0x1676   :  { %v5925_v41 = vmul.f32 0.5, %v5924_v36  ;;  %v5974_v50 = vmul.f32 %v5921_v11, %v10035_v29  ;;  %v309_v36 = vld [vmem:[#allocation19 + $0x18] sm:$0xff] }
0x1677   :  { %v7562_v14 = vpop.eup %7561  ;;  %v5994_v42 = vadd.f32 %v10109_v62, %v5983_v40  ;;  %v5984_v12 = vmul.f32 %v10102_v34, %v5973_v35  ;;  %6117 = vmatpush.msra.mxu1 %v309_v36  ;;  %v307_v40 = vld [vmem:[#allocation19 + $0x8] sm:$0xff] }
0x1678   :  { %v5933_v47 = vmul.f32 %v7562_v14, %v10097_v13  ;;  %v5926_v63 = vsub.f32 1.5, %v5925_v41  ;;  %v7564_v52 = vpop.eup %7563  ;;  %v5985_v48 = vmul.f32 %v10102_v34, %v5974_v50  ;;  %vm5939_vm7 = vweird.f32 %v7562_v14 }
0x1679   :  { %7063 = vmatmul.msk.f32.vlgmr.msra.gmra.mxu0 %vm689_vm3, %v5994_v42  ;;  %v5995_v5 = vadd.f32 %v10109_v62, %v5984_v12  ;;  %v5943_v45 = vmul.f32 %v7564_v52, %v5889_v49  ;;  %v7566_v26 = vpop.eup %7565  ;;  %vm5940_vm5 = vmor %vm5938_vm8, %vm5939_vm7  ;;  %vm5949_vm1 = vweird.f32 %v7564_v52  ;;  %6118 = vmatpush.msra.mxu1 %v308_v25  ;;  %v7272_v12 = vld [vmem:[%s10289_s22] ss:$0 sm:$0xff] }
0x167a   :  { %v5934_v16 = vmul.f32 %v7562_v14, %v5933_v47  ;;  %v5927_v15 = vmul.f32 %v7560_v28, %v5926_v63  ;;  %v5996_v10 = vadd.f32 %v10109_v62, %v5985_v48  ;;  %v5953_v56 = vmul.f32 %v7566_v26, %v5890_v7  ;;  %vm5950_vm10 = vmor %vm5948_vm9, %vm5949_vm1 }
0x167b   :  { %v5944_v20 = vmul.f32 %v7564_v52, %v5943_v45  ;;  %vm5959_vm11 = vweird.f32 %v7566_v26  ;;  %6119 = vmatpush.msra.mxu1 %v307_v40 }
0x167c   :  { %v5935_v51 = vmul.f32 0.5, %v5934_v16  ;;  %v5931_v39 = vsel %vm5930_vm6, %v7560_v28, %v5927_v15  ;;  %v5954_v44 = vmul.f32 %v7566_v26, %v5953_v56  ;;  %vm5960_vm13 = vmor %vm5958_vm12, %vm5959_vm11 }
0x167d   :  { %v5975_v29 = vmul.f32 %v5931_v39, %v10046_v37  ;;  %v5945_v4 = vmul.f32 0.5, %v5944_v20 }
0x167e   :  { %v5936_v57 = vsub.f32 1.5, %v5935_v51  ;;  %v5955_v18 = vmul.f32 0.5, %v5954_v44 }
0x167f   :  { %v5986_v53 = vmul.f32 %v10102_v34, %v5975_v29  ;;  %v5946_v6 = vsub.f32 1.5, %v5945_v4 }
0x1680   :  { %v5937_v8 = vmul.f32 %v7562_v14, %v5936_v57  ;;  %v5956_v28 = vsub.f32 1.5, %v5955_v18  ;;  %v7273_v18 = vld [vmem:[%s10291_s24] ss:$0 sm:$0xff] }
0x1681   :  { %7064 = vmatmul.msk.f32.gmra.mxu0 %vm689_vm3, %v5995_v5  ;;  %v5997_v37 = vadd.f32 %v10109_v62, %v5986_v53  ;;  %v5947_v46 = vmul.f32 %v7564_v52, %v5946_v6 }
0x1682   :  { %v5941_v59 = vsel %vm5940_vm5, %v7562_v14, %v5937_v8  ;;  %v5957_v2 = vmul.f32 %v7566_v26, %v5956_v28  ;;  %v306_v14 = vld [vmem:[#allocation19] sm:$0xff] }
0x1683   :  { %v5976_v55 = vmul.f32 %v5941_v59, %v10059_v33  ;;  %v5951_v13 = vsel %vm5950_vm10, %v7564_v52, %v5947_v46  ;;  %6120 = vmatpush.msra.mxu1 %v306_v14  ;;  %v311_v46 = vld [vmem:[#allocation20] sm:$0xff] }
0x1684   :  { %v5977_v30 = vmul.f32 %v5951_v13, %v10056_v19  ;;  %v5961_v60 = vsel %vm5960_vm13, %v7566_v26, %v5957_v2 }
0x1685   :  { %v5987_v61 = vmul.f32 %v10102_v34, %v5976_v55  ;;  %v5978_v49 = vmul.f32 %v5961_v60, %v10071_v23  ;;  %v313_v55 = vld [vmem:[#allocation20 + $0x10] sm:$0xff] }
0x1686   :  { %v5988_v33 = vmul.f32 %v10102_v34, %v5977_v30 }
0x1687   :  { %v5998_v22 = vadd.f32 %v10109_v62, %v5987_v61  ;;  %v5989_v9 = vmul.f32 %v10102_v34, %v5978_v49 }
0x1688   :  { %v5999_v0 = vadd.f32 %v10109_v62, %v5988_v33 }
0x1689   :  { %7065 = vmatmul.msk.f32.gmra.mxu0 %vm689_vm3, %v5996_v10  ;;  %v6000_v19 = vadd.f32 %v10109_v62, %v5989_v9 }
0x1691   :  { %7066 = vmatmul.msk.f32.gmra.mxu0 %vm689_vm3, %v5997_v37  ;;  %v312_v37 = vld [vmem:[#allocation20 + $0x8] sm:$0xff] }
0x1699   :  { %7067 = vmatmul.msk.f32.gmra.mxu0 %vm689_vm3, %v5998_v22 }
0x16a1   :  { %7068 = vmatmul.msk.f32.gmra.mxu0 %vm689_vm3, %v5999_v0 }
0x16a9   :  { %7069 = vmatmul.msk.f32.gmra.mxu0 %vm689_vm3, %v6000_v19 }
0x16df   :  { %v5875_v42 = vpop.xlane.xlu2 %5874 }
0x16e0   :  { %v5883_v23 = vmul.f32 %v5875_v42, %v10345_v43 }
0x16e2   :  { %v5891_v35 = vadd.f32 1e-05, %v5883_v23 }
0x16e4   :  { %7567 = vrsqrt.f32 %v5891_v35  ;;  %vm5968_vm15 = vweird.f32 %v5891_v35 }
0x16ea   :  { %v7568_v54 = vpop.eup %7567 }
0x16eb   :  { %v5963_v38 = vmul.f32 %v7568_v54, %v5891_v35  ;;  %vm5969_vm14 = vweird.f32 %v7568_v54 }
0x16ec   :  { %vm5970_vm2 = vmor %vm5968_vm15, %vm5969_vm14 }
0x16ed   :  { %v5964_v41 = vmul.f32 %v7568_v54, %v5963_v38 }
0x16ef   :  { %v5965_v47 = vmul.f32 0.5, %v5964_v41 }
0x16f1   :  { %v5966_v7 = vsub.f32 1.5, %v5965_v47 }
0x16f3   :  { %v5967_v11 = vmul.f32 %v7568_v54, %v5966_v7 }
0x16f5   :  { %v5971_v16 = vsel %vm5970_vm2, %v7568_v54, %v5967_v11 }
0x16f6   :  { %v6046_v63 = vpop.f32.mrf.mxu0  ;;  %v5979_v43 = vmul.f32 %v5971_v16, %v10085_v27  ;;  %v314_v27 = vld [vmem:[#allocation20 + $0x18] sm:$0xff] }
0x16f7   :  { %v6047_v52 = vadd.f32 %v7272_v12, %v6046_v63  ;;  %6190 = vmatpush.msrb.mxu3 %v314_v27 }
0x16f8   :  { %v5990_v5 = vmul.f32 %v10102_v34, %v5979_v43 }
0x16f9   :  { %v6070_v50 = vmax.f32 %v6047_v52, 0.0  ;;  %6191 = vmatpush.msrb.mxu3 %v313_v55 }
0x16fa   :  { %v6001_v45 = vadd.f32 %v10109_v62, %v5990_v5 }
0x16fb   :  { %7071 = vmatmul.msk.f32.vlgmr.msra.gmra.mxu1 %vm689_vm3, %v6070_v50  ;;  %6192 = vmatpush.msrb.mxu3 %v312_v37 }
0x16fc   :  { %7070 = vmatmul.msk.f32.gmra.mxu0 %vm689_vm3, %v6001_v45 }
0x16fd   :  { %6193 = vmatpush.msrb.mxu3 %v311_v46 }
0x16fe   :  { %v6049_v15 = vpop.f32.mrf.mxu0 }
0x16ff   :  { %v6050_v51 = vadd.f32 %v7272_v12, %v6049_v15 }
0x1701   :  { %v6071_v48 = vmax.f32 %v6050_v51, 0.0 }
0x1703   :  { %7072 = vmatmul.msk.f32.gmra.mxu1 %vm689_vm3, %v6071_v48 }
0x1706   :  { %v6052_v20 = vpop.f32.mrf.mxu0 }
0x1707   :  { %v6053_v39 = vadd.f32 %v7272_v12, %v6052_v20 }
0x1709   :  { %v6072_v57 = vmax.f32 %v6053_v39, 0.0 }
0x170b   :  { %7073 = vmatmul.msk.f32.gmra.mxu1 %vm689_vm3, %v6072_v57 }
0x170e   :  { %v6055_v26 = vpop.f32.mrf.mxu0 }
0x170f   :  { %v6056_v34 = vadd.f32 %v7272_v12, %v6055_v26 }
0x1711   :  { %v6073_v29 = vmax.f32 %v6056_v34, 0.0 }
0x1713   :  { %7074 = vmatmul.msk.f32.gmra.mxu1 %vm689_vm3, %v6073_v29 }
0x1716   :  { %v6058_v62 = vpop.f32.mrf.mxu0 }
0x1717   :  { %v6059_v10 = vadd.f32 %v7272_v12, %v6058_v62 }
0x1719   :  { %v6074_v4 = vmax.f32 %v6059_v10, 0.0 }
0x171b   :  { %7075 = vmatmul.msk.f32.gmra.mxu1 %vm689_vm3, %v6074_v4 }
0x171e   :  { %v6061_v8 = vpop.f32.mrf.mxu0 }
0x171f   :  { %v6062_v56 = vadd.f32 %v7272_v12, %v6061_v8 }
0x1721   :  { %v6075_v53 = vmax.f32 %v6062_v56, 0.0 }
0x1723   :  { %7076 = vmatmul.msk.f32.gmra.mxu1 %vm689_vm3, %v6075_v53 }
0x1726   :  { %v6064_v6 = vpop.f32.mrf.mxu0 }
0x1727   :  { %v6065_v59 = vadd.f32 %v7272_v12, %v6064_v6 }
0x1729   :  { %v6076_v44 = vmax.f32 %v6065_v59, 0.0 }
0x172b   :  { %7077 = vmatmul.msk.f32.gmra.mxu1 %vm689_vm3, %v6076_v44 }
0x1778   :  { %v6122_v61 = vpop.f32.mrf.mxu1 }
0x1779   :  { %v6123_v13 = vadd.f32 %v7273_v18, %v6122_v61  ;;  %v6067_v30 = vpop.f32.mrf.mxu0 }
0x177a   :  { %v6068_v22 = vadd.f32 %v7272_v12, %v6067_v30 }
0x177b   :  { %v6146_v28 = vadd.f32 %v6123_v13, %v9975_v3 }
0x177c   :  { %v6077_v2 = vmax.f32 %v6068_v22, 0.0 }
0x177d   :  { %7079 = vmatmul.msk.f32.vlgmr.msrb.gmra.mxu3 %vm689_vm3, %v6146_v28  ;;  %6638 = vmatpush.msrb.mxu0 %v6146_v28 }
0x177e   :  { %7078 = vmatmul.msk.f32.gmra.mxu1 %vm689_vm3, %v6077_v2 }
0x1780   :  { %v6125_v33 = vpop.f32.mrf.mxu1 }
0x1781   :  { %v6126_v60 = vadd.f32 %v7273_v18, %v6125_v33 }
0x1783   :  { %v6147_v49 = vadd.f32 %v6126_v60, %v9987_v21 }
0x1785   :  { %7080 = vmatmul.msk.f32.gmra.mxu3 %vm689_vm3, %v6147_v49  ;;  %6661 = vmatpush.msrb.mxu1 %v6147_v49 }
0x1788   :  { %v6128_v0 = vpop.f32.mrf.mxu1 }
0x1789   :  { %v6129_v9 = vadd.f32 %v7273_v18, %v6128_v0 }
0x178b   :  { %v6148_v19 = vadd.f32 %v6129_v9, %v9990_v32 }
0x178d   :  { %7081 = vmatmul.msk.f32.gmra.mxu3 %vm689_vm3, %v6148_v19 }
0x178e   :  { %6684 = vmatpush.msra.mxu3 %v6148_v19 }
0x1790   :  { %v6131_v3 = vpop.f32.mrf.mxu1 }
0x1791   :  { %v6132_v36 = vadd.f32 %v7273_v18, %v6131_v3 }
0x1793   :  { %v6149_v25 = vadd.f32 %v6132_v36, %v10001_v58 }
0x1795   :  { %7082 = vmatmul.msk.f32.gmra.mxu3 %vm689_vm3, %v6149_v25 }
0x1798   :  { %v6134_v40 = vpop.f32.mrf.mxu1 }
0x1799   :  { %v6135_v14 = vadd.f32 %v7273_v18, %v6134_v40 }
0x179b   :  { %v6150_v21 = vadd.f32 %v6135_v14, %v10005_v17 }
0x179d   :  { %7083 = vmatmul.msk.f32.gmra.mxu3 %vm689_vm3, %v6150_v21  ;;  %6730 = vmatpush.msra.mxu0 %v6150_v21 }
0x17a0   :  { %v6137_v42 = vpop.f32.mrf.mxu1 }
0x17a1   :  { %v6138_v23 = vadd.f32 %v7273_v18, %v6137_v42 }
0x17a3   :  { %v6151_v32 = vadd.f32 %v6138_v23, %v10009_v24 }
0x17a5   :  { %7084 = vmatmul.msk.f32.gmra.mxu3 %vm689_vm3, %v6151_v32  ;;  %6753 = vmatpush.msra.mxu1 %v6151_v32 }
0x17a8   :  { %v6140_v35 = vpop.f32.mrf.mxu1 }
0x17a9   :  { %v6141_v54 = vadd.f32 %v7273_v18, %v6140_v35 }
0x17ab   :  { %v6152_v58 = vadd.f32 %v6141_v54, %v10019_v31 }
0x17ad   :  { %7085 = vmatmul.msk.f32.gmra.mxu3 %vm689_vm3, %v6152_v58 }
0x17ae   :  { %6776 = vmatpush.msrb.mxu3 %v6152_v58 }
0x17fb   :  { %v6143_v38 = vpop.f32.mrf.mxu1 }
0x17fc   :  { %v6144_v41 = vadd.f32 %v7273_v18, %v6143_v38 }
0x17fe   :  { %v6153_v17 = vadd.f32 %v6144_v41, %v10050_v1 }
0x1800   :  { %v6195_v47 = vpop.f32.mrf.mxu3  ;;  %7086 = vmatmul.msk.f32.gmra.mxu3 %vm689_vm3, %v6153_v17 }
0x1801   :  { %v6220_v7 = vrot.slane %v6195_v47, 7  ;;  %7087 = vmatpush.xpose.msk.msrb.mxu2 %vm689_vm3, %v6195_v47 }
0x1804   :  { %7088 = vmatmul.msk.f32.vlgmr.msrb.gmra.mxu2 %vm689_vm3, %v6220_v7 }
0x1808   :  { %v6198_v24 = vpop.f32.mrf.mxu3 }
0x1809   :  { %v6246_v12 = vrot.slane %v6198_v24, 7  ;;  %7089 = vmatpush.xpose.msk.msra.mxu2 %vm689_vm3, %v6198_v24 }
0x180c   :  { %7090 = vmatmul.msk.f32.vlgmr.msra.gmra.mxu2 %vm689_vm3, %v6246_v12 }
0x1810   :  { %v6201_v31 = vpop.f32.mrf.mxu3 }
0x1811   :  { %v6272_v11 = vrot.slane %v6201_v31, 7  ;;  %7091 = vmatpush.xpose.msk.msrb.mxu2 %vm689_vm3, %v6201_v31 }
0x1814   :  { %7092 = vmatmul.msk.f32.vlgmr.msrb.gmra.mxu2 %vm689_vm3, %v6272_v11 }
0x1818   :  { %v6204_v1 = vpop.f32.mrf.mxu3 }
0x1819   :  { %v6298_v63 = vrot.slane %v6204_v1, 7  ;;  %7093 = vmatpush.xpose.msk.msra.mxu2 %vm689_vm3, %v6204_v1 }
0x181c   :  { %7094 = vmatmul.msk.f32.vlgmr.msra.gmra.mxu2 %vm689_vm3, %v6298_v63 }
0x1820   :  { %v6207_v16 = vpop.f32.mrf.mxu3 }
0x1821   :  { %v6324_v52 = vrot.slane %v6207_v16, 7  ;;  %7095 = vmatpush.xpose.msk.msrb.mxu2 %vm689_vm3, %v6207_v16 }
0x1824   :  { %7096 = vmatmul.msk.f32.vlgmr.msrb.gmra.mxu2 %vm689_vm3, %v6324_v52 }
0x1828   :  { %v6210_v43 = vpop.f32.mrf.mxu3 }
0x1829   :  { %v6350_v50 = vrot.slane %v6210_v43, 7  ;;  %7097 = vmatpush.xpose.msk.msra.mxu2 %vm689_vm3, %v6210_v43 }
0x182c   :  { %7098 = vmatmul.msk.f32.vlgmr.msra.gmra.mxu2 %vm689_vm3, %v6350_v50 }
0x1830   :  { %v6213_v5 = vpop.f32.mrf.mxu3 }
0x1831   :  { %v6376_v45 = vrot.slane %v6213_v5, 7  ;;  %7099 = vmatpush.xpose.msk.msrb.mxu2 %vm689_vm3, %v6213_v5 }
0x1834   :  { %7100 = vmatmul.msk.f32.vlgmr.msrb.gmra.mxu2 %vm689_vm3, %v6376_v45 }
0x1883   :  { %v6216_v15 = vpop.f32.mrf.mxu3 }
0x1884   :  { %v6402_v51 = vrot.slane %v6216_v15, 7  ;;  %7101 = vmatpush.xpose.msk.msra.mxu2 %vm689_vm3, %v6216_v15 }
0x1887   :  { %v6242_v48 = vpop.f32.mrf.mxu2  ;;  %7102 = vmatmul.msk.f32.vlgmr.msra.gmra.mxu2 %vm689_vm3, %v6402_v51 }
0x1888   :  { %6707 = vmatpush.msrb.mxu2 %v6149_v25  ;;  %v6428_v20 = vsel %vm6427_vm4, %v6242_v48, -inf }
0x1889   :  { %6429 = vmax.xlane.f32.xlu2 %v6428_v20 }
0x188a   :  { %6799 = vmatpush.msra.mxu2 %v6153_v17 }
0x188f   :  { %v6268_v39 = vpop.f32.mrf.mxu2 }
0x1890   :  { %v6431_v34 = vsel %vm6427_vm4, %v6268_v39, -inf }
0x1897   :  { %v6294_v57 = vpop.f32.mrf.mxu2 }
0x1898   :  { %v6434_v27 = vsel %vm6427_vm4, %v6294_v57, -inf }
0x1899   :  { %6435 = vmax.xlane.f32.xlu0 %v6434_v27 }
0x189f   :  { %v6320_v26 = vpop.f32.mrf.mxu2 }
0x18a0   :  { %v6437_v29 = vsel %vm6427_vm4, %v6320_v26, -inf }
0x18a1   :  { %6432 = vmax.xlane.f32.xlu0 %v6431_v34  ;;  %6438 = vmax.xlane.f32.xlu1 %v6437_v29 }
0x18a7   :  { %v6346_v62 = vpop.f32.mrf.mxu2 }
0x18a8   :  { %v6440_v10 = vsel %vm6427_vm4, %v6346_v62, -inf }
0x18a9   :  { %6441 = vmax.xlane.f32.xlu0 %v6440_v10 }
0x18af   :  { %v6372_v4 = vpop.f32.mrf.mxu2 }
0x18b0   :  { %v6443_v53 = vsel %vm6427_vm4, %v6372_v4, -inf }
0x18b7   :  { %v6398_v8 = vpop.f32.mrf.mxu2 }
0x18b8   :  { %v6446_v56 = vsel %vm6427_vm4, %v6398_v8, -inf }
0x18b9   :  { %6447 = vmax.xlane.f32.xlu1 %v6446_v56 }
0x18c1   :  { %6444 = vmax.xlane.f32.xlu1 %v6443_v53 }
0x18fc   :  { %v6430_v6 = vpop.xlane.xlu2 %6429 }
0x18fd   :  { %v6452_v59 = vsub.f32 %v6242_v48, %v6430_v6 }
0x18ff   :  { %v6460_v44 = vmul.f32 1.442695, %v6452_v59 }
0x1901   :  { %7569 = vpow2.f32 %v6460_v44 }
0x1907   :  { %v10202_v55 = vpop.eup %7569 }
0x1908   :  { %v6476_v37 = vsel %vm6427_vm4, %v10202_v55, 0.0 }
0x1909   :  { %6477 = vadd.xlane.f32.xlu1 %v6476_v37 }
0x190a   :  { %v6424_v46 = vpop.f32.mrf.mxu2 }
0x190b   :  { %v6449_v13 = vsel %vm6427_vm4, %v6424_v46, -inf }
0x190c   :  { %v6436_v18 = vpop.xlane.xlu0 %6435  ;;  %6450 = vmax.xlane.f32.xlu2 %v6449_v13 }
0x190d   :  { %v6454_v61 = vsub.f32 %v6294_v57, %v6436_v18 }
0x190f   :  { %v6464_v28 = vmul.f32 1.442695, %v6454_v61 }
0x1911   :  { %7571 = vpow2.f32 %v6464_v28 }
0x1914   :  { %v6433_v30 = vpop.xlane.xlu0 %6432  ;;  %v6439_v22 = vpop.xlane.xlu1 %6438 }
0x1915   :  { %v6453_v2 = vsub.f32 %v6268_v39, %v6433_v30  ;;  %v6455_v33 = vsub.f32 %v6320_v26, %v6439_v22 }
0x1917   :  { %v10207_v60 = vpop.eup %7571  ;;  %v6462_v49 = vmul.f32 1.442695, %v6453_v2  ;;  %v6466_v0 = vmul.f32 1.442695, %v6455_v33 }
0x1918   :  { %v6482_v9 = vsel %vm6427_vm4, %v10207_v60, 0.0 }
0x1919   :  { %7573 = vpow2.f32 %v6462_v49  ;;  %6483 = vadd.xlane.f32.xlu2 %v6482_v9 }
0x191a   :  { %7575 = vpow2.f32 %v6466_v0 }
0x191c   :  { %v6442_v19 = vpop.xlane.xlu0 %6441 }
0x191d   :  { %v6456_v3 = vsub.f32 %v6346_v62, %v6442_v19 }
0x191f   :  { %v10211_v36 = vpop.eup %7573  ;;  %v6468_v25 = vmul.f32 1.442695, %v6456_v3 }
0x1920   :  { %v10213_v40 = vpop.eup %7575  ;;  %v6479_v14 = vsel %vm6427_vm4, %v10211_v36, 0.0 }
0x1921   :  { %7577 = vpow2.f32 %v6468_v25  ;;  %v6485_v21 = vsel %vm6427_vm4, %v10213_v40, 0.0  ;;  %6480 = vadd.xlane.f32.xlu2 %v6479_v14 }
0x1922   :  { %6486 = vadd.xlane.f32.xlu0 %v6485_v21 }
0x1927   :  { %v10219_v42 = vpop.eup %7577 }
0x1928   :  { %v6488_v23 = vsel %vm6427_vm4, %v10219_v42, 0.0 }
0x1929   :  { %6489 = vadd.xlane.f32.xlu2 %v6488_v23 }
0x192c   :  { %v6448_v32 = vpop.xlane.xlu1 %6447 }
0x192d   :  { %v6458_v35 = vsub.f32 %v6398_v8, %v6448_v32 }
0x192f   :  { %v6472_v54 = vmul.f32 1.442695, %v6458_v35 }
0x1931   :  { %7579 = vpow2.f32 %v6472_v54 }
0x1934   :  { %v6445_v58 = vpop.xlane.xlu1 %6444 }
0x1935   :  { %v6457_v38 = vsub.f32 %v6372_v4, %v6445_v58 }
0x1937   :  { %v10223_v41 = vpop.eup %7579  ;;  %v6470_v17 = vmul.f32 1.442695, %v6457_v38 }
0x1938   :  { %v6494_v47 = vsel %vm6427_vm4, %v10223_v41, 0.0 }
0x1939   :  { %7581 = vpow2.f32 %v6470_v17  ;;  %6495 = vadd.xlane.f32.xlu0 %v6494_v47 }
0x193f   :  { %v10227_v7 = vpop.eup %7581 }
0x1940   :  { %v6491_v24 = vsel %vm6427_vm4, %v10227_v7, 0.0 }
0x1941   :  { %6492 = vadd.xlane.f32.xlu0 %v6491_v24 }
0x197c   :  { %v6478_v12 = vpop.xlane.xlu1 %6477 }
0x197d   :  { %7583 = vrcp.f32 %v6478_v12  ;;  %v6511_v43 = vand.u32 2147483648, %v6478_v12  ;;  %v6509_v5 = vand.u32 2147483647, %v6478_v12  ;;  %vm6505_vm7 = vweird.f32 %v6478_v12 }
0x197f   :  { %v6451_v31 = vpop.xlane.xlu2 %6450  ;;  %v6512_v15 = vor.u32 1.1754944e-38, %v6511_v43  ;;  %vm6510_vm5 = vcmp.eq.f32.partialorder %v6509_v5, 8.507059e+37 }
0x1980   :  { %v6459_v11 = vsub.f32 %v6424_v46, %v6451_v31 }
0x1982   :  { %v6474_v16 = vmul.f32 1.442695, %v6459_v11 }
0x1983   :  { %v7584_v1 = vpop.eup %7583 }
0x1984   :  { %v6501_v63 = vmul.f32 %v7584_v1, %v6478_v12  ;;  %7585 = vpow2.f32 %v6474_v16  ;;  %vm6506_vm6 = vweird.f32 %v7584_v1 }
0x1985   :  { %vm6507_vm8 = vmor %vm6505_vm7, %vm6506_vm6 }
0x1986   :  { %v6502_v52 = vsub.f32 1.0, %v6501_v63 }
0x1988   :  { %v6503_v50 = vmul.f32 %v7584_v1, %v6502_v52 }
0x198a   :  { %v6504_v45 = vadd.f32 %v7584_v1, %v6503_v50  ;;  %v10231_v51 = vpop.eup %7585 }
0x198b   :  { %v6497_v57 = vsel %vm6427_vm4, %v10231_v51, 0.0 }
0x198c   :  { %v6508_v48 = vsel %vm6507_vm8, %v7584_v1, %v6504_v45  ;;  %v6484_v20 = vpop.xlane.xlu2 %6483  ;;  %6498 = vadd.xlane.f32.xlu1 %v6497_v57 }
0x198d   :  { %v6513_v39 = vsel %vm6510_vm5, %v6512_v15, %v6508_v48  ;;  %7587 = vrcp.f32 %v6484_v20  ;;  %v6541_v4 = vand.u32 2147483648, %v6484_v20  ;;  %v6539_v56 = vand.u32 2147483647, %v6484_v20 }
0x198e   :  { %v6514_v27 = vmul.f32 %v10202_v55, %v6513_v39  ;;  %vm6535_vm9 = vweird.f32 %v6484_v20 }
0x198f   :  { %v6542_v59 = vor.u32 1.1754944e-38, %v6541_v4  ;;  %vm6540_vm11 = vcmp.eq.f32.partialorder %v6539_v56, 8.507059e+37 }
0x1990   :  { %7103 = vmatmul.msk.f32.vlgmr.msrb.gmra.mxu0 %vm339_vm0, %v6514_v27 }
0x1993   :  { %v7588_v26 = vpop.eup %7587 }
0x1994   :  { %v6531_v34 = vmul.f32 %v7588_v26, %v6484_v20  ;;  %v6481_v29 = vpop.xlane.xlu2 %6480  ;;  %vm6536_vm1 = vweird.f32 %v7588_v26 }
0x1995   :  { %v6487_v62 = vpop.xlane.xlu0 %6486  ;;  %7589 = vrcp.f32 %v6481_v29  ;;  %vm6537_vm10 = vmor %vm6535_vm9, %vm6536_vm1  ;;  %v6526_v22 = vand.u32 2147483648, %v6481_v29  ;;  %v6524_v49 = vand.u32 2147483647, %v6481_v29  ;;  %vm6520_vm14 = vweird.f32 %v6481_v29 }
0x1996   :  { %v6532_v10 = vsub.f32 1.0, %v6531_v34  ;;  %7591 = vrcp.f32 %v6487_v62  ;;  %v6556_v2 = vand.u32 2147483648, %v6487_v62  ;;  %v6554_v9 = vand.u32 2147483647, %v6487_v62 }
0x1997   :  { %vm6550_vm15 = vweird.f32 %v6487_v62  ;;  %v6527_v14 = vor.u32 1.1754944e-38, %v6526_v22  ;;  %vm6525_vm6 = vcmp.eq.f32.partialorder %v6524_v49, 8.507059e+37  ;;  %v318_v22 = vld [vmem:[%s10293_s26 + $0x18] sm:$0xff] }
0x1998   :  { %v6533_v8 = vmul.f32 %v7588_v26, %v6532_v10  ;;  %vm6555_vm7 = vcmp.eq.f32.partialorder %v6554_v9, 8.507059e+37  ;;  %6850 = vmatpush.msrb.mxu0 %v318_v22 }
0x199a   :  { %v6534_v53 = vadd.f32 %v7588_v26, %v6533_v8 }
0x199b   :  { %v7590_v6 = vpop.eup %7589 }
0x199c   :  { %v7592_v44 = vpop.eup %7591  ;;  %v6538_v55 = vsel %vm6537_vm10, %v7588_v26, %v6534_v53  ;;  %v6516_v37 = vmul.f32 %v7590_v6, %v6481_v29  ;;  %v6490_v46 = vpop.xlane.xlu2 %6489  ;;  %vm6521_vm12 = vweird.f32 %v7590_v6 }
0x199d   :  { %v6543_v18 = vsel %vm6540_vm11, %v6542_v59, %v6538_v55  ;;  %v6546_v61 = vmul.f32 %v7592_v44, %v6487_v62  ;;  %7593 = vrcp.f32 %v6490_v46  ;;  %vm6551_vm13 = vweird.f32 %v7592_v44  ;;  %vm6522_vm2 = vmor %vm6520_vm14, %vm6521_vm12 }
0x199e   :  { %v6544_v13 = vmul.f32 %v10207_v60, %v6543_v18  ;;  %v6517_v28 = vsub.f32 1.0, %v6516_v37  ;;  %vm6552_vm4 = vmor %vm6550_vm15, %vm6551_vm13  ;;  %v6557_v60 = vor.u32 1.1754944e-38, %v6556_v2  ;;  %v6571_v47 = vand.u32 2147483648, %v6490_v46  ;;  %v317_v2 = vld [vmem:[%s10293_s26 + $0x10] sm:$0xff] }
0x199f   :  { %v6547_v30 = vsub.f32 1.0, %v6546_v61  ;;  %v6569_v12 = vand.u32 2147483647, %v6490_v46  ;;  %vm6565_vm5 = vweird.f32 %v6490_v46  ;;  %6851 = vmatpush.msrb.mxu0 %v317_v2 }
0x19a0   :  { %v6518_v33 = vmul.f32 %v7590_v6, %v6517_v28  ;;  %7105 = vmatmul.msk.f32.vlgmr.msra.gmra.mxu3 %vm339_vm0, %v6544_v13  ;;  %v6572_v11 = vor.u32 1.1754944e-38, %v6571_v47 }
0x19a1   :  { %v6548_v0 = vmul.f32 %v7592_v44, %v6547_v30  ;;  %vm6570_vm9 = vcmp.eq.f32.partialorder %v6569_v12, 8.507059e+37 }
0x19a2   :  { %v6519_v19 = vadd.f32 %v7590_v6, %v6518_v33  ;;  %v316_v33 = vld [vmem:[%s10293_s26 + $0x8] sm:$0xff] }
0x19a3   :  { %v7594_v3 = vpop.eup %7593  ;;  %v6549_v25 = vadd.f32 %v7592_v44, %v6548_v0  ;;  %6852 = vmatpush.msrb.mxu0 %v316_v33 }
0x19a4   :  { %v6523_v21 = vsel %vm6522_vm2, %v7590_v6, %v6519_v19  ;;  %v6561_v23 = vmul.f32 %v7594_v3, %v6490_v46  ;;  %vm6566_vm8 = vweird.f32 %v7594_v3 }
0x19a5   :  { %v6553_v32 = vsel %vm6552_vm4, %v7592_v44, %v6549_v25  ;;  %v6528_v35 = vsel %vm6525_vm6, %v6527_v14, %v6523_v21  ;;  %vm6567_vm1 = vmor %vm6565_vm5, %vm6566_vm8 }
0x19a6   :  { %v6558_v54 = vsel %vm6555_vm7, %v6557_v60, %v6553_v32  ;;  %v6529_v58 = vmul.f32 %v10211_v36, %v6528_v35  ;;  %v6562_v38 = vsub.f32 1.0, %v6561_v23 }
0x19a7   :  { %v6559_v17 = vmul.f32 %v10213_v40, %v6558_v54 }
0x19a8   :  { %v6563_v24 = vmul.f32 %v7594_v3, %v6562_v38  ;;  %7104 = vmatmul.msk.f32.vlgmr.msrb.gmra.mxu1 %vm339_vm0, %v6529_v58 }
0x19a9   :  { %7106 = vmatmul.msk.f32.vlgmr.msrb.gmra.mxu2 %vm339_vm0, %v6559_v17 }
0x19aa   :  { %v6564_v31 = vadd.f32 %v7594_v3, %v6563_v24 }
0x19ac   :  { %v6568_v1 = vsel %vm6567_vm1, %v7594_v3, %v6564_v31  ;;  %v6496_v63 = vpop.xlane.xlu0 %6495  ;;  %vm6819_vm1 = vcmask 1042434  }
0x19ad   :  { %v6573_v16 = vsel %vm6570_vm9, %v6572_v11, %v6568_v1  ;;  %7595 = vrcp.f32 %v6496_v63  ;;  %v6601_v5 = vand.u32 2147483648, %v6496_v63  ;;  %v6599_v15 = vand.u32 2147483647, %v6496_v63 }
0x19ae   :  { %v6574_v36 = vmul.f32 %v10219_v42, %v6573_v16  ;;  %vm6595_vm11 = vweird.f32 %v6496_v63  ;;  %vm6822_vm9 = vcmask 1043459  }
0x19af   :  { %v6602_v39 = vor.u32 1.1754944e-38, %v6601_v5  ;;  %vm6600_vm13 = vcmp.eq.f32.partialorder %v6599_v15, 8.507059e+37 }
0x19b0   :  { %7107 = vmatmul.msk.f32.vlgmr.msra.gmra.mxu0 %vm339_vm0, %v6574_v36 }
0x19b3   :  { %v7596_v40 = vpop.eup %7595 }
0x19b4   :  { %v6591_v52 = vmul.f32 %v7596_v40, %v6496_v63  ;;  %v6493_v43 = vpop.xlane.xlu0 %6492  ;;  %vm6596_vm10 = vweird.f32 %v7596_v40  ;;  %v7274_v63 = vld [vmem:[#allocation2] ss:$0 sm:$0xff] }
0x19b5   :  { %7597 = vrcp.f32 %v6493_v43  ;;  %vm6597_vm12 = vmor %vm6595_vm11, %vm6596_vm10  ;;  %v6586_v29 = vand.u32 2147483648, %v6493_v43  ;;  %v6584_v10 = vand.u32 2147483647, %v6493_v43  ;;  %vm6580_vm15 = vweird.f32 %v6493_v43 }
0x19b6   :  { %v6592_v50 = vsub.f32 1.0, %v6591_v52  ;;  %vm6825_vm10 = vcmask 1044484   ;;  %vm6828_vm11 = vcmask 1045509  }
0x19b7   :  { %v6587_v8 = vor.u32 1.1754944e-38, %v6586_v29  ;;  %vm6585_vm4 = vcmp.eq.f32.partialorder %v6584_v10, 8.507059e+37 }
0x19b8   :  { %v6593_v45 = vmul.f32 %v7596_v40, %v6592_v50 }
0x19ba   :  { %v6594_v48 = vadd.f32 %v7596_v40, %v6593_v45 }
0x19bb   :  { %v7598_v20 = vpop.eup %7597 }
0x19bc   :  { %v6598_v57 = vsel %vm6597_vm12, %v7596_v40, %v6594_v48  ;;  %v6576_v27 = vmul.f32 %v7598_v20, %v6493_v43  ;;  %vm6581_vm14 = vweird.f32 %v7598_v20  ;;  %vm6831_vm12 = vcmask 1046534  }
0x19bd   :  { %v6603_v42 = vsel %vm6600_vm13, %v6602_v39, %v6598_v57  ;;  %vm6582_vm2 = vmor %vm6580_vm15, %vm6581_vm14  ;;  %vm6834_vm13 = vcmask 1047559   ;;  %vm6858_vm14 = vcmask 7168  }
0x19be   :  { %v6604_v26 = vmul.f32 %v10223_v41, %v6603_v42  ;;  %v6577_v34 = vsub.f32 1.0, %v6576_v27 }
0x19c0   :  { %v6578_v62 = vmul.f32 %v7598_v20, %v6577_v34  ;;  %7109 = vmatmul.msk.f32.vlgmr.msrb.gmra.mxu3 %vm339_vm0, %v6604_v26 }
0x19c2   :  { %v6579_v4 = vadd.f32 %v7598_v20, %v6578_v62 }
0x19c4   :  { %v6583_v56 = vsel %vm6582_vm2, %v7598_v20, %v6579_v4 }
0x19c5   :  { %v6588_v53 = vsel %vm6585_vm4, %v6587_v8, %v6583_v56 }
0x19c6   :  { %v6589_v6 = vmul.f32 %v10227_v7, %v6588_v53 }
0x19c8   :  { %7108 = vmatmul.msk.f32.vlgmr.msra.gmra.mxu1 %vm339_vm0, %v6589_v6 }
0x19ff   :  { %v6499_v59 = vpop.xlane.xlu1 %6498 }
0x1a00   :  { %7599 = vrcp.f32 %v6499_v59  ;;  %v6616_v37 = vand.u32 2147483648, %v6499_v59  ;;  %v6614_v18 = vand.u32 2147483647, %v6499_v59  ;;  %vm6610_vm7 = vweird.f32 %v6499_v59 }
0x1a02   :  { %v6617_v13 = vor.u32 1.1754944e-38, %v6616_v37  ;;  %vm6615_vm5 = vcmp.eq.f32.partialorder %v6614_v18, 8.507059e+37 }
0x1a06   :  { %v7600_v41 = vpop.eup %7599 }
0x1a07   :  { %v6606_v44 = vmul.f32 %v7600_v41, %v6499_v59  ;;  %vm6611_vm6 = vweird.f32 %v7600_v41 }
0x1a08   :  { %vm6612_vm8 = vmor %vm6610_vm7, %vm6611_vm6 }
0x1a09   :  { %v6607_v55 = vsub.f32 1.0, %v6606_v44 }
0x1a0b   :  { %v6608_v46 = vmul.f32 %v7600_v41, %v6607_v55 }
0x1a0d   :  { %v6609_v61 = vadd.f32 %v7600_v41, %v6608_v46  ;;  %v6640_v49 = vpop.f32.mrf.mxu0 }
0x1a0f   :  { %v6613_v28 = vsel %vm6612_vm8, %v7600_v41, %v6609_v61 }
0x1a10   :  { %v6618_v30 = vsel %vm6615_vm5, %v6617_v13, %v6613_v28 }
0x1a11   :  { %v6619_v7 = vmul.f32 %v10231_v51, %v6618_v30  ;;  %v315_v51 = vld [vmem:[%s10293_s26] sm:$0xff] }
0x1a12   :  { %6853 = vmatpush.msrb.mxu0 %v315_v51 }
0x1a13   :  { %7110 = vmatmul.msk.f32.vlgmr.msra.gmra.mxu2 %vm339_vm0, %v6619_v7  ;;  %vm6816_vm0 = vcmask 1041409  }
0x1a23   :  { %v6686_v3 = vpop.f32.mrf.mxu3 }
0x1a24   :  { %v6818_v21 = vrot.slane %v6686_v3, 6 }
0x1a25   :  { %v6663_v0 = vpop.f32.mrf.mxu1 }
0x1a26   :  { %v6815_v9 = vrot.slane %v6663_v0, 7 }
0x1a28   :  { %v6817_v25 = vsel %vm6816_vm0, %v6815_v9, %v6640_v49 }
0x1a29   :  { %v6820_v32 = vsel %vm6819_vm1, %v6818_v21, %v6817_v25 }
0x1a2c   :  { %v6709_v19 = vpop.f32.mrf.mxu2 }
0x1a2d   :  { %v6821_v14 = vrot.slane %v6709_v19, 5  ;;  %v6732_v60 = vpop.f32.mrf.mxu0 }
0x1a2e   :  { %v6824_v35 = vrot.slane %v6732_v60, 4 }
0x1a2f   :  { %v6823_v54 = vsel %vm6822_vm9, %v6821_v14, %v6820_v32 }
0x1a30   :  { %v6826_v17 = vsel %vm6825_vm10, %v6824_v35, %v6823_v54 }
0x1a43   :  { %v6778_v38 = vpop.f32.mrf.mxu3 }
0x1a44   :  { %v6830_v24 = vrot.slane %v6778_v38, 2 }
0x1a45   :  { %v6755_v23 = vpop.f32.mrf.mxu1 }
0x1a46   :  { %v6827_v58 = vrot.slane %v6755_v23, 3 }
0x1a48   :  { %v6829_v47 = vsel %vm6828_vm11, %v6827_v58, %v6826_v17 }
0x1a49   :  { %v6832_v11 = vsel %vm6831_vm12, %v6830_v24, %v6829_v47 }
0x1a96   :  { %v6801_v12 = vpop.f32.mrf.mxu2 }
0x1a97   :  { %v6833_v31 = vrot.slane %v6801_v12, 1 }
0x1a99   :  { %v6835_v1 = vsel %vm6834_vm13, %v6833_v31, %v6832_v11 }
0x1a9a   :  { %7111 = vmatmul.msk.f32.vlgmr.msrb.gmra.mxu0 %vm689_vm3, %v6835_v1 }
0x1b17   :  { %v6855_v16 = vpop.f32.mrf.mxu0 }
0x1b18   :  { %v6856_v36 = vadd.f32 %v7274_v63, %v6855_v16 }
0x1b1a   :  { %6859 = vst.msk [vmem:[%s10295_s28] sm:$0xff] %vm6858_vm14, %v6856_v36 }
0x1b1b   :  { %6864 = vsyncpa [#allocation4], 1 }
0x1b1c   :  { %6865 = vsyncpa [#allocation6], 1 }
0x1b1d   :  { %6866 = vsyncpa [#allocation9], 1 }
0x1b1e   :  { %6867 = vsyncpa [#allocation12], 1 }
0x1b1f   :  { %6868 = vsyncpa [#allocation15], 1 }
0x1b20   :  { %6869 = vsyncpa [#allocation18], 1 }
0x1b21   :  { %6870 = vsyncpa [#allocation21], 1 }

</bundles_post_ra>
